<compile_context>
chip_gen: v7x
topology: tpu7x:2x2x1
jax: 0.10.0
libtpu: 0.0.40
codegen_flags: <defaults>
</compile_context>

<pallas_src>
import functools

import jax
import jax.numpy as jnp
from jax.experimental import pallas as pl
from jax.experimental.pallas import tpu as pltpu

# ---- KAN spline hyperparameters (efficient-kan defaults) --------------------
GRID_SIZE = 5
SPLINE_ORDER = 3
GRID_RANGE = (-1.0, 1.0)
NUM_BASES = GRID_SIZE + SPLINE_ORDER          # 8 spline basis functions
NUM_FEATS = NUM_BASES + 1                     # + SiLU(x) channel = 9
LANE = 128
MATMUL_DTYPE = jnp.bfloat16                   # MXU input dtype (f32 accumulate)

_H_KNOT = (GRID_RANGE[1] - GRID_RANGE[0]) / GRID_SIZE           # uniform spacing
_KNOTS = [GRID_RANGE[0] + (j - SPLINE_ORDER) * _H_KNOT
          for j in range(GRID_SIZE + 2 * SPLINE_ORDER + 1)]     # 12 python floats


def _round_up(x, m):
    return ((x + m - 1) // m) * m


# ---- in-kernel math ---------------------------------------------------------
def _bspline_bases(x):
    """Uniform-knot Cox-de Boor.

    Degree-0 bases are differences of step functions; each level p reuses one
    scaled x (s = x/(p*h)) and compile-time constants -> pure VALU work with
    no runtime divides and ~30% fewer ops than the textbook recursion."""
    t = _KNOTS
    steps = [jnp.where(x >= tk, 1.0, 0.0) for tk in t]            # 12 steps
    bases = [steps[k] - steps[k + 1] for k in range(len(t) - 1)]  # 11 deg-0
    for p in range(1, SPLINE_ORDER + 1):
        inv = 1.0 / (p * _H_KNOT)          # compile-time constant
        s = x * inv                        # shared per level
        new_bases = []
        for k in range(len(bases) - 1):
            left = (s - t[k] * inv) * bases[k]
            right = (t[k + p + 1] * inv - s) * bases[k + 1]
            new_bases.append(left + right)
        bases = new_bases
    return bases                           # NUM_BASES arrays, shape of x


def _write_features(x, feat_ref):
    """Stage [SiLU(x), B_0(x), ..., B_7(x)] into the bf16 slab.

    x has a 128-multiple width, so every channel store is a lane-dense store
    at a 128-aligned offset.  Casting happens at write time (bf16 slab)."""
    n = x.shape[-1]
    feat_ref[:, 0:n] = (x * jax.nn.sigmoid(x)).astype(MATMUL_DTYPE)   # SiLU (EUP)
    for k, b in enumerate(_bspline_bases(x)):                          # unrolled
        feat_ref[:, (k + 1) * n:(k + 2) * n] = b.astype(MATMUL_DTYPE)
    return NUM_FEATS * n


def _kan_matmul(x, w_ref, feat_ref):
    """One wide-K MXU matmul: [SiLU(x), B_0(x)..B_7(x)] @ W_fused (f32 acc)."""
    width = _write_features(x, feat_ref)
    return jnp.dot(feat_ref[:, 0:width], w_ref[...],
                   preferred_element_type=jnp.float32)


def _layer_norm(x, gamma, beta, true_n, eps=1e-5):
    """One-pass LayerNorm over the TRUE width.

    Padded columns are exactly zero (zero weight columns upstream), so sums
    over the padded width equal sums over the true width; dividing by true_n
    gives the unpadded statistics.  gamma/beta are zero on pad columns, so the
    output stays zero there."""
    inv_n = 1.0 / true_n
    s = jnp.sum(x, axis=-1, keepdims=True)
    s2 = jnp.sum(x * x, axis=-1, keepdims=True)
    mean = s * inv_n
    var = s2 * inv_n - mean * mean
    return (x - mean) * jax.lax.rsqrt(var + eps) * gamma + beta


def _kq_kernel(xu_ref,
               w1_ref, g1_ref, b1_ref,
               w2a_ref, w2b_ref, g2_ref, b2_ref,
               w3_ref,
               q1_ref, q2_ref,
               feat_ref, hb_ref,
               *, h_half, h_full):
    p1 = g1_ref.shape[-1]
    x = xu_ref[...].astype(jnp.float32)

    # ---- layer 1: features built ONCE, both branches fused along N ---------
    h = _kan_matmul(x, w1_ref, feat_ref)                  # (Bt, 2*P1) f32
    ha = _layer_norm(h[:, 0:p1], g1_ref[0:1, :], b1_ref[0:1, :], h_half)
    hb = _layer_norm(h[:, p1:2 * p1], g1_ref[1:2, :], b1_ref[1:2, :], h_half)
    hb_ref[...] = hb                                      # park Q2 hidden in VMEM

    # ---- branch Q1: layer 2 + LN + final Out=1 layer on the MXU ------------
    h2 = _kan_matmul(ha, w2a_ref, feat_ref)               # (Bt, P2)
    h2 = _layer_norm(h2, g2_ref[0:1, :], b2_ref[0:1, :], h_full)
    q1_ref[...] = _kan_matmul(h2, w3_ref, feat_ref)[:, 0:1]

    # ---- branch Q2 ----------------------------------------------------------
    h2 = _kan_matmul(hb_ref[...], w2b_ref, feat_ref)
    h2 = _layer_norm(h2, g2_ref[1:2, :], b2_ref[1:2, :], h_full)
    q2_ref[...] = _kan_matmul(h2, w3_ref, feat_ref)[:, 1:2]


# ---- host-side parameter packing --------------------------------------------
def _pad_fused_weight(w, in_dim, p_in, p_out):
    """Zero-pad a fused (9*in, out) weight to (9*p_in, p_out), channel-major."""
    out_dim = w.shape[-1]
    w = w.reshape(NUM_FEATS, in_dim, out_dim)
    w = jnp.pad(w, ((0, 0), (0, p_in - in_dim), (0, p_out - out_dim)))
    return w.reshape(NUM_FEATS * p_in, p_out)


def _pad_vec(v, p):
    return jnp.pad(v, (0, p - v.shape[-1]))


def _tile_bytes(shape, itemsize):
    """Approximate VMEM footprint incl. (sublane, lane) layout padding."""
    rows = 1
    for d in shape[:-1]:
        rows *= d
    sub = 8 * (4 // itemsize)                  # f32 -> 8 sublanes, bf16 -> 16
    return _round_up(max(rows, 1), sub) * _round_up(shape[-1], LANE) * itemsize


# ---- wrapper ----------------------------------------------------------------
def kq_network_forward(state, action, params_q1, params_q2, *, batch_tile=None):
    """torch.cat([state, action], 1) -> (Q1(xu), Q2(xu)); both branches fused."""
    xu = jnp.concatenate([state, action], axis=1).astype(jnp.float32)
    batch, d_in = xu.shape

    w1a, g1a, b1a, w2a_w, g2a, b2a, w3a = params_q1
    w1b, g1b, b1b, w2b_w, g2b, b2b, w3b = params_q2

    h_half = g1a.shape[-1]
    h_full = g2a.shape[-1]
    pd = _round_up(d_in, LANE)
    p1 = _round_up(h_half, LANE)
    p2 = _round_up(h_full, LANE)

    # Pad + fuse parameters.  Zero pad rows/cols keep the math exact while
    # making every slab channel offset / store lane-dense.
    w1 = jnp.concatenate(
        [_pad_fused_weight(w1a, d_in, pd, p1),
         _pad_fused_weight(w1b, d_in, pd, p1)], axis=1).astype(MATMUL_DTYPE)
    w2a_p = _pad_fused_weight(w2a_w, h_half, p1, p2).astype(MATMUL_DTYPE)
    w2b_p = _pad_fused_weight(w2b_w, h_half, p1, p2).astype(MATMUL_DTYPE)
    w3 = jnp.concatenate(
        [_pad_fused_weight(w3a, h_full, p2, 1),
         _pad_fused_weight(w3b, h_full, p2, 1)], axis=1).astype(MATMUL_DTYPE)
    g1 = jnp.stack([_pad_vec(g1a, p1), _pad_vec(g1b, p1)], axis=0)
    b1 = jnp.stack([_pad_vec(b1a, p1), _pad_vec(b1b, p1)], axis=0)
    g2 = jnp.stack([_pad_vec(g2a, p2), _pad_vec(g2b, p2)], axis=0)
    b2 = jnp.stack([_pad_vec(b2a, p2), _pad_vec(b2b, p2)], axis=0)

    # ---- batch tiling & explicit VMEM budget --------------------------------
    try:
        phys_vmem = int(pltpu.get_tpu_info().vmem_capacity_bytes)
    except Exception:                                   # pragma: no cover
        phys_vmem = 64 * 2**20                          # assume smallest (v7x)

    weight_bytes = sum(_tile_bytes(a.shape, a.dtype.itemsize)
                       for a in (w1, w2a_p, w2b_p, w3, g1, b1, g2, b2))
    max_p = max(pd, p1, p2)

    def footprint(bt):
        slab = _tile_bytes((bt, NUM_FEATS * max_p), 2)            # bf16 slab
        stash = _tile_bytes((bt, p1), 4)                          # Q2 hidden
        io = 2 * _tile_bytes((bt, pd), 4) + 4 * _tile_bytes((bt, 1), 4)
        return slab + stash + io + 2 * weight_bytes               # dbl-buffered

    if batch_tile is None:
        batch_tile = batch if batch <= 1024 else 512   # big tiles on v5e/v6e
    batch_tile = max(8, _round_up(batch_tile, 8))
    while batch_tile > 8 and footprint(batch_tile) > int(0.6 * phys_vmem):
        batch_tile = max(8, _round_up(batch_tile // 2, 8))        # v7x-safe

    padded_batch = _round_up(batch, batch_tile)
    n_tiles = padded_batch // batch_tile
    vmem_limit = int(min(max(footprint(batch_tile) * 5 // 4, 32 * 2**20),
                         int(0.9 * phys_vmem)))

    xu_p = jnp.pad(xu, ((0, padded_batch - batch), (0, pd - d_in)))

    kernel = functools.partial(_kq_kernel, h_half=h_half, h_full=h_full)

    def full(a):                                   # whole-array, VMEM-resident
        return pl.BlockSpec(a.shape, lambda i: (0,) * a.ndim)

    q1, q2 = pl.pallas_call(
        kernel,
        out_shape=(jax.ShapeDtypeStruct((padded_batch, 1), jnp.float32),
                   jax.ShapeDtypeStruct((padded_batch, 1), jnp.float32)),
        grid_spec=pltpu.PrefetchScalarGridSpec(
            num_scalar_prefetch=0,
            grid=(n_tiles,),
            in_specs=[
                pl.BlockSpec((batch_tile, pd), lambda i: (i, 0)),
                full(w1), full(g1), full(b1),
                full(w2a_p), full(w2b_p), full(g2), full(b2),
                full(w3),
            ],
            out_specs=[pl.BlockSpec((batch_tile, 1), lambda i: (i, 0)),
                       pl.BlockSpec((batch_tile, 1), lambda i: (i, 0))],
            scratch_shapes=[
                pltpu.VMEM((batch_tile, NUM_FEATS * max_p), MATMUL_DTYPE),
                pltpu.VMEM((batch_tile, p1), jnp.float32),
            ],
        ),
        compiler_params=pltpu.CompilerParams(
            dimension_semantics=("parallel",),
            vmem_limit_bytes=vmem_limit),
    )(xu_p, w1, g1, b1, w2a_p, w2b_p, g2, b2, w3)

    return q1[:batch], q2[:batch]


# ---- deterministic parameter construction -----------------------------------
def _init_kan_fused_weight(key, in_dim, out_dim):
    """Fused (9*In, Out) f32 weight: rows [base_w ; spline_w[0] ; ... ; spline_w[7]]."""
    k1, k2 = jax.random.split(key)
    limit = (6.0 / (in_dim + out_dim)) ** 0.5            # xavier-uniform-like
    base_w = jax.random.uniform(k1, (in_dim, out_dim), jnp.float32, -limit, limit)
    spline_w = 0.1 * jax.random.normal(k2, (NUM_BASES, in_dim, out_dim), jnp.float32)
    return jnp.concatenate(
        [base_w, spline_w.reshape(NUM_BASES * in_dim, out_dim)], axis=0)


def init_q_params(key, num_inputs, num_actions, hidden_dim):
    d_in = num_inputs + num_actions
    h_half = hidden_dim // 2
    k1, k2, k3 = jax.random.split(key, 3)
    w1 = _init_kan_fused_weight(k1, d_in, h_half)            # (9*d_in, H/2)
    g1 = jnp.ones((h_half,), jnp.float32)
    b1 = jnp.zeros((h_half,), jnp.float32)
    w2 = _init_kan_fused_weight(k2, h_half, hidden_dim)      # (9*H/2, H)
    g2 = jnp.ones((hidden_dim,), jnp.float32)
    b2 = jnp.zeros((hidden_dim,), jnp.float32)
    w3 = _init_kan_fused_weight(k3, hidden_dim, 1)           # (9*H, 1)
    return (w1, g1, b1, w2, g2, b2, w3)


# ---- demo -------------------------------------------------------------------
if __name__ == "__main__":
    num_inputs, num_actions, hidden_dim, batch = 6, 2, 32, 2

    key = jax.random.PRNGKey(0)
    k_state, k_action, k_q1, k_q2 = jax.random.split(key, 4)

    state = jax.random.normal(k_state, (batch, num_inputs), jnp.float32)
    action = jax.random.normal(k_action, (batch, num_actions), jnp.float32)

    params_q1 = init_q_params(k_q1, num_inputs, num_actions, hidden_dim)
    params_q2 = init_q_params(k_q2, num_inputs, num_actions, hidden_dim)

    x1, x2 = kq_network_forward(state, action, params_q1, params_q2)
    jax.block_until_ready((x1, x2))

    assert x1.shape == (batch, 1) and x2.shape == (batch, 1)
    assert bool(jnp.all(jnp.isfinite(x1))) and bool(jnp.all(jnp.isfinite(x2)))
    print("KERNEL_OK")
</pallas_src>

<mosaic_0001>
module attributes {stable_mosaic.version = 11 : i64} {
  func.func @_kq_kernel(%arg0: i32, %arg1: memref<8x128xf32, #tpu.memory_space<vmem>>, %arg2: memref<1152x256xbf16, #tpu.memory_space<vmem>>, %arg3: memref<2x128xf32, #tpu.memory_space<vmem>>, %arg4: memref<2x128xf32, #tpu.memory_space<vmem>>, %arg5: memref<1152x128xbf16, #tpu.memory_space<vmem>>, %arg6: memref<1152x128xbf16, #tpu.memory_space<vmem>>, %arg7: memref<2x128xf32, #tpu.memory_space<vmem>>, %arg8: memref<2x128xf32, #tpu.memory_space<vmem>>, %arg9: memref<1152x2xbf16, #tpu.memory_space<vmem>>, %arg10: memref<8x1xf32, #tpu.memory_space<vmem>>, %arg11: memref<8x1xf32, #tpu.memory_space<vmem>>, %arg12: memref<8x1152xbf16, #tpu.memory_space<vmem>>, %arg13: memref<8x128xf32, #tpu.memory_space<vmem>>) attributes {dimension_semantics = [#tpu.dimension_semantics<parallel>], iteration_bounds = array<i64: 1>, scalar_prefetch = 0 : i64, scratch_operands = 2 : i64, tpu.core_type = #tpu.core_type<tc>, window_params = [{transform_indices = @transform_0, window_bounds = array<i64: 8, 128>}, {pipeline_mode = #tpu.pipeline_mode<synchronous>, transform_indices = @transform_1, window_bounds = array<i64: 1152, 256>}, {pipeline_mode = #tpu.pipeline_mode<synchronous>, transform_indices = @transform_2, window_bounds = array<i64: 2, 128>}, {pipeline_mode = #tpu.pipeline_mode<synchronous>, transform_indices = @transform_3, window_bounds = array<i64: 2, 128>}, {pipeline_mode = #tpu.pipeline_mode<synchronous>, transform_indices = @transform_4, window_bounds = array<i64: 1152, 128>}, {pipeline_mode = #tpu.pipeline_mode<synchronous>, transform_indices = @transform_5, window_bounds = array<i64: 1152, 128>}, {pipeline_mode = #tpu.pipeline_mode<synchronous>, transform_indices = @transform_6, window_bounds = array<i64: 2, 128>}, {pipeline_mode = #tpu.pipeline_mode<synchronous>, transform_indices = @transform_7, window_bounds = array<i64: 2, 128>}, {pipeline_mode = #tpu.pipeline_mode<synchronous>, transform_indices = @transform_8, window_bounds = array<i64: 1152, 2>}, {transform_indices = @transform_9, window_bounds = array<i64: 8, 1>}, {transform_indices = @transform_10, window_bounds = array<i64: 8, 1>}]} {
    %c0 = arith.constant 0 : index
    %c0_0 = arith.constant 0 : index
    %0 = vector.load %arg1[%c0, %c0_0] : memref<8x128xf32, #tpu.memory_space<vmem>>, vector<8x128xf32>
    %1 = arith.negf %0 : vector<8x128xf32>
    %2 = math.exp %1 : vector<8x128xf32>
    %cst = arith.constant 1.000000e+00 : f32
    %3 = vector.broadcast %cst : f32 to vector<8x128xf32>
    %4 = arith.addf %3, %2 : vector<8x128xf32>
    %5 = arith.divf %3, %4 : vector<8x128xf32>
    %6 = arith.mulf %0, %5 : vector<8x128xf32>
    %7 = arith.truncf %6 : vector<8x128xf32> to vector<8x128xbf16>
    %c0_1 = arith.constant 0 : index
    %c0_2 = arith.constant 0 : index
    %8 = vector.load %arg12[%c0_1, %c0_2] : memref<8x1152xbf16, #tpu.memory_space<vmem>>, vector<8x128xbf16>
    tpu.vector_store %arg12[%c0_1, %c0_2], %7 {strides = array<i32>} : memref<8x1152xbf16, #tpu.memory_space<vmem>>, vector<8x128xbf16>,
    %cst_3 = arith.constant -2.200000e+00 : f32
    %9 = vector.broadcast %cst_3 : f32 to vector<8x128xf32>
    %10 = arith.cmpf oge, %0, %9 : vector<8x128xf32>
    %cst_4 = arith.constant 1.000000e+00 : f32
    %cst_5 = arith.constant 0.000000e+00 : f32
    %11 = vector.broadcast %cst_4 : f32 to vector<8x128xf32>
    %12 = vector.broadcast %cst_5 : f32 to vector<8x128xf32>
    %13 = arith.select %10, %11, %12 : vector<8x128xi1>, vector<8x128xf32>
    %cst_6 = arith.constant -1.800000e+00 : f32
    %14 = vector.broadcast %cst_6 : f32 to vector<8x128xf32>
    %15 = arith.cmpf oge, %0, %14 : vector<8x128xf32>
    %cst_7 = arith.constant 1.000000e+00 : f32
    %cst_8 = arith.constant 0.000000e+00 : f32
    %16 = vector.broadcast %cst_7 : f32 to vector<8x128xf32>
    %17 = vector.broadcast %cst_8 : f32 to vector<8x128xf32>
    %18 = arith.select %15, %16, %17 : vector<8x128xi1>, vector<8x128xf32>
    %cst_9 = arith.constant -1.400000e+00 : f32
    %19 = vector.broadcast %cst_9 : f32 to vector<8x128xf32>
    %20 = arith.cmpf oge, %0, %19 : vector<8x128xf32>
    %cst_10 = arith.constant 1.000000e+00 : f32
    %cst_11 = arith.constant 0.000000e+00 : f32
    %21 = vector.broadcast %cst_10 : f32 to vector<8x128xf32>
    %22 = vector.broadcast %cst_11 : f32 to vector<8x128xf32>
    %23 = arith.select %20, %21, %22 : vector<8x128xi1>, vector<8x128xf32>
    %cst_12 = arith.constant -1.000000e+00 : f32
    %24 = vector.broadcast %cst_12 : f32 to vector<8x128xf32>
    %25 = arith.cmpf oge, %0, %24 : vector<8x128xf32>
    %cst_13 = arith.constant 1.000000e+00 : f32
    %cst_14 = arith.constant 0.000000e+00 : f32
    %26 = vector.broadcast %cst_13 : f32 to vector<8x128xf32>
    %27 = vector.broadcast %cst_14 : f32 to vector<8x128xf32>
    %28 = arith.select %25, %26, %27 : vector<8x128xi1>, vector<8x128xf32>
    %cst_15 = arith.constant -6.000000e-01 : f32
    %29 = vector.broadcast %cst_15 : f32 to vector<8x128xf32>
    %30 = arith.cmpf oge, %0, %29 : vector<8x128xf32>
    %cst_16 = arith.constant 1.000000e+00 : f32
    %cst_17 = arith.constant 0.000000e+00 : f32
    %31 = vector.broadcast %cst_16 : f32 to vector<8x128xf32>
    %32 = vector.broadcast %cst_17 : f32 to vector<8x128xf32>
    %33 = arith.select %30, %31, %32 : vector<8x128xi1>, vector<8x128xf32>
    %cst_18 = arith.constant -2.000000e-01 : f32
    %34 = vector.broadcast %cst_18 : f32 to vector<8x128xf32>
    %35 = arith.cmpf oge, %0, %34 : vector<8x128xf32>
    %cst_19 = arith.constant 1.000000e+00 : f32
    %cst_20 = arith.constant 0.000000e+00 : f32
    %36 = vector.broadcast %cst_19 : f32 to vector<8x128xf32>
    %37 = vector.broadcast %cst_20 : f32 to vector<8x128xf32>
    %38 = arith.select %35, %36, %37 : vector<8x128xi1>, vector<8x128xf32>
    %cst_21 = arith.constant 2.000000e-01 : f32
    %39 = vector.broadcast %cst_21 : f32 to vector<8x128xf32>
    %40 = arith.cmpf oge, %0, %39 : vector<8x128xf32>
    %cst_22 = arith.constant 1.000000e+00 : f32
    %cst_23 = arith.constant 0.000000e+00 : f32
    %41 = vector.broadcast %cst_22 : f32 to vector<8x128xf32>
    %42 = vector.broadcast %cst_23 : f32 to vector<8x128xf32>
    %43 = arith.select %40, %41, %42 : vector<8x128xi1>, vector<8x128xf32>
    %cst_24 = arith.constant 6.000000e-01 : f32
    %44 = vector.broadcast %cst_24 : f32 to vector<8x128xf32>
    %45 = arith.cmpf oge, %0, %44 : vector<8x128xf32>
    %cst_25 = arith.constant 1.000000e+00 : f32
    %cst_26 = arith.constant 0.000000e+00 : f32
    %46 = vector.broadcast %cst_25 : f32 to vector<8x128xf32>
    %47 = vector.broadcast %cst_26 : f32 to vector<8x128xf32>
    %48 = arith.select %45, %46, %47 : vector<8x128xi1>, vector<8x128xf32>
    %cst_27 = arith.constant 1.000000e+00 : f32
    %49 = vector.broadcast %cst_27 : f32 to vector<8x128xf32>
    %50 = arith.cmpf oge, %0, %49 : vector<8x128xf32>
    %cst_28 = arith.constant 1.000000e+00 : f32
    %cst_29 = arith.constant 0.000000e+00 : f32
    %51 = vector.broadcast %cst_28 : f32 to vector<8x128xf32>
    %52 = vector.broadcast %cst_29 : f32 to vector<8x128xf32>
    %53 = arith.select %50, %51, %52 : vector<8x128xi1>, vector<8x128xf32>
    %cst_30 = arith.constant 1.400000e+00 : f32
    %54 = vector.broadcast %cst_30 : f32 to vector<8x128xf32>
    %55 = arith.cmpf oge, %0, %54 : vector<8x128xf32>
    %cst_31 = arith.constant 1.000000e+00 : f32
    %cst_32 = arith.constant 0.000000e+00 : f32
    %56 = vector.broadcast %cst_31 : f32 to vector<8x128xf32>
    %57 = vector.broadcast %cst_32 : f32 to vector<8x128xf32>
    %58 = arith.select %55, %56, %57 : vector<8x128xi1>, vector<8x128xf32>
    %cst_33 = arith.constant 1.800000e+00 : f32
    %59 = vector.broadcast %cst_33 : f32 to vector<8x128xf32>
    %60 = arith.cmpf oge, %0, %59 : vector<8x128xf32>
    %cst_34 = arith.constant 1.000000e+00 : f32
    %cst_35 = arith.constant 0.000000e+00 : f32
    %61 = vector.broadcast %cst_34 : f32 to vector<8x128xf32>
    %62 = vector.broadcast %cst_35 : f32 to vector<8x128xf32>
    %63 = arith.select %60, %61, %62 : vector<8x128xi1>, vector<8x128xf32>
    %cst_36 = arith.constant 2.200000e+00 : f32
    %64 = vector.broadcast %cst_36 : f32 to vector<8x128xf32>
    %65 = arith.cmpf oge, %0, %64 : vector<8x128xf32>
    %cst_37 = arith.constant 1.000000e+00 : f32
    %cst_38 = arith.constant 0.000000e+00 : f32
    %66 = vector.broadcast %cst_37 : f32 to vector<8x128xf32>
    %67 = vector.broadcast %cst_38 : f32 to vector<8x128xf32>
    %68 = arith.select %65, %66, %67 : vector<8x128xi1>, vector<8x128xf32>
    %69 = arith.subf %13, %18 : vector<8x128xf32>
    %70 = arith.subf %18, %23 : vector<8x128xf32>
    %71 = arith.subf %23, %28 : vector<8x128xf32>
    %72 = arith.subf %28, %33 : vector<8x128xf32>
    %73 = arith.subf %33, %38 : vector<8x128xf32>
    %74 = arith.subf %38, %43 : vector<8x128xf32>
    %75 = arith.subf %43, %48 : vector<8x128xf32>
    %76 = arith.subf %48, %53 : vector<8x128xf32>
    %77 = arith.subf %53, %58 : vector<8x128xf32>
    %78 = arith.subf %58, %63 : vector<8x128xf32>
    %79 = arith.subf %63, %68 : vector<8x128xf32>
    %cst_39 = arith.constant 2.500000e+00 : f32
    %80 = vector.broadcast %cst_39 : f32 to vector<8x128xf32>
    %81 = arith.mulf %0, %80 : vector<8x128xf32>
    %cst_40 = arith.constant -5.500000e+00 : f32
    %82 = vector.broadcast %cst_40 : f32 to vector<8x128xf32>
    %83 = arith.subf %81, %82 : vector<8x128xf32>
    %84 = arith.mulf %83, %69 : vector<8x128xf32>
    %cst_41 = arith.constant -3.500000e+00 : f32
    %85 = vector.broadcast %cst_41 : f32 to vector<8x128xf32>
    %86 = arith.subf %85, %81 : vector<8x128xf32>
    %87 = arith.mulf %86, %70 : vector<8x128xf32>
    %88 = arith.addf %84, %87 : vector<8x128xf32>
    %cst_42 = arith.constant -4.500000e+00 : f32
    %89 = vector.broadcast %cst_42 : f32 to vector<8x128xf32>
    %90 = arith.subf %81, %89 : vector<8x128xf32>
    %91 = arith.mulf %90, %70 : vector<8x128xf32>
    %cst_43 = arith.constant -2.500000e+00 : f32
    %92 = vector.broadcast %cst_43 : f32 to vector<8x128xf32>
    %93 = arith.subf %92, %81 : vector<8x128xf32>
    %94 = arith.mulf %93, %71 : vector<8x128xf32>
    %95 = arith.addf %91, %94 : vector<8x128xf32>
    %cst_44 = arith.constant -3.500000e+00 : f32
    %96 = vector.broadcast %cst_44 : f32 to vector<8x128xf32>
    %97 = arith.subf %81, %96 : vector<8x128xf32>
    %98 = arith.mulf %97, %71 : vector<8x128xf32>
    %cst_45 = arith.constant -1.500000e+00 : f32
    %99 = vector.broadcast %cst_45 : f32 to vector<8x128xf32>
    %100 = arith.subf %99, %81 : vector<8x128xf32>
    %101 = arith.mulf %100, %72 : vector<8x128xf32>
    %102 = arith.addf %98, %101 : vector<8x128xf32>
    %cst_46 = arith.constant -2.500000e+00 : f32
    %103 = vector.broadcast %cst_46 : f32 to vector<8x128xf32>
    %104 = arith.subf %81, %103 : vector<8x128xf32>
    %105 = arith.mulf %104, %72 : vector<8x128xf32>
    %cst_47 = arith.constant -5.000000e-01 : f32
    %106 = vector.broadcast %cst_47 : f32 to vector<8x128xf32>
    %107 = arith.subf %106, %81 : vector<8x128xf32>
    %108 = arith.mulf %107, %73 : vector<8x128xf32>
    %109 = arith.addf %105, %108 : vector<8x128xf32>
    %cst_48 = arith.constant -1.500000e+00 : f32
    %110 = vector.broadcast %cst_48 : f32 to vector<8x128xf32>
    %111 = arith.subf %81, %110 : vector<8x128xf32>
    %112 = arith.mulf %111, %73 : vector<8x128xf32>
    %cst_49 = arith.constant 5.000000e-01 : f32
    %113 = vector.broadcast %cst_49 : f32 to vector<8x128xf32>
    %114 = arith.subf %113, %81 : vector<8x128xf32>
    %115 = arith.mulf %114, %74 : vector<8x128xf32>
    %116 = arith.addf %112, %115 : vector<8x128xf32>
    %cst_50 = arith.constant -5.000000e-01 : f32
    %117 = vector.broadcast %cst_50 : f32 to vector<8x128xf32>
    %118 = arith.subf %81, %117 : vector<8x128xf32>
    %119 = arith.mulf %118, %74 : vector<8x128xf32>
    %cst_51 = arith.constant 1.500000e+00 : f32
    %120 = vector.broadcast %cst_51 : f32 to vector<8x128xf32>
    %121 = arith.subf %120, %81 : vector<8x128xf32>
    %122 = arith.mulf %121, %75 : vector<8x128xf32>
    %123 = arith.addf %119, %122 : vector<8x128xf32>
    %cst_52 = arith.constant 5.000000e-01 : f32
    %124 = vector.broadcast %cst_52 : f32 to vector<8x128xf32>
    %125 = arith.subf %81, %124 : vector<8x128xf32>
    %126 = arith.mulf %125, %75 : vector<8x128xf32>
    %cst_53 = arith.constant 2.500000e+00 : f32
    %127 = vector.broadcast %cst_53 : f32 to vector<8x128xf32>
    %128 = arith.subf %127, %81 : vector<8x128xf32>
    %129 = arith.mulf %128, %76 : vector<8x128xf32>
    %130 = arith.addf %126, %129 : vector<8x128xf32>
    %cst_54 = arith.constant 1.500000e+00 : f32
    %131 = vector.broadcast %cst_54 : f32 to vector<8x128xf32>
    %132 = arith.subf %81, %131 : vector<8x128xf32>
    %133 = arith.mulf %132, %76 : vector<8x128xf32>
    %cst_55 = arith.constant 3.500000e+00 : f32
    %134 = vector.broadcast %cst_55 : f32 to vector<8x128xf32>
    %135 = arith.subf %134, %81 : vector<8x128xf32>
    %136 = arith.mulf %135, %77 : vector<8x128xf32>
    %137 = arith.addf %133, %136 : vector<8x128xf32>
    %cst_56 = arith.constant 2.500000e+00 : f32
    %138 = vector.broadcast %cst_56 : f32 to vector<8x128xf32>
    %139 = arith.subf %81, %138 : vector<8x128xf32>
    %140 = arith.mulf %139, %77 : vector<8x128xf32>
    %cst_57 = arith.constant 4.500000e+00 : f32
    %141 = vector.broadcast %cst_57 : f32 to vector<8x128xf32>
    %142 = arith.subf %141, %81 : vector<8x128xf32>
    %143 = arith.mulf %142, %78 : vector<8x128xf32>
    %144 = arith.addf %140, %143 : vector<8x128xf32>
    %cst_58 = arith.constant 3.500000e+00 : f32
    %145 = vector.broadcast %cst_58 : f32 to vector<8x128xf32>
    %146 = arith.subf %81, %145 : vector<8x128xf32>
    %147 = arith.mulf %146, %78 : vector<8x128xf32>
    %cst_59 = arith.constant 5.500000e+00 : f32
    %148 = vector.broadcast %cst_59 : f32 to vector<8x128xf32>
    %149 = arith.subf %148, %81 : vector<8x128xf32>
    %150 = arith.mulf %149, %79 : vector<8x128xf32>
    %151 = arith.addf %147, %150 : vector<8x128xf32>
    %cst_60 = arith.constant 1.250000e+00 : f32
    %152 = vector.broadcast %cst_60 : f32 to vector<8x128xf32>
    %153 = arith.mulf %0, %152 : vector<8x128xf32>
    %cst_61 = arith.constant -2.750000e+00 : f32
    %154 = vector.broadcast %cst_61 : f32 to vector<8x128xf32>
    %155 = arith.subf %153, %154 : vector<8x128xf32>
    %156 = arith.mulf %155, %88 : vector<8x128xf32>
    %cst_62 = arith.constant -1.250000e+00 : f32
    %157 = vector.broadcast %cst_62 : f32 to vector<8x128xf32>
    %158 = arith.subf %157, %153 : vector<8x128xf32>
    %159 = arith.mulf %158, %95 : vector<8x128xf32>
    %160 = arith.addf %156, %159 : vector<8x128xf32>
    %cst_63 = arith.constant -2.250000e+00 : f32
    %161 = vector.broadcast %cst_63 : f32 to vector<8x128xf32>
    %162 = arith.subf %153, %161 : vector<8x128xf32>
    %163 = arith.mulf %162, %95 : vector<8x128xf32>
    %cst_64 = arith.constant -7.500000e-01 : f32
    %164 = vector.broadcast %cst_64 : f32 to vector<8x128xf32>
    %165 = arith.subf %164, %153 : vector<8x128xf32>
    %166 = arith.mulf %165, %102 : vector<8x128xf32>
    %167 = arith.addf %163, %166 : vector<8x128xf32>
    %cst_65 = arith.constant -1.750000e+00 : f32
    %168 = vector.broadcast %cst_65 : f32 to vector<8x128xf32>
    %169 = arith.subf %153, %168 : vector<8x128xf32>
    %170 = arith.mulf %169, %102 : vector<8x128xf32>
    %cst_66 = arith.constant -2.500000e-01 : f32
    %171 = vector.broadcast %cst_66 : f32 to vector<8x128xf32>
    %172 = arith.subf %171, %153 : vector<8x128xf32>
    %173 = arith.mulf %172, %109 : vector<8x128xf32>
    %174 = arith.addf %170, %173 : vector<8x128xf32>
    %cst_67 = arith.constant -1.250000e+00 : f32
    %175 = vector.broadcast %cst_67 : f32 to vector<8x128xf32>
    %176 = arith.subf %153, %175 : vector<8x128xf32>
    %177 = arith.mulf %176, %109 : vector<8x128xf32>
    %cst_68 = arith.constant 2.500000e-01 : f32
    %178 = vector.broadcast %cst_68 : f32 to vector<8x128xf32>
    %179 = arith.subf %178, %153 : vector<8x128xf32>
    %180 = arith.mulf %179, %116 : vector<8x128xf32>
    %181 = arith.addf %177, %180 : vector<8x128xf32>
    %cst_69 = arith.constant -7.500000e-01 : f32
    %182 = vector.broadcast %cst_69 : f32 to vector<8x128xf32>
    %183 = arith.subf %153, %182 : vector<8x128xf32>
    %184 = arith.mulf %183, %116 : vector<8x128xf32>
    %cst_70 = arith.constant 7.500000e-01 : f32
    %185 = vector.broadcast %cst_70 : f32 to vector<8x128xf32>
    %186 = arith.subf %185, %153 : vector<8x128xf32>
    %187 = arith.mulf %186, %123 : vector<8x128xf32>
    %188 = arith.addf %184, %187 : vector<8x128xf32>
    %cst_71 = arith.constant -2.500000e-01 : f32
    %189 = vector.broadcast %cst_71 : f32 to vector<8x128xf32>
    %190 = arith.subf %153, %189 : vector<8x128xf32>
    %191 = arith.mulf %190, %123 : vector<8x128xf32>
    %cst_72 = arith.constant 1.250000e+00 : f32
    %192 = vector.broadcast %cst_72 : f32 to vector<8x128xf32>
    %193 = arith.subf %192, %153 : vector<8x128xf32>
    %194 = arith.mulf %193, %130 : vector<8x128xf32>
    %195 = arith.addf %191, %194 : vector<8x128xf32>
    %cst_73 = arith.constant 2.500000e-01 : f32
    %196 = vector.broadcast %cst_73 : f32 to vector<8x128xf32>
    %197 = arith.subf %153, %196 : vector<8x128xf32>
    %198 = arith.mulf %197, %130 : vector<8x128xf32>
    %cst_74 = arith.constant 1.750000e+00 : f32
    %199 = vector.broadcast %cst_74 : f32 to vector<8x128xf32>
    %200 = arith.subf %199, %153 : vector<8x128xf32>
    %201 = arith.mulf %200, %137 : vector<8x128xf32>
    %202 = arith.addf %198, %201 : vector<8x128xf32>
    %cst_75 = arith.constant 7.500000e-01 : f32
    %203 = vector.broadcast %cst_75 : f32 to vector<8x128xf32>
    %204 = arith.subf %153, %203 : vector<8x128xf32>
    %205 = arith.mulf %204, %137 : vector<8x128xf32>
    %cst_76 = arith.constant 2.250000e+00 : f32
    %206 = vector.broadcast %cst_76 : f32 to vector<8x128xf32>
    %207 = arith.subf %206, %153 : vector<8x128xf32>
    %208 = arith.mulf %207, %144 : vector<8x128xf32>
    %209 = arith.addf %205, %208 : vector<8x128xf32>
    %cst_77 = arith.constant 1.250000e+00 : f32
    %210 = vector.broadcast %cst_77 : f32 to vector<8x128xf32>
    %211 = arith.subf %153, %210 : vector<8x128xf32>
    %212 = arith.mulf %211, %144 : vector<8x128xf32>
    %cst_78 = arith.constant 2.750000e+00 : f32
    %213 = vector.broadcast %cst_78 : f32 to vector<8x128xf32>
    %214 = arith.subf %213, %153 : vector<8x128xf32>
    %215 = arith.mulf %214, %151 : vector<8x128xf32>
    %216 = arith.addf %212, %215 : vector<8x128xf32>
    %cst_79 = arith.constant 0.833333313 : f32
    %217 = vector.broadcast %cst_79 : f32 to vector<8x128xf32>
    %218 = arith.mulf %0, %217 : vector<8x128xf32>
    %cst_80 = arith.constant -1.83333337 : f32
    %219 = vector.broadcast %cst_80 : f32 to vector<8x128xf32>
    %220 = arith.subf %218, %219 : vector<8x128xf32>
    %221 = arith.mulf %220, %160 : vector<8x128xf32>
    %cst_81 = arith.constant -5.000000e-01 : f32
    %222 = vector.broadcast %cst_81 : f32 to vector<8x128xf32>
    %223 = arith.subf %222, %218 : vector<8x128xf32>
    %224 = arith.mulf %223, %167 : vector<8x128xf32>
    %225 = arith.addf %221, %224 : vector<8x128xf32>
    %cst_82 = arith.constant -1.500000e+00 : f32
    %226 = vector.broadcast %cst_82 : f32 to vector<8x128xf32>
    %227 = arith.subf %218, %226 : vector<8x128xf32>
    %228 = arith.mulf %227, %167 : vector<8x128xf32>
    %cst_83 = arith.constant -0.166666672 : f32
    %229 = vector.broadcast %cst_83 : f32 to vector<8x128xf32>
    %230 = arith.subf %229, %218 : vector<8x128xf32>
    %231 = arith.mulf %230, %174 : vector<8x128xf32>
    %232 = arith.addf %228, %231 : vector<8x128xf32>
    %cst_84 = arith.constant -1.16666663 : f32
    %233 = vector.broadcast %cst_84 : f32 to vector<8x128xf32>
    %234 = arith.subf %218, %233 : vector<8x128xf32>
    %235 = arith.mulf %234, %174 : vector<8x128xf32>
    %cst_85 = arith.constant 0.166666672 : f32
    %236 = vector.broadcast %cst_85 : f32 to vector<8x128xf32>
    %237 = arith.subf %236, %218 : vector<8x128xf32>
    %238 = arith.mulf %237, %181 : vector<8x128xf32>
    %239 = arith.addf %235, %238 : vector<8x128xf32>
    %cst_86 = arith.constant -0.833333313 : f32
    %240 = vector.broadcast %cst_86 : f32 to vector<8x128xf32>
    %241 = arith.subf %218, %240 : vector<8x128xf32>
    %242 = arith.mulf %241, %181 : vector<8x128xf32>
    %cst_87 = arith.constant 5.000000e-01 : f32
    %243 = vector.broadcast %cst_87 : f32 to vector<8x128xf32>
    %244 = arith.subf %243, %218 : vector<8x128xf32>
    %245 = arith.mulf %244, %188 : vector<8x128xf32>
    %246 = arith.addf %242, %245 : vector<8x128xf32>
    %cst_88 = arith.constant -5.000000e-01 : f32
    %247 = vector.broadcast %cst_88 : f32 to vector<8x128xf32>
    %248 = arith.subf %218, %247 : vector<8x128xf32>
    %249 = arith.mulf %248, %188 : vector<8x128xf32>
    %cst_89 = arith.constant 0.833333313 : f32
    %250 = vector.broadcast %cst_89 : f32 to vector<8x128xf32>
    %251 = arith.subf %250, %218 : vector<8x128xf32>
    %252 = arith.mulf %251, %195 : vector<8x128xf32>
    %253 = arith.addf %249, %252 : vector<8x128xf32>
    %cst_90 = arith.constant -0.166666672 : f32
    %254 = vector.broadcast %cst_90 : f32 to vector<8x128xf32>
    %255 = arith.subf %218, %254 : vector<8x128xf32>
    %256 = arith.mulf %255, %195 : vector<8x128xf32>
    %cst_91 = arith.constant 1.16666663 : f32
    %257 = vector.broadcast %cst_91 : f32 to vector<8x128xf32>
    %258 = arith.subf %257, %218 : vector<8x128xf32>
    %259 = arith.mulf %258, %202 : vector<8x128xf32>
    %260 = arith.addf %256, %259 : vector<8x128xf32>
    %cst_92 = arith.constant 0.166666672 : f32
    %261 = vector.broadcast %cst_92 : f32 to vector<8x128xf32>
    %262 = arith.subf %218, %261 : vector<8x128xf32>
    %263 = arith.mulf %262, %202 : vector<8x128xf32>
    %cst_93 = arith.constant 1.500000e+00 : f32
    %264 = vector.broadcast %cst_93 : f32 to vector<8x128xf32>
    %265 = arith.subf %264, %218 : vector<8x128xf32>
    %266 = arith.mulf %265, %209 : vector<8x128xf32>
    %267 = arith.addf %263, %266 : vector<8x128xf32>
    %cst_94 = arith.constant 5.000000e-01 : f32
    %268 = vector.broadcast %cst_94 : f32 to vector<8x128xf32>
    %269 = arith.subf %218, %268 : vector<8x128xf32>
    %270 = arith.mulf %269, %209 : vector<8x128xf32>
    %cst_95 = arith.constant 1.83333337 : f32
    %271 = vector.broadcast %cst_95 : f32 to vector<8x128xf32>
    %272 = arith.subf %271, %218 : vector<8x128xf32>
    %273 = arith.mulf %272, %216 : vector<8x128xf32>
    %274 = arith.addf %270, %273 : vector<8x128xf32>
    %275 = arith.truncf %225 : vector<8x128xf32> to vector<8x128xbf16>
    %c0_96 = arith.constant 0 : index
    %c128 = arith.constant 128 : index
    %276 = vector.load %arg12[%c0_96, %c128] : memref<8x1152xbf16, #tpu.memory_space<vmem>>, vector<8x128xbf16>
    tpu.vector_store %arg12[%c0_96, %c128], %275 {strides = array<i32>} : memref<8x1152xbf16, #tpu.memory_space<vmem>>, vector<8x128xbf16>,
    %277 = arith.truncf %232 : vector<8x128xf32> to vector<8x128xbf16>
    %c0_97 = arith.constant 0 : index
    %c256 = arith.constant 256 : index
    %278 = vector.load %arg12[%c0_97, %c256] : memref<8x1152xbf16, #tpu.memory_space<vmem>>, vector<8x128xbf16>
    tpu.vector_store %arg12[%c0_97, %c256], %277 {strides = array<i32>} : memref<8x1152xbf16, #tpu.memory_space<vmem>>, vector<8x128xbf16>,
    %279 = arith.truncf %239 : vector<8x128xf32> to vector<8x128xbf16>
    %c0_98 = arith.constant 0 : index
    %c384 = arith.constant 384 : index
    %280 = vector.load %arg12[%c0_98, %c384] : memref<8x1152xbf16, #tpu.memory_space<vmem>>, vector<8x128xbf16>
    tpu.vector_store %arg12[%c0_98, %c384], %279 {strides = array<i32>} : memref<8x1152xbf16, #tpu.memory_space<vmem>>, vector<8x128xbf16>,
    %281 = arith.truncf %246 : vector<8x128xf32> to vector<8x128xbf16>
    %c0_99 = arith.constant 0 : index
    %c512 = arith.constant 512 : index
    %282 = vector.load %arg12[%c0_99, %c512] : memref<8x1152xbf16, #tpu.memory_space<vmem>>, vector<8x128xbf16>
    tpu.vector_store %arg12[%c0_99, %c512], %281 {strides = array<i32>} : memref<8x1152xbf16, #tpu.memory_space<vmem>>, vector<8x128xbf16>,
    %283 = arith.truncf %253 : vector<8x128xf32> to vector<8x128xbf16>
    %c0_100 = arith.constant 0 : index
    %c640 = arith.constant 640 : index
    %284 = vector.load %arg12[%c0_100, %c640] : memref<8x1152xbf16, #tpu.memory_space<vmem>>, vector<8x128xbf16>
    tpu.vector_store %arg12[%c0_100, %c640], %283 {strides = array<i32>} : memref<8x1152xbf16, #tpu.memory_space<vmem>>, vector<8x128xbf16>,
    %285 = arith.truncf %260 : vector<8x128xf32> to vector<8x128xbf16>
    %c0_101 = arith.constant 0 : index
    %c768 = arith.constant 768 : index
    %286 = vector.load %arg12[%c0_101, %c768] : memref<8x1152xbf16, #tpu.memory_space<vmem>>, vector<8x128xbf16>
    tpu.vector_store %arg12[%c0_101, %c768], %285 {strides = array<i32>} : memref<8x1152xbf16, #tpu.memory_space<vmem>>, vector<8x128xbf16>,
    %287 = arith.truncf %267 : vector<8x128xf32> to vector<8x128xbf16>
    %c0_102 = arith.constant 0 : index
    %c896 = arith.constant 896 : index
    %288 = vector.load %arg12[%c0_102, %c896] : memref<8x1152xbf16, #tpu.memory_space<vmem>>, vector<8x128xbf16>
    tpu.vector_store %arg12[%c0_102, %c896], %287 {strides = array<i32>} : memref<8x1152xbf16, #tpu.memory_space<vmem>>, vector<8x128xbf16>,
    %289 = arith.truncf %274 : vector<8x128xf32> to vector<8x128xbf16>
    %c0_103 = arith.constant 0 : index
    %c1024 = arith.constant 1024 : index
    %290 = vector.load %arg12[%c0_103, %c1024] : memref<8x1152xbf16, #tpu.memory_space<vmem>>, vector<8x128xbf16>
    tpu.vector_store %arg12[%c0_103, %c1024], %289 {strides = array<i32>} : memref<8x1152xbf16, #tpu.memory_space<vmem>>, vector<8x128xbf16>,
    %c0_104 = arith.constant 0 : index
    %c0_105 = arith.constant 0 : index
    %291 = vector.load %arg12[%c0_104, %c0_105] : memref<8x1152xbf16, #tpu.memory_space<vmem>>, vector<8x1152xbf16>
    %c0_106 = arith.constant 0 : index
    %c0_107 = arith.constant 0 : index
    %292 = vector.load %arg2[%c0_106, %c0_107] : memref<1152x256xbf16, #tpu.memory_space<vmem>>, vector<1152x256xbf16>
    %cst_108 = arith.constant dense<0.000000e+00> : vector<8x256xf32>
    %293 = tpu.matmul %291, %292, %cst_108 {dimension_numbers = #tpu.dot_dimension_numbers<[1], [0], [0], [1], [0, 0, 1, 1], [], []>} : vector<8x1152xbf16>, vector<1152x256xbf16>, vector<8x256xf32> -> vector<8x256xf32>
    %294 = vector.extract_strided_slice %293 {offsets = [0, 0], sizes = [8, 128], strides = [1, 1]} : vector<8x256xf32> to vector<8x128xf32>
    %c0_109 = arith.constant 0 : index
    %c0_110 = arith.constant 0 : index
    %295 = vector.load %arg3[%c0_109, %c0_110] : memref<2x128xf32, #tpu.memory_space<vmem>>, vector<1x128xf32>
    %c0_111 = arith.constant 0 : index
    %c0_112 = arith.constant 0 : index
    %296 = vector.load %arg4[%c0_111, %c0_112] : memref<2x128xf32, #tpu.memory_space<vmem>>, vector<1x128xf32>
    %cst_113 = arith.constant dense<0.000000e+00> : vector<8xf32>
    %297 = vector.multi_reduction <add>, %294, %cst_113 [1] : vector<8x128xf32> to vector<8xf32>
    %298 = vector.shape_cast %297 : vector<8xf32> to vector<8x1xf32>
    %299 = arith.mulf %294, %294 : vector<8x128xf32>
    %cst_114 = arith.constant dense<0.000000e+00> : vector<8xf32>
    %300 = vector.multi_reduction <add>, %299, %cst_114 [1] : vector<8x128xf32> to vector<8xf32>
    %301 = vector.shape_cast %300 : vector<8xf32> to vector<8x1xf32>
    %cst_115 = arith.constant 6.250000e-02 : f32
    %302 = vector.broadcast %cst_115 : f32 to vector<8x1xf32>
    %303 = arith.mulf %298, %302 : vector<8x1xf32>
    %cst_116 = arith.constant 6.250000e-02 : f32
    %304 = vector.broadcast %cst_116 : f32 to vector<8x1xf32>
    %305 = arith.mulf %301, %304 : vector<8x1xf32>
    %306 = arith.mulf %303, %303 : vector<8x1xf32>
    %307 = arith.subf %305, %306 : vector<8x1xf32>
    %308 = vector.broadcast %303 : vector<8x1xf32> to vector<8x128xf32>
    %309 = arith.subf %294, %308 : vector<8x128xf32>
    %cst_117 = arith.constant 9.99999974E-6 : f32
    %310 = vector.broadcast %cst_117 : f32 to vector<8x1xf32>
    %311 = arith.addf %307, %310 : vector<8x1xf32>
    %312 = math.rsqrt %311 : vector<8x1xf32>
    %313 = vector.broadcast %312 : vector<8x1xf32> to vector<8x128xf32>
    %314 = arith.mulf %309, %313 : vector<8x128xf32>
    %315 = vector.broadcast %295 : vector<1x128xf32> to vector<8x128xf32>
    %316 = arith.mulf %314, %315 : vector<8x128xf32>
    %317 = vector.broadcast %296 : vector<1x128xf32> to vector<8x128xf32>
    %318 = arith.addf %316, %317 : vector<8x128xf32>
    %319 = vector.extract_strided_slice %293 {offsets = [0, 128], sizes = [8, 128], strides = [1, 1]} : vector<8x256xf32> to vector<8x128xf32>
    %c1 = arith.constant 1 : index
    %c0_118 = arith.constant 0 : index
    %320 = vector.load %arg3[%c1, %c0_118] : memref<2x128xf32, #tpu.memory_space<vmem>>, vector<1x128xf32>
    %c1_119 = arith.constant 1 : index
    %c0_120 = arith.constant 0 : index
    %321 = vector.load %arg4[%c1_119, %c0_120] : memref<2x128xf32, #tpu.memory_space<vmem>>, vector<1x128xf32>
    %cst_121 = arith.constant dense<0.000000e+00> : vector<8xf32>
    %322 = vector.multi_reduction <add>, %319, %cst_121 [1] : vector<8x128xf32> to vector<8xf32>
    %323 = vector.shape_cast %322 : vector<8xf32> to vector<8x1xf32>
    %324 = arith.mulf %319, %319 : vector<8x128xf32>
    %cst_122 = arith.constant dense<0.000000e+00> : vector<8xf32>
    %325 = vector.multi_reduction <add>, %324, %cst_122 [1] : vector<8x128xf32> to vector<8xf32>
    %326 = vector.shape_cast %325 : vector<8xf32> to vector<8x1xf32>
    %cst_123 = arith.constant 6.250000e-02 : f32
    %327 = vector.broadcast %cst_123 : f32 to vector<8x1xf32>
    %328 = arith.mulf %323, %327 : vector<8x1xf32>
    %cst_124 = arith.constant 6.250000e-02 : f32
    %329 = vector.broadcast %cst_124 : f32 to vector<8x1xf32>
    %330 = arith.mulf %326, %329 : vector<8x1xf32>
    %331 = arith.mulf %328, %328 : vector<8x1xf32>
    %332 = arith.subf %330, %331 : vector<8x1xf32>
    %333 = vector.broadcast %328 : vector<8x1xf32> to vector<8x128xf32>
    %334 = arith.subf %319, %333 : vector<8x128xf32>
    %cst_125 = arith.constant 9.99999974E-6 : f32
    %335 = vector.broadcast %cst_125 : f32 to vector<8x1xf32>
    %336 = arith.addf %332, %335 : vector<8x1xf32>
    %337 = math.rsqrt %336 : vector<8x1xf32>
    %338 = vector.broadcast %337 : vector<8x1xf32> to vector<8x128xf32>
    %339 = arith.mulf %334, %338 : vector<8x128xf32>
    %340 = vector.broadcast %320 : vector<1x128xf32> to vector<8x128xf32>
    %341 = arith.mulf %339, %340 : vector<8x128xf32>
    %342 = vector.broadcast %321 : vector<1x128xf32> to vector<8x128xf32>
    %343 = arith.addf %341, %342 : vector<8x128xf32>
    %c0_126 = arith.constant 0 : index
    %c0_127 = arith.constant 0 : index
    %344 = vector.load %arg13[%c0_126, %c0_127] : memref<8x128xf32, #tpu.memory_space<vmem>>, vector<8x128xf32>
    tpu.vector_store %arg13[%c0_126, %c0_127], %343 {strides = array<i32>} : memref<8x128xf32, #tpu.memory_space<vmem>>, vector<8x128xf32>,
    %345 = arith.negf %318 : vector<8x128xf32>
    %346 = math.exp %345 : vector<8x128xf32>
    %cst_128 = arith.constant 1.000000e+00 : f32
    %347 = vector.broadcast %cst_128 : f32 to vector<8x128xf32>
    %348 = arith.addf %347, %346 : vector<8x128xf32>
    %349 = arith.divf %347, %348 : vector<8x128xf32>
    %350 = arith.mulf %318, %349 : vector<8x128xf32>
    %351 = arith.truncf %350 : vector<8x128xf32> to vector<8x128xbf16>
    %c0_129 = arith.constant 0 : index
    %c0_130 = arith.constant 0 : index
    %352 = vector.load %arg12[%c0_129, %c0_130] : memref<8x1152xbf16, #tpu.memory_space<vmem>>, vector<8x128xbf16>
    tpu.vector_store %arg12[%c0_129, %c0_130], %351 {strides = array<i32>} : memref<8x1152xbf16, #tpu.memory_space<vmem>>, vector<8x128xbf16>,
    %cst_131 = arith.constant -2.200000e+00 : f32
    %353 = vector.broadcast %cst_131 : f32 to vector<8x128xf32>
    %354 = arith.cmpf oge, %318, %353 : vector<8x128xf32>
    %cst_132 = arith.constant 1.000000e+00 : f32
    %cst_133 = arith.constant 0.000000e+00 : f32
    %355 = vector.broadcast %cst_132 : f32 to vector<8x128xf32>
    %356 = vector.broadcast %cst_133 : f32 to vector<8x128xf32>
    %357 = arith.select %354, %355, %356 : vector<8x128xi1>, vector<8x128xf32>
    %cst_134 = arith.constant -1.800000e+00 : f32
    %358 = vector.broadcast %cst_134 : f32 to vector<8x128xf32>
    %359 = arith.cmpf oge, %318, %358 : vector<8x128xf32>
    %cst_135 = arith.constant 1.000000e+00 : f32
    %cst_136 = arith.constant 0.000000e+00 : f32
    %360 = vector.broadcast %cst_135 : f32 to vector<8x128xf32>
    %361 = vector.broadcast %cst_136 : f32 to vector<8x128xf32>
    %362 = arith.select %359, %360, %361 : vector<8x128xi1>, vector<8x128xf32>
    %cst_137 = arith.constant -1.400000e+00 : f32
    %363 = vector.broadcast %cst_137 : f32 to vector<8x128xf32>
    %364 = arith.cmpf oge, %318, %363 : vector<8x128xf32>
    %cst_138 = arith.constant 1.000000e+00 : f32
    %cst_139 = arith.constant 0.000000e+00 : f32
    %365 = vector.broadcast %cst_138 : f32 to vector<8x128xf32>
    %366 = vector.broadcast %cst_139 : f32 to vector<8x128xf32>
    %367 = arith.select %364, %365, %366 : vector<8x128xi1>, vector<8x128xf32>
    %cst_140 = arith.constant -1.000000e+00 : f32
    %368 = vector.broadcast %cst_140 : f32 to vector<8x128xf32>
    %369 = arith.cmpf oge, %318, %368 : vector<8x128xf32>
    %cst_141 = arith.constant 1.000000e+00 : f32
    %cst_142 = arith.constant 0.000000e+00 : f32
    %370 = vector.broadcast %cst_141 : f32 to vector<8x128xf32>
    %371 = vector.broadcast %cst_142 : f32 to vector<8x128xf32>
    %372 = arith.select %369, %370, %371 : vector<8x128xi1>, vector<8x128xf32>
    %cst_143 = arith.constant -6.000000e-01 : f32
    %373 = vector.broadcast %cst_143 : f32 to vector<8x128xf32>
    %374 = arith.cmpf oge, %318, %373 : vector<8x128xf32>
    %cst_144 = arith.constant 1.000000e+00 : f32
    %cst_145 = arith.constant 0.000000e+00 : f32
    %375 = vector.broadcast %cst_144 : f32 to vector<8x128xf32>
    %376 = vector.broadcast %cst_145 : f32 to vector<8x128xf32>
    %377 = arith.select %374, %375, %376 : vector<8x128xi1>, vector<8x128xf32>
    %cst_146 = arith.constant -2.000000e-01 : f32
    %378 = vector.broadcast %cst_146 : f32 to vector<8x128xf32>
    %379 = arith.cmpf oge, %318, %378 : vector<8x128xf32>
    %cst_147 = arith.constant 1.000000e+00 : f32
    %cst_148 = arith.constant 0.000000e+00 : f32
    %380 = vector.broadcast %cst_147 : f32 to vector<8x128xf32>
    %381 = vector.broadcast %cst_148 : f32 to vector<8x128xf32>
    %382 = arith.select %379, %380, %381 : vector<8x128xi1>, vector<8x128xf32>
    %cst_149 = arith.constant 2.000000e-01 : f32
    %383 = vector.broadcast %cst_149 : f32 to vector<8x128xf32>
    %384 = arith.cmpf oge, %318, %383 : vector<8x128xf32>
    %cst_150 = arith.constant 1.000000e+00 : f32
    %cst_151 = arith.constant 0.000000e+00 : f32
    %385 = vector.broadcast %cst_150 : f32 to vector<8x128xf32>
    %386 = vector.broadcast %cst_151 : f32 to vector<8x128xf32>
    %387 = arith.select %384, %385, %386 : vector<8x128xi1>, vector<8x128xf32>
    %cst_152 = arith.constant 6.000000e-01 : f32
    %388 = vector.broadcast %cst_152 : f32 to vector<8x128xf32>
    %389 = arith.cmpf oge, %318, %388 : vector<8x128xf32>
    %cst_153 = arith.constant 1.000000e+00 : f32
    %cst_154 = arith.constant 0.000000e+00 : f32
    %390 = vector.broadcast %cst_153 : f32 to vector<8x128xf32>
    %391 = vector.broadcast %cst_154 : f32 to vector<8x128xf32>
    %392 = arith.select %389, %390, %391 : vector<8x128xi1>, vector<8x128xf32>
    %cst_155 = arith.constant 1.000000e+00 : f32
    %393 = vector.broadcast %cst_155 : f32 to vector<8x128xf32>
    %394 = arith.cmpf oge, %318, %393 : vector<8x128xf32>
    %cst_156 = arith.constant 1.000000e+00 : f32
    %cst_157 = arith.constant 0.000000e+00 : f32
    %395 = vector.broadcast %cst_156 : f32 to vector<8x128xf32>
    %396 = vector.broadcast %cst_157 : f32 to vector<8x128xf32>
    %397 = arith.select %394, %395, %396 : vector<8x128xi1>, vector<8x128xf32>
    %cst_158 = arith.constant 1.400000e+00 : f32
    %398 = vector.broadcast %cst_158 : f32 to vector<8x128xf32>
    %399 = arith.cmpf oge, %318, %398 : vector<8x128xf32>
    %cst_159 = arith.constant 1.000000e+00 : f32
    %cst_160 = arith.constant 0.000000e+00 : f32
    %400 = vector.broadcast %cst_159 : f32 to vector<8x128xf32>
    %401 = vector.broadcast %cst_160 : f32 to vector<8x128xf32>
    %402 = arith.select %399, %400, %401 : vector<8x128xi1>, vector<8x128xf32>
    %cst_161 = arith.constant 1.800000e+00 : f32
    %403 = vector.broadcast %cst_161 : f32 to vector<8x128xf32>
    %404 = arith.cmpf oge, %318, %403 : vector<8x128xf32>
    %cst_162 = arith.constant 1.000000e+00 : f32
    %cst_163 = arith.constant 0.000000e+00 : f32
    %405 = vector.broadcast %cst_162 : f32 to vector<8x128xf32>
    %406 = vector.broadcast %cst_163 : f32 to vector<8x128xf32>
    %407 = arith.select %404, %405, %406 : vector<8x128xi1>, vector<8x128xf32>
    %cst_164 = arith.constant 2.200000e+00 : f32
    %408 = vector.broadcast %cst_164 : f32 to vector<8x128xf32>
    %409 = arith.cmpf oge, %318, %408 : vector<8x128xf32>
    %cst_165 = arith.constant 1.000000e+00 : f32
    %cst_166 = arith.constant 0.000000e+00 : f32
    %410 = vector.broadcast %cst_165 : f32 to vector<8x128xf32>
    %411 = vector.broadcast %cst_166 : f32 to vector<8x128xf32>
    %412 = arith.select %409, %410, %411 : vector<8x128xi1>, vector<8x128xf32>
    %413 = arith.subf %357, %362 : vector<8x128xf32>
    %414 = arith.subf %362, %367 : vector<8x128xf32>
    %415 = arith.subf %367, %372 : vector<8x128xf32>
    %416 = arith.subf %372, %377 : vector<8x128xf32>
    %417 = arith.subf %377, %382 : vector<8x128xf32>
    %418 = arith.subf %382, %387 : vector<8x128xf32>
    %419 = arith.subf %387, %392 : vector<8x128xf32>
    %420 = arith.subf %392, %397 : vector<8x128xf32>
    %421 = arith.subf %397, %402 : vector<8x128xf32>
    %422 = arith.subf %402, %407 : vector<8x128xf32>
    %423 = arith.subf %407, %412 : vector<8x128xf32>
    %cst_167 = arith.constant 2.500000e+00 : f32
    %424 = vector.broadcast %cst_167 : f32 to vector<8x128xf32>
    %425 = arith.mulf %318, %424 : vector<8x128xf32>
    %cst_168 = arith.constant -5.500000e+00 : f32
    %426 = vector.broadcast %cst_168 : f32 to vector<8x128xf32>
    %427 = arith.subf %425, %426 : vector<8x128xf32>
    %428 = arith.mulf %427, %413 : vector<8x128xf32>
    %cst_169 = arith.constant -3.500000e+00 : f32
    %429 = vector.broadcast %cst_169 : f32 to vector<8x128xf32>
    %430 = arith.subf %429, %425 : vector<8x128xf32>
    %431 = arith.mulf %430, %414 : vector<8x128xf32>
    %432 = arith.addf %428, %431 : vector<8x128xf32>
    %cst_170 = arith.constant -4.500000e+00 : f32
    %433 = vector.broadcast %cst_170 : f32 to vector<8x128xf32>
    %434 = arith.subf %425, %433 : vector<8x128xf32>
    %435 = arith.mulf %434, %414 : vector<8x128xf32>
    %cst_171 = arith.constant -2.500000e+00 : f32
    %436 = vector.broadcast %cst_171 : f32 to vector<8x128xf32>
    %437 = arith.subf %436, %425 : vector<8x128xf32>
    %438 = arith.mulf %437, %415 : vector<8x128xf32>
    %439 = arith.addf %435, %438 : vector<8x128xf32>
    %cst_172 = arith.constant -3.500000e+00 : f32
    %440 = vector.broadcast %cst_172 : f32 to vector<8x128xf32>
    %441 = arith.subf %425, %440 : vector<8x128xf32>
    %442 = arith.mulf %441, %415 : vector<8x128xf32>
    %cst_173 = arith.constant -1.500000e+00 : f32
    %443 = vector.broadcast %cst_173 : f32 to vector<8x128xf32>
    %444 = arith.subf %443, %425 : vector<8x128xf32>
    %445 = arith.mulf %444, %416 : vector<8x128xf32>
    %446 = arith.addf %442, %445 : vector<8x128xf32>
    %cst_174 = arith.constant -2.500000e+00 : f32
    %447 = vector.broadcast %cst_174 : f32 to vector<8x128xf32>
    %448 = arith.subf %425, %447 : vector<8x128xf32>
    %449 = arith.mulf %448, %416 : vector<8x128xf32>
    %cst_175 = arith.constant -5.000000e-01 : f32
    %450 = vector.broadcast %cst_175 : f32 to vector<8x128xf32>
    %451 = arith.subf %450, %425 : vector<8x128xf32>
    %452 = arith.mulf %451, %417 : vector<8x128xf32>
    %453 = arith.addf %449, %452 : vector<8x128xf32>
    %cst_176 = arith.constant -1.500000e+00 : f32
    %454 = vector.broadcast %cst_176 : f32 to vector<8x128xf32>
    %455 = arith.subf %425, %454 : vector<8x128xf32>
    %456 = arith.mulf %455, %417 : vector<8x128xf32>
    %cst_177 = arith.constant 5.000000e-01 : f32
    %457 = vector.broadcast %cst_177 : f32 to vector<8x128xf32>
    %458 = arith.subf %457, %425 : vector<8x128xf32>
    %459 = arith.mulf %458, %418 : vector<8x128xf32>
    %460 = arith.addf %456, %459 : vector<8x128xf32>
    %cst_178 = arith.constant -5.000000e-01 : f32
    %461 = vector.broadcast %cst_178 : f32 to vector<8x128xf32>
    %462 = arith.subf %425, %461 : vector<8x128xf32>
    %463 = arith.mulf %462, %418 : vector<8x128xf32>
    %cst_179 = arith.constant 1.500000e+00 : f32
    %464 = vector.broadcast %cst_179 : f32 to vector<8x128xf32>
    %465 = arith.subf %464, %425 : vector<8x128xf32>
    %466 = arith.mulf %465, %419 : vector<8x128xf32>
    %467 = arith.addf %463, %466 : vector<8x128xf32>
    %cst_180 = arith.constant 5.000000e-01 : f32
    %468 = vector.broadcast %cst_180 : f32 to vector<8x128xf32>
    %469 = arith.subf %425, %468 : vector<8x128xf32>
    %470 = arith.mulf %469, %419 : vector<8x128xf32>
    %cst_181 = arith.constant 2.500000e+00 : f32
    %471 = vector.broadcast %cst_181 : f32 to vector<8x128xf32>
    %472 = arith.subf %471, %425 : vector<8x128xf32>
    %473 = arith.mulf %472, %420 : vector<8x128xf32>
    %474 = arith.addf %470, %473 : vector<8x128xf32>
    %cst_182 = arith.constant 1.500000e+00 : f32
    %475 = vector.broadcast %cst_182 : f32 to vector<8x128xf32>
    %476 = arith.subf %425, %475 : vector<8x128xf32>
    %477 = arith.mulf %476, %420 : vector<8x128xf32>
    %cst_183 = arith.constant 3.500000e+00 : f32
    %478 = vector.broadcast %cst_183 : f32 to vector<8x128xf32>
    %479 = arith.subf %478, %425 : vector<8x128xf32>
    %480 = arith.mulf %479, %421 : vector<8x128xf32>
    %481 = arith.addf %477, %480 : vector<8x128xf32>
    %cst_184 = arith.constant 2.500000e+00 : f32
    %482 = vector.broadcast %cst_184 : f32 to vector<8x128xf32>
    %483 = arith.subf %425, %482 : vector<8x128xf32>
    %484 = arith.mulf %483, %421 : vector<8x128xf32>
    %cst_185 = arith.constant 4.500000e+00 : f32
    %485 = vector.broadcast %cst_185 : f32 to vector<8x128xf32>
    %486 = arith.subf %485, %425 : vector<8x128xf32>
    %487 = arith.mulf %486, %422 : vector<8x128xf32>
    %488 = arith.addf %484, %487 : vector<8x128xf32>
    %cst_186 = arith.constant 3.500000e+00 : f32
    %489 = vector.broadcast %cst_186 : f32 to vector<8x128xf32>
    %490 = arith.subf %425, %489 : vector<8x128xf32>
    %491 = arith.mulf %490, %422 : vector<8x128xf32>
    %cst_187 = arith.constant 5.500000e+00 : f32
    %492 = vector.broadcast %cst_187 : f32 to vector<8x128xf32>
    %493 = arith.subf %492, %425 : vector<8x128xf32>
    %494 = arith.mulf %493, %423 : vector<8x128xf32>
    %495 = arith.addf %491, %494 : vector<8x128xf32>
    %cst_188 = arith.constant 1.250000e+00 : f32
    %496 = vector.broadcast %cst_188 : f32 to vector<8x128xf32>
    %497 = arith.mulf %318, %496 : vector<8x128xf32>
    %cst_189 = arith.constant -2.750000e+00 : f32
    %498 = vector.broadcast %cst_189 : f32 to vector<8x128xf32>
    %499 = arith.subf %497, %498 : vector<8x128xf32>
    %500 = arith.mulf %499, %432 : vector<8x128xf32>
    %cst_190 = arith.constant -1.250000e+00 : f32
    %501 = vector.broadcast %cst_190 : f32 to vector<8x128xf32>
    %502 = arith.subf %501, %497 : vector<8x128xf32>
    %503 = arith.mulf %502, %439 : vector<8x128xf32>
    %504 = arith.addf %500, %503 : vector<8x128xf32>
    %cst_191 = arith.constant -2.250000e+00 : f32
    %505 = vector.broadcast %cst_191 : f32 to vector<8x128xf32>
    %506 = arith.subf %497, %505 : vector<8x128xf32>
    %507 = arith.mulf %506, %439 : vector<8x128xf32>
    %cst_192 = arith.constant -7.500000e-01 : f32
    %508 = vector.broadcast %cst_192 : f32 to vector<8x128xf32>
    %509 = arith.subf %508, %497 : vector<8x128xf32>
    %510 = arith.mulf %509, %446 : vector<8x128xf32>
    %511 = arith.addf %507, %510 : vector<8x128xf32>
    %cst_193 = arith.constant -1.750000e+00 : f32
    %512 = vector.broadcast %cst_193 : f32 to vector<8x128xf32>
    %513 = arith.subf %497, %512 : vector<8x128xf32>
    %514 = arith.mulf %513, %446 : vector<8x128xf32>
    %cst_194 = arith.constant -2.500000e-01 : f32
    %515 = vector.broadcast %cst_194 : f32 to vector<8x128xf32>
    %516 = arith.subf %515, %497 : vector<8x128xf32>
    %517 = arith.mulf %516, %453 : vector<8x128xf32>
    %518 = arith.addf %514, %517 : vector<8x128xf32>
    %cst_195 = arith.constant -1.250000e+00 : f32
    %519 = vector.broadcast %cst_195 : f32 to vector<8x128xf32>
    %520 = arith.subf %497, %519 : vector<8x128xf32>
    %521 = arith.mulf %520, %453 : vector<8x128xf32>
    %cst_196 = arith.constant 2.500000e-01 : f32
    %522 = vector.broadcast %cst_196 : f32 to vector<8x128xf32>
    %523 = arith.subf %522, %497 : vector<8x128xf32>
    %524 = arith.mulf %523, %460 : vector<8x128xf32>
    %525 = arith.addf %521, %524 : vector<8x128xf32>
    %cst_197 = arith.constant -7.500000e-01 : f32
    %526 = vector.broadcast %cst_197 : f32 to vector<8x128xf32>
    %527 = arith.subf %497, %526 : vector<8x128xf32>
    %528 = arith.mulf %527, %460 : vector<8x128xf32>
    %cst_198 = arith.constant 7.500000e-01 : f32
    %529 = vector.broadcast %cst_198 : f32 to vector<8x128xf32>
    %530 = arith.subf %529, %497 : vector<8x128xf32>
    %531 = arith.mulf %530, %467 : vector<8x128xf32>
    %532 = arith.addf %528, %531 : vector<8x128xf32>
    %cst_199 = arith.constant -2.500000e-01 : f32
    %533 = vector.broadcast %cst_199 : f32 to vector<8x128xf32>
    %534 = arith.subf %497, %533 : vector<8x128xf32>
    %535 = arith.mulf %534, %467 : vector<8x128xf32>
    %cst_200 = arith.constant 1.250000e+00 : f32
    %536 = vector.broadcast %cst_200 : f32 to vector<8x128xf32>
    %537 = arith.subf %536, %497 : vector<8x128xf32>
    %538 = arith.mulf %537, %474 : vector<8x128xf32>
    %539 = arith.addf %535, %538 : vector<8x128xf32>
    %cst_201 = arith.constant 2.500000e-01 : f32
    %540 = vector.broadcast %cst_201 : f32 to vector<8x128xf32>
    %541 = arith.subf %497, %540 : vector<8x128xf32>
    %542 = arith.mulf %541, %474 : vector<8x128xf32>
    %cst_202 = arith.constant 1.750000e+00 : f32
    %543 = vector.broadcast %cst_202 : f32 to vector<8x128xf32>
    %544 = arith.subf %543, %497 : vector<8x128xf32>
    %545 = arith.mulf %544, %481 : vector<8x128xf32>
    %546 = arith.addf %542, %545 : vector<8x128xf32>
    %cst_203 = arith.constant 7.500000e-01 : f32
    %547 = vector.broadcast %cst_203 : f32 to vector<8x128xf32>
    %548 = arith.subf %497, %547 : vector<8x128xf32>
    %549 = arith.mulf %548, %481 : vector<8x128xf32>
    %cst_204 = arith.constant 2.250000e+00 : f32
    %550 = vector.broadcast %cst_204 : f32 to vector<8x128xf32>
    %551 = arith.subf %550, %497 : vector<8x128xf32>
    %552 = arith.mulf %551, %488 : vector<8x128xf32>
    %553 = arith.addf %549, %552 : vector<8x128xf32>
    %cst_205 = arith.constant 1.250000e+00 : f32
    %554 = vector.broadcast %cst_205 : f32 to vector<8x128xf32>
    %555 = arith.subf %497, %554 : vector<8x128xf32>
    %556 = arith.mulf %555, %488 : vector<8x128xf32>
    %cst_206 = arith.constant 2.750000e+00 : f32
    %557 = vector.broadcast %cst_206 : f32 to vector<8x128xf32>
    %558 = arith.subf %557, %497 : vector<8x128xf32>
    %559 = arith.mulf %558, %495 : vector<8x128xf32>
    %560 = arith.addf %556, %559 : vector<8x128xf32>
    %cst_207 = arith.constant 0.833333313 : f32
    %561 = vector.broadcast %cst_207 : f32 to vector<8x128xf32>
    %562 = arith.mulf %318, %561 : vector<8x128xf32>
    %cst_208 = arith.constant -1.83333337 : f32
    %563 = vector.broadcast %cst_208 : f32 to vector<8x128xf32>
    %564 = arith.subf %562, %563 : vector<8x128xf32>
    %565 = arith.mulf %564, %504 : vector<8x128xf32>
    %cst_209 = arith.constant -5.000000e-01 : f32
    %566 = vector.broadcast %cst_209 : f32 to vector<8x128xf32>
    %567 = arith.subf %566, %562 : vector<8x128xf32>
    %568 = arith.mulf %567, %511 : vector<8x128xf32>
    %569 = arith.addf %565, %568 : vector<8x128xf32>
    %cst_210 = arith.constant -1.500000e+00 : f32
    %570 = vector.broadcast %cst_210 : f32 to vector<8x128xf32>
    %571 = arith.subf %562, %570 : vector<8x128xf32>
    %572 = arith.mulf %571, %511 : vector<8x128xf32>
    %cst_211 = arith.constant -0.166666672 : f32
    %573 = vector.broadcast %cst_211 : f32 to vector<8x128xf32>
    %574 = arith.subf %573, %562 : vector<8x128xf32>
    %575 = arith.mulf %574, %518 : vector<8x128xf32>
    %576 = arith.addf %572, %575 : vector<8x128xf32>
    %cst_212 = arith.constant -1.16666663 : f32
    %577 = vector.broadcast %cst_212 : f32 to vector<8x128xf32>
    %578 = arith.subf %562, %577 : vector<8x128xf32>
    %579 = arith.mulf %578, %518 : vector<8x128xf32>
    %cst_213 = arith.constant 0.166666672 : f32
    %580 = vector.broadcast %cst_213 : f32 to vector<8x128xf32>
    %581 = arith.subf %580, %562 : vector<8x128xf32>
    %582 = arith.mulf %581, %525 : vector<8x128xf32>
    %583 = arith.addf %579, %582 : vector<8x128xf32>
    %cst_214 = arith.constant -0.833333313 : f32
    %584 = vector.broadcast %cst_214 : f32 to vector<8x128xf32>
    %585 = arith.subf %562, %584 : vector<8x128xf32>
    %586 = arith.mulf %585, %525 : vector<8x128xf32>
    %cst_215 = arith.constant 5.000000e-01 : f32
    %587 = vector.broadcast %cst_215 : f32 to vector<8x128xf32>
    %588 = arith.subf %587, %562 : vector<8x128xf32>
    %589 = arith.mulf %588, %532 : vector<8x128xf32>
    %590 = arith.addf %586, %589 : vector<8x128xf32>
    %cst_216 = arith.constant -5.000000e-01 : f32
    %591 = vector.broadcast %cst_216 : f32 to vector<8x128xf32>
    %592 = arith.subf %562, %591 : vector<8x128xf32>
    %593 = arith.mulf %592, %532 : vector<8x128xf32>
    %cst_217 = arith.constant 0.833333313 : f32
    %594 = vector.broadcast %cst_217 : f32 to vector<8x128xf32>
    %595 = arith.subf %594, %562 : vector<8x128xf32>
    %596 = arith.mulf %595, %539 : vector<8x128xf32>
    %597 = arith.addf %593, %596 : vector<8x128xf32>
    %cst_218 = arith.constant -0.166666672 : f32
    %598 = vector.broadcast %cst_218 : f32 to vector<8x128xf32>
    %599 = arith.subf %562, %598 : vector<8x128xf32>
    %600 = arith.mulf %599, %539 : vector<8x128xf32>
    %cst_219 = arith.constant 1.16666663 : f32
    %601 = vector.broadcast %cst_219 : f32 to vector<8x128xf32>
    %602 = arith.subf %601, %562 : vector<8x128xf32>
    %603 = arith.mulf %602, %546 : vector<8x128xf32>
    %604 = arith.addf %600, %603 : vector<8x128xf32>
    %cst_220 = arith.constant 0.166666672 : f32
    %605 = vector.broadcast %cst_220 : f32 to vector<8x128xf32>
    %606 = arith.subf %562, %605 : vector<8x128xf32>
    %607 = arith.mulf %606, %546 : vector<8x128xf32>
    %cst_221 = arith.constant 1.500000e+00 : f32
    %608 = vector.broadcast %cst_221 : f32 to vector<8x128xf32>
    %609 = arith.subf %608, %562 : vector<8x128xf32>
    %610 = arith.mulf %609, %553 : vector<8x128xf32>
    %611 = arith.addf %607, %610 : vector<8x128xf32>
    %cst_222 = arith.constant 5.000000e-01 : f32
    %612 = vector.broadcast %cst_222 : f32 to vector<8x128xf32>
    %613 = arith.subf %562, %612 : vector<8x128xf32>
    %614 = arith.mulf %613, %553 : vector<8x128xf32>
    %cst_223 = arith.constant 1.83333337 : f32
    %615 = vector.broadcast %cst_223 : f32 to vector<8x128xf32>
    %616 = arith.subf %615, %562 : vector<8x128xf32>
    %617 = arith.mulf %616, %560 : vector<8x128xf32>
    %618 = arith.addf %614, %617 : vector<8x128xf32>
    %619 = arith.truncf %569 : vector<8x128xf32> to vector<8x128xbf16>
    %c0_224 = arith.constant 0 : index
    %c128_225 = arith.constant 128 : index
    %620 = vector.load %arg12[%c0_224, %c128_225] : memref<8x1152xbf16, #tpu.memory_space<vmem>>, vector<8x128xbf16>
    tpu.vector_store %arg12[%c0_224, %c128_225], %619 {strides = array<i32>} : memref<8x1152xbf16, #tpu.memory_space<vmem>>, vector<8x128xbf16>,
    %621 = arith.truncf %576 : vector<8x128xf32> to vector<8x128xbf16>
    %c0_226 = arith.constant 0 : index
    %c256_227 = arith.constant 256 : index
    %622 = vector.load %arg12[%c0_226, %c256_227] : memref<8x1152xbf16, #tpu.memory_space<vmem>>, vector<8x128xbf16>
    tpu.vector_store %arg12[%c0_226, %c256_227], %621 {strides = array<i32>} : memref<8x1152xbf16, #tpu.memory_space<vmem>>, vector<8x128xbf16>,
    %623 = arith.truncf %583 : vector<8x128xf32> to vector<8x128xbf16>
    %c0_228 = arith.constant 0 : index
    %c384_229 = arith.constant 384 : index
    %624 = vector.load %arg12[%c0_228, %c384_229] : memref<8x1152xbf16, #tpu.memory_space<vmem>>, vector<8x128xbf16>
    tpu.vector_store %arg12[%c0_228, %c384_229], %623 {strides = array<i32>} : memref<8x1152xbf16, #tpu.memory_space<vmem>>, vector<8x128xbf16>,
    %625 = arith.truncf %590 : vector<8x128xf32> to vector<8x128xbf16>
    %c0_230 = arith.constant 0 : index
    %c512_231 = arith.constant 512 : index
    %626 = vector.load %arg12[%c0_230, %c512_231] : memref<8x1152xbf16, #tpu.memory_space<vmem>>, vector<8x128xbf16>
    tpu.vector_store %arg12[%c0_230, %c512_231], %625 {strides = array<i32>} : memref<8x1152xbf16, #tpu.memory_space<vmem>>, vector<8x128xbf16>,
    %627 = arith.truncf %597 : vector<8x128xf32> to vector<8x128xbf16>
    %c0_232 = arith.constant 0 : index
    %c640_233 = arith.constant 640 : index
    %628 = vector.load %arg12[%c0_232, %c640_233] : memref<8x1152xbf16, #tpu.memory_space<vmem>>, vector<8x128xbf16>
    tpu.vector_store %arg12[%c0_232, %c640_233], %627 {strides = array<i32>} : memref<8x1152xbf16, #tpu.memory_space<vmem>>, vector<8x128xbf16>,
    %629 = arith.truncf %604 : vector<8x128xf32> to vector<8x128xbf16>
    %c0_234 = arith.constant 0 : index
    %c768_235 = arith.constant 768 : index
    %630 = vector.load %arg12[%c0_234, %c768_235] : memref<8x1152xbf16, #tpu.memory_space<vmem>>, vector<8x128xbf16>
    tpu.vector_store %arg12[%c0_234, %c768_235], %629 {strides = array<i32>} : memref<8x1152xbf16, #tpu.memory_space<vmem>>, vector<8x128xbf16>,
    %631 = arith.truncf %611 : vector<8x128xf32> to vector<8x128xbf16>
    %c0_236 = arith.constant 0 : index
    %c896_237 = arith.constant 896 : index
    %632 = vector.load %arg12[%c0_236, %c896_237] : memref<8x1152xbf16, #tpu.memory_space<vmem>>, vector<8x128xbf16>
    tpu.vector_store %arg12[%c0_236, %c896_237], %631 {strides = array<i32>} : memref<8x1152xbf16, #tpu.memory_space<vmem>>, vector<8x128xbf16>,
    %633 = arith.truncf %618 : vector<8x128xf32> to vector<8x128xbf16>
    %c0_238 = arith.constant 0 : index
    %c1024_239 = arith.constant 1024 : index
    %634 = vector.load %arg12[%c0_238, %c1024_239] : memref<8x1152xbf16, #tpu.memory_space<vmem>>, vector<8x128xbf16>
    tpu.vector_store %arg12[%c0_238, %c1024_239], %633 {strides = array<i32>} : memref<8x1152xbf16, #tpu.memory_space<vmem>>, vector<8x128xbf16>,
    %c0_240 = arith.constant 0 : index
    %c0_241 = arith.constant 0 : index
    %635 = vector.load %arg12[%c0_240, %c0_241] : memref<8x1152xbf16, #tpu.memory_space<vmem>>, vector<8x1152xbf16>
    %c0_242 = arith.constant 0 : index
    %c0_243 = arith.constant 0 : index
    %636 = vector.load %arg5[%c0_242, %c0_243] : memref<1152x128xbf16, #tpu.memory_space<vmem>>, vector<1152x128xbf16>
    %cst_244 = arith.constant dense<0.000000e+00> : vector<8x128xf32>
    %637 = tpu.matmul %635, %636, %cst_244 {dimension_numbers = #tpu.dot_dimension_numbers<[1], [0], [0], [1], [0, 0, 1, 1], [], []>} : vector<8x1152xbf16>, vector<1152x128xbf16>, vector<8x128xf32> -> vector<8x128xf32>
    %c0_245 = arith.constant 0 : index
    %c0_246 = arith.constant 0 : index
    %638 = vector.load %arg7[%c0_245, %c0_246] : memref<2x128xf32, #tpu.memory_space<vmem>>, vector<1x128xf32>
    %c0_247 = arith.constant 0 : index
    %c0_248 = arith.constant 0 : index
    %639 = vector.load %arg8[%c0_247, %c0_248] : memref<2x128xf32, #tpu.memory_space<vmem>>, vector<1x128xf32>
    %cst_249 = arith.constant dense<0.000000e+00> : vector<8xf32>
    %640 = vector.multi_reduction <add>, %637, %cst_249 [1] : vector<8x128xf32> to vector<8xf32>
    %641 = vector.shape_cast %640 : vector<8xf32> to vector<8x1xf32>
    %642 = arith.mulf %637, %637 : vector<8x128xf32>
    %cst_250 = arith.constant dense<0.000000e+00> : vector<8xf32>
    %643 = vector.multi_reduction <add>, %642, %cst_250 [1] : vector<8x128xf32> to vector<8xf32>
    %644 = vector.shape_cast %643 : vector<8xf32> to vector<8x1xf32>
    %cst_251 = arith.constant 3.125000e-02 : f32
    %645 = vector.broadcast %cst_251 : f32 to vector<8x1xf32>
    %646 = arith.mulf %641, %645 : vector<8x1xf32>
    %cst_252 = arith.constant 3.125000e-02 : f32
    %647 = vector.broadcast %cst_252 : f32 to vector<8x1xf32>
    %648 = arith.mulf %644, %647 : vector<8x1xf32>
    %649 = arith.mulf %646, %646 : vector<8x1xf32>
    %650 = arith.subf %648, %649 : vector<8x1xf32>
    %651 = vector.broadcast %646 : vector<8x1xf32> to vector<8x128xf32>
    %652 = arith.subf %637, %651 : vector<8x128xf32>
    %cst_253 = arith.constant 9.99999974E-6 : f32
    %653 = vector.broadcast %cst_253 : f32 to vector<8x1xf32>
    %654 = arith.addf %650, %653 : vector<8x1xf32>
    %655 = math.rsqrt %654 : vector<8x1xf32>
    %656 = vector.broadcast %655 : vector<8x1xf32> to vector<8x128xf32>
    %657 = arith.mulf %652, %656 : vector<8x128xf32>
    %658 = vector.broadcast %638 : vector<1x128xf32> to vector<8x128xf32>
    %659 = arith.mulf %657, %658 : vector<8x128xf32>
    %660 = vector.broadcast %639 : vector<1x128xf32> to vector<8x128xf32>
    %661 = arith.addf %659, %660 : vector<8x128xf32>
    %662 = arith.negf %661 : vector<8x128xf32>
    %663 = math.exp %662 : vector<8x128xf32>
    %cst_254 = arith.constant 1.000000e+00 : f32
    %664 = vector.broadcast %cst_254 : f32 to vector<8x128xf32>
    %665 = arith.addf %664, %663 : vector<8x128xf32>
    %666 = arith.divf %664, %665 : vector<8x128xf32>
    %667 = arith.mulf %661, %666 : vector<8x128xf32>
    %668 = arith.truncf %667 : vector<8x128xf32> to vector<8x128xbf16>
    %c0_255 = arith.constant 0 : index
    %c0_256 = arith.constant 0 : index
    %669 = vector.load %arg12[%c0_255, %c0_256] : memref<8x1152xbf16, #tpu.memory_space<vmem>>, vector<8x128xbf16>
    tpu.vector_store %arg12[%c0_255, %c0_256], %668 {strides = array<i32>} : memref<8x1152xbf16, #tpu.memory_space<vmem>>, vector<8x128xbf16>,
    %cst_257 = arith.constant -2.200000e+00 : f32
    %670 = vector.broadcast %cst_257 : f32 to vector<8x128xf32>
    %671 = arith.cmpf oge, %661, %670 : vector<8x128xf32>
    %cst_258 = arith.constant 1.000000e+00 : f32
    %cst_259 = arith.constant 0.000000e+00 : f32
    %672 = vector.broadcast %cst_258 : f32 to vector<8x128xf32>
    %673 = vector.broadcast %cst_259 : f32 to vector<8x128xf32>
    %674 = arith.select %671, %672, %673 : vector<8x128xi1>, vector<8x128xf32>
    %cst_260 = arith.constant -1.800000e+00 : f32
    %675 = vector.broadcast %cst_260 : f32 to vector<8x128xf32>
    %676 = arith.cmpf oge, %661, %675 : vector<8x128xf32>
    %cst_261 = arith.constant 1.000000e+00 : f32
    %cst_262 = arith.constant 0.000000e+00 : f32
    %677 = vector.broadcast %cst_261 : f32 to vector<8x128xf32>
    %678 = vector.broadcast %cst_262 : f32 to vector<8x128xf32>
    %679 = arith.select %676, %677, %678 : vector<8x128xi1>, vector<8x128xf32>
    %cst_263 = arith.constant -1.400000e+00 : f32
    %680 = vector.broadcast %cst_263 : f32 to vector<8x128xf32>
    %681 = arith.cmpf oge, %661, %680 : vector<8x128xf32>
    %cst_264 = arith.constant 1.000000e+00 : f32
    %cst_265 = arith.constant 0.000000e+00 : f32
    %682 = vector.broadcast %cst_264 : f32 to vector<8x128xf32>
    %683 = vector.broadcast %cst_265 : f32 to vector<8x128xf32>
    %684 = arith.select %681, %682, %683 : vector<8x128xi1>, vector<8x128xf32>
    %cst_266 = arith.constant -1.000000e+00 : f32
    %685 = vector.broadcast %cst_266 : f32 to vector<8x128xf32>
    %686 = arith.cmpf oge, %661, %685 : vector<8x128xf32>
    %cst_267 = arith.constant 1.000000e+00 : f32
    %cst_268 = arith.constant 0.000000e+00 : f32
    %687 = vector.broadcast %cst_267 : f32 to vector<8x128xf32>
    %688 = vector.broadcast %cst_268 : f32 to vector<8x128xf32>
    %689 = arith.select %686, %687, %688 : vector<8x128xi1>, vector<8x128xf32>
    %cst_269 = arith.constant -6.000000e-01 : f32
    %690 = vector.broadcast %cst_269 : f32 to vector<8x128xf32>
    %691 = arith.cmpf oge, %661, %690 : vector<8x128xf32>
    %cst_270 = arith.constant 1.000000e+00 : f32
    %cst_271 = arith.constant 0.000000e+00 : f32
    %692 = vector.broadcast %cst_270 : f32 to vector<8x128xf32>
    %693 = vector.broadcast %cst_271 : f32 to vector<8x128xf32>
    %694 = arith.select %691, %692, %693 : vector<8x128xi1>, vector<8x128xf32>
    %cst_272 = arith.constant -2.000000e-01 : f32
    %695 = vector.broadcast %cst_272 : f32 to vector<8x128xf32>
    %696 = arith.cmpf oge, %661, %695 : vector<8x128xf32>
    %cst_273 = arith.constant 1.000000e+00 : f32
    %cst_274 = arith.constant 0.000000e+00 : f32
    %697 = vector.broadcast %cst_273 : f32 to vector<8x128xf32>
    %698 = vector.broadcast %cst_274 : f32 to vector<8x128xf32>
    %699 = arith.select %696, %697, %698 : vector<8x128xi1>, vector<8x128xf32>
    %cst_275 = arith.constant 2.000000e-01 : f32
    %700 = vector.broadcast %cst_275 : f32 to vector<8x128xf32>
    %701 = arith.cmpf oge, %661, %700 : vector<8x128xf32>
    %cst_276 = arith.constant 1.000000e+00 : f32
    %cst_277 = arith.constant 0.000000e+00 : f32
    %702 = vector.broadcast %cst_276 : f32 to vector<8x128xf32>
    %703 = vector.broadcast %cst_277 : f32 to vector<8x128xf32>
    %704 = arith.select %701, %702, %703 : vector<8x128xi1>, vector<8x128xf32>
    %cst_278 = arith.constant 6.000000e-01 : f32
    %705 = vector.broadcast %cst_278 : f32 to vector<8x128xf32>
    %706 = arith.cmpf oge, %661, %705 : vector<8x128xf32>
    %cst_279 = arith.constant 1.000000e+00 : f32
    %cst_280 = arith.constant 0.000000e+00 : f32
    %707 = vector.broadcast %cst_279 : f32 to vector<8x128xf32>
    %708 = vector.broadcast %cst_280 : f32 to vector<8x128xf32>
    %709 = arith.select %706, %707, %708 : vector<8x128xi1>, vector<8x128xf32>
    %cst_281 = arith.constant 1.000000e+00 : f32
    %710 = vector.broadcast %cst_281 : f32 to vector<8x128xf32>
    %711 = arith.cmpf oge, %661, %710 : vector<8x128xf32>
    %cst_282 = arith.constant 1.000000e+00 : f32
    %cst_283 = arith.constant 0.000000e+00 : f32
    %712 = vector.broadcast %cst_282 : f32 to vector<8x128xf32>
    %713 = vector.broadcast %cst_283 : f32 to vector<8x128xf32>
    %714 = arith.select %711, %712, %713 : vector<8x128xi1>, vector<8x128xf32>
    %cst_284 = arith.constant 1.400000e+00 : f32
    %715 = vector.broadcast %cst_284 : f32 to vector<8x128xf32>
    %716 = arith.cmpf oge, %661, %715 : vector<8x128xf32>
    %cst_285 = arith.constant 1.000000e+00 : f32
    %cst_286 = arith.constant 0.000000e+00 : f32
    %717 = vector.broadcast %cst_285 : f32 to vector<8x128xf32>
    %718 = vector.broadcast %cst_286 : f32 to vector<8x128xf32>
    %719 = arith.select %716, %717, %718 : vector<8x128xi1>, vector<8x128xf32>
    %cst_287 = arith.constant 1.800000e+00 : f32
    %720 = vector.broadcast %cst_287 : f32 to vector<8x128xf32>
    %721 = arith.cmpf oge, %661, %720 : vector<8x128xf32>
    %cst_288 = arith.constant 1.000000e+00 : f32
    %cst_289 = arith.constant 0.000000e+00 : f32
    %722 = vector.broadcast %cst_288 : f32 to vector<8x128xf32>
    %723 = vector.broadcast %cst_289 : f32 to vector<8x128xf32>
    %724 = arith.select %721, %722, %723 : vector<8x128xi1>, vector<8x128xf32>
    %cst_290 = arith.constant 2.200000e+00 : f32
    %725 = vector.broadcast %cst_290 : f32 to vector<8x128xf32>
    %726 = arith.cmpf oge, %661, %725 : vector<8x128xf32>
    %cst_291 = arith.constant 1.000000e+00 : f32
    %cst_292 = arith.constant 0.000000e+00 : f32
    %727 = vector.broadcast %cst_291 : f32 to vector<8x128xf32>
    %728 = vector.broadcast %cst_292 : f32 to vector<8x128xf32>
    %729 = arith.select %726, %727, %728 : vector<8x128xi1>, vector<8x128xf32>
    %730 = arith.subf %674, %679 : vector<8x128xf32>
    %731 = arith.subf %679, %684 : vector<8x128xf32>
    %732 = arith.subf %684, %689 : vector<8x128xf32>
    %733 = arith.subf %689, %694 : vector<8x128xf32>
    %734 = arith.subf %694, %699 : vector<8x128xf32>
    %735 = arith.subf %699, %704 : vector<8x128xf32>
    %736 = arith.subf %704, %709 : vector<8x128xf32>
    %737 = arith.subf %709, %714 : vector<8x128xf32>
    %738 = arith.subf %714, %719 : vector<8x128xf32>
    %739 = arith.subf %719, %724 : vector<8x128xf32>
    %740 = arith.subf %724, %729 : vector<8x128xf32>
    %cst_293 = arith.constant 2.500000e+00 : f32
    %741 = vector.broadcast %cst_293 : f32 to vector<8x128xf32>
    %742 = arith.mulf %661, %741 : vector<8x128xf32>
    %cst_294 = arith.constant -5.500000e+00 : f32
    %743 = vector.broadcast %cst_294 : f32 to vector<8x128xf32>
    %744 = arith.subf %742, %743 : vector<8x128xf32>
    %745 = arith.mulf %744, %730 : vector<8x128xf32>
    %cst_295 = arith.constant -3.500000e+00 : f32
    %746 = vector.broadcast %cst_295 : f32 to vector<8x128xf32>
    %747 = arith.subf %746, %742 : vector<8x128xf32>
    %748 = arith.mulf %747, %731 : vector<8x128xf32>
    %749 = arith.addf %745, %748 : vector<8x128xf32>
    %cst_296 = arith.constant -4.500000e+00 : f32
    %750 = vector.broadcast %cst_296 : f32 to vector<8x128xf32>
    %751 = arith.subf %742, %750 : vector<8x128xf32>
    %752 = arith.mulf %751, %731 : vector<8x128xf32>
    %cst_297 = arith.constant -2.500000e+00 : f32
    %753 = vector.broadcast %cst_297 : f32 to vector<8x128xf32>
    %754 = arith.subf %753, %742 : vector<8x128xf32>
    %755 = arith.mulf %754, %732 : vector<8x128xf32>
    %756 = arith.addf %752, %755 : vector<8x128xf32>
    %cst_298 = arith.constant -3.500000e+00 : f32
    %757 = vector.broadcast %cst_298 : f32 to vector<8x128xf32>
    %758 = arith.subf %742, %757 : vector<8x128xf32>
    %759 = arith.mulf %758, %732 : vector<8x128xf32>
    %cst_299 = arith.constant -1.500000e+00 : f32
    %760 = vector.broadcast %cst_299 : f32 to vector<8x128xf32>
    %761 = arith.subf %760, %742 : vector<8x128xf32>
    %762 = arith.mulf %761, %733 : vector<8x128xf32>
    %763 = arith.addf %759, %762 : vector<8x128xf32>
    %cst_300 = arith.constant -2.500000e+00 : f32
    %764 = vector.broadcast %cst_300 : f32 to vector<8x128xf32>
    %765 = arith.subf %742, %764 : vector<8x128xf32>
    %766 = arith.mulf %765, %733 : vector<8x128xf32>
    %cst_301 = arith.constant -5.000000e-01 : f32
    %767 = vector.broadcast %cst_301 : f32 to vector<8x128xf32>
    %768 = arith.subf %767, %742 : vector<8x128xf32>
    %769 = arith.mulf %768, %734 : vector<8x128xf32>
    %770 = arith.addf %766, %769 : vector<8x128xf32>
    %cst_302 = arith.constant -1.500000e+00 : f32
    %771 = vector.broadcast %cst_302 : f32 to vector<8x128xf32>
    %772 = arith.subf %742, %771 : vector<8x128xf32>
    %773 = arith.mulf %772, %734 : vector<8x128xf32>
    %cst_303 = arith.constant 5.000000e-01 : f32
    %774 = vector.broadcast %cst_303 : f32 to vector<8x128xf32>
    %775 = arith.subf %774, %742 : vector<8x128xf32>
    %776 = arith.mulf %775, %735 : vector<8x128xf32>
    %777 = arith.addf %773, %776 : vector<8x128xf32>
    %cst_304 = arith.constant -5.000000e-01 : f32
    %778 = vector.broadcast %cst_304 : f32 to vector<8x128xf32>
    %779 = arith.subf %742, %778 : vector<8x128xf32>
    %780 = arith.mulf %779, %735 : vector<8x128xf32>
    %cst_305 = arith.constant 1.500000e+00 : f32
    %781 = vector.broadcast %cst_305 : f32 to vector<8x128xf32>
    %782 = arith.subf %781, %742 : vector<8x128xf32>
    %783 = arith.mulf %782, %736 : vector<8x128xf32>
    %784 = arith.addf %780, %783 : vector<8x128xf32>
    %cst_306 = arith.constant 5.000000e-01 : f32
    %785 = vector.broadcast %cst_306 : f32 to vector<8x128xf32>
    %786 = arith.subf %742, %785 : vector<8x128xf32>
    %787 = arith.mulf %786, %736 : vector<8x128xf32>
    %cst_307 = arith.constant 2.500000e+00 : f32
    %788 = vector.broadcast %cst_307 : f32 to vector<8x128xf32>
    %789 = arith.subf %788, %742 : vector<8x128xf32>
    %790 = arith.mulf %789, %737 : vector<8x128xf32>
    %791 = arith.addf %787, %790 : vector<8x128xf32>
    %cst_308 = arith.constant 1.500000e+00 : f32
    %792 = vector.broadcast %cst_308 : f32 to vector<8x128xf32>
    %793 = arith.subf %742, %792 : vector<8x128xf32>
    %794 = arith.mulf %793, %737 : vector<8x128xf32>
    %cst_309 = arith.constant 3.500000e+00 : f32
    %795 = vector.broadcast %cst_309 : f32 to vector<8x128xf32>
    %796 = arith.subf %795, %742 : vector<8x128xf32>
    %797 = arith.mulf %796, %738 : vector<8x128xf32>
    %798 = arith.addf %794, %797 : vector<8x128xf32>
    %cst_310 = arith.constant 2.500000e+00 : f32
    %799 = vector.broadcast %cst_310 : f32 to vector<8x128xf32>
    %800 = arith.subf %742, %799 : vector<8x128xf32>
    %801 = arith.mulf %800, %738 : vector<8x128xf32>
    %cst_311 = arith.constant 4.500000e+00 : f32
    %802 = vector.broadcast %cst_311 : f32 to vector<8x128xf32>
    %803 = arith.subf %802, %742 : vector<8x128xf32>
    %804 = arith.mulf %803, %739 : vector<8x128xf32>
    %805 = arith.addf %801, %804 : vector<8x128xf32>
    %cst_312 = arith.constant 3.500000e+00 : f32
    %806 = vector.broadcast %cst_312 : f32 to vector<8x128xf32>
    %807 = arith.subf %742, %806 : vector<8x128xf32>
    %808 = arith.mulf %807, %739 : vector<8x128xf32>
    %cst_313 = arith.constant 5.500000e+00 : f32
    %809 = vector.broadcast %cst_313 : f32 to vector<8x128xf32>
    %810 = arith.subf %809, %742 : vector<8x128xf32>
    %811 = arith.mulf %810, %740 : vector<8x128xf32>
    %812 = arith.addf %808, %811 : vector<8x128xf32>
    %cst_314 = arith.constant 1.250000e+00 : f32
    %813 = vector.broadcast %cst_314 : f32 to vector<8x128xf32>
    %814 = arith.mulf %661, %813 : vector<8x128xf32>
    %cst_315 = arith.constant -2.750000e+00 : f32
    %815 = vector.broadcast %cst_315 : f32 to vector<8x128xf32>
    %816 = arith.subf %814, %815 : vector<8x128xf32>
    %817 = arith.mulf %816, %749 : vector<8x128xf32>
    %cst_316 = arith.constant -1.250000e+00 : f32
    %818 = vector.broadcast %cst_316 : f32 to vector<8x128xf32>
    %819 = arith.subf %818, %814 : vector<8x128xf32>
    %820 = arith.mulf %819, %756 : vector<8x128xf32>
    %821 = arith.addf %817, %820 : vector<8x128xf32>
    %cst_317 = arith.constant -2.250000e+00 : f32
    %822 = vector.broadcast %cst_317 : f32 to vector<8x128xf32>
    %823 = arith.subf %814, %822 : vector<8x128xf32>
    %824 = arith.mulf %823, %756 : vector<8x128xf32>
    %cst_318 = arith.constant -7.500000e-01 : f32
    %825 = vector.broadcast %cst_318 : f32 to vector<8x128xf32>
    %826 = arith.subf %825, %814 : vector<8x128xf32>
    %827 = arith.mulf %826, %763 : vector<8x128xf32>
    %828 = arith.addf %824, %827 : vector<8x128xf32>
    %cst_319 = arith.constant -1.750000e+00 : f32
    %829 = vector.broadcast %cst_319 : f32 to vector<8x128xf32>
    %830 = arith.subf %814, %829 : vector<8x128xf32>
    %831 = arith.mulf %830, %763 : vector<8x128xf32>
    %cst_320 = arith.constant -2.500000e-01 : f32
    %832 = vector.broadcast %cst_320 : f32 to vector<8x128xf32>
    %833 = arith.subf %832, %814 : vector<8x128xf32>
    %834 = arith.mulf %833, %770 : vector<8x128xf32>
    %835 = arith.addf %831, %834 : vector<8x128xf32>
    %cst_321 = arith.constant -1.250000e+00 : f32
    %836 = vector.broadcast %cst_321 : f32 to vector<8x128xf32>
    %837 = arith.subf %814, %836 : vector<8x128xf32>
    %838 = arith.mulf %837, %770 : vector<8x128xf32>
    %cst_322 = arith.constant 2.500000e-01 : f32
    %839 = vector.broadcast %cst_322 : f32 to vector<8x128xf32>
    %840 = arith.subf %839, %814 : vector<8x128xf32>
    %841 = arith.mulf %840, %777 : vector<8x128xf32>
    %842 = arith.addf %838, %841 : vector<8x128xf32>
    %cst_323 = arith.constant -7.500000e-01 : f32
    %843 = vector.broadcast %cst_323 : f32 to vector<8x128xf32>
    %844 = arith.subf %814, %843 : vector<8x128xf32>
    %845 = arith.mulf %844, %777 : vector<8x128xf32>
    %cst_324 = arith.constant 7.500000e-01 : f32
    %846 = vector.broadcast %cst_324 : f32 to vector<8x128xf32>
    %847 = arith.subf %846, %814 : vector<8x128xf32>
    %848 = arith.mulf %847, %784 : vector<8x128xf32>
    %849 = arith.addf %845, %848 : vector<8x128xf32>
    %cst_325 = arith.constant -2.500000e-01 : f32
    %850 = vector.broadcast %cst_325 : f32 to vector<8x128xf32>
    %851 = arith.subf %814, %850 : vector<8x128xf32>
    %852 = arith.mulf %851, %784 : vector<8x128xf32>
    %cst_326 = arith.constant 1.250000e+00 : f32
    %853 = vector.broadcast %cst_326 : f32 to vector<8x128xf32>
    %854 = arith.subf %853, %814 : vector<8x128xf32>
    %855 = arith.mulf %854, %791 : vector<8x128xf32>
    %856 = arith.addf %852, %855 : vector<8x128xf32>
    %cst_327 = arith.constant 2.500000e-01 : f32
    %857 = vector.broadcast %cst_327 : f32 to vector<8x128xf32>
    %858 = arith.subf %814, %857 : vector<8x128xf32>
    %859 = arith.mulf %858, %791 : vector<8x128xf32>
    %cst_328 = arith.constant 1.750000e+00 : f32
    %860 = vector.broadcast %cst_328 : f32 to vector<8x128xf32>
    %861 = arith.subf %860, %814 : vector<8x128xf32>
    %862 = arith.mulf %861, %798 : vector<8x128xf32>
    %863 = arith.addf %859, %862 : vector<8x128xf32>
    %cst_329 = arith.constant 7.500000e-01 : f32
    %864 = vector.broadcast %cst_329 : f32 to vector<8x128xf32>
    %865 = arith.subf %814, %864 : vector<8x128xf32>
    %866 = arith.mulf %865, %798 : vector<8x128xf32>
    %cst_330 = arith.constant 2.250000e+00 : f32
    %867 = vector.broadcast %cst_330 : f32 to vector<8x128xf32>
    %868 = arith.subf %867, %814 : vector<8x128xf32>
    %869 = arith.mulf %868, %805 : vector<8x128xf32>
    %870 = arith.addf %866, %869 : vector<8x128xf32>
    %cst_331 = arith.constant 1.250000e+00 : f32
    %871 = vector.broadcast %cst_331 : f32 to vector<8x128xf32>
    %872 = arith.subf %814, %871 : vector<8x128xf32>
    %873 = arith.mulf %872, %805 : vector<8x128xf32>
    %cst_332 = arith.constant 2.750000e+00 : f32
    %874 = vector.broadcast %cst_332 : f32 to vector<8x128xf32>
    %875 = arith.subf %874, %814 : vector<8x128xf32>
    %876 = arith.mulf %875, %812 : vector<8x128xf32>
    %877 = arith.addf %873, %876 : vector<8x128xf32>
    %cst_333 = arith.constant 0.833333313 : f32
    %878 = vector.broadcast %cst_333 : f32 to vector<8x128xf32>
    %879 = arith.mulf %661, %878 : vector<8x128xf32>
    %cst_334 = arith.constant -1.83333337 : f32
    %880 = vector.broadcast %cst_334 : f32 to vector<8x128xf32>
    %881 = arith.subf %879, %880 : vector<8x128xf32>
    %882 = arith.mulf %881, %821 : vector<8x128xf32>
    %cst_335 = arith.constant -5.000000e-01 : f32
    %883 = vector.broadcast %cst_335 : f32 to vector<8x128xf32>
    %884 = arith.subf %883, %879 : vector<8x128xf32>
    %885 = arith.mulf %884, %828 : vector<8x128xf32>
    %886 = arith.addf %882, %885 : vector<8x128xf32>
    %cst_336 = arith.constant -1.500000e+00 : f32
    %887 = vector.broadcast %cst_336 : f32 to vector<8x128xf32>
    %888 = arith.subf %879, %887 : vector<8x128xf32>
    %889 = arith.mulf %888, %828 : vector<8x128xf32>
    %cst_337 = arith.constant -0.166666672 : f32
    %890 = vector.broadcast %cst_337 : f32 to vector<8x128xf32>
    %891 = arith.subf %890, %879 : vector<8x128xf32>
    %892 = arith.mulf %891, %835 : vector<8x128xf32>
    %893 = arith.addf %889, %892 : vector<8x128xf32>
    %cst_338 = arith.constant -1.16666663 : f32
    %894 = vector.broadcast %cst_338 : f32 to vector<8x128xf32>
    %895 = arith.subf %879, %894 : vector<8x128xf32>
    %896 = arith.mulf %895, %835 : vector<8x128xf32>
    %cst_339 = arith.constant 0.166666672 : f32
    %897 = vector.broadcast %cst_339 : f32 to vector<8x128xf32>
    %898 = arith.subf %897, %879 : vector<8x128xf32>
    %899 = arith.mulf %898, %842 : vector<8x128xf32>
    %900 = arith.addf %896, %899 : vector<8x128xf32>
    %cst_340 = arith.constant -0.833333313 : f32
    %901 = vector.broadcast %cst_340 : f32 to vector<8x128xf32>
    %902 = arith.subf %879, %901 : vector<8x128xf32>
    %903 = arith.mulf %902, %842 : vector<8x128xf32>
    %cst_341 = arith.constant 5.000000e-01 : f32
    %904 = vector.broadcast %cst_341 : f32 to vector<8x128xf32>
    %905 = arith.subf %904, %879 : vector<8x128xf32>
    %906 = arith.mulf %905, %849 : vector<8x128xf32>
    %907 = arith.addf %903, %906 : vector<8x128xf32>
    %cst_342 = arith.constant -5.000000e-01 : f32
    %908 = vector.broadcast %cst_342 : f32 to vector<8x128xf32>
    %909 = arith.subf %879, %908 : vector<8x128xf32>
    %910 = arith.mulf %909, %849 : vector<8x128xf32>
    %cst_343 = arith.constant 0.833333313 : f32
    %911 = vector.broadcast %cst_343 : f32 to vector<8x128xf32>
    %912 = arith.subf %911, %879 : vector<8x128xf32>
    %913 = arith.mulf %912, %856 : vector<8x128xf32>
    %914 = arith.addf %910, %913 : vector<8x128xf32>
    %cst_344 = arith.constant -0.166666672 : f32
    %915 = vector.broadcast %cst_344 : f32 to vector<8x128xf32>
    %916 = arith.subf %879, %915 : vector<8x128xf32>
    %917 = arith.mulf %916, %856 : vector<8x128xf32>
    %cst_345 = arith.constant 1.16666663 : f32
    %918 = vector.broadcast %cst_345 : f32 to vector<8x128xf32>
    %919 = arith.subf %918, %879 : vector<8x128xf32>
    %920 = arith.mulf %919, %863 : vector<8x128xf32>
    %921 = arith.addf %917, %920 : vector<8x128xf32>
    %cst_346 = arith.constant 0.166666672 : f32
    %922 = vector.broadcast %cst_346 : f32 to vector<8x128xf32>
    %923 = arith.subf %879, %922 : vector<8x128xf32>
    %924 = arith.mulf %923, %863 : vector<8x128xf32>
    %cst_347 = arith.constant 1.500000e+00 : f32
    %925 = vector.broadcast %cst_347 : f32 to vector<8x128xf32>
    %926 = arith.subf %925, %879 : vector<8x128xf32>
    %927 = arith.mulf %926, %870 : vector<8x128xf32>
    %928 = arith.addf %924, %927 : vector<8x128xf32>
    %cst_348 = arith.constant 5.000000e-01 : f32
    %929 = vector.broadcast %cst_348 : f32 to vector<8x128xf32>
    %930 = arith.subf %879, %929 : vector<8x128xf32>
    %931 = arith.mulf %930, %870 : vector<8x128xf32>
    %cst_349 = arith.constant 1.83333337 : f32
    %932 = vector.broadcast %cst_349 : f32 to vector<8x128xf32>
    %933 = arith.subf %932, %879 : vector<8x128xf32>
    %934 = arith.mulf %933, %877 : vector<8x128xf32>
    %935 = arith.addf %931, %934 : vector<8x128xf32>
    %936 = arith.truncf %886 : vector<8x128xf32> to vector<8x128xbf16>
    %c0_350 = arith.constant 0 : index
    %c128_351 = arith.constant 128 : index
    %937 = vector.load %arg12[%c0_350, %c128_351] : memref<8x1152xbf16, #tpu.memory_space<vmem>>, vector<8x128xbf16>
    tpu.vector_store %arg12[%c0_350, %c128_351], %936 {strides = array<i32>} : memref<8x1152xbf16, #tpu.memory_space<vmem>>, vector<8x128xbf16>,
    %938 = arith.truncf %893 : vector<8x128xf32> to vector<8x128xbf16>
    %c0_352 = arith.constant 0 : index
    %c256_353 = arith.constant 256 : index
    %939 = vector.load %arg12[%c0_352, %c256_353] : memref<8x1152xbf16, #tpu.memory_space<vmem>>, vector<8x128xbf16>
    tpu.vector_store %arg12[%c0_352, %c256_353], %938 {strides = array<i32>} : memref<8x1152xbf16, #tpu.memory_space<vmem>>, vector<8x128xbf16>,
    %940 = arith.truncf %900 : vector<8x128xf32> to vector<8x128xbf16>
    %c0_354 = arith.constant 0 : index
    %c384_355 = arith.constant 384 : index
    %941 = vector.load %arg12[%c0_354, %c384_355] : memref<8x1152xbf16, #tpu.memory_space<vmem>>, vector<8x128xbf16>
    tpu.vector_store %arg12[%c0_354, %c384_355], %940 {strides = array<i32>} : memref<8x1152xbf16, #tpu.memory_space<vmem>>, vector<8x128xbf16>,
    %942 = arith.truncf %907 : vector<8x128xf32> to vector<8x128xbf16>
    %c0_356 = arith.constant 0 : index
    %c512_357 = arith.constant 512 : index
    %943 = vector.load %arg12[%c0_356, %c512_357] : memref<8x1152xbf16, #tpu.memory_space<vmem>>, vector<8x128xbf16>
    tpu.vector_store %arg12[%c0_356, %c512_357], %942 {strides = array<i32>} : memref<8x1152xbf16, #tpu.memory_space<vmem>>, vector<8x128xbf16>,
    %944 = arith.truncf %914 : vector<8x128xf32> to vector<8x128xbf16>
    %c0_358 = arith.constant 0 : index
    %c640_359 = arith.constant 640 : index
    %945 = vector.load %arg12[%c0_358, %c640_359] : memref<8x1152xbf16, #tpu.memory_space<vmem>>, vector<8x128xbf16>
    tpu.vector_store %arg12[%c0_358, %c640_359], %944 {strides = array<i32>} : memref<8x1152xbf16, #tpu.memory_space<vmem>>, vector<8x128xbf16>,
    %946 = arith.truncf %921 : vector<8x128xf32> to vector<8x128xbf16>
    %c0_360 = arith.constant 0 : index
    %c768_361 = arith.constant 768 : index
    %947 = vector.load %arg12[%c0_360, %c768_361] : memref<8x1152xbf16, #tpu.memory_space<vmem>>, vector<8x128xbf16>
    tpu.vector_store %arg12[%c0_360, %c768_361], %946 {strides = array<i32>} : memref<8x1152xbf16, #tpu.memory_space<vmem>>, vector<8x128xbf16>,
    %948 = arith.truncf %928 : vector<8x128xf32> to vector<8x128xbf16>
    %c0_362 = arith.constant 0 : index
    %c896_363 = arith.constant 896 : index
    %949 = vector.load %arg12[%c0_362, %c896_363] : memref<8x1152xbf16, #tpu.memory_space<vmem>>, vector<8x128xbf16>
    tpu.vector_store %arg12[%c0_362, %c896_363], %948 {strides = array<i32>} : memref<8x1152xbf16, #tpu.memory_space<vmem>>, vector<8x128xbf16>,
    %950 = arith.truncf %935 : vector<8x128xf32> to vector<8x128xbf16>
    %c0_364 = arith.constant 0 : index
    %c1024_365 = arith.constant 1024 : index
    %951 = vector.load %arg12[%c0_364, %c1024_365] : memref<8x1152xbf16, #tpu.memory_space<vmem>>, vector<8x128xbf16>
    tpu.vector_store %arg12[%c0_364, %c1024_365], %950 {strides = array<i32>} : memref<8x1152xbf16, #tpu.memory_space<vmem>>, vector<8x128xbf16>,
    %c0_366 = arith.constant 0 : index
    %c0_367 = arith.constant 0 : index
    %952 = vector.load %arg12[%c0_366, %c0_367] : memref<8x1152xbf16, #tpu.memory_space<vmem>>, vector<8x1152xbf16>
    %c0_368 = arith.constant 0 : index
    %c0_369 = arith.constant 0 : index
    %953 = vector.load %arg9[%c0_368, %c0_369] : memref<1152x2xbf16, #tpu.memory_space<vmem>>, vector<1152x2xbf16>
    %cst_370 = arith.constant dense<0.000000e+00> : vector<8x2xf32>
    %954 = tpu.matmul %952, %953, %cst_370 {dimension_numbers = #tpu.dot_dimension_numbers<[1], [0], [0], [1], [0, 0, 1, 1], [], []>} : vector<8x1152xbf16>, vector<1152x2xbf16>, vector<8x2xf32> -> vector<8x2xf32>
    %955 = vector.extract_strided_slice %954 {offsets = [0, 0], sizes = [8, 1], strides = [1, 1]} : vector<8x2xf32> to vector<8x1xf32>
    %c0_371 = arith.constant 0 : index
    %c0_372 = arith.constant 0 : index
    %956 = vector.load %arg10[%c0_371, %c0_372] : memref<8x1xf32, #tpu.memory_space<vmem>>, vector<8x1xf32>
    tpu.vector_store %arg10[%c0_371, %c0_372], %955 {strides = array<i32>} : memref<8x1xf32, #tpu.memory_space<vmem>>, vector<8x1xf32>,
    %c0_373 = arith.constant 0 : index
    %c0_374 = arith.constant 0 : index
    %957 = vector.load %arg13[%c0_373, %c0_374] : memref<8x128xf32, #tpu.memory_space<vmem>>, vector<8x128xf32>
    %958 = arith.negf %957 : vector<8x128xf32>
    %959 = math.exp %958 : vector<8x128xf32>
    %cst_375 = arith.constant 1.000000e+00 : f32
    %960 = vector.broadcast %cst_375 : f32 to vector<8x128xf32>
    %961 = arith.addf %960, %959 : vector<8x128xf32>
    %962 = arith.divf %960, %961 : vector<8x128xf32>
    %963 = arith.mulf %957, %962 : vector<8x128xf32>
    %964 = arith.truncf %963 : vector<8x128xf32> to vector<8x128xbf16>
    %c0_376 = arith.constant 0 : index
    %c0_377 = arith.constant 0 : index
    %965 = vector.load %arg12[%c0_376, %c0_377] : memref<8x1152xbf16, #tpu.memory_space<vmem>>, vector<8x128xbf16>
    tpu.vector_store %arg12[%c0_376, %c0_377], %964 {strides = array<i32>} : memref<8x1152xbf16, #tpu.memory_space<vmem>>, vector<8x128xbf16>,
    %cst_378 = arith.constant -2.200000e+00 : f32
    %966 = vector.broadcast %cst_378 : f32 to vector<8x128xf32>
    %967 = arith.cmpf oge, %957, %966 : vector<8x128xf32>
    %cst_379 = arith.constant 1.000000e+00 : f32
    %cst_380 = arith.constant 0.000000e+00 : f32
    %968 = vector.broadcast %cst_379 : f32 to vector<8x128xf32>
    %969 = vector.broadcast %cst_380 : f32 to vector<8x128xf32>
    %970 = arith.select %967, %968, %969 : vector<8x128xi1>, vector<8x128xf32>
    %cst_381 = arith.constant -1.800000e+00 : f32
    %971 = vector.broadcast %cst_381 : f32 to vector<8x128xf32>
    %972 = arith.cmpf oge, %957, %971 : vector<8x128xf32>
    %cst_382 = arith.constant 1.000000e+00 : f32
    %cst_383 = arith.constant 0.000000e+00 : f32
    %973 = vector.broadcast %cst_382 : f32 to vector<8x128xf32>
    %974 = vector.broadcast %cst_383 : f32 to vector<8x128xf32>
    %975 = arith.select %972, %973, %974 : vector<8x128xi1>, vector<8x128xf32>
    %cst_384 = arith.constant -1.400000e+00 : f32
    %976 = vector.broadcast %cst_384 : f32 to vector<8x128xf32>
    %977 = arith.cmpf oge, %957, %976 : vector<8x128xf32>
    %cst_385 = arith.constant 1.000000e+00 : f32
    %cst_386 = arith.constant 0.000000e+00 : f32
    %978 = vector.broadcast %cst_385 : f32 to vector<8x128xf32>
    %979 = vector.broadcast %cst_386 : f32 to vector<8x128xf32>
    %980 = arith.select %977, %978, %979 : vector<8x128xi1>, vector<8x128xf32>
    %cst_387 = arith.constant -1.000000e+00 : f32
    %981 = vector.broadcast %cst_387 : f32 to vector<8x128xf32>
    %982 = arith.cmpf oge, %957, %981 : vector<8x128xf32>
    %cst_388 = arith.constant 1.000000e+00 : f32
    %cst_389 = arith.constant 0.000000e+00 : f32
    %983 = vector.broadcast %cst_388 : f32 to vector<8x128xf32>
    %984 = vector.broadcast %cst_389 : f32 to vector<8x128xf32>
    %985 = arith.select %982, %983, %984 : vector<8x128xi1>, vector<8x128xf32>
    %cst_390 = arith.constant -6.000000e-01 : f32
    %986 = vector.broadcast %cst_390 : f32 to vector<8x128xf32>
    %987 = arith.cmpf oge, %957, %986 : vector<8x128xf32>
    %cst_391 = arith.constant 1.000000e+00 : f32
    %cst_392 = arith.constant 0.000000e+00 : f32
    %988 = vector.broadcast %cst_391 : f32 to vector<8x128xf32>
    %989 = vector.broadcast %cst_392 : f32 to vector<8x128xf32>
    %990 = arith.select %987, %988, %989 : vector<8x128xi1>, vector<8x128xf32>
    %cst_393 = arith.constant -2.000000e-01 : f32
    %991 = vector.broadcast %cst_393 : f32 to vector<8x128xf32>
    %992 = arith.cmpf oge, %957, %991 : vector<8x128xf32>
    %cst_394 = arith.constant 1.000000e+00 : f32
    %cst_395 = arith.constant 0.000000e+00 : f32
    %993 = vector.broadcast %cst_394 : f32 to vector<8x128xf32>
    %994 = vector.broadcast %cst_395 : f32 to vector<8x128xf32>
    %995 = arith.select %992, %993, %994 : vector<8x128xi1>, vector<8x128xf32>
    %cst_396 = arith.constant 2.000000e-01 : f32
    %996 = vector.broadcast %cst_396 : f32 to vector<8x128xf32>
    %997 = arith.cmpf oge, %957, %996 : vector<8x128xf32>
    %cst_397 = arith.constant 1.000000e+00 : f32
    %cst_398 = arith.constant 0.000000e+00 : f32
    %998 = vector.broadcast %cst_397 : f32 to vector<8x128xf32>
    %999 = vector.broadcast %cst_398 : f32 to vector<8x128xf32>
    %1000 = arith.select %997, %998, %999 : vector<8x128xi1>, vector<8x128xf32>
    %cst_399 = arith.constant 6.000000e-01 : f32
    %1001 = vector.broadcast %cst_399 : f32 to vector<8x128xf32>
    %1002 = arith.cmpf oge, %957, %1001 : vector<8x128xf32>
    %cst_400 = arith.constant 1.000000e+00 : f32
    %cst_401 = arith.constant 0.000000e+00 : f32
    %1003 = vector.broadcast %cst_400 : f32 to vector<8x128xf32>
    %1004 = vector.broadcast %cst_401 : f32 to vector<8x128xf32>
    %1005 = arith.select %1002, %1003, %1004 : vector<8x128xi1>, vector<8x128xf32>
    %cst_402 = arith.constant 1.000000e+00 : f32
    %1006 = vector.broadcast %cst_402 : f32 to vector<8x128xf32>
    %1007 = arith.cmpf oge, %957, %1006 : vector<8x128xf32>
    %cst_403 = arith.constant 1.000000e+00 : f32
    %cst_404 = arith.constant 0.000000e+00 : f32
    %1008 = vector.broadcast %cst_403 : f32 to vector<8x128xf32>
    %1009 = vector.broadcast %cst_404 : f32 to vector<8x128xf32>
    %1010 = arith.select %1007, %1008, %1009 : vector<8x128xi1>, vector<8x128xf32>
    %cst_405 = arith.constant 1.400000e+00 : f32
    %1011 = vector.broadcast %cst_405 : f32 to vector<8x128xf32>
    %1012 = arith.cmpf oge, %957, %1011 : vector<8x128xf32>
    %cst_406 = arith.constant 1.000000e+00 : f32
    %cst_407 = arith.constant 0.000000e+00 : f32
    %1013 = vector.broadcast %cst_406 : f32 to vector<8x128xf32>
    %1014 = vector.broadcast %cst_407 : f32 to vector<8x128xf32>
    %1015 = arith.select %1012, %1013, %1014 : vector<8x128xi1>, vector<8x128xf32>
    %cst_408 = arith.constant 1.800000e+00 : f32
    %1016 = vector.broadcast %cst_408 : f32 to vector<8x128xf32>
    %1017 = arith.cmpf oge, %957, %1016 : vector<8x128xf32>
    %cst_409 = arith.constant 1.000000e+00 : f32
    %cst_410 = arith.constant 0.000000e+00 : f32
    %1018 = vector.broadcast %cst_409 : f32 to vector<8x128xf32>
    %1019 = vector.broadcast %cst_410 : f32 to vector<8x128xf32>
    %1020 = arith.select %1017, %1018, %1019 : vector<8x128xi1>, vector<8x128xf32>
    %cst_411 = arith.constant 2.200000e+00 : f32
    %1021 = vector.broadcast %cst_411 : f32 to vector<8x128xf32>
    %1022 = arith.cmpf oge, %957, %1021 : vector<8x128xf32>
    %cst_412 = arith.constant 1.000000e+00 : f32
    %cst_413 = arith.constant 0.000000e+00 : f32
    %1023 = vector.broadcast %cst_412 : f32 to vector<8x128xf32>
    %1024 = vector.broadcast %cst_413 : f32 to vector<8x128xf32>
    %1025 = arith.select %1022, %1023, %1024 : vector<8x128xi1>, vector<8x128xf32>
    %1026 = arith.subf %970, %975 : vector<8x128xf32>
    %1027 = arith.subf %975, %980 : vector<8x128xf32>
    %1028 = arith.subf %980, %985 : vector<8x128xf32>
    %1029 = arith.subf %985, %990 : vector<8x128xf32>
    %1030 = arith.subf %990, %995 : vector<8x128xf32>
    %1031 = arith.subf %995, %1000 : vector<8x128xf32>
    %1032 = arith.subf %1000, %1005 : vector<8x128xf32>
    %1033 = arith.subf %1005, %1010 : vector<8x128xf32>
    %1034 = arith.subf %1010, %1015 : vector<8x128xf32>
    %1035 = arith.subf %1015, %1020 : vector<8x128xf32>
    %1036 = arith.subf %1020, %1025 : vector<8x128xf32>
    %cst_414 = arith.constant 2.500000e+00 : f32
    %1037 = vector.broadcast %cst_414 : f32 to vector<8x128xf32>
    %1038 = arith.mulf %957, %1037 : vector<8x128xf32>
    %cst_415 = arith.constant -5.500000e+00 : f32
    %1039 = vector.broadcast %cst_415 : f32 to vector<8x128xf32>
    %1040 = arith.subf %1038, %1039 : vector<8x128xf32>
    %1041 = arith.mulf %1040, %1026 : vector<8x128xf32>
    %cst_416 = arith.constant -3.500000e+00 : f32
    %1042 = vector.broadcast %cst_416 : f32 to vector<8x128xf32>
    %1043 = arith.subf %1042, %1038 : vector<8x128xf32>
    %1044 = arith.mulf %1043, %1027 : vector<8x128xf32>
    %1045 = arith.addf %1041, %1044 : vector<8x128xf32>
    %cst_417 = arith.constant -4.500000e+00 : f32
    %1046 = vector.broadcast %cst_417 : f32 to vector<8x128xf32>
    %1047 = arith.subf %1038, %1046 : vector<8x128xf32>
    %1048 = arith.mulf %1047, %1027 : vector<8x128xf32>
    %cst_418 = arith.constant -2.500000e+00 : f32
    %1049 = vector.broadcast %cst_418 : f32 to vector<8x128xf32>
    %1050 = arith.subf %1049, %1038 : vector<8x128xf32>
    %1051 = arith.mulf %1050, %1028 : vector<8x128xf32>
    %1052 = arith.addf %1048, %1051 : vector<8x128xf32>
    %cst_419 = arith.constant -3.500000e+00 : f32
    %1053 = vector.broadcast %cst_419 : f32 to vector<8x128xf32>
    %1054 = arith.subf %1038, %1053 : vector<8x128xf32>
    %1055 = arith.mulf %1054, %1028 : vector<8x128xf32>
    %cst_420 = arith.constant -1.500000e+00 : f32
    %1056 = vector.broadcast %cst_420 : f32 to vector<8x128xf32>
    %1057 = arith.subf %1056, %1038 : vector<8x128xf32>
    %1058 = arith.mulf %1057, %1029 : vector<8x128xf32>
    %1059 = arith.addf %1055, %1058 : vector<8x128xf32>
    %cst_421 = arith.constant -2.500000e+00 : f32
    %1060 = vector.broadcast %cst_421 : f32 to vector<8x128xf32>
    %1061 = arith.subf %1038, %1060 : vector<8x128xf32>
    %1062 = arith.mulf %1061, %1029 : vector<8x128xf32>
    %cst_422 = arith.constant -5.000000e-01 : f32
    %1063 = vector.broadcast %cst_422 : f32 to vector<8x128xf32>
    %1064 = arith.subf %1063, %1038 : vector<8x128xf32>
    %1065 = arith.mulf %1064, %1030 : vector<8x128xf32>
    %1066 = arith.addf %1062, %1065 : vector<8x128xf32>
    %cst_423 = arith.constant -1.500000e+00 : f32
    %1067 = vector.broadcast %cst_423 : f32 to vector<8x128xf32>
    %1068 = arith.subf %1038, %1067 : vector<8x128xf32>
    %1069 = arith.mulf %1068, %1030 : vector<8x128xf32>
    %cst_424 = arith.constant 5.000000e-01 : f32
    %1070 = vector.broadcast %cst_424 : f32 to vector<8x128xf32>
    %1071 = arith.subf %1070, %1038 : vector<8x128xf32>
    %1072 = arith.mulf %1071, %1031 : vector<8x128xf32>
    %1073 = arith.addf %1069, %1072 : vector<8x128xf32>
    %cst_425 = arith.constant -5.000000e-01 : f32
    %1074 = vector.broadcast %cst_425 : f32 to vector<8x128xf32>
    %1075 = arith.subf %1038, %1074 : vector<8x128xf32>
    %1076 = arith.mulf %1075, %1031 : vector<8x128xf32>
    %cst_426 = arith.constant 1.500000e+00 : f32
    %1077 = vector.broadcast %cst_426 : f32 to vector<8x128xf32>
    %1078 = arith.subf %1077, %1038 : vector<8x128xf32>
    %1079 = arith.mulf %1078, %1032 : vector<8x128xf32>
    %1080 = arith.addf %1076, %1079 : vector<8x128xf32>
    %cst_427 = arith.constant 5.000000e-01 : f32
    %1081 = vector.broadcast %cst_427 : f32 to vector<8x128xf32>
    %1082 = arith.subf %1038, %1081 : vector<8x128xf32>
    %1083 = arith.mulf %1082, %1032 : vector<8x128xf32>
    %cst_428 = arith.constant 2.500000e+00 : f32
    %1084 = vector.broadcast %cst_428 : f32 to vector<8x128xf32>
    %1085 = arith.subf %1084, %1038 : vector<8x128xf32>
    %1086 = arith.mulf %1085, %1033 : vector<8x128xf32>
    %1087 = arith.addf %1083, %1086 : vector<8x128xf32>
    %cst_429 = arith.constant 1.500000e+00 : f32
    %1088 = vector.broadcast %cst_429 : f32 to vector<8x128xf32>
    %1089 = arith.subf %1038, %1088 : vector<8x128xf32>
    %1090 = arith.mulf %1089, %1033 : vector<8x128xf32>
    %cst_430 = arith.constant 3.500000e+00 : f32
    %1091 = vector.broadcast %cst_430 : f32 to vector<8x128xf32>
    %1092 = arith.subf %1091, %1038 : vector<8x128xf32>
    %1093 = arith.mulf %1092, %1034 : vector<8x128xf32>
    %1094 = arith.addf %1090, %1093 : vector<8x128xf32>
    %cst_431 = arith.constant 2.500000e+00 : f32
    %1095 = vector.broadcast %cst_431 : f32 to vector<8x128xf32>
    %1096 = arith.subf %1038, %1095 : vector<8x128xf32>
    %1097 = arith.mulf %1096, %1034 : vector<8x128xf32>
    %cst_432 = arith.constant 4.500000e+00 : f32
    %1098 = vector.broadcast %cst_432 : f32 to vector<8x128xf32>
    %1099 = arith.subf %1098, %1038 : vector<8x128xf32>
    %1100 = arith.mulf %1099, %1035 : vector<8x128xf32>
    %1101 = arith.addf %1097, %1100 : vector<8x128xf32>
    %cst_433 = arith.constant 3.500000e+00 : f32
    %1102 = vector.broadcast %cst_433 : f32 to vector<8x128xf32>
    %1103 = arith.subf %1038, %1102 : vector<8x128xf32>
    %1104 = arith.mulf %1103, %1035 : vector<8x128xf32>
    %cst_434 = arith.constant 5.500000e+00 : f32
    %1105 = vector.broadcast %cst_434 : f32 to vector<8x128xf32>
    %1106 = arith.subf %1105, %1038 : vector<8x128xf32>
    %1107 = arith.mulf %1106, %1036 : vector<8x128xf32>
    %1108 = arith.addf %1104, %1107 : vector<8x128xf32>
    %cst_435 = arith.constant 1.250000e+00 : f32
    %1109 = vector.broadcast %cst_435 : f32 to vector<8x128xf32>
    %1110 = arith.mulf %957, %1109 : vector<8x128xf32>
    %cst_436 = arith.constant -2.750000e+00 : f32
    %1111 = vector.broadcast %cst_436 : f32 to vector<8x128xf32>
    %1112 = arith.subf %1110, %1111 : vector<8x128xf32>
    %1113 = arith.mulf %1112, %1045 : vector<8x128xf32>
    %cst_437 = arith.constant -1.250000e+00 : f32
    %1114 = vector.broadcast %cst_437 : f32 to vector<8x128xf32>
    %1115 = arith.subf %1114, %1110 : vector<8x128xf32>
    %1116 = arith.mulf %1115, %1052 : vector<8x128xf32>
    %1117 = arith.addf %1113, %1116 : vector<8x128xf32>
    %cst_438 = arith.constant -2.250000e+00 : f32
    %1118 = vector.broadcast %cst_438 : f32 to vector<8x128xf32>
    %1119 = arith.subf %1110, %1118 : vector<8x128xf32>
    %1120 = arith.mulf %1119, %1052 : vector<8x128xf32>
    %cst_439 = arith.constant -7.500000e-01 : f32
    %1121 = vector.broadcast %cst_439 : f32 to vector<8x128xf32>
    %1122 = arith.subf %1121, %1110 : vector<8x128xf32>
    %1123 = arith.mulf %1122, %1059 : vector<8x128xf32>
    %1124 = arith.addf %1120, %1123 : vector<8x128xf32>
    %cst_440 = arith.constant -1.750000e+00 : f32
    %1125 = vector.broadcast %cst_440 : f32 to vector<8x128xf32>
    %1126 = arith.subf %1110, %1125 : vector<8x128xf32>
    %1127 = arith.mulf %1126, %1059 : vector<8x128xf32>
    %cst_441 = arith.constant -2.500000e-01 : f32
    %1128 = vector.broadcast %cst_441 : f32 to vector<8x128xf32>
    %1129 = arith.subf %1128, %1110 : vector<8x128xf32>
    %1130 = arith.mulf %1129, %1066 : vector<8x128xf32>
    %1131 = arith.addf %1127, %1130 : vector<8x128xf32>
    %cst_442 = arith.constant -1.250000e+00 : f32
    %1132 = vector.broadcast %cst_442 : f32 to vector<8x128xf32>
    %1133 = arith.subf %1110, %1132 : vector<8x128xf32>
    %1134 = arith.mulf %1133, %1066 : vector<8x128xf32>
    %cst_443 = arith.constant 2.500000e-01 : f32
    %1135 = vector.broadcast %cst_443 : f32 to vector<8x128xf32>
    %1136 = arith.subf %1135, %1110 : vector<8x128xf32>
    %1137 = arith.mulf %1136, %1073 : vector<8x128xf32>
    %1138 = arith.addf %1134, %1137 : vector<8x128xf32>
    %cst_444 = arith.constant -7.500000e-01 : f32
    %1139 = vector.broadcast %cst_444 : f32 to vector<8x128xf32>
    %1140 = arith.subf %1110, %1139 : vector<8x128xf32>
    %1141 = arith.mulf %1140, %1073 : vector<8x128xf32>
    %cst_445 = arith.constant 7.500000e-01 : f32
    %1142 = vector.broadcast %cst_445 : f32 to vector<8x128xf32>
    %1143 = arith.subf %1142, %1110 : vector<8x128xf32>
    %1144 = arith.mulf %1143, %1080 : vector<8x128xf32>
    %1145 = arith.addf %1141, %1144 : vector<8x128xf32>
    %cst_446 = arith.constant -2.500000e-01 : f32
    %1146 = vector.broadcast %cst_446 : f32 to vector<8x128xf32>
    %1147 = arith.subf %1110, %1146 : vector<8x128xf32>
    %1148 = arith.mulf %1147, %1080 : vector<8x128xf32>
    %cst_447 = arith.constant 1.250000e+00 : f32
    %1149 = vector.broadcast %cst_447 : f32 to vector<8x128xf32>
    %1150 = arith.subf %1149, %1110 : vector<8x128xf32>
    %1151 = arith.mulf %1150, %1087 : vector<8x128xf32>
    %1152 = arith.addf %1148, %1151 : vector<8x128xf32>
    %cst_448 = arith.constant 2.500000e-01 : f32
    %1153 = vector.broadcast %cst_448 : f32 to vector<8x128xf32>
    %1154 = arith.subf %1110, %1153 : vector<8x128xf32>
    %1155 = arith.mulf %1154, %1087 : vector<8x128xf32>
    %cst_449 = arith.constant 1.750000e+00 : f32
    %1156 = vector.broadcast %cst_449 : f32 to vector<8x128xf32>
    %1157 = arith.subf %1156, %1110 : vector<8x128xf32>
    %1158 = arith.mulf %1157, %1094 : vector<8x128xf32>
    %1159 = arith.addf %1155, %1158 : vector<8x128xf32>
    %cst_450 = arith.constant 7.500000e-01 : f32
    %1160 = vector.broadcast %cst_450 : f32 to vector<8x128xf32>
    %1161 = arith.subf %1110, %1160 : vector<8x128xf32>
    %1162 = arith.mulf %1161, %1094 : vector<8x128xf32>
    %cst_451 = arith.constant 2.250000e+00 : f32
    %1163 = vector.broadcast %cst_451 : f32 to vector<8x128xf32>
    %1164 = arith.subf %1163, %1110 : vector<8x128xf32>
    %1165 = arith.mulf %1164, %1101 : vector<8x128xf32>
    %1166 = arith.addf %1162, %1165 : vector<8x128xf32>
    %cst_452 = arith.constant 1.250000e+00 : f32
    %1167 = vector.broadcast %cst_452 : f32 to vector<8x128xf32>
    %1168 = arith.subf %1110, %1167 : vector<8x128xf32>
    %1169 = arith.mulf %1168, %1101 : vector<8x128xf32>
    %cst_453 = arith.constant 2.750000e+00 : f32
    %1170 = vector.broadcast %cst_453 : f32 to vector<8x128xf32>
    %1171 = arith.subf %1170, %1110 : vector<8x128xf32>
    %1172 = arith.mulf %1171, %1108 : vector<8x128xf32>
    %1173 = arith.addf %1169, %1172 : vector<8x128xf32>
    %cst_454 = arith.constant 0.833333313 : f32
    %1174 = vector.broadcast %cst_454 : f32 to vector<8x128xf32>
    %1175 = arith.mulf %957, %1174 : vector<8x128xf32>
    %cst_455 = arith.constant -1.83333337 : f32
    %1176 = vector.broadcast %cst_455 : f32 to vector<8x128xf32>
    %1177 = arith.subf %1175, %1176 : vector<8x128xf32>
    %1178 = arith.mulf %1177, %1117 : vector<8x128xf32>
    %cst_456 = arith.constant -5.000000e-01 : f32
    %1179 = vector.broadcast %cst_456 : f32 to vector<8x128xf32>
    %1180 = arith.subf %1179, %1175 : vector<8x128xf32>
    %1181 = arith.mulf %1180, %1124 : vector<8x128xf32>
    %1182 = arith.addf %1178, %1181 : vector<8x128xf32>
    %cst_457 = arith.constant -1.500000e+00 : f32
    %1183 = vector.broadcast %cst_457 : f32 to vector<8x128xf32>
    %1184 = arith.subf %1175, %1183 : vector<8x128xf32>
    %1185 = arith.mulf %1184, %1124 : vector<8x128xf32>
    %cst_458 = arith.constant -0.166666672 : f32
    %1186 = vector.broadcast %cst_458 : f32 to vector<8x128xf32>
    %1187 = arith.subf %1186, %1175 : vector<8x128xf32>
    %1188 = arith.mulf %1187, %1131 : vector<8x128xf32>
    %1189 = arith.addf %1185, %1188 : vector<8x128xf32>
    %cst_459 = arith.constant -1.16666663 : f32
    %1190 = vector.broadcast %cst_459 : f32 to vector<8x128xf32>
    %1191 = arith.subf %1175, %1190 : vector<8x128xf32>
    %1192 = arith.mulf %1191, %1131 : vector<8x128xf32>
    %cst_460 = arith.constant 0.166666672 : f32
    %1193 = vector.broadcast %cst_460 : f32 to vector<8x128xf32>
    %1194 = arith.subf %1193, %1175 : vector<8x128xf32>
    %1195 = arith.mulf %1194, %1138 : vector<8x128xf32>
    %1196 = arith.addf %1192, %1195 : vector<8x128xf32>
    %cst_461 = arith.constant -0.833333313 : f32
    %1197 = vector.broadcast %cst_461 : f32 to vector<8x128xf32>
    %1198 = arith.subf %1175, %1197 : vector<8x128xf32>
    %1199 = arith.mulf %1198, %1138 : vector<8x128xf32>
    %cst_462 = arith.constant 5.000000e-01 : f32
    %1200 = vector.broadcast %cst_462 : f32 to vector<8x128xf32>
    %1201 = arith.subf %1200, %1175 : vector<8x128xf32>
    %1202 = arith.mulf %1201, %1145 : vector<8x128xf32>
    %1203 = arith.addf %1199, %1202 : vector<8x128xf32>
    %cst_463 = arith.constant -5.000000e-01 : f32
    %1204 = vector.broadcast %cst_463 : f32 to vector<8x128xf32>
    %1205 = arith.subf %1175, %1204 : vector<8x128xf32>
    %1206 = arith.mulf %1205, %1145 : vector<8x128xf32>
    %cst_464 = arith.constant 0.833333313 : f32
    %1207 = vector.broadcast %cst_464 : f32 to vector<8x128xf32>
    %1208 = arith.subf %1207, %1175 : vector<8x128xf32>
    %1209 = arith.mulf %1208, %1152 : vector<8x128xf32>
    %1210 = arith.addf %1206, %1209 : vector<8x128xf32>
    %cst_465 = arith.constant -0.166666672 : f32
    %1211 = vector.broadcast %cst_465 : f32 to vector<8x128xf32>
    %1212 = arith.subf %1175, %1211 : vector<8x128xf32>
    %1213 = arith.mulf %1212, %1152 : vector<8x128xf32>
    %cst_466 = arith.constant 1.16666663 : f32
    %1214 = vector.broadcast %cst_466 : f32 to vector<8x128xf32>
    %1215 = arith.subf %1214, %1175 : vector<8x128xf32>
    %1216 = arith.mulf %1215, %1159 : vector<8x128xf32>
    %1217 = arith.addf %1213, %1216 : vector<8x128xf32>
    %cst_467 = arith.constant 0.166666672 : f32
    %1218 = vector.broadcast %cst_467 : f32 to vector<8x128xf32>
    %1219 = arith.subf %1175, %1218 : vector<8x128xf32>
    %1220 = arith.mulf %1219, %1159 : vector<8x128xf32>
    %cst_468 = arith.constant 1.500000e+00 : f32
    %1221 = vector.broadcast %cst_468 : f32 to vector<8x128xf32>
    %1222 = arith.subf %1221, %1175 : vector<8x128xf32>
    %1223 = arith.mulf %1222, %1166 : vector<8x128xf32>
    %1224 = arith.addf %1220, %1223 : vector<8x128xf32>
    %cst_469 = arith.constant 5.000000e-01 : f32
    %1225 = vector.broadcast %cst_469 : f32 to vector<8x128xf32>
    %1226 = arith.subf %1175, %1225 : vector<8x128xf32>
    %1227 = arith.mulf %1226, %1166 : vector<8x128xf32>
    %cst_470 = arith.constant 1.83333337 : f32
    %1228 = vector.broadcast %cst_470 : f32 to vector<8x128xf32>
    %1229 = arith.subf %1228, %1175 : vector<8x128xf32>
    %1230 = arith.mulf %1229, %1173 : vector<8x128xf32>
    %1231 = arith.addf %1227, %1230 : vector<8x128xf32>
    %1232 = arith.truncf %1182 : vector<8x128xf32> to vector<8x128xbf16>
    %c0_471 = arith.constant 0 : index
    %c128_472 = arith.constant 128 : index
    %1233 = vector.load %arg12[%c0_471, %c128_472] : memref<8x1152xbf16, #tpu.memory_space<vmem>>, vector<8x128xbf16>
    tpu.vector_store %arg12[%c0_471, %c128_472], %1232 {strides = array<i32>} : memref<8x1152xbf16, #tpu.memory_space<vmem>>, vector<8x128xbf16>,
    %1234 = arith.truncf %1189 : vector<8x128xf32> to vector<8x128xbf16>
    %c0_473 = arith.constant 0 : index
    %c256_474 = arith.constant 256 : index
    %1235 = vector.load %arg12[%c0_473, %c256_474] : memref<8x1152xbf16, #tpu.memory_space<vmem>>, vector<8x128xbf16>
    tpu.vector_store %arg12[%c0_473, %c256_474], %1234 {strides = array<i32>} : memref<8x1152xbf16, #tpu.memory_space<vmem>>, vector<8x128xbf16>,
    %1236 = arith.truncf %1196 : vector<8x128xf32> to vector<8x128xbf16>
    %c0_475 = arith.constant 0 : index
    %c384_476 = arith.constant 384 : index
    %1237 = vector.load %arg12[%c0_475, %c384_476] : memref<8x1152xbf16, #tpu.memory_space<vmem>>, vector<8x128xbf16>
    tpu.vector_store %arg12[%c0_475, %c384_476], %1236 {strides = array<i32>} : memref<8x1152xbf16, #tpu.memory_space<vmem>>, vector<8x128xbf16>,
    %1238 = arith.truncf %1203 : vector<8x128xf32> to vector<8x128xbf16>
    %c0_477 = arith.constant 0 : index
    %c512_478 = arith.constant 512 : index
    %1239 = vector.load %arg12[%c0_477, %c512_478] : memref<8x1152xbf16, #tpu.memory_space<vmem>>, vector<8x128xbf16>
    tpu.vector_store %arg12[%c0_477, %c512_478], %1238 {strides = array<i32>} : memref<8x1152xbf16, #tpu.memory_space<vmem>>, vector<8x128xbf16>,
    %1240 = arith.truncf %1210 : vector<8x128xf32> to vector<8x128xbf16>
    %c0_479 = arith.constant 0 : index
    %c640_480 = arith.constant 640 : index
    %1241 = vector.load %arg12[%c0_479, %c640_480] : memref<8x1152xbf16, #tpu.memory_space<vmem>>, vector<8x128xbf16>
    tpu.vector_store %arg12[%c0_479, %c640_480], %1240 {strides = array<i32>} : memref<8x1152xbf16, #tpu.memory_space<vmem>>, vector<8x128xbf16>,
    %1242 = arith.truncf %1217 : vector<8x128xf32> to vector<8x128xbf16>
    %c0_481 = arith.constant 0 : index
    %c768_482 = arith.constant 768 : index
    %1243 = vector.load %arg12[%c0_481, %c768_482] : memref<8x1152xbf16, #tpu.memory_space<vmem>>, vector<8x128xbf16>
    tpu.vector_store %arg12[%c0_481, %c768_482], %1242 {strides = array<i32>} : memref<8x1152xbf16, #tpu.memory_space<vmem>>, vector<8x128xbf16>,
    %1244 = arith.truncf %1224 : vector<8x128xf32> to vector<8x128xbf16>
    %c0_483 = arith.constant 0 : index
    %c896_484 = arith.constant 896 : index
    %1245 = vector.load %arg12[%c0_483, %c896_484] : memref<8x1152xbf16, #tpu.memory_space<vmem>>, vector<8x128xbf16>
    tpu.vector_store %arg12[%c0_483, %c896_484], %1244 {strides = array<i32>} : memref<8x1152xbf16, #tpu.memory_space<vmem>>, vector<8x128xbf16>,
    %1246 = arith.truncf %1231 : vector<8x128xf32> to vector<8x128xbf16>
    %c0_485 = arith.constant 0 : index
    %c1024_486 = arith.constant 1024 : index
    %1247 = vector.load %arg12[%c0_485, %c1024_486] : memref<8x1152xbf16, #tpu.memory_space<vmem>>, vector<8x128xbf16>
    tpu.vector_store %arg12[%c0_485, %c1024_486], %1246 {strides = array<i32>} : memref<8x1152xbf16, #tpu.memory_space<vmem>>, vector<8x128xbf16>,
    %c0_487 = arith.constant 0 : index
    %c0_488 = arith.constant 0 : index
    %1248 = vector.load %arg12[%c0_487, %c0_488] : memref<8x1152xbf16, #tpu.memory_space<vmem>>, vector<8x1152xbf16>
    %c0_489 = arith.constant 0 : index
    %c0_490 = arith.constant 0 : index
    %1249 = vector.load %arg6[%c0_489, %c0_490] : memref<1152x128xbf16, #tpu.memory_space<vmem>>, vector<1152x128xbf16>
    %cst_491 = arith.constant dense<0.000000e+00> : vector<8x128xf32>
    %1250 = tpu.matmul %1248, %1249, %cst_491 {dimension_numbers = #tpu.dot_dimension_numbers<[1], [0], [0], [1], [0, 0, 1, 1], [], []>} : vector<8x1152xbf16>, vector<1152x128xbf16>, vector<8x128xf32> -> vector<8x128xf32>
    %c1_492 = arith.constant 1 : index
    %c0_493 = arith.constant 0 : index
    %1251 = vector.load %arg7[%c1_492, %c0_493] : memref<2x128xf32, #tpu.memory_space<vmem>>, vector<1x128xf32>
    %c1_494 = arith.constant 1 : index
    %c0_495 = arith.constant 0 : index
    %1252 = vector.load %arg8[%c1_494, %c0_495] : memref<2x128xf32, #tpu.memory_space<vmem>>, vector<1x128xf32>
    %cst_496 = arith.constant dense<0.000000e+00> : vector<8xf32>
    %1253 = vector.multi_reduction <add>, %1250, %cst_496 [1] : vector<8x128xf32> to vector<8xf32>
    %1254 = vector.shape_cast %1253 : vector<8xf32> to vector<8x1xf32>
    %1255 = arith.mulf %1250, %1250 : vector<8x128xf32>
    %cst_497 = arith.constant dense<0.000000e+00> : vector<8xf32>
    %1256 = vector.multi_reduction <add>, %1255, %cst_497 [1] : vector<8x128xf32> to vector<8xf32>
    %1257 = vector.shape_cast %1256 : vector<8xf32> to vector<8x1xf32>
    %cst_498 = arith.constant 3.125000e-02 : f32
    %1258 = vector.broadcast %cst_498 : f32 to vector<8x1xf32>
    %1259 = arith.mulf %1254, %1258 : vector<8x1xf32>
    %cst_499 = arith.constant 3.125000e-02 : f32
    %1260 = vector.broadcast %cst_499 : f32 to vector<8x1xf32>
    %1261 = arith.mulf %1257, %1260 : vector<8x1xf32>
    %1262 = arith.mulf %1259, %1259 : vector<8x1xf32>
    %1263 = arith.subf %1261, %1262 : vector<8x1xf32>
    %1264 = vector.broadcast %1259 : vector<8x1xf32> to vector<8x128xf32>
    %1265 = arith.subf %1250, %1264 : vector<8x128xf32>
    %cst_500 = arith.constant 9.99999974E-6 : f32
    %1266 = vector.broadcast %cst_500 : f32 to vector<8x1xf32>
    %1267 = arith.addf %1263, %1266 : vector<8x1xf32>
    %1268 = math.rsqrt %1267 : vector<8x1xf32>
    %1269 = vector.broadcast %1268 : vector<8x1xf32> to vector<8x128xf32>
    %1270 = arith.mulf %1265, %1269 : vector<8x128xf32>
    %1271 = vector.broadcast %1251 : vector<1x128xf32> to vector<8x128xf32>
    %1272 = arith.mulf %1270, %1271 : vector<8x128xf32>
    %1273 = vector.broadcast %1252 : vector<1x128xf32> to vector<8x128xf32>
    %1274 = arith.addf %1272, %1273 : vector<8x128xf32>
    %1275 = arith.negf %1274 : vector<8x128xf32>
    %1276 = math.exp %1275 : vector<8x128xf32>
    %cst_501 = arith.constant 1.000000e+00 : f32
    %1277 = vector.broadcast %cst_501 : f32 to vector<8x128xf32>
    %1278 = arith.addf %1277, %1276 : vector<8x128xf32>
    %1279 = arith.divf %1277, %1278 : vector<8x128xf32>
    %1280 = arith.mulf %1274, %1279 : vector<8x128xf32>
    %1281 = arith.truncf %1280 : vector<8x128xf32> to vector<8x128xbf16>
    %c0_502 = arith.constant 0 : index
    %c0_503 = arith.constant 0 : index
    %1282 = vector.load %arg12[%c0_502, %c0_503] : memref<8x1152xbf16, #tpu.memory_space<vmem>>, vector<8x128xbf16>
    tpu.vector_store %arg12[%c0_502, %c0_503], %1281 {strides = array<i32>} : memref<8x1152xbf16, #tpu.memory_space<vmem>>, vector<8x128xbf16>,
    %cst_504 = arith.constant -2.200000e+00 : f32
    %1283 = vector.broadcast %cst_504 : f32 to vector<8x128xf32>
    %1284 = arith.cmpf oge, %1274, %1283 : vector<8x128xf32>
    %cst_505 = arith.constant 1.000000e+00 : f32
    %cst_506 = arith.constant 0.000000e+00 : f32
    %1285 = vector.broadcast %cst_505 : f32 to vector<8x128xf32>
    %1286 = vector.broadcast %cst_506 : f32 to vector<8x128xf32>
    %1287 = arith.select %1284, %1285, %1286 : vector<8x128xi1>, vector<8x128xf32>
    %cst_507 = arith.constant -1.800000e+00 : f32
    %1288 = vector.broadcast %cst_507 : f32 to vector<8x128xf32>
    %1289 = arith.cmpf oge, %1274, %1288 : vector<8x128xf32>
    %cst_508 = arith.constant 1.000000e+00 : f32
    %cst_509 = arith.constant 0.000000e+00 : f32
    %1290 = vector.broadcast %cst_508 : f32 to vector<8x128xf32>
    %1291 = vector.broadcast %cst_509 : f32 to vector<8x128xf32>
    %1292 = arith.select %1289, %1290, %1291 : vector<8x128xi1>, vector<8x128xf32>
    %cst_510 = arith.constant -1.400000e+00 : f32
    %1293 = vector.broadcast %cst_510 : f32 to vector<8x128xf32>
    %1294 = arith.cmpf oge, %1274, %1293 : vector<8x128xf32>
    %cst_511 = arith.constant 1.000000e+00 : f32
    %cst_512 = arith.constant 0.000000e+00 : f32
    %1295 = vector.broadcast %cst_511 : f32 to vector<8x128xf32>
    %1296 = vector.broadcast %cst_512 : f32 to vector<8x128xf32>
    %1297 = arith.select %1294, %1295, %1296 : vector<8x128xi1>, vector<8x128xf32>
    %cst_513 = arith.constant -1.000000e+00 : f32
    %1298 = vector.broadcast %cst_513 : f32 to vector<8x128xf32>
    %1299 = arith.cmpf oge, %1274, %1298 : vector<8x128xf32>
    %cst_514 = arith.constant 1.000000e+00 : f32
    %cst_515 = arith.constant 0.000000e+00 : f32
    %1300 = vector.broadcast %cst_514 : f32 to vector<8x128xf32>
    %1301 = vector.broadcast %cst_515 : f32 to vector<8x128xf32>
    %1302 = arith.select %1299, %1300, %1301 : vector<8x128xi1>, vector<8x128xf32>
    %cst_516 = arith.constant -6.000000e-01 : f32
    %1303 = vector.broadcast %cst_516 : f32 to vector<8x128xf32>
    %1304 = arith.cmpf oge, %1274, %1303 : vector<8x128xf32>
    %cst_517 = arith.constant 1.000000e+00 : f32
    %cst_518 = arith.constant 0.000000e+00 : f32
    %1305 = vector.broadcast %cst_517 : f32 to vector<8x128xf32>
    %1306 = vector.broadcast %cst_518 : f32 to vector<8x128xf32>
    %1307 = arith.select %1304, %1305, %1306 : vector<8x128xi1>, vector<8x128xf32>
    %cst_519 = arith.constant -2.000000e-01 : f32
    %1308 = vector.broadcast %cst_519 : f32 to vector<8x128xf32>
    %1309 = arith.cmpf oge, %1274, %1308 : vector<8x128xf32>
    %cst_520 = arith.constant 1.000000e+00 : f32
    %cst_521 = arith.constant 0.000000e+00 : f32
    %1310 = vector.broadcast %cst_520 : f32 to vector<8x128xf32>
    %1311 = vector.broadcast %cst_521 : f32 to vector<8x128xf32>
    %1312 = arith.select %1309, %1310, %1311 : vector<8x128xi1>, vector<8x128xf32>
    %cst_522 = arith.constant 2.000000e-01 : f32
    %1313 = vector.broadcast %cst_522 : f32 to vector<8x128xf32>
    %1314 = arith.cmpf oge, %1274, %1313 : vector<8x128xf32>
    %cst_523 = arith.constant 1.000000e+00 : f32
    %cst_524 = arith.constant 0.000000e+00 : f32
    %1315 = vector.broadcast %cst_523 : f32 to vector<8x128xf32>
    %1316 = vector.broadcast %cst_524 : f32 to vector<8x128xf32>
    %1317 = arith.select %1314, %1315, %1316 : vector<8x128xi1>, vector<8x128xf32>
    %cst_525 = arith.constant 6.000000e-01 : f32
    %1318 = vector.broadcast %cst_525 : f32 to vector<8x128xf32>
    %1319 = arith.cmpf oge, %1274, %1318 : vector<8x128xf32>
    %cst_526 = arith.constant 1.000000e+00 : f32
    %cst_527 = arith.constant 0.000000e+00 : f32
    %1320 = vector.broadcast %cst_526 : f32 to vector<8x128xf32>
    %1321 = vector.broadcast %cst_527 : f32 to vector<8x128xf32>
    %1322 = arith.select %1319, %1320, %1321 : vector<8x128xi1>, vector<8x128xf32>
    %cst_528 = arith.constant 1.000000e+00 : f32
    %1323 = vector.broadcast %cst_528 : f32 to vector<8x128xf32>
    %1324 = arith.cmpf oge, %1274, %1323 : vector<8x128xf32>
    %cst_529 = arith.constant 1.000000e+00 : f32
    %cst_530 = arith.constant 0.000000e+00 : f32
    %1325 = vector.broadcast %cst_529 : f32 to vector<8x128xf32>
    %1326 = vector.broadcast %cst_530 : f32 to vector<8x128xf32>
    %1327 = arith.select %1324, %1325, %1326 : vector<8x128xi1>, vector<8x128xf32>
    %cst_531 = arith.constant 1.400000e+00 : f32
    %1328 = vector.broadcast %cst_531 : f32 to vector<8x128xf32>
    %1329 = arith.cmpf oge, %1274, %1328 : vector<8x128xf32>
    %cst_532 = arith.constant 1.000000e+00 : f32
    %cst_533 = arith.constant 0.000000e+00 : f32
    %1330 = vector.broadcast %cst_532 : f32 to vector<8x128xf32>
    %1331 = vector.broadcast %cst_533 : f32 to vector<8x128xf32>
    %1332 = arith.select %1329, %1330, %1331 : vector<8x128xi1>, vector<8x128xf32>
    %cst_534 = arith.constant 1.800000e+00 : f32
    %1333 = vector.broadcast %cst_534 : f32 to vector<8x128xf32>
    %1334 = arith.cmpf oge, %1274, %1333 : vector<8x128xf32>
    %cst_535 = arith.constant 1.000000e+00 : f32
    %cst_536 = arith.constant 0.000000e+00 : f32
    %1335 = vector.broadcast %cst_535 : f32 to vector<8x128xf32>
    %1336 = vector.broadcast %cst_536 : f32 to vector<8x128xf32>
    %1337 = arith.select %1334, %1335, %1336 : vector<8x128xi1>, vector<8x128xf32>
    %cst_537 = arith.constant 2.200000e+00 : f32
    %1338 = vector.broadcast %cst_537 : f32 to vector<8x128xf32>
    %1339 = arith.cmpf oge, %1274, %1338 : vector<8x128xf32>
    %cst_538 = arith.constant 1.000000e+00 : f32
    %cst_539 = arith.constant 0.000000e+00 : f32
    %1340 = vector.broadcast %cst_538 : f32 to vector<8x128xf32>
    %1341 = vector.broadcast %cst_539 : f32 to vector<8x128xf32>
    %1342 = arith.select %1339, %1340, %1341 : vector<8x128xi1>, vector<8x128xf32>
    %1343 = arith.subf %1287, %1292 : vector<8x128xf32>
    %1344 = arith.subf %1292, %1297 : vector<8x128xf32>
    %1345 = arith.subf %1297, %1302 : vector<8x128xf32>
    %1346 = arith.subf %1302, %1307 : vector<8x128xf32>
    %1347 = arith.subf %1307, %1312 : vector<8x128xf32>
    %1348 = arith.subf %1312, %1317 : vector<8x128xf32>
    %1349 = arith.subf %1317, %1322 : vector<8x128xf32>
    %1350 = arith.subf %1322, %1327 : vector<8x128xf32>
    %1351 = arith.subf %1327, %1332 : vector<8x128xf32>
    %1352 = arith.subf %1332, %1337 : vector<8x128xf32>
    %1353 = arith.subf %1337, %1342 : vector<8x128xf32>
    %cst_540 = arith.constant 2.500000e+00 : f32
    %1354 = vector.broadcast %cst_540 : f32 to vector<8x128xf32>
    %1355 = arith.mulf %1274, %1354 : vector<8x128xf32>
    %cst_541 = arith.constant -5.500000e+00 : f32
    %1356 = vector.broadcast %cst_541 : f32 to vector<8x128xf32>
    %1357 = arith.subf %1355, %1356 : vector<8x128xf32>
    %1358 = arith.mulf %1357, %1343 : vector<8x128xf32>
    %cst_542 = arith.constant -3.500000e+00 : f32
    %1359 = vector.broadcast %cst_542 : f32 to vector<8x128xf32>
    %1360 = arith.subf %1359, %1355 : vector<8x128xf32>
    %1361 = arith.mulf %1360, %1344 : vector<8x128xf32>
    %1362 = arith.addf %1358, %1361 : vector<8x128xf32>
    %cst_543 = arith.constant -4.500000e+00 : f32
    %1363 = vector.broadcast %cst_543 : f32 to vector<8x128xf32>
    %1364 = arith.subf %1355, %1363 : vector<8x128xf32>
    %1365 = arith.mulf %1364, %1344 : vector<8x128xf32>
    %cst_544 = arith.constant -2.500000e+00 : f32
    %1366 = vector.broadcast %cst_544 : f32 to vector<8x128xf32>
    %1367 = arith.subf %1366, %1355 : vector<8x128xf32>
    %1368 = arith.mulf %1367, %1345 : vector<8x128xf32>
    %1369 = arith.addf %1365, %1368 : vector<8x128xf32>
    %cst_545 = arith.constant -3.500000e+00 : f32
    %1370 = vector.broadcast %cst_545 : f32 to vector<8x128xf32>
    %1371 = arith.subf %1355, %1370 : vector<8x128xf32>
    %1372 = arith.mulf %1371, %1345 : vector<8x128xf32>
    %cst_546 = arith.constant -1.500000e+00 : f32
    %1373 = vector.broadcast %cst_546 : f32 to vector<8x128xf32>
    %1374 = arith.subf %1373, %1355 : vector<8x128xf32>
    %1375 = arith.mulf %1374, %1346 : vector<8x128xf32>
    %1376 = arith.addf %1372, %1375 : vector<8x128xf32>
    %cst_547 = arith.constant -2.500000e+00 : f32
    %1377 = vector.broadcast %cst_547 : f32 to vector<8x128xf32>
    %1378 = arith.subf %1355, %1377 : vector<8x128xf32>
    %1379 = arith.mulf %1378, %1346 : vector<8x128xf32>
    %cst_548 = arith.constant -5.000000e-01 : f32
    %1380 = vector.broadcast %cst_548 : f32 to vector<8x128xf32>
    %1381 = arith.subf %1380, %1355 : vector<8x128xf32>
    %1382 = arith.mulf %1381, %1347 : vector<8x128xf32>
    %1383 = arith.addf %1379, %1382 : vector<8x128xf32>
    %cst_549 = arith.constant -1.500000e+00 : f32
    %1384 = vector.broadcast %cst_549 : f32 to vector<8x128xf32>
    %1385 = arith.subf %1355, %1384 : vector<8x128xf32>
    %1386 = arith.mulf %1385, %1347 : vector<8x128xf32>
    %cst_550 = arith.constant 5.000000e-01 : f32
    %1387 = vector.broadcast %cst_550 : f32 to vector<8x128xf32>
    %1388 = arith.subf %1387, %1355 : vector<8x128xf32>
    %1389 = arith.mulf %1388, %1348 : vector<8x128xf32>
    %1390 = arith.addf %1386, %1389 : vector<8x128xf32>
    %cst_551 = arith.constant -5.000000e-01 : f32
    %1391 = vector.broadcast %cst_551 : f32 to vector<8x128xf32>
    %1392 = arith.subf %1355, %1391 : vector<8x128xf32>
    %1393 = arith.mulf %1392, %1348 : vector<8x128xf32>
    %cst_552 = arith.constant 1.500000e+00 : f32
    %1394 = vector.broadcast %cst_552 : f32 to vector<8x128xf32>
    %1395 = arith.subf %1394, %1355 : vector<8x128xf32>
    %1396 = arith.mulf %1395, %1349 : vector<8x128xf32>
    %1397 = arith.addf %1393, %1396 : vector<8x128xf32>
    %cst_553 = arith.constant 5.000000e-01 : f32
    %1398 = vector.broadcast %cst_553 : f32 to vector<8x128xf32>
    %1399 = arith.subf %1355, %1398 : vector<8x128xf32>
    %1400 = arith.mulf %1399, %1349 : vector<8x128xf32>
    %cst_554 = arith.constant 2.500000e+00 : f32
    %1401 = vector.broadcast %cst_554 : f32 to vector<8x128xf32>
    %1402 = arith.subf %1401, %1355 : vector<8x128xf32>
    %1403 = arith.mulf %1402, %1350 : vector<8x128xf32>
    %1404 = arith.addf %1400, %1403 : vector<8x128xf32>
    %cst_555 = arith.constant 1.500000e+00 : f32
    %1405 = vector.broadcast %cst_555 : f32 to vector<8x128xf32>
    %1406 = arith.subf %1355, %1405 : vector<8x128xf32>
    %1407 = arith.mulf %1406, %1350 : vector<8x128xf32>
    %cst_556 = arith.constant 3.500000e+00 : f32
    %1408 = vector.broadcast %cst_556 : f32 to vector<8x128xf32>
    %1409 = arith.subf %1408, %1355 : vector<8x128xf32>
    %1410 = arith.mulf %1409, %1351 : vector<8x128xf32>
    %1411 = arith.addf %1407, %1410 : vector<8x128xf32>
    %cst_557 = arith.constant 2.500000e+00 : f32
    %1412 = vector.broadcast %cst_557 : f32 to vector<8x128xf32>
    %1413 = arith.subf %1355, %1412 : vector<8x128xf32>
    %1414 = arith.mulf %1413, %1351 : vector<8x128xf32>
    %cst_558 = arith.constant 4.500000e+00 : f32
    %1415 = vector.broadcast %cst_558 : f32 to vector<8x128xf32>
    %1416 = arith.subf %1415, %1355 : vector<8x128xf32>
    %1417 = arith.mulf %1416, %1352 : vector<8x128xf32>
    %1418 = arith.addf %1414, %1417 : vector<8x128xf32>
    %cst_559 = arith.constant 3.500000e+00 : f32
    %1419 = vector.broadcast %cst_559 : f32 to vector<8x128xf32>
    %1420 = arith.subf %1355, %1419 : vector<8x128xf32>
    %1421 = arith.mulf %1420, %1352 : vector<8x128xf32>
    %cst_560 = arith.constant 5.500000e+00 : f32
    %1422 = vector.broadcast %cst_560 : f32 to vector<8x128xf32>
    %1423 = arith.subf %1422, %1355 : vector<8x128xf32>
    %1424 = arith.mulf %1423, %1353 : vector<8x128xf32>
    %1425 = arith.addf %1421, %1424 : vector<8x128xf32>
    %cst_561 = arith.constant 1.250000e+00 : f32
    %1426 = vector.broadcast %cst_561 : f32 to vector<8x128xf32>
    %1427 = arith.mulf %1274, %1426 : vector<8x128xf32>
    %cst_562 = arith.constant -2.750000e+00 : f32
    %1428 = vector.broadcast %cst_562 : f32 to vector<8x128xf32>
    %1429 = arith.subf %1427, %1428 : vector<8x128xf32>
    %1430 = arith.mulf %1429, %1362 : vector<8x128xf32>
    %cst_563 = arith.constant -1.250000e+00 : f32
    %1431 = vector.broadcast %cst_563 : f32 to vector<8x128xf32>
    %1432 = arith.subf %1431, %1427 : vector<8x128xf32>
    %1433 = arith.mulf %1432, %1369 : vector<8x128xf32>
    %1434 = arith.addf %1430, %1433 : vector<8x128xf32>
    %cst_564 = arith.constant -2.250000e+00 : f32
    %1435 = vector.broadcast %cst_564 : f32 to vector<8x128xf32>
    %1436 = arith.subf %1427, %1435 : vector<8x128xf32>
    %1437 = arith.mulf %1436, %1369 : vector<8x128xf32>
    %cst_565 = arith.constant -7.500000e-01 : f32
    %1438 = vector.broadcast %cst_565 : f32 to vector<8x128xf32>
    %1439 = arith.subf %1438, %1427 : vector<8x128xf32>
    %1440 = arith.mulf %1439, %1376 : vector<8x128xf32>
    %1441 = arith.addf %1437, %1440 : vector<8x128xf32>
    %cst_566 = arith.constant -1.750000e+00 : f32
    %1442 = vector.broadcast %cst_566 : f32 to vector<8x128xf32>
    %1443 = arith.subf %1427, %1442 : vector<8x128xf32>
    %1444 = arith.mulf %1443, %1376 : vector<8x128xf32>
    %cst_567 = arith.constant -2.500000e-01 : f32
    %1445 = vector.broadcast %cst_567 : f32 to vector<8x128xf32>
    %1446 = arith.subf %1445, %1427 : vector<8x128xf32>
    %1447 = arith.mulf %1446, %1383 : vector<8x128xf32>
    %1448 = arith.addf %1444, %1447 : vector<8x128xf32>
    %cst_568 = arith.constant -1.250000e+00 : f32
    %1449 = vector.broadcast %cst_568 : f32 to vector<8x128xf32>
    %1450 = arith.subf %1427, %1449 : vector<8x128xf32>
    %1451 = arith.mulf %1450, %1383 : vector<8x128xf32>
    %cst_569 = arith.constant 2.500000e-01 : f32
    %1452 = vector.broadcast %cst_569 : f32 to vector<8x128xf32>
    %1453 = arith.subf %1452, %1427 : vector<8x128xf32>
    %1454 = arith.mulf %1453, %1390 : vector<8x128xf32>
    %1455 = arith.addf %1451, %1454 : vector<8x128xf32>
    %cst_570 = arith.constant -7.500000e-01 : f32
    %1456 = vector.broadcast %cst_570 : f32 to vector<8x128xf32>
    %1457 = arith.subf %1427, %1456 : vector<8x128xf32>
    %1458 = arith.mulf %1457, %1390 : vector<8x128xf32>
    %cst_571 = arith.constant 7.500000e-01 : f32
    %1459 = vector.broadcast %cst_571 : f32 to vector<8x128xf32>
    %1460 = arith.subf %1459, %1427 : vector<8x128xf32>
    %1461 = arith.mulf %1460, %1397 : vector<8x128xf32>
    %1462 = arith.addf %1458, %1461 : vector<8x128xf32>
    %cst_572 = arith.constant -2.500000e-01 : f32
    %1463 = vector.broadcast %cst_572 : f32 to vector<8x128xf32>
    %1464 = arith.subf %1427, %1463 : vector<8x128xf32>
    %1465 = arith.mulf %1464, %1397 : vector<8x128xf32>
    %cst_573 = arith.constant 1.250000e+00 : f32
    %1466 = vector.broadcast %cst_573 : f32 to vector<8x128xf32>
    %1467 = arith.subf %1466, %1427 : vector<8x128xf32>
    %1468 = arith.mulf %1467, %1404 : vector<8x128xf32>
    %1469 = arith.addf %1465, %1468 : vector<8x128xf32>
    %cst_574 = arith.constant 2.500000e-01 : f32
    %1470 = vector.broadcast %cst_574 : f32 to vector<8x128xf32>
    %1471 = arith.subf %1427, %1470 : vector<8x128xf32>
    %1472 = arith.mulf %1471, %1404 : vector<8x128xf32>
    %cst_575 = arith.constant 1.750000e+00 : f32
    %1473 = vector.broadcast %cst_575 : f32 to vector<8x128xf32>
    %1474 = arith.subf %1473, %1427 : vector<8x128xf32>
    %1475 = arith.mulf %1474, %1411 : vector<8x128xf32>
    %1476 = arith.addf %1472, %1475 : vector<8x128xf32>
    %cst_576 = arith.constant 7.500000e-01 : f32
    %1477 = vector.broadcast %cst_576 : f32 to vector<8x128xf32>
    %1478 = arith.subf %1427, %1477 : vector<8x128xf32>
    %1479 = arith.mulf %1478, %1411 : vector<8x128xf32>
    %cst_577 = arith.constant 2.250000e+00 : f32
    %1480 = vector.broadcast %cst_577 : f32 to vector<8x128xf32>
    %1481 = arith.subf %1480, %1427 : vector<8x128xf32>
    %1482 = arith.mulf %1481, %1418 : vector<8x128xf32>
    %1483 = arith.addf %1479, %1482 : vector<8x128xf32>
    %cst_578 = arith.constant 1.250000e+00 : f32
    %1484 = vector.broadcast %cst_578 : f32 to vector<8x128xf32>
    %1485 = arith.subf %1427, %1484 : vector<8x128xf32>
    %1486 = arith.mulf %1485, %1418 : vector<8x128xf32>
    %cst_579 = arith.constant 2.750000e+00 : f32
    %1487 = vector.broadcast %cst_579 : f32 to vector<8x128xf32>
    %1488 = arith.subf %1487, %1427 : vector<8x128xf32>
    %1489 = arith.mulf %1488, %1425 : vector<8x128xf32>
    %1490 = arith.addf %1486, %1489 : vector<8x128xf32>
    %cst_580 = arith.constant 0.833333313 : f32
    %1491 = vector.broadcast %cst_580 : f32 to vector<8x128xf32>
    %1492 = arith.mulf %1274, %1491 : vector<8x128xf32>
    %cst_581 = arith.constant -1.83333337 : f32
    %1493 = vector.broadcast %cst_581 : f32 to vector<8x128xf32>
    %1494 = arith.subf %1492, %1493 : vector<8x128xf32>
    %1495 = arith.mulf %1494, %1434 : vector<8x128xf32>
    %cst_582 = arith.constant -5.000000e-01 : f32
    %1496 = vector.broadcast %cst_582 : f32 to vector<8x128xf32>
    %1497 = arith.subf %1496, %1492 : vector<8x128xf32>
    %1498 = arith.mulf %1497, %1441 : vector<8x128xf32>
    %1499 = arith.addf %1495, %1498 : vector<8x128xf32>
    %cst_583 = arith.constant -1.500000e+00 : f32
    %1500 = vector.broadcast %cst_583 : f32 to vector<8x128xf32>
    %1501 = arith.subf %1492, %1500 : vector<8x128xf32>
    %1502 = arith.mulf %1501, %1441 : vector<8x128xf32>
    %cst_584 = arith.constant -0.166666672 : f32
    %1503 = vector.broadcast %cst_584 : f32 to vector<8x128xf32>
    %1504 = arith.subf %1503, %1492 : vector<8x128xf32>
    %1505 = arith.mulf %1504, %1448 : vector<8x128xf32>
    %1506 = arith.addf %1502, %1505 : vector<8x128xf32>
    %cst_585 = arith.constant -1.16666663 : f32
    %1507 = vector.broadcast %cst_585 : f32 to vector<8x128xf32>
    %1508 = arith.subf %1492, %1507 : vector<8x128xf32>
    %1509 = arith.mulf %1508, %1448 : vector<8x128xf32>
    %cst_586 = arith.constant 0.166666672 : f32
    %1510 = vector.broadcast %cst_586 : f32 to vector<8x128xf32>
    %1511 = arith.subf %1510, %1492 : vector<8x128xf32>
    %1512 = arith.mulf %1511, %1455 : vector<8x128xf32>
    %1513 = arith.addf %1509, %1512 : vector<8x128xf32>
    %cst_587 = arith.constant -0.833333313 : f32
    %1514 = vector.broadcast %cst_587 : f32 to vector<8x128xf32>
    %1515 = arith.subf %1492, %1514 : vector<8x128xf32>
    %1516 = arith.mulf %1515, %1455 : vector<8x128xf32>
    %cst_588 = arith.constant 5.000000e-01 : f32
    %1517 = vector.broadcast %cst_588 : f32 to vector<8x128xf32>
    %1518 = arith.subf %1517, %1492 : vector<8x128xf32>
    %1519 = arith.mulf %1518, %1462 : vector<8x128xf32>
    %1520 = arith.addf %1516, %1519 : vector<8x128xf32>
    %cst_589 = arith.constant -5.000000e-01 : f32
    %1521 = vector.broadcast %cst_589 : f32 to vector<8x128xf32>
    %1522 = arith.subf %1492, %1521 : vector<8x128xf32>
    %1523 = arith.mulf %1522, %1462 : vector<8x128xf32>
    %cst_590 = arith.constant 0.833333313 : f32
    %1524 = vector.broadcast %cst_590 : f32 to vector<8x128xf32>
    %1525 = arith.subf %1524, %1492 : vector<8x128xf32>
    %1526 = arith.mulf %1525, %1469 : vector<8x128xf32>
    %1527 = arith.addf %1523, %1526 : vector<8x128xf32>
    %cst_591 = arith.constant -0.166666672 : f32
    %1528 = vector.broadcast %cst_591 : f32 to vector<8x128xf32>
    %1529 = arith.subf %1492, %1528 : vector<8x128xf32>
    %1530 = arith.mulf %1529, %1469 : vector<8x128xf32>
    %cst_592 = arith.constant 1.16666663 : f32
    %1531 = vector.broadcast %cst_592 : f32 to vector<8x128xf32>
    %1532 = arith.subf %1531, %1492 : vector<8x128xf32>
    %1533 = arith.mulf %1532, %1476 : vector<8x128xf32>
    %1534 = arith.addf %1530, %1533 : vector<8x128xf32>
    %cst_593 = arith.constant 0.166666672 : f32
    %1535 = vector.broadcast %cst_593 : f32 to vector<8x128xf32>
    %1536 = arith.subf %1492, %1535 : vector<8x128xf32>
    %1537 = arith.mulf %1536, %1476 : vector<8x128xf32>
    %cst_594 = arith.constant 1.500000e+00 : f32
    %1538 = vector.broadcast %cst_594 : f32 to vector<8x128xf32>
    %1539 = arith.subf %1538, %1492 : vector<8x128xf32>
    %1540 = arith.mulf %1539, %1483 : vector<8x128xf32>
    %1541 = arith.addf %1537, %1540 : vector<8x128xf32>
    %cst_595 = arith.constant 5.000000e-01 : f32
    %1542 = vector.broadcast %cst_595 : f32 to vector<8x128xf32>
    %1543 = arith.subf %1492, %1542 : vector<8x128xf32>
    %1544 = arith.mulf %1543, %1483 : vector<8x128xf32>
    %cst_596 = arith.constant 1.83333337 : f32
    %1545 = vector.broadcast %cst_596 : f32 to vector<8x128xf32>
    %1546 = arith.subf %1545, %1492 : vector<8x128xf32>
    %1547 = arith.mulf %1546, %1490 : vector<8x128xf32>
    %1548 = arith.addf %1544, %1547 : vector<8x128xf32>
    %1549 = arith.truncf %1499 : vector<8x128xf32> to vector<8x128xbf16>
    %c0_597 = arith.constant 0 : index
    %c128_598 = arith.constant 128 : index
    %1550 = vector.load %arg12[%c0_597, %c128_598] : memref<8x1152xbf16, #tpu.memory_space<vmem>>, vector<8x128xbf16>
    tpu.vector_store %arg12[%c0_597, %c128_598], %1549 {strides = array<i32>} : memref<8x1152xbf16, #tpu.memory_space<vmem>>, vector<8x128xbf16>,
    %1551 = arith.truncf %1506 : vector<8x128xf32> to vector<8x128xbf16>
    %c0_599 = arith.constant 0 : index
    %c256_600 = arith.constant 256 : index
    %1552 = vector.load %arg12[%c0_599, %c256_600] : memref<8x1152xbf16, #tpu.memory_space<vmem>>, vector<8x128xbf16>
    tpu.vector_store %arg12[%c0_599, %c256_600], %1551 {strides = array<i32>} : memref<8x1152xbf16, #tpu.memory_space<vmem>>, vector<8x128xbf16>,
    %1553 = arith.truncf %1513 : vector<8x128xf32> to vector<8x128xbf16>
    %c0_601 = arith.constant 0 : index
    %c384_602 = arith.constant 384 : index
    %1554 = vector.load %arg12[%c0_601, %c384_602] : memref<8x1152xbf16, #tpu.memory_space<vmem>>, vector<8x128xbf16>
    tpu.vector_store %arg12[%c0_601, %c384_602], %1553 {strides = array<i32>} : memref<8x1152xbf16, #tpu.memory_space<vmem>>, vector<8x128xbf16>,
    %1555 = arith.truncf %1520 : vector<8x128xf32> to vector<8x128xbf16>
    %c0_603 = arith.constant 0 : index
    %c512_604 = arith.constant 512 : index
    %1556 = vector.load %arg12[%c0_603, %c512_604] : memref<8x1152xbf16, #tpu.memory_space<vmem>>, vector<8x128xbf16>
    tpu.vector_store %arg12[%c0_603, %c512_604], %1555 {strides = array<i32>} : memref<8x1152xbf16, #tpu.memory_space<vmem>>, vector<8x128xbf16>,
    %1557 = arith.truncf %1527 : vector<8x128xf32> to vector<8x128xbf16>
    %c0_605 = arith.constant 0 : index
    %c640_606 = arith.constant 640 : index
    %1558 = vector.load %arg12[%c0_605, %c640_606] : memref<8x1152xbf16, #tpu.memory_space<vmem>>, vector<8x128xbf16>
    tpu.vector_store %arg12[%c0_605, %c640_606], %1557 {strides = array<i32>} : memref<8x1152xbf16, #tpu.memory_space<vmem>>, vector<8x128xbf16>,
    %1559 = arith.truncf %1534 : vector<8x128xf32> to vector<8x128xbf16>
    %c0_607 = arith.constant 0 : index
    %c768_608 = arith.constant 768 : index
    %1560 = vector.load %arg12[%c0_607, %c768_608] : memref<8x1152xbf16, #tpu.memory_space<vmem>>, vector<8x128xbf16>
    tpu.vector_store %arg12[%c0_607, %c768_608], %1559 {strides = array<i32>} : memref<8x1152xbf16, #tpu.memory_space<vmem>>, vector<8x128xbf16>,
    %1561 = arith.truncf %1541 : vector<8x128xf32> to vector<8x128xbf16>
    %c0_609 = arith.constant 0 : index
    %c896_610 = arith.constant 896 : index
    %1562 = vector.load %arg12[%c0_609, %c896_610] : memref<8x1152xbf16, #tpu.memory_space<vmem>>, vector<8x128xbf16>
    tpu.vector_store %arg12[%c0_609, %c896_610], %1561 {strides = array<i32>} : memref<8x1152xbf16, #tpu.memory_space<vmem>>, vector<8x128xbf16>,
    %1563 = arith.truncf %1548 : vector<8x128xf32> to vector<8x128xbf16>
    %c0_611 = arith.constant 0 : index
    %c1024_612 = arith.constant 1024 : index
    %1564 = vector.load %arg12[%c0_611, %c1024_612] : memref<8x1152xbf16, #tpu.memory_space<vmem>>, vector<8x128xbf16>
    tpu.vector_store %arg12[%c0_611, %c1024_612], %1563 {strides = array<i32>} : memref<8x1152xbf16, #tpu.memory_space<vmem>>, vector<8x128xbf16>,
    %c0_613 = arith.constant 0 : index
    %c0_614 = arith.constant 0 : index
    %1565 = vector.load %arg12[%c0_613, %c0_614] : memref<8x1152xbf16, #tpu.memory_space<vmem>>, vector<8x1152xbf16>
    %c0_615 = arith.constant 0 : index
    %c0_616 = arith.constant 0 : index
    %1566 = vector.load %arg9[%c0_615, %c0_616] : memref<1152x2xbf16, #tpu.memory_space<vmem>>, vector<1152x2xbf16>
    %cst_617 = arith.constant dense<0.000000e+00> : vector<8x2xf32>
    %1567 = tpu.matmul %1565, %1566, %cst_617 {dimension_numbers = #tpu.dot_dimension_numbers<[1], [0], [0], [1], [0, 0, 1, 1], [], []>} : vector<8x1152xbf16>, vector<1152x2xbf16>, vector<8x2xf32> -> vector<8x2xf32>
    %1568 = vector.extract_strided_slice %1567 {offsets = [0, 1], sizes = [8, 1], strides = [1, 1]} : vector<8x2xf32> to vector<8x1xf32>
    %c0_618 = arith.constant 0 : index
    %c0_619 = arith.constant 0 : index
    %1569 = vector.load %arg11[%c0_618, %c0_619] : memref<8x1xf32, #tpu.memory_space<vmem>>, vector<8x1xf32>
    tpu.vector_store %arg11[%c0_618, %c0_619], %1568 {strides = array<i32>} : memref<8x1xf32, #tpu.memory_space<vmem>>, vector<8x1xf32>,
    return
  }
  func.func @transform_0(%arg0: i32) -> (i32, i32) {
    %c0_i32 = arith.constant 0 : i32
    %c0_i32_0 = arith.constant 0 : i32
    return %arg0, %c0_i32 : i32, i32
  }
  func.func @transform_1(%arg0: i32) -> (i32, i32) {
    %c0_i32 = arith.constant 0 : i32
    %c0_i32_0 = arith.constant 0 : i32
    %c0_i32_1 = arith.constant 0 : i32
    return %c0_i32, %c0_i32_0 : i32, i32
  }
  func.func @transform_2(%arg0: i32) -> (i32, i32) {
    %c0_i32 = arith.constant 0 : i32
    %c0_i32_0 = arith.constant 0 : i32
    %c0_i32_1 = arith.constant 0 : i32
    return %c0_i32, %c0_i32_0 : i32, i32
  }
  func.func @transform_3(%arg0: i32) -> (i32, i32) {
    %c0_i32 = arith.constant 0 : i32
    %c0_i32_0 = arith.constant 0 : i32
    %c0_i32_1 = arith.constant 0 : i32
    return %c0_i32, %c0_i32_0 : i32, i32
  }
  func.func @transform_4(%arg0: i32) -> (i32, i32) {
    %c0_i32 = arith.constant 0 : i32
    %c0_i32_0 = arith.constant 0 : i32
    %c0_i32_1 = arith.constant 0 : i32
    return %c0_i32, %c0_i32_0 : i32, i32
  }
  func.func @transform_5(%arg0: i32) -> (i32, i32) {
    %c0_i32 = arith.constant 0 : i32
    %c0_i32_0 = arith.constant 0 : i32
    %c0_i32_1 = arith.constant 0 : i32
    return %c0_i32, %c0_i32_0 : i32, i32
  }
  func.func @transform_6(%arg0: i32) -> (i32, i32) {
    %c0_i32 = arith.constant 0 : i32
    %c0_i32_0 = arith.constant 0 : i32
    %c0_i32_1 = arith.constant 0 : i32
    return %c0_i32, %c0_i32_0 : i32, i32
  }
  func.func @transform_7(%arg0: i32) -> (i32, i32) {
    %c0_i32 = arith.constant 0 : i32
    %c0_i32_0 = arith.constant 0 : i32
    %c0_i32_1 = arith.constant 0 : i32
    return %c0_i32, %c0_i32_0 : i32, i32
  }
  func.func @transform_8(%arg0: i32) -> (i32, i32) {
    %c0_i32 = arith.constant 0 : i32
    %c0_i32_0 = arith.constant 0 : i32
    %c0_i32_1 = arith.constant 0 : i32
    return %c0_i32, %c0_i32_0 : i32, i32
  }
  func.func @transform_9(%arg0: i32) -> (i32, i32) {
    %c0_i32 = arith.constant 0 : i32
    %c0_i32_0 = arith.constant 0 : i32
    return %arg0, %c0_i32 : i32, i32
  }
  func.func @transform_10(%arg0: i32) -> (i32, i32) {
    %c0_i32 = arith.constant 0 : i32
    %c0_i32_0 = arith.constant 0 : i32
    return %arg0, %c0_i32 : i32, i32
  }
}

</mosaic_0001>

<bundles_post_ra>
// kernel: tpu_custom_call.1
= control target key start
LH: loop header
LB: loop body
LE: loop exit
PB: predicated region body
PF: predicated region fallthrough
CT: control target
= control target key end

     0   :  { %16 = vsyncpa [#allocation5], 0  ;;  %s8942_s0 = inlined_call_operand.vmem [shape: f32[8,128], index: 0, kind: input, shape index: {}]   ;;  %s8943_s1 = inlined_call_operand.hbm [shape: bf16[1152,256], index: 1, kind: input, shape index: {}]   ;;  %s8944_s2 = inlined_call_operand.vmem [shape: f32[2,128], index: 2, kind: input, shape index: {}]   ;;  %s8945_s3 = inlined_call_operand.vmem [shape: f32[2,128], index: 3, kind: input, shape index: {}]   ;;  %s8946_s4 = inlined_call_operand.vmem [shape: bf16[1152,128], index: 4, kind: input, shape index: {}]   ;;  %s8947_s5 = inlined_call_operand.hbm [shape: bf16[1152,128], index: 5, kind: input, shape index: {}]   ;;  %s8948_s6 = inlined_call_operand.vmem [shape: f32[2,128], index: 6, kind: input, shape index: {}]   ;;  %s8949_s7 = inlined_call_operand.vmem [shape: f32[2,128], index: 7, kind: input, shape index: {}]   ;;  %s8950_s8 = inlined_call_operand.vmem [shape: bf16[1152,2], index: 8, kind: input, shape index: {}]   ;;  %s8951_s9 = inlined_call_operand.vmem [shape: f32[8,1], index: 9, kind: output, shape index: {0}]   ;;  %s8952_s10 = inlined_call_operand.vmem [shape: f32[8,1], index: 10, kind: output, shape index: {1}]  }
   0x1   :  { %17 = vsyncpa [#allocation7], 0  ;;  %s7364_s13 = smov [#allocation4]   ;;  %s7316_s17 = scalar_lea.hbm %s8943_s1, 18432 }
   0x2   :  { %s25_s14 = sshll.u32 %s7364_s13, 4  ;;  %p7317_p0 = scmp.ne.s32.totalorder %s8943_s1, %s7316_s17  ;;  %s26_s14 = int_to_ptr.vmem [resolvable:$true] %s25_s14 }
   0x3   :  { %p7320_p1 = scmp.lt.u32.totalorder %s7316_s17, %s8943_s1 }
   0x5   :  { %p7322_p2 = pnand %p7320_p1, %p7317_p0 }
   0x7   :  { %7325 = shalt.err (!%p7322_p2)
}
   0x8   :  { %s7326_s22 = scalar_lea.vmem %s26_s14, 18432  ;;  %p7331_p4 = scmp.lt.s32.totalorder %s26_s14, %s26_s14 }
   0x9   :  { %p7327_p3 = scmp.ne.s32.totalorder %s26_s14, %s7326_s22  ;;  %p7332_p5 = scmp.lt.s32.totalorder %s7326_s22, %s7326_s22 }
   0xb   :  { %p7333_p6 = por %p7332_p5, %p7331_p4 }
   0xd   :  { %p7334_p7 = pnand %p7333_p6, %p7327_p3 }
   0xf   :  { %7337 = shalt.err (!%p7334_p7)
}
  0x10   :  { %s7365_s23 = smov 128   ;;  %s7366_s24 = smov 8  }
  0x11   :  { %31 = dma.hbm_to_vmem [thread:$0]  %s8943_s1, 18432, %s26_s14, [#allocation5], %s7365_s23, %s7365_s23, %s7366_s24  }
  0x12   :  { %s7367_s27 = smov [#allocation6]   ;;  %s7338_s11 = scalar_lea.hbm %s8947_s5, 9216 }
  0x13   :  { %s43_s28 = sshll.u32 %s7367_s27, 4  ;;  %p7339_p8 = scmp.ne.s32.totalorder %s8947_s5, %s7338_s11  ;;  %s44_s28 = int_to_ptr.vmem [resolvable:$true] %s43_s28 }
  0x14   :  { %p7342_p9 = scmp.lt.u32.totalorder %s7338_s11, %s8947_s5 }
  0x16   :  { %p7344_p10 = pnand %p7342_p9, %p7339_p8 }
  0x18   :  { %7347 = shalt.err (!%p7344_p10)
}
  0x19   :  { %s7348_s17 = scalar_lea.vmem %s44_s28, 9216  ;;  %p7353_p12 = scmp.lt.s32.totalorder %s44_s28, %s44_s28 }
  0x1a   :  { %p7349_p11 = scmp.ne.s32.totalorder %s44_s28, %s7348_s17  ;;  %p7354_p13 = scmp.lt.s32.totalorder %s7348_s17, %s7348_s17 }
  0x1c   :  { %p7355_p0 = por %p7354_p13, %p7353_p12 }
  0x1e   :  { %p7356_p1 = pnand %p7355_p0, %p7349_p11 }
  0x20   :  { %7359 = shalt.err (!%p7356_p1)
}
  0x21   :  { %s7368_s1 = smov 64   ;;  %s7369_s14 = smov 4  }
  0x22   :  { %49 = dma.hbm_to_vmem [thread:$0]  %s8947_s5, 9216, %s44_s28, [#allocation7], %s7368_s1, %s7368_s1, %s7369_s14  }
  0x23   :  { %7360 = dma.done.wait [#allocation5], 18432  }
  0x24   :  { %7361 = vsyncadd [#allocation5], 4294948864 }
  0x25   :  { %7362 = dma.done.wait [#allocation7], 9216  }
  0x26   :  { %7363 = vsyncadd [#allocation7], 4294958080  ;;  %v6740_v0 = vld [vmem:[#allocation4 + $0x4] ss:$8 sps:$4 sm:$0xff]   ;;  %v6742_v1 = vld [vmem:[#allocation4] ss:$8 sps:$4 sm:$0xff]  }
  0x27   :  { %1163 = vmatprep.subr.bf16.mxu0 %v6740_v0  ;;  %v6743_v2 = vld [vmem:[#allocation4 + $0x14] ss:$8 sps:$4 sm:$0xff]   ;;  %v6745_v3 = vld [vmem:[#allocation4 + $0x10] ss:$8 sps:$4 sm:$0xff]   ;;  %v6746_v4 = vld [vmem:[#allocation4 + $0x24] ss:$8 sps:$4 sm:$0xff]  }
  0x28   :  { %1164 = vmatpush1.bf16.msra.mxu0 %v6742_v1  ;;  %v6748_v5 = vld [vmem:[#allocation4 + $0x20] ss:$8 sps:$4 sm:$0xff]   ;;  %v6749_v6 = vld [vmem:[#allocation4 + $0x34] ss:$8 sps:$4 sm:$0xff]   ;;  %v6751_v7 = vld [vmem:[#allocation4 + $0x30] ss:$8 sps:$4 sm:$0xff]  }
  0x29   :  { %1165 = vmatprep.subr.bf16.mxu0 %v6743_v2  ;;  %v6752_v8 = vld [vmem:[#allocation4 + $0x44] ss:$8 sps:$4 sm:$0xff]   ;;  %v6754_v9 = vld [vmem:[#allocation4 + $0x40] ss:$8 sps:$4 sm:$0xff]   ;;  %v6755_v10 = vld [vmem:[#allocation4 + $0x54] ss:$8 sps:$4 sm:$0xff]  }
  0x2a   :  { %v6757_v11 = vld [vmem:[#allocation4 + $0x50] ss:$8 sps:$4 sm:$0xff]   ;;  %v6758_v12 = vld [vmem:[#allocation4 + $0x64] ss:$8 sps:$4 sm:$0xff]   ;;  %v6760_v13 = vld [vmem:[#allocation4 + $0x60] ss:$8 sps:$4 sm:$0xff]  }
  0x2b   :  { %v7456_v14 = vld [vmem:[%s8942_s0] sm:$0xff]  ;;  %v7370_v16 = vmov 0.0   ;;  %v6763_v24 = vld [vmem:[#allocation4 + $0x70] ss:$8 sps:$4 sm:$0xff]   ;;  %v6764_v31 = vld [vmem:[#allocation4 + $0x84] ss:$8 sps:$4 sm:$0xff]  }
  0x2c   :  { %1166 = vmatpush1.bf16.msra.mxu0 %v6745_v3  ;;  %v5531_v15 = vmul.f32 -1.442695, %v7456_v14  ;;  %vm73_vm0 = vcmp.ge.f32.partialorder %v7456_v14, -2.2  ;;  %vm75_vm1 = vcmp.ge.f32.partialorder %v7456_v14, -1.8 }
  0x2d   :  { %1167 = vmatprep.subr.bf16.mxu0 %v6746_v4  ;;  %v74_v17 = vsel %vm73_vm0, 1.0, %v7370_v16  ;;  %v76_v18 = vsel %vm75_vm1, 1.0, %v7370_v16  ;;  %vm77_vm2 = vcmp.ge.f32.partialorder %v7456_v14, -1.4  ;;  %vm79_vm3 = vcmp.ge.f32.partialorder %v7456_v14, -1.0 }
  0x2e   :  { %v6761_v19 = vld [vmem:[#allocation4 + $0x74] ss:$8 sps:$4 sm:$0xff]   ;;  %7258 = vpow2.f32 %v5531_v15  ;;  %v78_v20 = vsel %vm77_vm2, 1.0, %v7370_v16  ;;  %v80_v21 = vsel %vm79_vm3, 1.0, %v7370_v16  ;;  %vm81_vm4 = vcmp.ge.f32.partialorder %v7456_v14, -0.6 }
  0x2f   :  { %v82_v22 = vsel %vm81_vm4, 1.0, %v7370_v16  ;;  %v97_v23 = vsub.f32 %v74_v17, %v76_v18  ;;  %v98_v25 = vsub.f32 %v76_v18, %v78_v20  ;;  %v99_v26 = vsub.f32 %v78_v20, %v80_v21  ;;  %v6766_v44 = vld [vmem:[#allocation4 + $0x80] ss:$8 sps:$4 sm:$0xff]   ;;  %v6767_v49 = vld [vmem:[#allocation4 + $0x94] ss:$8 sps:$4 sm:$0xff]  }
  0x30   :  { %1168 = vmatpush1.bf16.msra.mxu0 %v6748_v5  ;;  %v7470_v27 = vmul.f32 2.5, %v7456_v14  ;;  %v7473_v28 = vmul.f32 1.25, %v7456_v14  ;;  %v100_v29 = vsub.f32 %v80_v21, %v82_v22  ;;  %v7476_v30 = vmul.f32 0.8333333, %v7456_v14  ;;  %v6769_v59 = vld [vmem:[#allocation4 + $0x90] ss:$8 sps:$4 sm:$0xff]  }
  0x31   :  { %1169 = vmatprep.subr.bf16.mxu0 %v6749_v6  ;;  %vm83_vm5 = vcmp.ge.f32.partialorder %v7456_v14, -0.2  ;;  %vm85_vm6 = vcmp.ge.f32.partialorder %v7456_v14, 0.2  ;;  %v6770_v63 = vld [vmem:[#allocation4 + $0xa4] ss:$8 sps:$4 sm:$0xff]  }
  0x32   :  { %v5532_v32 = vadd.f32 5.5, %v7470_v27  ;;  %v111_v33 = vsub.f32 -3.5, %v7470_v27  ;;  %v5533_v34 = vadd.f32 4.5, %v7470_v27  ;;  %v116_v35 = vsub.f32 -2.5, %v7470_v27 }
  0x33   :  { %v5534_v36 = vadd.f32 3.5, %v7470_v27  ;;  %v121_v37 = vsub.f32 -1.5, %v7470_v27  ;;  %v5542_v38 = vadd.f32 2.75, %v7473_v28  ;;  %v162_v39 = vsub.f32 -1.25, %v7473_v28 }
  0x34   :  { %1170 = vmatpush1.bf16.msra.mxu0 %v6751_v7  ;;  %v110_v40 = vmul.f32 %v5532_v32, %v97_v23  ;;  %v112_v41 = vmul.f32 %v111_v33, %v98_v25  ;;  %v115_v42 = vmul.f32 %v5533_v34, %v98_v25  ;;  %v117_v43 = vmul.f32 %v116_v35, %v99_v26  ;;  %v6776_v32 = vld [vmem:[#allocation4 + $0xc4] ss:$8 sps:$4 sm:$0xff]  }
  0x35   :  { %1171 = vmatprep.subr.bf16.mxu0 %v6752_v8  ;;  %v120_v45 = vmul.f32 %v5534_v36, %v99_v26  ;;  %v122_v46 = vmul.f32 %v121_v37, %v100_v29  ;;  %v5543_v47 = vadd.f32 2.25, %v7473_v28  ;;  %v167_v48 = vsub.f32 -0.75, %v7473_v28  ;;  %v6775_v26 = vld [vmem:[#allocation4 + $0xb0] ss:$8 sps:$4 sm:$0xff]  }
  0x36   :  { %v113_v50 = vadd.f32 %v112_v41, %v110_v40  ;;  %v118_v51 = vadd.f32 %v117_v43, %v115_v42  ;;  %v5551_v53 = vadd.f32 1.8333334, %v7476_v30  ;;  %v84_v54 = vsel %vm83_vm5, 1.0, %v7370_v16  ;;  %v6778_v40 = vld [vmem:[#allocation4 + $0xc0] ss:$8 sps:$4 sm:$0xff]  }
  0x37   :  { %v123_v52 = vadd.f32 %v122_v46, %v120_v45  ;;  %v208_v62 = vsub.f32 -0.5, %v7476_v30  ;;  %v86_v1 = vsel %vm85_vm6, 1.0, %v7370_v16  ;;  %v101_v2 = vsub.f32 %v82_v22, %v84_v54 }
  0x38   :  { %1172 = vmatpush1.bf16.msra.mxu0 %v6754_v9  ;;  %v7259_v55 = vpop.eup %7258  ;;  %v161_v56 = vmul.f32 %v5542_v38, %v113_v50  ;;  %v163_v57 = vmul.f32 %v162_v39, %v118_v51  ;;  %v166_v58 = vmul.f32 %v5543_v47, %v118_v51  ;;  %v7496_v4 = vsub.f32 %v84_v54, %v86_v1  ;;  %v6772_v9 = vld [vmem:[#allocation4 + $0xa0] ss:$8 sps:$4 sm:$0xff]  }
  0x39   :  { %1173 = vmatprep.subr.bf16.mxu0 %v6755_v10  ;;  %v67_v60 = vadd.f32 1.0, %v7259_v55  ;;  %v168_v61 = vmul.f32 %v167_v48, %v123_v52  ;;  %v5535_v5 = vadd.f32 2.5, %v7470_v27  ;;  %v126_v7 = vsub.f32 -0.5, %v7470_v27 }
  0x3a   :  { %v164_v0 = vadd.f32 %v163_v57, %v161_v56  ;;  %v5536_v8 = vadd.f32 1.5, %v7470_v27  ;;  %v5544_v18 = vadd.f32 1.75, %v7473_v28  ;;  %v172_v21 = vsub.f32 -0.25, %v7473_v28  ;;  %v6782_v57 = vld [vmem:[#allocation4 + $0xe4] ss:$8 sps:$4 sm:$0xff]  }
  0x3b   :  { %7260 = vrcp.f32 %v67_v60  ;;  %v169_v3 = vadd.f32 %v168_v61, %v166_v58  ;;  %v127_v15 = vmul.f32 %v126_v7, %v101_v2  ;;  %v5545_v22 = vadd.f32 1.25, %v7473_v28  ;;  %v6785_v7 = vld [vmem:[#allocation4 + $0xf4] ss:$8 sps:$4 sm:$0xff]  }
  0x3c   :  { %1174 = vmatpush1.bf16.msra.mxu0 %v6757_v11  ;;  %v207_v6 = vmul.f32 %v5551_v53, %v164_v0  ;;  %v125_v11 = vmul.f32 %v5535_v5, %v100_v29  ;;  %v130_v17 = vmul.f32 %v5536_v8, %v101_v2  ;;  %v177_v25 = vsub.f32 0.25, %v7473_v28  ;;  %v6784_v2 = vld [vmem:[#allocation4 + $0xe0] ss:$8 sps:$4 sm:$0xff]  }
  0x3d   :  { %1175 = vmatprep.subr.bf16.mxu0 %v6758_v12  ;;  %v209_v10 = vmul.f32 %v208_v62, %v169_v3  ;;  %v131_v12 = vsub.f32 0.5, %v7470_v27  ;;  %v5552_v36 = vadd.f32 1.5, %v7476_v30  ;;  %v213_v38 = vsub.f32 -0.16666667, %v7476_v30 }
  0x3e   :  { %v128_v23 = vadd.f32 %v127_v15, %v125_v11  ;;  %v5553_v42 = vadd.f32 1.1666666, %v7476_v30  ;;  %v218_v43 = vsub.f32 0.16666667, %v7476_v30  ;;  %vm87_vm7 = vcmp.ge.f32.partialorder %v7456_v14, 0.6 }
  0x3f   :  { %v132_v20 = vmul.f32 %v131_v12, %v7496_v4  ;;  %v212_v46 = vmul.f32 %v5552_v36, %v169_v3  ;;  %v88_v47 = vsel %vm87_vm7, 1.0, %v7370_v16  ;;  %vm89_vm8 = vcmp.ge.f32.partialorder %v7456_v14, 1.0 }
  0x40   :  { %1176 = vmatpush1.bf16.msra.mxu0 %v6760_v13  ;;  %v6773_v13 = vld [vmem:[#allocation4 + $0xb4] ss:$8 sps:$4 sm:$0xff]   ;;  %v173_v33 = vmul.f32 %v172_v21, %v128_v23  ;;  %v176_v34 = vmul.f32 %v5545_v22, %v128_v23  ;;  %v7516_v50 = vsel %vm89_vm8, 1.0, %v7370_v16  ;;  %v103_v51 = vsub.f32 %v86_v1, %v88_v47  ;;  %v6791_v23 = vld [vmem:[#allocation4 + $0x104] ss:$8 sps:$4 sm:$0xff]  }
  0x41   :  { %1177 = vmatprep.subr.bf16.mxu0 %v6761_v19  ;;  %v210_v19 = vadd.f32 %v209_v10, %v207_v6  ;;  %v7519_v55 = vsub.f32 %v88_v47, %v7516_v50  ;;  %v5537_v56 = vadd.f32 0.5, %v7470_v27  ;;  %v136_v58 = vsub.f32 1.5, %v7470_v27  ;;  %v6807_v47 = vld [vmem:[#allocation4 + $0x154] ss:$8 sps:$4 sm:$0xff]  }
  0x42   :  { %v141_v61 = vsub.f32 2.5, %v7470_v27  ;;  %v5546_v62 = vadd.f32 0.75, %v7473_v28  ;;  %v182_v1 = vsub.f32 0.75, %v7473_v28  ;;  %v187_v10 = vsub.f32 1.25, %v7473_v28 }
  0x43   :  { %v246_v29 = vpack.c.bf16 %v210_v19, %v210_v19  ;;  %v135_v60 = vmul.f32 %v5537_v56, %v7496_v4  ;;  %v5547_v4 = vadd.f32 0.25, %v7473_v28  ;;  %v5554_v12 = vadd.f32 0.8333333, %v7476_v30  ;;  %v6814_v56 = vld [vmem:[#allocation4 + $0x180] ss:$8 sps:$4 sm:$0xff]  }
  0x44   :  { %1178 = vmatpush1.bf16.msra.mxu0 %v6763_v24  ;;  %v171_v24 = vmul.f32 %v5544_v18, %v123_v52  ;;  %v6781_v52 = vld [vmem:[#allocation4 + $0xd0] ss:$8 sps:$4 sm:$0xff]   ;;  %v142_v6 = vmul.f32 %v141_v61, %v7519_v55  ;;  %v5555_v21 = vadd.f32 0.5, %v7476_v30  ;;  %v6825_v61 = vld [vmem:[#allocation4 + $0x1b4] ss:$8 sps:$4 sm:$0xff]   ;;  %vm7372_vm8 = vmmov 0  }
  0x45   :  { %1179 = vmatprep.subr.bf16.mxu0 %v6764_v31  ;;  %v133_v31 = vadd.f32 %v132_v20, %v130_v17  ;;  %247 = vst [vmem:[#allocation2 + $0x4] sm:$0xf] %v246_v29  ;;  %v7261_v39 = vpop.eup %7260  ;;  %v223_v17 = vsub.f32 0.5, %v7476_v30  ;;  %v6787_v18 = vld [vmem:[#allocation4 + $0xf0] ss:$8 sps:$4 sm:$0xff]  }
  0x46   :  { %v174_v37 = vadd.f32 %v173_v33, %v171_v24  ;;  %v70_v45 = vmul.f32 %v7261_v39, %v7456_v14  ;;  %vm91_vm9 = vcmp.ge.f32.partialorder %v7456_v14, 1.4  ;;  %vm93_vm10 = vcmp.ge.f32.partialorder %v7456_v14, 1.8 }
  0x47   :  { %v178_v35 = vmul.f32 %v177_v25, %v133_v31  ;;  %vm95_vm11 = vcmp.ge.f32.partialorder %v7456_v14, 2.2  ;;  %v5550_v14 = vadd.f32 -1.25, %v7473_v28 }
  0x48   :  { %1180 = vmatpush1.bf16.msra.mxu0 %v6766_v44  ;;  %v6779_v44 = vld [vmem:[#allocation4 + $0xd4] ss:$8 sps:$4 sm:$0xff]   ;;  %v71_v48 = vpack.c.bf16 %v70_v45, %v70_v45  ;;  %v217_v53 = vmul.f32 %v5553_v42, %v174_v37  ;;  %v6796_v42 = vld [vmem:[#allocation4 + $0x120] ss:$8 sps:$4 sm:$0xff]   ;;  %v6804_v45 = vld [vmem:[#allocation4 + $0x144] ss:$8 sps:$4 sm:$0xff]  }
  0x49   :  { %1181 = vmatprep.subr.bf16.mxu0 %v6767_v49  ;;  %v179_v41 = vadd.f32 %v178_v35, %v176_v34  ;;  %v214_v49 = vmul.f32 %v213_v38, %v174_v37  ;;  %v6789_v34 = vld [vmem:[#allocation4 + $0x100] ss:$8 sps:$4 sm:$0xff]   ;;  %v6795_v37 = vld [vmem:[#allocation4 + $0x114] ss:$8 sps:$4 sm:$0xff]  }
  0x4a   :  { %72 = vst [vmem:[#allocation2] sm:$0xf] %v71_v48  ;;  %v6805_v48 = vld [vmem:[#allocation4 + $0x150] ss:$8 sps:$4 sm:$0xff]  }
  0x4b   :  { %v219_v54 = vmul.f32 %v218_v43, %v179_v41  ;;  %v7528_v3 = vadd.f32 %v214_v49, %v212_v46  ;;  %v222_v25 = vmul.f32 %v5554_v12, %v179_v41  ;;  %v6798_v41 = vld [vmem:[#allocation4 + $0x124] ss:$8 sps:$4 sm:$0xff]   ;;  %v6801_v43 = vld [vmem:[#allocation4 + $0x134] ss:$8 sps:$4 sm:$0xff]   ;;  %v6802_v46 = vld [vmem:[#allocation4 + $0x140] ss:$8 sps:$4 sm:$0xff]  }
  0x4c   :  { %1182 = vmatpush1.bf16.msra.mxu0 %v6769_v59  ;;  %v5538_v59 = vadd.f32 -0.5, %v7470_v27  ;;  %v6810_v49 = vld [vmem:[#allocation4 + $0x164] ss:$8 sps:$4 sm:$0xff]  }
  0x4d   :  { %1183 = vmatprep.subr.bf16.mxu0 %v6770_v63  ;;  %v137_v63 = vmul.f32 %v136_v58, %v103_v51  ;;  %v220_v5 = vadd.f32 %v219_v54, %v217_v53  ;;  %v6811_v53 = vld [vmem:[#allocation4 + $0x170] ss:$8 sps:$4 sm:$0xff]   ;;  %v6816_v54 = vld [vmem:[#allocation4 + $0x184] ss:$8 sps:$4 sm:$0xff]  }
  0x4e   :  { %v140_v0 = vmul.f32 %v5538_v59, %v103_v51  ;;  %v6808_v51 = vld [vmem:[#allocation4 + $0x160] ss:$8 sps:$4 sm:$0xff]   ;;  %v6817_v58 = vld [vmem:[#allocation4 + $0x190] ss:$8 sps:$4 sm:$0xff]   ;;  %v6822_v59 = vld [vmem:[#allocation4 + $0x1a4] ss:$8 sps:$4 sm:$0xff]  }
  0x4f   :  { %v138_v8 = vadd.f32 %v137_v63, %v135_v60  ;;  %v7286_v35 = vpack.c.bf16 %v220_v5, %v220_v5  ;;  %v6820_v60 = vld [vmem:[#allocation4 + $0x1a0] ss:$8 sps:$4 sm:$0xff]   ;;  %v6828_v63 = vld [vmem:[#allocation4 + $0x1c4] ss:$8 sps:$4 sm:$0xff]   ;;  %v7551_v5 = vsel %vm93_vm10, 1.0, %v7370_v16 }
  0x50   :  { %1184 = vmatpush1.bf16.msra.mxu0 %v6772_v9  ;;  %v181_v9 = vmul.f32 %v5546_v62, %v133_v31  ;;  %v7533_v11 = vadd.f32 %v142_v6, %v140_v0  ;;  %v6823_v62 = vld [vmem:[#allocation4 + $0x1b0] ss:$8 sps:$4 sm:$0xff]   ;;  %v6826_v0 = vld [vmem:[#allocation4 + $0x1c0] ss:$8 sps:$4 sm:$0xff]  }
  0x51   :  { %1185 = vmatprep.subr.bf16.mxu0 %v6773_v13  ;;  %v183_v13 = vmul.f32 %v182_v1, %v138_v8  ;;  %v186_v15 = vmul.f32 %v5547_v4, %v138_v8  ;;  %v262_v19 = vld [vmem:[#allocation2] sm:$0xff]  ;;  %v5539_v8 = vadd.f32 -1.5, %v7470_v27  ;;  %v5540_v4 = vadd.f32 -2.5, %v7470_v27 }
  0x52   :  { %v188_v20 = vmul.f32 %v187_v10, %v7533_v11  ;;  %v5560_v22 = vcombine.high %v262_v19, %v262_v19  ;;  %v5559_v31 = vcombine.low %v262_v19, %v262_v19  ;;  %v6831_v1 = vld [vmem:[#allocation4 + $0x1d4] ss:$8 sps:$4 sm:$0xff]   ;;  %v151_v10 = vsub.f32 4.5, %v7470_v27 }
  0x53   :  { %v184_v24 = vadd.f32 %v183_v13, %v181_v9  ;;  %v146_v9 = vsub.f32 3.5, %v7470_v27  ;;  %v145_v12 = vmul.f32 %v5539_v8, %v7519_v55  ;;  %v6855_v8 = vld [vmem:[#allocation4 + $0x254] ss:$8 sps:$4 sm:$0xff]  }
  0x54   :  { %1186 = vmatpush1.bf16.msra.mxu0 %v6775_v26  ;;  %v228_v26 = vsub.f32 0.8333333, %v7476_v30  ;;  %v7540_v29 = vadd.f32 %v188_v20, %v186_v15  ;;  %1195 = vmatprep.mubr.bf16.mxu0 %v5560_v22  ;;  %v6829_v15 = vld [vmem:[#allocation4 + $0x1d0] ss:$8 sps:$4 sm:$0xff]   ;;  %v5548_v20 = vadd.f32 -0.25, %v7473_v28  ;;  %v5549_v22 = vadd.f32 -0.75, %v7473_v28 }
  0x55   :  { %1187 = vmatprep.subr.bf16.mxu0 %v6776_v32  ;;  %v224_v32 = vmul.f32 %v223_v17, %v184_v24  ;;  %v227_v33 = vmul.f32 %v5555_v21, %v184_v24  ;;  %v6834_v17 = vld [vmem:[#allocation4 + $0x1e4] ss:$8 sps:$4 sm:$0xff]   ;;  %v192_v21 = vsub.f32 1.75, %v7473_v28  ;;  %v197_v24 = vsub.f32 2.25, %v7473_v28 }
  0x56   :  { %v229_v36 = vmul.f32 %v228_v26, %v7540_v29  ;;  %v191_v55 = vmul.f32 %v5548_v20, %v7533_v11  ;;  %v6862_v20 = vld [vmem:[#allocation4 + $0x280] ss:$8 sps:$4 sm:$0xff]  }
  0x57   :  { %v7543_v38 = vadd.f32 %v224_v32, %v222_v25  ;;  %v6837_v32 = vld [vmem:[#allocation4 + $0x1f4] ss:$8 sps:$4 sm:$0xff]  }
  0x58   :  { %1188 = vmatpush1.bf16.msra.mxu0 %v6778_v40  ;;  %v7545_v39 = vadd.f32 %v229_v36, %v227_v33  ;;  %v6793_v40 = vld [vmem:[#allocation4 + $0x110] ss:$8 sps:$4 sm:$0xff]   ;;  %v233_v36 = vsub.f32 1.1666666, %v7476_v30 }
  0x59   :  { %1189 = vmatprep.subr.bf16.mxu0 %v6779_v44  ;;  %v6799_v44 = vld [vmem:[#allocation4 + $0x130] ss:$8 sps:$4 sm:$0xff]  }
  0x5c   :  { %1190 = vmatpush1.bf16.msra.mxu0 %v6781_v52  ;;  %v6813_v52 = vld [vmem:[#allocation4 + $0x174] ss:$8 sps:$4 sm:$0xff]  }
  0x5d   :  { %1191 = vmatprep.subr.bf16.mxu0 %v6782_v57  ;;  %v6819_v57 = vld [vmem:[#allocation4 + $0x194] ss:$8 sps:$4 sm:$0xff]  }
  0x60   :  { %1192 = vmatpush1.bf16.msra.mxu0 %v6784_v2  ;;  %v92_v2 = vsel %vm91_vm9, 1.0, %v7370_v16 }
  0x61   :  { %1193 = vmatprep.subr.bf16.mxu0 %v6785_v7  ;;  %v105_v6 = vsub.f32 %v7516_v50, %v92_v2  ;;  %v7555_v7 = vsub.f32 %v92_v2, %v7551_v5 }
  0x63   :  { %v147_v13 = vmul.f32 %v146_v9, %v105_v6  ;;  %v152_v50 = vmul.f32 %v151_v10, %v7555_v7  ;;  %v6853_v10 = vld [vmem:[#allocation4 + $0x250] ss:$8 sps:$4 sm:$0xff]  }
  0x64   :  { %1194 = vmatpush1.bf16.msra.mxu0 %v6787_v18  ;;  %v150_v18 = vmul.f32 %v5540_v4, %v105_v6  ;;  %v202_v6 = vsub.f32 2.75, %v7473_v28  ;;  %v6859_v28 = vld [vmem:[#allocation4 + $0x270] ss:$8 sps:$4 sm:$0xff]  }
  0x65   :  { %1204 = vmatprep.subr.bf16.mxu0 %v6791_v23  ;;  %v148_v19 = vadd.f32 %v147_v13, %v145_v12  ;;  %v6858_v12 = vld [vmem:[#allocation4 + $0x264] ss:$8 sps:$4 sm:$0xff]  }
  0x66   :  { %v153_v23 = vadd.f32 %v152_v50, %v150_v18  ;;  %v6861_v18 = vld [vmem:[#allocation4 + $0x274] ss:$8 sps:$4 sm:$0xff]  }
  0x67   :  { %1196 = vmatmul.mubr.bf16.vlgmr.msra.gmra.mrb[0].mxu0 %v5559_v31  ;;  %v193_v25 = vmul.f32 %v192_v21, %v148_v19  ;;  %v196_v26 = vmul.f32 %v5549_v22, %v148_v19  ;;  %v6832_v31 = vld [vmem:[#allocation4 + $0x1e0] ss:$8 sps:$4 sm:$0xff]   ;;  %v6864_v19 = vld [vmem:[#allocation4 + $0x284] ss:$8 sps:$4 sm:$0xff]   ;;  %v6867_v21 = vld [vmem:[#allocation4 + $0x294] ss:$8 sps:$4 sm:$0xff]  }
  0x68   :  { %1205 = vmatpush1.bf16.msra.mxu0 %v6789_v34  ;;  %1236 = vmatprep.mubr.bf16.mxu0 %v7286_v35  ;;  %v198_v33 = vmul.f32 %v197_v24, %v153_v23  ;;  %v5556_v35 = vadd.f32 0.16666667, %v7476_v30  ;;  %v6870_v22 = vld [vmem:[#allocation4 + $0x2a4] ss:$8 sps:$4 sm:$0xff]   ;;  %v6873_v24 = vld [vmem:[#allocation4 + $0x2b4] ss:$8 sps:$4 sm:$0xff]  }
  0x69   :  { %1206 = vmatprep.subr.bf16.mxu0 %v6795_v37  ;;  %v194_v34 = vadd.f32 %v193_v25, %v191_v55  ;;  %v5557_v37 = vadd.f32 -0.16666667, %v7476_v30  ;;  %v6871_v55 = vld [vmem:[#allocation4 + $0x2b0] ss:$8 sps:$4 sm:$0xff]   ;;  %v6876_v25 = vld [vmem:[#allocation4 + $0x2c4] ss:$8 sps:$4 sm:$0xff]  }
  0x6b   :  { %v234_v11 = vmul.f32 %v233_v36, %v194_v34  ;;  %v6883_v36 = vld [vmem:[#allocation4 + $0x2f0] ss:$8 sps:$4 sm:$0xff]  }
  0x6c   :  { %1207 = vmatpush1.bf16.msra.mxu0 %v6793_v40  ;;  %v199_v40 = vadd.f32 %v198_v33, %v196_v26  ;;  %v6874_v26 = vld [vmem:[#allocation4 + $0x2c0] ss:$8 sps:$4 sm:$0xff]   ;;  %v6882_v33 = vld [vmem:[#allocation4 + $0x2e4] ss:$8 sps:$4 sm:$0xff]  }
  0x6d   :  { %1208 = vmatprep.subr.bf16.mxu0 %v6798_v41  ;;  %v238_v41 = vsub.f32 1.5, %v7476_v30 }
  0x70   :  { %1209 = vmatpush1.bf16.msra.mxu0 %v6796_v42  ;;  %v232_v42 = vmul.f32 %v5556_v35, %v7540_v29  ;;  %v6843_v29 = vld [vmem:[#allocation4 + $0x214] ss:$8 sps:$4 sm:$0xff]  }
  0x71   :  { %1210 = vmatprep.subr.bf16.mxu0 %v6801_v43  ;;  %v237_v43 = vmul.f32 %v5557_v37, %v194_v34  ;;  %v6880_v34 = vld [vmem:[#allocation4 + $0x2e0] ss:$8 sps:$4 sm:$0xff]   ;;  %v6885_v35 = vld [vmem:[#allocation4 + $0x2f4] ss:$8 sps:$4 sm:$0xff]   ;;  %v6888_v37 = vld [vmem:[#allocation4 + $0x304] ss:$8 sps:$4 sm:$0xff]  }
  0x74   :  { %1211 = vmatpush1.bf16.msra.mxu0 %v6799_v44  ;;  %v6835_v44 = vld [vmem:[#allocation4 + $0x1f0] ss:$8 sps:$4 sm:$0xff]  }
  0x75   :  { %1212 = vmatprep.subr.bf16.mxu0 %v6804_v45  ;;  %v6840_v45 = vld [vmem:[#allocation4 + $0x204] ss:$8 sps:$4 sm:$0xff]  }
  0x78   :  { %1213 = vmatpush1.bf16.msra.mxu0 %v6802_v46  ;;  %v239_v46 = vmul.f32 %v238_v41, %v199_v40  ;;  %v7289_v41 = vpack.c.bf16 %v7543_v38, %v7543_v38  ;;  %v6898_v38 = vld [vmem:[#allocation4 + $0x340] ss:$8 sps:$4 sm:$0xff]  }
  0x79   :  { %1214 = vmatprep.subr.bf16.mxu0 %v6807_v47  ;;  %v7573_v47 = vadd.f32 %v234_v11, %v232_v42  ;;  %v6891_v42 = vld [vmem:[#allocation4 + $0x314] ss:$8 sps:$4 sm:$0xff]  }
  0x7c   :  { %1215 = vmatpush1.bf16.msra.mxu0 %v6805_v48  ;;  %v7575_v48 = vadd.f32 %v239_v46, %v237_v43  ;;  %v6889_v43 = vld [vmem:[#allocation4 + $0x310] ss:$8 sps:$4 sm:$0xff]   ;;  %v6897_v46 = vld [vmem:[#allocation4 + $0x334] ss:$8 sps:$4 sm:$0xff]  }
  0x7d   :  { %1216 = vmatprep.subr.bf16.mxu0 %v6810_v49  ;;  %v7287_v49 = vpack.c.bf16 %v7528_v3, %v7528_v3  ;;  %v6844_v3 = vld [vmem:[#allocation4 + $0x220] ss:$8 sps:$4 sm:$0xff]  }
  0x7e   :  { %v7290_v11 = vpack.c.bf16 %v7575_v48, %v7575_v48  ;;  %v6901_v48 = vld [vmem:[#allocation4 + $0x350] ss:$8 sps:$4 sm:$0xff]  }
  0x80   :  { %1217 = vmatpush1.bf16.msra.mxu0 %v6808_v51  ;;  %v6838_v51 = vld [vmem:[#allocation4 + $0x200] ss:$8 sps:$4 sm:$0xff]  }
  0x81   :  { %1218 = vmatprep.subr.bf16.mxu0 %v6813_v52  ;;  %v7288_v52 = vpack.c.bf16 %v7545_v39, %v7545_v39 }
  0x84   :  { %1219 = vmatpush1.bf16.msra.mxu0 %v6811_v53  ;;  %v6841_v53 = vld [vmem:[#allocation4 + $0x210] ss:$8 sps:$4 sm:$0xff]  }
  0x85   :  { %1220 = vmatprep.subr.bf16.mxu0 %v6816_v54  ;;  %v6846_v54 = vld [vmem:[#allocation4 + $0x224] ss:$8 sps:$4 sm:$0xff]  }
  0x88   :  { %1221 = vmatpush1.bf16.msra.mxu0 %v6814_v56  ;;  %v96_v56 = vsel %vm95_vm11, 1.0, %v7370_v16 }
  0x89   :  { %1222 = vmatprep.subr.bf16.mxu0 %v6819_v57  ;;  %v5541_v57 = vadd.f32 -3.5, %v7470_v27 }
  0x8b   :  { %v155_v39 = vmul.f32 %v5541_v57, %v7555_v7  ;;  %v6912_v57 = vld [vmem:[#allocation4 + $0x384] ss:$8 sps:$4 sm:$0xff]  }
  0x8c   :  { %1223 = vmatpush1.bf16.msra.mxu0 %v6817_v58  ;;  %v6849_v58 = vld [vmem:[#allocation4 + $0x234] ss:$8 sps:$4 sm:$0xff]  }
  0x8d   :  { %1224 = vmatprep.subr.bf16.mxu0 %v6822_v59  ;;  %v107_v59 = vsub.f32 %v7551_v5, %v96_v56  ;;  %v6850_v5 = vld [vmem:[#allocation4 + $0x240] ss:$8 sps:$4 sm:$0xff]   ;;  %v6907_v56 = vld [vmem:[#allocation4 + $0x370] ss:$8 sps:$4 sm:$0xff]  }
  0x90   :  { %1225 = vmatpush1.bf16.msra.mxu0 %v6820_v60  ;;  %v156_v60 = vsub.f32 5.5, %v7470_v27  ;;  %v243_v27 = vsub.f32 1.8333334, %v7476_v30 }
  0x91   :  { %1226 = vmatprep.subr.bf16.mxu0 %v6825_v61  ;;  %v6847_v61 = vld [vmem:[#allocation4 + $0x230] ss:$8 sps:$4 sm:$0xff]  }
  0x94   :  { %1227 = vmatpush1.bf16.msra.mxu0 %v6823_v62  ;;  %v6852_v62 = vld [vmem:[#allocation4 + $0x244] ss:$8 sps:$4 sm:$0xff]  }
  0x95   :  { %1228 = vmatprep.subr.bf16.mxu0 %v6828_v63  ;;  %v157_v63 = vmul.f32 %v156_v60, %v107_v59  ;;  %v6913_v59 = vld [vmem:[#allocation4 + $0x390] ss:$8 sps:$4 sm:$0xff]   ;;  %v6921_v60 = vld [vmem:[#allocation4 + $0x3b4] ss:$8 sps:$4 sm:$0xff]  }
  0x97   :  { %v158_v2 = vadd.f32 %v157_v63, %v155_v39  ;;  %v6918_v39 = vld [vmem:[#allocation4 + $0x3a4] ss:$8 sps:$4 sm:$0xff]   ;;  %v6922_v63 = vld [vmem:[#allocation4 + $0x3c0] ss:$8 sps:$4 sm:$0xff]  }
  0x98   :  { %1229 = vmatpush1.bf16.msra.mxu0 %v6826_v0  ;;  %v201_v0 = vmul.f32 %v5550_v14, %v153_v23  ;;  %v6868_v23 = vld [vmem:[#allocation4 + $0x2a0] ss:$8 sps:$4 sm:$0xff]  }
  0x99   :  { %1230 = vmatprep.subr.bf16.mxu0 %v6831_v1  ;;  %v5558_v1 = vadd.f32 -0.5, %v7476_v30  ;;  %v203_v9 = vmul.f32 %v202_v6, %v158_v2  ;;  %v6865_v30 = vld [vmem:[#allocation4 + $0x290] ss:$8 sps:$4 sm:$0xff]   ;;  %v6916_v14 = vld [vmem:[#allocation4 + $0x3a0] ss:$8 sps:$4 sm:$0xff]  }
  0x9a   :  { %v6930_v2 = vld [vmem:[#allocation4 + $0x3e4] ss:$8 sps:$4 sm:$0xff]   ;;  %v6928_v6 = vld [vmem:[#allocation4 + $0x3e0] ss:$8 sps:$4 sm:$0xff]  }
  0x9b   :  { %v242_v7 = vmul.f32 %v5558_v1, %v199_v40  ;;  %v204_v4 = vadd.f32 %v203_v9, %v201_v0  ;;  %v6886_v40 = vld [vmem:[#allocation4 + $0x300] ss:$8 sps:$4 sm:$0xff]   ;;  %v6927_v0 = vld [vmem:[#allocation4 + $0x3d4] ss:$8 sps:$4 sm:$0xff]   ;;  %v6925_v1 = vld [vmem:[#allocation4 + $0x3d0] ss:$8 sps:$4 sm:$0xff]  }
  0x9c   :  { %1231 = vmatpush1.bf16.msra.mxu0 %v6829_v15  ;;  %v6936_v9 = vld [vmem:[#allocation4 + $0x404] ss:$8 sps:$4 sm:$0xff]  }
  0x9d   :  { %1232 = vmatprep.subr.bf16.mxu0 %v6834_v17  ;;  %v244_v13 = vmul.f32 %v243_v27, %v204_v4  ;;  %v6856_v17 = vld [vmem:[#allocation4 + $0x260] ss:$8 sps:$4 sm:$0xff]   ;;  %v7291_v4 = vpack.c.bf16 %v7573_v47, %v7573_v47  ;;  %v6939_v27 = vld [vmem:[#allocation4 + $0x414] ss:$8 sps:$4 sm:$0xff]  }
  0x9e   :  { %v6951_v47 = vld [vmem:[#allocation4 + $0x454] ss:$8 sps:$4 sm:$0xff]  }
  0x9f   :  { %v245_v15 = vadd.f32 %v244_v13, %v242_v7  ;;  %v6934_v7 = vld [vmem:[#allocation4 + $0x400] ss:$8 sps:$4 sm:$0xff]   ;;  %v7371_v13 = vmov 0  }
  0xa0   :  { %1233 = vmatpush1.bf16.msra.mxu0 %v6832_v31  ;;  %v6879_v31 = vld [vmem:[#allocation4 + $0x2d4] ss:$8 sps:$4 sm:$0xff]  }
  0xa1   :  { %1234 = vmatprep.subr.bf16.mxu0 %v6837_v32  ;;  %v260_v50 = vpack.c.bf16 %v245_v15, %v245_v15  ;;  %v6877_v32 = vld [vmem:[#allocation4 + $0x2d0] ss:$8 sps:$4 sm:$0xff]   ;;  %v6940_v15 = vld [vmem:[#allocation4 + $0x420] ss:$8 sps:$4 sm:$0xff]  }
  0xa3   :  { %261 = vst [vmem:[#allocation2 + $0x20] sm:$0xf] %v260_v50  ;;  %v6948_v50 = vld [vmem:[#allocation4 + $0x444] ss:$8 sps:$4 sm:$0xff]  }
  0xa4   :  { %1235 = vmatpush1.bf16.msra.mxu0 %v6835_v44  ;;  %v6894_v44 = vld [vmem:[#allocation4 + $0x324] ss:$8 sps:$4 sm:$0xff]  }
  0xa5   :  { %1245 = vmatprep.subr.bf16.mxu0 %v6840_v45  ;;  %v6892_v45 = vld [vmem:[#allocation4 + $0x320] ss:$8 sps:$4 sm:$0xff]  }
  0xa7   :  { %1237 = vmatmul.mubr.bf16.vlgmr.msra.gmra.mrb[0].mxu0 %v7287_v49  ;;  %v6895_v49 = vld [vmem:[#allocation4 + $0x330] ss:$8 sps:$4 sm:$0xff]  }
  0xa8   :  { %1246 = vmatpush1.bf16.msra.mxu0 %v6838_v51  ;;  %1277 = vmatprep.mubr.bf16.mxu0 %v7288_v52  ;;  %v6900_v51 = vld [vmem:[#allocation4 + $0x344] ss:$8 sps:$4 sm:$0xff]   ;;  %v6903_v52 = vld [vmem:[#allocation4 + $0x354] ss:$8 sps:$4 sm:$0xff]  }
  0xa9   :  { %1247 = vmatprep.subr.bf16.mxu0 %v6843_v29  ;;  %v6906_v29 = vld [vmem:[#allocation4 + $0x364] ss:$8 sps:$4 sm:$0xff]  }
  0xac   :  { %1248 = vmatpush1.bf16.msra.mxu0 %v6841_v53  ;;  %v6904_v53 = vld [vmem:[#allocation4 + $0x360] ss:$8 sps:$4 sm:$0xff]  }
  0xad   :  { %1249 = vmatprep.subr.bf16.mxu0 %v6846_v54  ;;  %v6909_v54 = vld [vmem:[#allocation4 + $0x374] ss:$8 sps:$4 sm:$0xff]  }
  0xb0   :  { %1250 = vmatpush1.bf16.msra.mxu0 %v6844_v3  ;;  %v6910_v3 = vld [vmem:[#allocation4 + $0x380] ss:$8 sps:$4 sm:$0xff]  }
  0xb1   :  { %1251 = vmatprep.subr.bf16.mxu0 %v6849_v58  ;;  %v6915_v58 = vld [vmem:[#allocation4 + $0x394] ss:$8 sps:$4 sm:$0xff]  }
  0xb4   :  { %1252 = vmatpush1.bf16.msra.mxu0 %v6847_v61  ;;  %v6919_v61 = vld [vmem:[#allocation4 + $0x3b0] ss:$8 sps:$4 sm:$0xff]  }
  0xb5   :  { %1253 = vmatprep.subr.bf16.mxu0 %v6852_v62  ;;  %v6924_v62 = vld [vmem:[#allocation4 + $0x3c4] ss:$8 sps:$4 sm:$0xff]  }
  0xb8   :  { %1254 = vmatpush1.bf16.msra.mxu0 %v6850_v5  ;;  %v6933_v5 = vld [vmem:[#allocation4 + $0x3f4] ss:$8 sps:$4 sm:$0xff]  }
  0xb9   :  { %1255 = vmatprep.subr.bf16.mxu0 %v6855_v8  ;;  %v6931_v8 = vld [vmem:[#allocation4 + $0x3f0] ss:$8 sps:$4 sm:$0xff]  }
  0xbc   :  { %1256 = vmatpush1.bf16.msra.mxu0 %v6853_v10  ;;  %v6937_v10 = vld [vmem:[#allocation4 + $0x410] ss:$8 sps:$4 sm:$0xff]  }
  0xbd   :  { %1257 = vmatprep.subr.bf16.mxu0 %v6858_v12  ;;  %v6942_v12 = vld [vmem:[#allocation4 + $0x424] ss:$8 sps:$4 sm:$0xff]  }
  0xc0   :  { %1258 = vmatpush1.bf16.msra.mxu0 %v6856_v17  ;;  %v6945_v17 = vld [vmem:[#allocation4 + $0x434] ss:$8 sps:$4 sm:$0xff]  }
  0xc1   :  { %1259 = vmatprep.subr.bf16.mxu0 %v6861_v18  ;;  %v6943_v18 = vld [vmem:[#allocation4 + $0x430] ss:$8 sps:$4 sm:$0xff]  }
  0xc4   :  { %1260 = vmatpush1.bf16.msra.mxu0 %v6859_v28  ;;  %v6946_v28 = vld [vmem:[#allocation4 + $0x440] ss:$8 sps:$4 sm:$0xff]  }
  0xc5   :  { %1261 = vmatprep.subr.bf16.mxu0 %v6864_v19  ;;  %v6949_v19 = vld [vmem:[#allocation4 + $0x450] ss:$8 sps:$4 sm:$0xff]  }
  0xc8   :  { %1262 = vmatpush1.bf16.msra.mxu0 %v6862_v20  ;;  %v6954_v20 = vld [vmem:[#allocation4 + $0x464] ss:$8 sps:$4 sm:$0xff]  }
  0xc9   :  { %1263 = vmatprep.subr.bf16.mxu0 %v6867_v21  ;;  %v6952_v21 = vld [vmem:[#allocation4 + $0x460] ss:$8 sps:$4 sm:$0xff]  }
  0xcc   :  { %1264 = vmatpush1.bf16.msra.mxu0 %v6865_v30  ;;  %v6957_v30 = vld [vmem:[#allocation4 + $0x474] ss:$8 sps:$4 sm:$0xff]  }
  0xcd   :  { %1265 = vmatprep.subr.bf16.mxu0 %v6870_v22  ;;  %v6955_v22 = vld [vmem:[#allocation4 + $0x470] ss:$8 sps:$4 sm:$0xff]  }
  0xd0   :  { %1266 = vmatpush1.bf16.msra.mxu0 %v6868_v23  ;;  %v6958_v23 = vld [vmem:[#allocation2 + $0x20] ss:$0 sps:$4 sm:$0xff]  }
  0xd1   :  { %1267 = vmatprep.subr.bf16.mxu0 %v6873_v24 }
  0xd4   :  { %1268 = vmatpush1.bf16.msra.mxu0 %v6871_v55 }
  0xd5   :  { %1269 = vmatprep.subr.bf16.mxu0 %v6876_v25 }
  0xd8   :  { %1270 = vmatpush1.bf16.msra.mxu0 %v6874_v26 }
  0xd9   :  { %1271 = vmatprep.subr.bf16.mxu0 %v6879_v31 }
  0xdc   :  { %1272 = vmatpush1.bf16.msra.mxu0 %v6877_v32  ;;  %v6959_v32 = vld [vmem:[%s8946_s4 + $0x40] sm:$0xff]  }
  0xdd   :  { %1273 = vmatprep.subr.bf16.mxu0 %v6882_v33  ;;  %v6960_v33 = vld [vmem:[%s8946_s4] sm:$0xff]   ;;  %6246 = vmatprep.subr.bf16.mxu1 %v6959_v32 }
  0xde   :  { %6247 = vmatpush3.bf16.msra.mxu1 %v6960_v33 }
  0xe0   :  { %1274 = vmatpush1.bf16.msra.mxu0 %v6880_v34  ;;  %v6961_v34 = vld [vmem:[%s8946_s4 + $0x48] sm:$0xff]  }
  0xe1   :  { %1275 = vmatprep.subr.bf16.mxu0 %v6885_v35  ;;  %v6962_v35 = vld [vmem:[%s8946_s4 + $0x8] sm:$0xff]   ;;  %6248 = vmatprep.subr.bf16.mxu1 %v6961_v34 }
  0xe2   :  { %6249 = vmatpush3.bf16.msra.mxu1 %v6962_v35 }
  0xe4   :  { %1276 = vmatpush1.bf16.msra.mxu0 %v6883_v36  ;;  %v6963_v36 = vld [vmem:[%s8946_s4 + $0x50] sm:$0xff]  }
  0xe5   :  { %1286 = vmatprep.subr.bf16.mxu0 %v6888_v37  ;;  %v6964_v37 = vld [vmem:[%s8946_s4 + $0x10] sm:$0xff]   ;;  %6250 = vmatprep.subr.bf16.mxu1 %v6963_v36 }
  0xe6   :  { %6251 = vmatpush3.bf16.msra.mxu1 %v6964_v37 }
  0xe7   :  { %1278 = vmatmul.mubr.bf16.vlgmr.msra.gmra.mrb[0].mxu0 %v7289_v41  ;;  %v6966_v41 = vld [vmem:[%s8946_s4 + $0x18] sm:$0xff]  }
  0xe8   :  { %1287 = vmatpush1.bf16.msra.mxu0 %v6886_v40  ;;  %1318 = vmatprep.mubr.bf16.mxu0 %v7290_v11  ;;  %v6965_v40 = vld [vmem:[%s8946_s4 + $0x58] sm:$0xff]   ;;  %v6968_v11 = vld [vmem:[%s8946_s4 + $0x20] sm:$0xff]  }
  0xe9   :  { %1288 = vmatprep.subr.bf16.mxu0 %v6891_v42  ;;  %6252 = vmatprep.subr.bf16.mxu1 %v6965_v40  ;;  %v6967_v42 = vld [vmem:[%s8946_s4 + $0x60] sm:$0xff]  }
  0xea   :  { %6253 = vmatpush3.bf16.msra.mxu1 %v6966_v41 }
  0xeb   :  { %6254 = vmatprep.subr.bf16.mxu1 %v6967_v42 }
  0xec   :  { %1289 = vmatpush1.bf16.msra.mxu0 %v6889_v43  ;;  %v6969_v43 = vld [vmem:[%s8946_s4 + $0x68] sm:$0xff]  }
  0xed   :  { %1290 = vmatprep.subr.bf16.mxu0 %v6894_v44  ;;  %v6970_v44 = vld [vmem:[%s8946_s4 + $0x28] sm:$0xff]  }
  0xee   :  { %6255 = vmatpush3.bf16.msra.mxu1 %v6968_v11 }
  0xef   :  { %6256 = vmatprep.subr.bf16.mxu1 %v6969_v43 }
  0xf0   :  { %1291 = vmatpush1.bf16.msra.mxu0 %v6892_v45  ;;  %v6971_v45 = vld [vmem:[%s8946_s4 + $0x70] sm:$0xff]  }
  0xf1   :  { %1292 = vmatprep.subr.bf16.mxu0 %v6897_v46  ;;  %v6972_v46 = vld [vmem:[%s8946_s4 + $0x30] sm:$0xff]  }
  0xf2   :  { %6257 = vmatpush3.bf16.msra.mxu1 %v6970_v44 }
  0xf3   :  { %6258 = vmatprep.subr.bf16.mxu1 %v6971_v45 }
  0xf4   :  { %1293 = vmatpush1.bf16.msra.mxu0 %v6895_v49  ;;  %v6973_v49 = vld [vmem:[%s8946_s4 + $0x78] sm:$0xff]  }
  0xf5   :  { %1294 = vmatprep.subr.bf16.mxu0 %v6900_v51  ;;  %v6974_v51 = vld [vmem:[%s8946_s4 + $0x38] sm:$0xff]  }
  0xf6   :  { %6259 = vmatpush3.bf16.msra.mxu1 %v6972_v46 }
  0xf7   :  { %6260 = vmatprep.subr.bf16.mxu1 %v6973_v49 }
  0xf8   :  { %1295 = vmatpush1.bf16.msra.mxu0 %v6898_v38  ;;  %v6976_v38 = vld [vmem:[%s8946_s4 + $0xc0] sm:$0xff]  }
  0xf9   :  { %1296 = vmatprep.subr.bf16.mxu0 %v6903_v52 }
  0xfa   :  { %6261 = vmatpush3.bf16.msra.mxu1 %v6974_v51 }
  0xfb   :  { %6268 = vmatprep.subr.bf16.mxu1 %v6976_v38 }
  0xfc   :  { %1297 = vmatpush1.bf16.msra.mxu0 %v6901_v48 }
  0xfd   :  { %1298 = vmatprep.subr.bf16.mxu0 %v6906_v29 }
 0x100   :  { %1299 = vmatpush1.bf16.msra.mxu0 %v6904_v53 }
 0x101   :  { %1300 = vmatprep.subr.bf16.mxu0 %v6909_v54 }
 0x104   :  { %1301 = vmatpush1.bf16.msra.mxu0 %v6907_v56 }
 0x105   :  { %1302 = vmatprep.subr.bf16.mxu0 %v6912_v57 }
 0x108   :  { %1303 = vmatpush1.bf16.msra.mxu0 %v6910_v3 }
 0x109   :  { %1304 = vmatprep.subr.bf16.mxu0 %v6915_v58 }
 0x10c   :  { %1305 = vmatpush1.bf16.msra.mxu0 %v6913_v59  ;;  %v5712_v59 = vld [vmem:[%s8944_s2] ss:$0 sm:$0xff] }
 0x10d   :  { %1306 = vmatprep.subr.bf16.mxu0 %v6918_v39 }
 0x110   :  { %1307 = vmatpush1.bf16.msra.mxu0 %v6916_v14  ;;  %v5713_v14 = vld [vmem:[%s8945_s3] ss:$0 sm:$0xff] }
 0x111   :  { %1308 = vmatprep.subr.bf16.mxu0 %v6921_v60 }
 0x114   :  { %1309 = vmatpush1.bf16.msra.mxu0 %v6919_v61 }
 0x115   :  { %1310 = vmatprep.subr.bf16.mxu0 %v6924_v62 }
 0x118   :  { %1311 = vmatpush1.bf16.msra.mxu0 %v6922_v63 }
 0x119   :  { %1312 = vmatprep.subr.bf16.mxu0 %v6927_v0 }
 0x11c   :  { %1313 = vmatpush1.bf16.msra.mxu0 %v6925_v1 }
 0x11d   :  { %1314 = vmatprep.subr.bf16.mxu0 %v6930_v2 }
 0x120   :  { %1315 = vmatpush1.bf16.msra.mxu0 %v6928_v6 }
 0x121   :  { %1316 = vmatprep.subr.bf16.mxu0 %v6933_v5 }
 0x124   :  { %1317 = vmatpush1.bf16.msra.mxu0 %v6931_v8 }
 0x125   :  { %1327 = vmatprep.subr.bf16.mxu0 %v6936_v9 }
 0x127   :  { %1319 = vmatmul.mubr.bf16.vlgmr.msra.gmra.mrb[0].mxu0 %v7291_v4 }
 0x128   :  { %1328 = vmatpush1.bf16.msra.mxu0 %v6934_v7  ;;  %1359 = vmatprep.mubr.bf16.mxu0 %v7371_v13 }
 0x129   :  { %1329 = vmatprep.subr.bf16.mxu0 %v6939_v27 }
 0x12c   :  { %1330 = vmatpush1.bf16.msra.mxu0 %v6937_v10 }
 0x12d   :  { %1331 = vmatprep.subr.bf16.mxu0 %v6942_v12 }
 0x130   :  { %1332 = vmatpush1.bf16.msra.mxu0 %v6940_v15 }
 0x131   :  { %1333 = vmatprep.subr.bf16.mxu0 %v6945_v17 }
 0x134   :  { %1334 = vmatpush1.bf16.msra.mxu0 %v6943_v18 }
 0x135   :  { %1335 = vmatprep.subr.bf16.mxu0 %v6948_v50 }
 0x138   :  { %1336 = vmatpush1.bf16.msra.mxu0 %v6946_v28 }
 0x139   :  { %1337 = vmatprep.subr.bf16.mxu0 %v6951_v47 }
 0x13c   :  { %1338 = vmatpush1.bf16.msra.mxu0 %v6949_v19 }
 0x13d   :  { %1339 = vmatprep.subr.bf16.mxu0 %v6954_v20 }
 0x140   :  { %1340 = vmatpush1.bf16.msra.mxu0 %v6952_v21 }
 0x141   :  { %1341 = vmatprep.subr.bf16.mxu0 %v6957_v30 }
 0x144   :  { %1342 = vmatpush1.bf16.msra.mxu0 %v6955_v22 }
 0x145   :  { %6654 = vmatprep.subr.bf16.mxu0 %v7370_v16 }
 0x147   :  { %1360 = vmatmul.mubr.bf16.vlgmr.msra.gmra.mrb[0].mxu0 %v6958_v23 }
 0x148   :  { %6670 = vmatprep.mubr.msk.bf16.mxu0 %vm7372_vm8, %v7370_v16 }
 0x21a   :  { %v1361_v24 = vpop.f32.mrb[0].mxu0 }
 0x21b   :  { %1370 = vadd.xlane.f32.xlu0 %v1361_v24  ;;  %v7598_v55 = vpop.f32.mrb[1].mxu0  ;;  %v1372_v31 = vmul.f32 %v1361_v24, %v1361_v24 }
 0x21c   :  { %v1365_v25 = vpop.f32.mrb[2].mxu0 }
 0x21d   :  { %v1366_v26 = vpop.f32.mrb[3].mxu0 }
 0x21f   :  { %1373 = vadd.xlane.f32.xlu0 %v1372_v31 }
 0x223   :  { %1395 = vadd.xlane.f32.xlu0 %v7598_v55 }
 0x2a8   :  { %v1371_v52 = vpop.xlane.xlu0 %1370 }
 0x2a9   :  { %v1375_v48 = vmul.f32 0.0625, %v1371_v52 }
 0x2ab   :  { %v1377_v53 = vmul.f32 %v1375_v48, %v1375_v48  ;;  %v1379_v3 = vsub.f32 %v1361_v24, %v1375_v48 }
 0x2ac   :  { %v1374_v29 = vpop.xlane.xlu0 %1373 }
 0x2ad   :  { %v1376_v54 = vmul.f32 0.0625, %v1374_v29 }
 0x2af   :  { %v1378_v56 = vsub.f32 %v1376_v54, %v1377_v53 }
 0x2b1   :  { %v1380_v57 = vadd.f32 1e-05, %v1378_v56 }
 0x2b3   :  { %7262 = vrsqrt.f32 %v1380_v57 }
 0x2bd   :  { %v7263_v58 = vpop.eup %7262 }
 0x2be   :  { %v1382_v39 = vmul.f32 %v7263_v58, %v1379_v3 }
 0x2c0   :  { %v1387_v60 = vmul.f32 %v5712_v59, %v1382_v39 }
 0x2c2   :  { %v7658_v61 = vadd.f32 %v5713_v14, %v1387_v60 }
 0x2c4   :  { %v7661_v62 = vmul.f32 2.5, %v7658_v61  ;;  %v7664_v63 = vmul.f32 1.25, %v7658_v61  ;;  %v7667_v0 = vmul.f32 0.8333333, %v7658_v61  ;;  %v5716_v1 = vmul.f32 -1.442695, %v7658_v61 }
 0x2c5   :  { %vm1428_vm12 = vcmp.ge.f32.partialorder %v7658_v61, -2.2  ;;  %vm1430_vm13 = vcmp.ge.f32.partialorder %v7658_v61, -1.8  ;;  %vm1432_vm14 = vcmp.ge.f32.partialorder %v7658_v61, -1.4 }
 0x2c6   :  { %7264 = vpow2.f32 %v5716_v1  ;;  %v1429_v2 = vsel %vm1428_vm12, 1.0, %v7370_v16  ;;  %v1431_v6 = vsel %vm1430_vm13, 1.0, %v7370_v16  ;;  %v1433_v5 = vsel %vm1432_vm14, 1.0, %v7370_v16 }
 0x2c7   :  { %vm1434_vm15 = vcmp.ge.f32.partialorder %v7658_v61, -1.0  ;;  %vm1436_vm0 = vcmp.ge.f32.partialorder %v7658_v61, -0.6  ;;  %v1452_v8 = vsub.f32 %v1429_v2, %v1431_v6  ;;  %v1453_v9 = vsub.f32 %v1431_v6, %v1433_v5 }
 0x2c8   :  { %v1435_v7 = vsel %vm1434_vm15, 1.0, %v7370_v16  ;;  %v1437_v4 = vsel %vm1436_vm0, 1.0, %v7370_v16  ;;  %v5717_v27 = vadd.f32 5.5, %v7661_v62  ;;  %v1466_v10 = vsub.f32 -3.5, %v7661_v62 }
 0x2c9   :  { %v1454_v12 = vsub.f32 %v1433_v5, %v1435_v7  ;;  %v1455_v13 = vsub.f32 %v1435_v7, %v1437_v4  ;;  %v5718_v15 = vadd.f32 4.5, %v7661_v62  ;;  %v1471_v17 = vsub.f32 -2.5, %v7661_v62 }
 0x2ca   :  { %v1465_v18 = vmul.f32 %v5717_v27, %v1452_v8  ;;  %v1467_v50 = vmul.f32 %v1466_v10, %v1453_v9  ;;  %v5719_v28 = vadd.f32 3.5, %v7661_v62  ;;  %v1476_v47 = vsub.f32 -1.5, %v7661_v62 }
 0x2cb   :  { %v1470_v19 = vmul.f32 %v5718_v15, %v1453_v9  ;;  %v1472_v20 = vmul.f32 %v1471_v17, %v1454_v12  ;;  %v5727_v21 = vadd.f32 2.75, %v7664_v63  ;;  %v1517_v24 = vsub.f32 -1.25, %v7664_v63 }
 0x2cc   :  { %v1468_v30 = vadd.f32 %v1467_v50, %v1465_v18  ;;  %v1475_v22 = vmul.f32 %v5719_v28, %v1454_v12  ;;  %v1477_v23 = vmul.f32 %v1476_v47, %v1455_v13  ;;  %v5728_v26 = vadd.f32 2.25, %v7664_v63 }
 0x2cd   :  { %v1473_v25 = vadd.f32 %v1472_v20, %v1470_v19  ;;  %v1522_v31 = vsub.f32 -0.75, %v7664_v63  ;;  %v5736_v32 = vadd.f32 1.8333334, %v7667_v0  ;;  %vm1438_vm1 = vcmp.ge.f32.partialorder %v7658_v61, -0.2 }
 0x2ce   :  { %v1478_v33 = vadd.f32 %v1477_v23, %v1475_v22  ;;  %v1516_v34 = vmul.f32 %v5727_v21, %v1468_v30  ;;  %vm1440_vm2 = vcmp.ge.f32.partialorder %v7658_v61, 0.2  ;;  %v1439_v37 = vsel %vm1438_vm1, 1.0, %v7370_v16 }
 0x2cf   :  { %v1518_v35 = vmul.f32 %v1517_v24, %v1473_v25  ;;  %v1521_v36 = vmul.f32 %v5728_v26, %v1473_v25  ;;  %v1441_v40 = vsel %vm1440_vm2, 1.0, %v7370_v16  ;;  %v1456_v11 = vsub.f32 %v1437_v4, %v1439_v37 }
 0x2d0   :  { %v7265_v41 = vpop.eup %7264  ;;  %v1523_v42 = vmul.f32 %v1522_v31, %v1478_v33  ;;  %v1457_v43 = vsub.f32 %v1439_v37, %v1441_v40  ;;  %v5720_v44 = vadd.f32 2.5, %v7661_v62  ;;  %v1481_v49 = vsub.f32 -0.5, %v7661_v62 }
 0x2d1   :  { %v1422_v45 = vadd.f32 1.0, %v7265_v41  ;;  %v1519_v46 = vadd.f32 %v1518_v35, %v1516_v34  ;;  %v5721_v51 = vadd.f32 1.5, %v7661_v62  ;;  %v1563_v52 = vsub.f32 -0.5, %v7667_v0 }
 0x2d2   :  { %v1524_v38 = vadd.f32 %v1523_v42, %v1521_v36  ;;  %v1480_v48 = vmul.f32 %v5720_v44, %v1455_v13  ;;  %v1486_v29 = vsub.f32 0.5, %v7661_v62  ;;  %v1482_v54 = vmul.f32 %v1481_v49, %v1456_v11 }
 0x2d3   :  { %7266 = vrcp.f32 %v1422_v45  ;;  %v1562_v53 = vmul.f32 %v5736_v32, %v1519_v46  ;;  %v1485_v56 = vmul.f32 %v5721_v51, %v1456_v11  ;;  %v5729_v59 = vadd.f32 1.75, %v7664_v63 }
 0x2d4   :  { %v1564_v57 = vmul.f32 %v1563_v52, %v1524_v38  ;;  %v1487_v3 = vmul.f32 %v1486_v29, %v1457_v43  ;;  %v1483_v58 = vadd.f32 %v1482_v54, %v1480_v48  ;;  %v1527_v39 = vsub.f32 -0.25, %v7664_v63 }
 0x2d5   :  { %v5730_v14 = vadd.f32 1.25, %v7664_v63  ;;  %v1532_v2 = vsub.f32 0.25, %v7664_v63  ;;  %v1526_v6 = vmul.f32 %v5729_v59, %v1478_v33  ;;  %vm1442_vm3 = vcmp.ge.f32.partialorder %v7658_v61, 0.6 }
 0x2d6   :  { %v1565_v60 = vadd.f32 %v1564_v57, %v1562_v53  ;;  %v7703_v1 = vadd.f32 %v1487_v3, %v1485_v56  ;;  %v1528_v5 = vmul.f32 %v1527_v39, %v1483_v58  ;;  %vm1444_vm4 = vcmp.ge.f32.partialorder %v7658_v61, 1.0 }
 0x2d7   :  { %v1531_v8 = vmul.f32 %v5730_v14, %v1483_v58  ;;  %v1443_v4 = vsel %vm1442_vm3, 1.0, %v7370_v16  ;;  %v1445_v27 = vsel %vm1444_vm4, 1.0, %v7370_v16  ;;  %v5722_v10 = vadd.f32 0.5, %v7661_v62 }
 0x2d8   :  { %v1601_v9 = vpack.c.bf16 %v1565_v60, %v1565_v60  ;;  %v1533_v7 = vmul.f32 %v1532_v2, %v7703_v1  ;;  %v1458_v12 = vsub.f32 %v1441_v40, %v1443_v4  ;;  %v1459_v13 = vsub.f32 %v1443_v4, %v1445_v27  ;;  %v6978_v2 = vld [vmem:[%s8946_s4 + $0x80] sm:$0xff]  }
 0x2d9   :  { %v1491_v15 = vsub.f32 1.5, %v7661_v62  ;;  %v1529_v17 = vadd.f32 %v1528_v5, %v1526_v6  ;;  %v5723_v18 = vadd.f32 -0.5, %v7661_v62  ;;  %v1490_v28 = vmul.f32 %v5722_v10, %v1457_v43 }
 0x2da   :  { %1602 = vst [vmem:[#allocation2 + $0x4] sm:$0xf] %v1601_v9  ;;  %v7714_v50 = vadd.f32 %v1533_v7, %v1531_v8  ;;  %v1496_v19 = vsub.f32 2.5, %v7661_v62  ;;  %v5737_v21 = vadd.f32 1.5, %v7667_v0  ;;  %v1568_v30 = vsub.f32 -0.16666667, %v7667_v0 }
 0x2db   :  { %v1492_v47 = vmul.f32 %v1491_v15, %v1458_v12  ;;  %v5738_v22 = vadd.f32 1.1666666, %v7667_v0  ;;  %v1495_v23 = vmul.f32 %v5723_v18, %v1458_v12  ;;  %v1573_v25 = vsub.f32 0.16666667, %v7667_v0  ;;  %v6979_v8 = vld [vmem:[%s8946_s4 + $0xc8] sm:$0xff]  }
 0x2dc   :  { %v1497_v26 = vmul.f32 %v1496_v19, %v1459_v13  ;;  %v1567_v31 = vmul.f32 %v5737_v21, %v1524_v38  ;;  %v1569_v32 = vmul.f32 %v1568_v30, %v1529_v17  ;;  %v5732_v40 = vadd.f32 0.25, %v7664_v63  ;;  %v6981_v21 = vld [vmem:[%s8946_s4 + $0xd0] sm:$0xff]  }
 0x2dd   :  { %v7267_v20 = vpop.eup %7266  ;;  %v1572_v33 = vmul.f32 %v5738_v22, %v1529_v17  ;;  %v1574_v35 = vmul.f32 %v1573_v25, %v7714_v50  ;;  %v7723_v36 = vadd.f32 %v1492_v47, %v1490_v28  ;;  %v1542_v41 = vsub.f32 1.25, %v7664_v63  ;;  %v6980_v28 = vld [vmem:[%s8946_s4 + $0x88] sm:$0xff]  }
 0x2de   :  { %v1425_v24 = vmul.f32 %v7267_v20, %v7658_v61  ;;  %v1498_v37 = vadd.f32 %v1497_v26, %v1495_v23  ;;  %v7727_v42 = vadd.f32 %v1569_v32, %v1567_v31  ;;  %vm1446_vm5 = vcmp.ge.f32.partialorder %v7658_v61, 1.4 }
 0x2df   :  { %vm1448_vm6 = vcmp.ge.f32.partialorder %v7658_v61, 1.8  ;;  %v1575_v11 = vadd.f32 %v1574_v35, %v1572_v33  ;;  %v1541_v43 = vmul.f32 %v5732_v40, %v7723_v36  ;;  %v1447_v45 = vsel %vm1446_vm5, 1.0, %v7370_v16 }
 0x2e0   :  { %v1426_v34 = vpack.c.bf16 %v1425_v24, %v1425_v24  ;;  %v1543_v44 = vmul.f32 %v1542_v41, %v1498_v37  ;;  %v1449_v46 = vsel %vm1448_vm6, 1.0, %v7370_v16  ;;  %vm1450_vm7 = vcmp.ge.f32.partialorder %v7658_v61, 2.2  ;;  %v6983_v41 = vld [vmem:[%s8946_s4 + $0xd8] sm:$0xff]  }
 0x2e1   :  { %v1460_v49 = vsub.f32 %v1445_v27, %v1447_v45  ;;  %v5724_v51 = vadd.f32 -1.5, %v7661_v62  ;;  %v1461_v38 = vsub.f32 %v1447_v45, %v1449_v46  ;;  %v1501_v48 = vsub.f32 3.5, %v7661_v62 }
 0x2e2   :  { %1427 = vst [vmem:[#allocation2] sm:$0xf] %v1426_v34  ;;  %v5725_v29 = vadd.f32 -2.5, %v7661_v62  ;;  %v1506_v53 = vsub.f32 4.5, %v7661_v62  ;;  %v7739_v54 = vadd.f32 %v1543_v44, %v1541_v43  ;;  %v1451_v56 = vsel %vm1450_vm7, 1.0, %v7370_v16  ;;  %v6982_v34 = vld [vmem:[%s8946_s4 + $0x90] sm:$0xff]  }
 0x2e3   :  { %v1500_v52 = vmul.f32 %v5724_v51, %v1459_v13  ;;  %v5733_v57 = vadd.f32 -0.25, %v7664_v63  ;;  %v1502_v58 = vmul.f32 %v1501_v48, %v1460_v49  ;;  %v1547_v39 = vsub.f32 1.75, %v7664_v63 }
 0x2e4   :  { %v1505_v61 = vmul.f32 %v5725_v29, %v1460_v49  ;;  %v1507_v59 = vmul.f32 %v1506_v53, %v1461_v38  ;;  %v5734_v5 = vadd.f32 -0.75, %v7664_v63  ;;  %v1552_v4 = vsub.f32 2.25, %v7664_v63  ;;  %v6984_v49 = vld [vmem:[%s8946_s4 + $0x98] sm:$0xff]   ;;  %v6985_v29 = vld [vmem:[%s8946_s4 + $0xe0] sm:$0xff]  }
 0x2e5   :  { %v1546_v6 = vmul.f32 %v5733_v57, %v1498_v37  ;;  %v1503_v9 = vadd.f32 %v1502_v58, %v1500_v52  ;;  %v5741_v27 = vadd.f32 0.16666667, %v7667_v0  ;;  %v7292_v10 = vpack.c.bf16 %v1575_v11, %v1575_v11  ;;  %v6987_v58 = vld [vmem:[%s8946_s4 + $0xe8] sm:$0xff]  }
 0x2e6   :  { %v1508_v7 = vadd.f32 %v1507_v59, %v1505_v61  ;;  %v1462_v12 = vsub.f32 %v1449_v46, %v1451_v56  ;;  %v1588_v47 = vsub.f32 1.1666666, %v7667_v0  ;;  %v5726_v19 = vadd.f32 -3.5, %v7661_v62 }
 0x2e7   :  { %v1548_v13 = vmul.f32 %v1547_v39, %v1503_v9  ;;  %v1551_v15 = vmul.f32 %v5734_v5, %v1503_v9  ;;  %v1587_v18 = vmul.f32 %v5741_v27, %v7739_v54  ;;  %v1511_v20 = vsub.f32 5.5, %v7661_v62 }
 0x2e8   :  { %v1553_v17 = vmul.f32 %v1552_v4, %v1508_v7  ;;  %v5742_v23 = vadd.f32 -0.16666667, %v7667_v0  ;;  %v1593_v24 = vsub.f32 1.5, %v7667_v0  ;;  %v1510_v25 = vmul.f32 %v5726_v19, %v1461_v38  ;;  %v7001_v19 = vld [vmem:[%s8946_s4 + $0x160] sm:$0xff]  }
 0x2e9   :  { %v1617_v3 = vld [vmem:[#allocation2] sm:$0xff]  ;;  %v1549_v30 = vadd.f32 %v1548_v13, %v1546_v6  ;;  %v1512_v26 = vmul.f32 %v1511_v20, %v1462_v12  ;;  %v5735_v31 = vadd.f32 -1.25, %v7664_v63  ;;  %v1557_v40 = vsub.f32 2.75, %v7664_v63  ;;  %v6995_v13 = vld [vmem:[%s8946_s4 + $0x148] sm:$0xff]  }
 0x2ea   :  { %v5745_v14 = vcombine.high %v1617_v3, %v1617_v3  ;;  %v5744_v60 = vcombine.low %v1617_v3, %v1617_v3  ;;  %v1554_v22 = vadd.f32 %v1553_v17, %v1551_v15  ;;  %v5743_v45 = vadd.f32 -0.5, %v7667_v0  ;;  %v6986_v3 = vld [vmem:[%s8946_s4 + $0xa0] sm:$0xff]   ;;  %v6996_v17 = vld [vmem:[%s8946_s4 + $0x108] sm:$0xff]  }
 0x2eb   :  { %v1589_v62 = vmul.f32 %v1588_v47, %v1549_v30  ;;  %v1592_v32 = vmul.f32 %v5742_v23, %v1549_v30  ;;  %v1513_v35 = vadd.f32 %v1512_v26, %v1510_v25  ;;  %v1556_v37 = vmul.f32 %v5735_v31, %v1508_v7  ;;  %v6990_v7 = vld [vmem:[%s8946_s4 + $0xb0] sm:$0xff]   ;;  %v7000_v47 = vld [vmem:[%s8946_s4 + $0x118] sm:$0xff]   ;;  %v7002_v20 = vld [vmem:[%s8946_s4 + $0x120] sm:$0xff]  }
 0x2ec   :  { %2262 = vmatprep.mubr.bf16.mxu1 %v5745_v14  ;;  %v1594_v33 = vmul.f32 %v1593_v24, %v1554_v22  ;;  %v5731_v46 = vadd.f32 0.75, %v7664_v63  ;;  %v1537_v51 = vsub.f32 0.75, %v7664_v63  ;;  %v1597_v52 = vmul.f32 %v5743_v45, %v1554_v22  ;;  %v7004_v30 = vld [vmem:[%s8946_s4 + $0x128] sm:$0xff]   ;;  %v7005_v22 = vld [vmem:[%s8946_s4 + $0x170] sm:$0xff]   ;;  %v7007_v24 = vld [vmem:[%s8946_s4 + $0x178] sm:$0xff]  }
 0x2ed   :  { %2263 = vmatmul.mubr.bf16.vlgmr.msra.gmra.mrb[0].mxu1 %v5744_v60  ;;  %v7775_v11 = vadd.f32 %v1589_v62, %v1587_v18  ;;  %v1558_v44 = vmul.f32 %v1557_v40, %v1513_v35  ;;  %v1598_v48 = vsub.f32 1.8333334, %v7667_v0  ;;  %v1578_v39 = vsub.f32 0.5, %v7667_v0  ;;  %v6997_v18 = vld [vmem:[%s8946_s4 + $0x150] sm:$0xff]   ;;  %v7008_v25 = vld [vmem:[%s8946_s4 + $0x138] sm:$0xff]   ;;  %v7009_v26 = vld [vmem:[%s8946_s4 + $0x1c0] sm:$0xff]  }
 0x2ee   :  { %6269 = vmatpush3.bf16.msra.mxu1 %v6978_v2  ;;  %2302 = vmatprep.mubr.bf16.mxu1 %v7292_v10  ;;  %v7777_v43 = vadd.f32 %v1594_v33, %v1592_v32  ;;  %v1536_v53 = vmul.f32 %v5731_v46, %v7703_v1  ;;  %v1538_v56 = vmul.f32 %v1537_v51, %v7723_v36  ;;  %v6988_v1 = vld [vmem:[%s8946_s4 + $0xa8] sm:$0xff]   ;;  %v5739_v36 = vadd.f32 0.8333333, %v7667_v0  ;;  %v6989_v2 = vld [vmem:[%s8946_s4 + $0xf0] sm:$0xff]   ;;  %v6994_v10 = vld [vmem:[%s8946_s4 + $0x100] sm:$0xff]  }
 0x2ef   :  { %6270 = vmatprep.subr.bf16.mxu1 %v6979_v8  ;;  %v1559_v38 = vadd.f32 %v1558_v44, %v1556_v37  ;;  %v5740_v14 = vadd.f32 0.5, %v7667_v0  ;;  %v1583_v60 = vsub.f32 0.8333333, %v7667_v0  ;;  %v6991_v0 = vld [vmem:[%s8946_s4 + $0xf8] sm:$0xff]   ;;  %v7293_v12 = vpack.c.bf16 %v7727_v42, %v7727_v42  ;;  %v6998_v42 = vld [vmem:[%s8946_s4 + $0x110] sm:$0xff]   ;;  %v7010_v31 = vld [vmem:[%s8946_s4 + $0x180] sm:$0xff]  }
 0x2f0   :  { %v1539_v61 = vadd.f32 %v1538_v56, %v1536_v53  ;;  %v1577_v6 = vmul.f32 %v5739_v36, %v7714_v50  ;;  %v6992_v50 = vld [vmem:[%s8946_s4 + $0xb8] sm:$0xff]   ;;  %v7006_v23 = vld [vmem:[%s8946_s4 + $0x130] sm:$0xff]   ;;  %v7011_v32 = vld [vmem:[%s8946_s4 + $0x1c8] sm:$0xff]   ;;  %v7296_v33 = vpack.c.bf16 %v7777_v43, %v7777_v43 }
 0x2f1   :  { %v1599_v57 = vmul.f32 %v1598_v48, %v1559_v38  ;;  %v1584_v9 = vmul.f32 %v1583_v60, %v7739_v54  ;;  %v6993_v54 = vld [vmem:[%s8946_s4 + $0x140] sm:$0xff]   ;;  %v7013_v35 = vld [vmem:[%s8946_s4 + $0x1d0] sm:$0xff]   ;;  %v7015_v40 = vld [vmem:[%s8946_s4 + $0x1d8] sm:$0xff]  }
 0x2f2   :  { %6271 = vmatpush3.bf16.msra.mxu1 %v6980_v28  ;;  %v1579_v5 = vmul.f32 %v1578_v39, %v1539_v61  ;;  %v1582_v8 = vmul.f32 %v5740_v14, %v1539_v61  ;;  %v6999_v28 = vld [vmem:[%s8946_s4 + $0x158] sm:$0xff]   ;;  %v7014_v37 = vld [vmem:[%s8946_s4 + $0x190] sm:$0xff]   ;;  %v7017_v43 = vld [vmem:[%s8946_s4 + $0x1e0] sm:$0xff]  }
 0x2f3   :  { %6272 = vmatprep.subr.bf16.mxu1 %v6981_v21  ;;  %v1600_v63 = vadd.f32 %v1599_v57, %v1597_v52  ;;  %v7003_v21 = vld [vmem:[%s8946_s4 + $0x168] sm:$0xff]   ;;  %v7018_v44 = vld [vmem:[%s8946_s4 + $0x1a0] sm:$0xff]   ;;  %v7022_v51 = vld [vmem:[%s8946_s4 + $0x1b0] sm:$0xff]  }
 0x2f4   :  { %v1580_v4 = vadd.f32 %v1579_v5, %v1577_v6  ;;  %v1585_v27 = vadd.f32 %v1584_v9, %v1582_v8  ;;  %v7019_v45 = vld [vmem:[%s8946_s4 + $0x1e8] sm:$0xff]   ;;  %v7023_v38 = vld [vmem:[%s8946_s4 + $0x1f8] sm:$0xff]   ;;  %v7025_v48 = vld [vmem:[%s8946_s4 + $0x200] sm:$0xff]  }
 0x2f5   :  { %v1615_v59 = vpack.c.bf16 %v1600_v63, %v1600_v63  ;;  %v7020_v46 = vld [vmem:[%s8946_s4 + $0x1a8] sm:$0xff]   ;;  %v7024_v52 = vld [vmem:[%s8946_s4 + $0x1b8] sm:$0xff]   ;;  %v7027_v56 = vld [vmem:[%s8946_s4 + $0x210] sm:$0xff]  }
 0x2f6   :  { %6273 = vmatpush3.bf16.msra.mxu1 %v6982_v34  ;;  %v7294_v15 = vpack.c.bf16 %v1585_v27, %v1585_v27  ;;  %v7295_v62 = vpack.c.bf16 %v1580_v4, %v1580_v4  ;;  %v7012_v34 = vld [vmem:[%s8946_s4 + $0x188] sm:$0xff]   ;;  %v7029_v57 = vld [vmem:[%s8946_s4 + $0x220] sm:$0xff]   ;;  %v7031_v63 = vld [vmem:[%s8946_s4 + $0x230] sm:$0xff]  }
 0x2f7   :  { %6274 = vmatprep.subr.bf16.mxu1 %v6983_v41  ;;  %1616 = vst [vmem:[#allocation2 + $0x20] sm:$0xf] %v1615_v59  ;;  %v7016_v41 = vld [vmem:[%s8946_s4 + $0x198] sm:$0xff]   ;;  %v7026_v53 = vld [vmem:[%s8946_s4 + $0x208] sm:$0xff]  }
 0x2fa   :  { %6275 = vmatpush3.bf16.msra.mxu1 %v6984_v49  ;;  %v7021_v49 = vld [vmem:[%s8946_s4 + $0x1f0] sm:$0xff]  }
 0x2fb   :  { %6276 = vmatprep.subr.bf16.mxu1 %v6985_v29  ;;  %v7297_v29 = vpack.c.bf16 %v7775_v11, %v7775_v11  ;;  %v7028_v11 = vld [vmem:[%s8946_s4 + $0x218] sm:$0xff]  }
 0x2fe   :  { %6277 = vmatpush3.bf16.msra.mxu1 %v6986_v3  ;;  %v7030_v3 = vld [vmem:[%s8946_s4 + $0x228] sm:$0xff]   ;;  %v7033_v61 = vld [vmem:[#allocation2 + $0x20] ss:$0 sps:$4 sm:$0xff]  }
 0x2ff   :  { %6278 = vmatprep.subr.bf16.mxu1 %v6987_v58  ;;  %v7032_v58 = vld [vmem:[%s8946_s4 + $0x238] sm:$0xff]  }
 0x302   :  { %6279 = vmatpush3.bf16.msra.mxu1 %v6988_v1 }
 0x303   :  { %6280 = vmatprep.subr.bf16.mxu1 %v6989_v2 }
 0x306   :  { %6281 = vmatpush3.bf16.msra.mxu1 %v6990_v7 }
 0x307   :  { %6282 = vmatprep.subr.bf16.mxu1 %v6991_v0 }
 0x30a   :  { %6283 = vmatpush3.bf16.msra.mxu1 %v6992_v50 }
 0x30b   :  { %6290 = vmatprep.subr.bf16.mxu1 %v6993_v54 }
 0x30d   :  { %2303 = vmatmul.mubr.bf16.vlgmr.msra.gmra.mrb[4].mxu1 %v7293_v12 }
 0x30e   :  { %6291 = vmatpush3.bf16.msra.mxu1 %v6994_v10  ;;  %2342 = vmatprep.mubr.bf16.mxu1 %v7294_v15 }
 0x30f   :  { %6292 = vmatprep.subr.bf16.mxu1 %v6995_v13 }
 0x312   :  { %6293 = vmatpush3.bf16.msra.mxu1 %v6996_v17 }
 0x313   :  { %6294 = vmatprep.subr.bf16.mxu1 %v6997_v18 }
 0x316   :  { %6295 = vmatpush3.bf16.msra.mxu1 %v6998_v42 }
 0x317   :  { %6296 = vmatprep.subr.bf16.mxu1 %v6999_v28 }
 0x31a   :  { %6297 = vmatpush3.bf16.msra.mxu1 %v7000_v47 }
 0x31b   :  { %6298 = vmatprep.subr.bf16.mxu1 %v7001_v19 }
 0x31e   :  { %6299 = vmatpush3.bf16.msra.mxu1 %v7002_v20 }
 0x31f   :  { %6300 = vmatprep.subr.bf16.mxu1 %v7003_v21 }
 0x322   :  { %6301 = vmatpush3.bf16.msra.mxu1 %v7004_v30  ;;  %v1397_v30 = vmul.f32 %v7598_v55, %v7598_v55 }
 0x323   :  { %6302 = vmatprep.subr.bf16.mxu1 %v7005_v22  ;;  %v7034_v22 = vld [vmem:[%s8950_s8 + $0x200] sm:$0xff]  }
 0x324   :  { %6655 = vmatpush3.bf16.msra.mxu0 %v7034_v22 }
 0x325   :  { %6656 = vmatprep.subr.bf16.mxu0 %v7370_v16 }
 0x326   :  { %6303 = vmatpush3.bf16.msra.mxu1 %v7006_v23  ;;  %v7037_v23 = vld [vmem:[%s8950_s8 + $0x40] sm:$0xff]  }
 0x327   :  { %6304 = vmatprep.subr.bf16.mxu1 %v7007_v24  ;;  %v7039_v24 = vld [vmem:[%s8950_s8] sm:$0xff]  }
 0x32a   :  { %6305 = vmatpush3.bf16.msra.mxu1 %v7008_v25  ;;  %v7035_v25 = vld [vmem:[%s8950_s8 + $0x208] sm:$0xff]  }
 0x32b   :  { %6312 = vmatprep.subr.bf16.mxu1 %v7009_v26  ;;  %v7040_v26 = vld [vmem:[%s8950_s8 + $0x48] sm:$0xff]   ;;  %6657 = vmatpush3.bf16.msra.mxu0 %v7035_v25 }
 0x32c   :  { %6658 = vmatprep.subr.bf16.mxu0 %v7370_v16 }
 0x32d   :  { %2343 = vmatmul.mubr.bf16.vlgmr.msra.gmra.mrb[8].mxu1 %v7295_v62  ;;  %v7043_v62 = vld [vmem:[%s8950_s8 + $0x50] sm:$0xff]  }
 0x32e   :  { %6313 = vmatpush3.bf16.msra.mxu1 %v7010_v31  ;;  %2382 = vmatprep.mubr.bf16.mxu1 %v7296_v33  ;;  %v7042_v31 = vld [vmem:[%s8950_s8 + $0x8] sm:$0xff]   ;;  %v7045_v33 = vld [vmem:[%s8950_s8 + $0x10] sm:$0xff]  }
 0x32f   :  { %6314 = vmatprep.subr.bf16.mxu1 %v7011_v32  ;;  %v7036_v32 = vld [vmem:[%s8950_s8 + $0x210] sm:$0xff]  }
 0x330   :  { %6659 = vmatpush3.bf16.msra.mxu0 %v7036_v32 }
 0x331   :  { %6660 = vmatprep.subr.bf16.mxu0 %v7370_v16 }
 0x332   :  { %6315 = vmatpush3.bf16.msra.mxu1 %v7012_v34  ;;  %v7046_v34 = vld [vmem:[%s8950_s8 + $0x58] sm:$0xff]  }
 0x333   :  { %6316 = vmatprep.subr.bf16.mxu1 %v7013_v35  ;;  %v7038_v35 = vld [vmem:[%s8950_s8 + $0x218] sm:$0xff]  }
 0x334   :  { %6661 = vmatpush3.bf16.msra.mxu0 %v7038_v35 }
 0x335   :  { %6662 = vmatprep.subr.bf16.mxu0 %v7370_v16 }
 0x336   :  { %6317 = vmatpush3.bf16.msra.mxu1 %v7014_v37  ;;  %v7048_v37 = vld [vmem:[%s8950_s8 + $0x18] sm:$0xff]  }
 0x337   :  { %6318 = vmatprep.subr.bf16.mxu1 %v7015_v40  ;;  %v7049_v40 = vld [vmem:[%s8950_s8 + $0x60] sm:$0xff]  }
 0x33a   :  { %6319 = vmatpush3.bf16.msra.mxu1 %v7016_v41  ;;  %v7041_v41 = vld [vmem:[%s8950_s8 + $0x220] sm:$0xff]  }
 0x33b   :  { %6320 = vmatprep.subr.bf16.mxu1 %v7017_v43  ;;  %v7051_v43 = vld [vmem:[%s8950_s8 + $0x20] sm:$0xff]   ;;  %6663 = vmatpush3.bf16.msra.mxu0 %v7041_v41 }
 0x33c   :  { %6664 = vmatprep.subr.bf16.mxu0 %v7370_v16 }
 0x33e   :  { %6321 = vmatpush3.bf16.msra.mxu1 %v7018_v44  ;;  %v7053_v44 = vld [vmem:[%s8950_s8 + $0x68] sm:$0xff]  }
 0x33f   :  { %6322 = vmatprep.subr.bf16.mxu1 %v7019_v45  ;;  %v7044_v45 = vld [vmem:[%s8950_s8 + $0x228] sm:$0xff]  }
 0x340   :  { %6665 = vmatpush3.bf16.msra.mxu0 %v7044_v45 }
 0x341   :  { %6666 = vmatprep.subr.bf16.mxu0 %v7370_v16 }
 0x342   :  { %6323 = vmatpush3.bf16.msra.mxu1 %v7020_v46  ;;  %v7047_v46 = vld [vmem:[%s8950_s8 + $0x230] sm:$0xff]  }
 0x343   :  { %6324 = vmatprep.subr.bf16.mxu1 %v7021_v49  ;;  %v7050_v49 = vld [vmem:[%s8950_s8 + $0x238] sm:$0xff]  }
 0x344   :  { %6667 = vmatpush3.bf16.msra.mxu0 %v7047_v46 }
 0x345   :  { %6668 = vmatprep.subr.bf16.mxu0 %v7370_v16 }
 0x346   :  { %6325 = vmatpush3.bf16.msra.mxu1 %v7022_v51  ;;  %v7052_v51 = vld [vmem:[#allocation6 + $0xc0] sm:$0xff]  }
 0x347   :  { %6326 = vmatprep.subr.bf16.mxu1 %v7023_v38  ;;  %v7056_v38 = vld [vmem:[%s8950_s8 + $0x28] sm:$0xff]  }
 0x348   :  { %6669 = vmatpush3.bf16.msra.mxu0 %v7050_v49 }
 0x349   :  { %6462 = vmatprep.subr.bf16.mxu0 %v7052_v51 }
 0x34a   :  { %6327 = vmatpush3.bf16.msra.mxu1 %v7024_v52  ;;  %v7058_v52 = vld [vmem:[%s8950_s8 + $0x70] sm:$0xff]  }
 0x34b   :  { %6634 = vmatprep.subr.bf16.mxu1 %v7370_v16 }
 0x34d   :  { %2383 = vmatmul.mubr.bf16.vlgmr.msra.gmra.mrb[12].mxu1 %v7297_v29  ;;  %v7062_v29 = vld [vmem:[%s8950_s8 + $0x78] sm:$0xff]  }
 0x34e   :  { %6635 = vmatpush3.bf16.msra.mxu1 %v7025_v48  ;;  %6650 = vmatprep.mubr.msk.bf16.mxu1 %vm7372_vm8, %v7370_v16  ;;  %v7060_v48 = vld [vmem:[%s8950_s8 + $0x30] sm:$0xff]  }
 0x34f   :  { %6636 = vmatprep.subr.bf16.mxu1 %v7370_v16 }
 0x352   :  { %6637 = vmatpush3.bf16.msra.mxu1 %v7026_v53  ;;  %v7064_v53 = vld [vmem:[%s8950_s8 + $0x38] sm:$0xff]  }
 0x353   :  { %6638 = vmatprep.subr.bf16.mxu1 %v7370_v16 }
 0x356   :  { %6639 = vmatpush3.bf16.msra.mxu1 %v7027_v56 }
 0x357   :  { %6640 = vmatprep.subr.bf16.mxu1 %v7370_v16 }
 0x35a   :  { %6641 = vmatpush3.bf16.msra.mxu1 %v7028_v11 }
 0x35b   :  { %6642 = vmatprep.subr.bf16.mxu1 %v7370_v16 }
 0x35e   :  { %6643 = vmatpush3.bf16.msra.mxu1 %v7029_v57  ;;  %v1396_v57 = vpop.xlane.xlu0 %1395 }
 0x35f   :  { %6644 = vmatprep.subr.bf16.mxu1 %v7370_v16 }
 0x362   :  { %6645 = vmatpush3.bf16.msra.mxu1 %v7030_v3 }
 0x363   :  { %6646 = vmatprep.subr.bf16.mxu1 %v7370_v16 }
 0x366   :  { %6647 = vmatpush3.bf16.msra.mxu1 %v7031_v63  ;;  %v7067_v63 = vld [vmem:[%s8950_s8 + $0xc0] sm:$0xff]  }
 0x367   :  { %6648 = vmatprep.subr.bf16.mxu1 %v7370_v16 }
 0x36a   :  { %6649 = vmatpush3.bf16.msra.mxu1 %v7032_v58  ;;  %v1400_v58 = vmul.f32 0.0625, %v1396_v57 }
 0x36b   :  { %6343 = vmatprep.subr.bf16.mxu1 %v7037_v23 }
 0x36d   :  { %6651 = vmatmul.mubr.bf16.vlgmr.msra.gmra.mrb[16].mxu1 %v7033_v61 }
 0x36e   :  { %6344 = vmatpush3.bf16.msra.mxu1 %v7039_v24 }
 0x36f   :  { %6345 = vmatprep.subr.bf16.mxu1 %v7040_v26 }
 0x372   :  { %6346 = vmatpush3.bf16.msra.mxu1 %v7042_v31 }
 0x373   :  { %6347 = vmatprep.subr.bf16.mxu1 %v7043_v62 }
 0x376   :  { %6348 = vmatpush3.bf16.msra.mxu1 %v7045_v33 }
 0x377   :  { %6349 = vmatprep.subr.bf16.mxu1 %v7046_v34 }
 0x37a   :  { %6350 = vmatpush3.bf16.msra.mxu1 %v7048_v37 }
 0x37b   :  { %6351 = vmatprep.subr.bf16.mxu1 %v7049_v40 }
 0x37e   :  { %6352 = vmatpush3.bf16.msra.mxu1 %v7051_v43 }
 0x37f   :  { %6353 = vmatprep.subr.bf16.mxu1 %v7053_v44 }
 0x382   :  { %6354 = vmatpush3.bf16.msra.mxu1 %v7056_v38 }
 0x383   :  { %6355 = vmatprep.subr.bf16.mxu1 %v7058_v52 }
 0x386   :  { %6356 = vmatpush3.bf16.msra.mxu1 %v7060_v48 }
 0x387   :  { %6357 = vmatprep.subr.bf16.mxu1 %v7062_v29 }
 0x38a   :  { %6358 = vmatpush3.bf16.msra.mxu1 %v7064_v53 }
 0x38b   :  { %6365 = vmatprep.subr.bf16.mxu1 %v7067_v63 }
 0x3c0   :  { %v6262_v59 = vpop.f32.mrb[0].mxu1 }
 0x3c1   :  { %v6263_v1 = vpop.f32.mrb[1].mxu1 }
 0x3c2   :  { %v6264_v36 = vadd.f32 %v6263_v1, %v6262_v59  ;;  %v6265_v39 = vpop.f32.mrb[2].mxu1 }
 0x3c3   :  { %v6266_v14 = vpop.f32.mrb[3].mxu1  ;;  %v1402_v39 = vmul.f32 %v1400_v58, %v1400_v58 }
 0x3e0   :  { %v6284_v60 = vpop.f32.mrb[4].mxu1 }
 0x3e1   :  { %v6285_v2 = vpop.f32.mrb[5].mxu1 }
 0x3e2   :  { %v6286_v6 = vadd.f32 %v6285_v2, %v6284_v60  ;;  %v6287_v5 = vpop.f32.mrb[6].mxu1 }
 0x3e3   :  { %v6288_v8 = vpop.f32.mrb[7].mxu1 }
 0x3e4   :  { %v2305_v9 = vadd.f32 %v6286_v6, %v6264_v36 }
 0x400   :  { %v6306_v7 = vpop.f32.mrb[8].mxu1 }
 0x401   :  { %v6307_v0 = vpop.f32.mrb[9].mxu1 }
 0x402   :  { %v6308_v4 = vadd.f32 %v6307_v0, %v6306_v7  ;;  %v6309_v27 = vpop.f32.mrb[10].mxu1  ;;  %v5826_v0 = vld [vmem:[%s8949_s7] ss:$0 sm:$0xff] }
 0x403   :  { %v6310_v50 = vpop.f32.mrb[11].mxu1 }
 0x404   :  { %v2345_v54 = vadd.f32 %v6308_v4, %v2305_v9  ;;  %v5825_v9 = vld [vmem:[%s8948_s6] ss:$0 sm:$0xff]  ;;  %v1404_v4 = vsub.f32 %v7598_v55, %v1400_v58 }
 0x420   :  { %v6328_v10 = vpop.f32.mrb[12].mxu1 }
 0x421   :  { %v6329_v12 = vpop.f32.mrb[13].mxu1 }
 0x422   :  { %v6330_v13 = vadd.f32 %v6329_v12, %v6328_v10  ;;  %v6331_v15 = vpop.f32.mrb[14].mxu1 }
 0x423   :  { %v6332_v17 = vpop.f32.mrb[15].mxu1  ;;  %v5715_v15 = vld [vmem:[%s8945_s3 + $0x1] ss:$0 sm:$0xff] }
 0x424   :  { %v2385_v18 = vadd.f32 %v6330_v13, %v2345_v54  ;;  %v5714_v54 = vld [vmem:[%s8944_s2 + $0x1] ss:$0 sm:$0xff] }
 0x440   :  { %v2424_v42 = vpop.f32.mrb[16].mxu1 }
 0x441   :  { %v7954_v28 = vadd.f32 %v2424_v42, %v2385_v18  ;;  %v6652_v47 = vpop.f32.mrb[17].mxu1 }
 0x442   :  { %v2427_v19 = vpop.f32.mrb[18].mxu1 }
 0x443   :  { %v6653_v20 = vpop.f32.mrb[19].mxu1  ;;  %2432 = vadd.xlane.f32.xlu1 %v7954_v28  ;;  %v2434_v21 = vmul.f32 %v7954_v28, %v7954_v28 }
 0x447   :  { %2435 = vadd.xlane.f32.xlu1 %v2434_v21 }
 0x44b   :  { %1398 = vadd.xlane.f32.xlu1 %v1397_v30 }
 0x4d0   :  { %v2433_v56 = vpop.xlane.xlu1 %2432 }
 0x4d1   :  { %v2437_v11 = vmul.f32 0.03125, %v2433_v56 }
 0x4d3   :  { %v2439_v61 = vmul.f32 %v2437_v11, %v2437_v11  ;;  %v2441_v5 = vsub.f32 %v7954_v28, %v2437_v11 }
 0x4d4   :  { %v2436_v3 = vpop.xlane.xlu1 %2435 }
 0x4d5   :  { %v2438_v59 = vmul.f32 0.03125, %v2436_v3 }
 0x4d7   :  { %v2440_v1 = vsub.f32 %v2438_v59, %v2439_v61 }
 0x4d8   :  { %v1399_v36 = vpop.xlane.xlu1 %1398 }
 0x4d9   :  { %v2442_v14 = vadd.f32 1e-05, %v2440_v1  ;;  %v1401_v60 = vmul.f32 0.0625, %v1399_v36 }
 0x4db   :  { %7268 = vrsqrt.f32 %v2442_v14  ;;  %v1403_v2 = vsub.f32 %v1401_v60, %v1402_v39 }
 0x4dd   :  { %v1405_v6 = vadd.f32 1e-05, %v1403_v2 }
 0x4df   :  { %7270 = vrsqrt.f32 %v1405_v6 }
 0x4e5   :  { %v7269_v8 = vpop.eup %7268 }
 0x4e6   :  { %v2444_v7 = vmul.f32 %v7269_v8, %v2441_v5 }
 0x4e8   :  { %v2449_v27 = vmul.f32 %v5825_v9, %v2444_v7 }
 0x4e9   :  { %v7271_v50 = vpop.eup %7270 }
 0x4ea   :  { %v8054_v10 = vadd.f32 %v5826_v0, %v2449_v27  ;;  %v1407_v12 = vmul.f32 %v7271_v50, %v1404_v4 }
 0x4ec   :  { %v1412_v13 = vmul.f32 %v5714_v54, %v1407_v12  ;;  %vm2468_vm9 = vcmp.ge.f32.partialorder %v8054_v10, -1.4  ;;  %vm2470_vm10 = vcmp.ge.f32.partialorder %v8054_v10, -1.0  ;;  %vm2480_vm11 = vcmp.ge.f32.partialorder %v8054_v10, 1.0 }
 0x4ed   :  { %vm2474_vm12 = vcmp.ge.f32.partialorder %v8054_v10, -0.2  ;;  %vm2476_vm13 = vcmp.ge.f32.partialorder %v8054_v10, 0.2  ;;  %vm2478_vm14 = vcmp.ge.f32.partialorder %v8054_v10, 0.6 }
 0x4ee   :  { %v8066_v55 = vmul.f32 2.5, %v8054_v10  ;;  %v8068_v17 = vadd.f32 %v5715_v15, %v1412_v13  ;;  %vm2472_vm15 = vcmp.ge.f32.partialorder %v8054_v10, -0.6  ;;  %v8072_v18 = vsel %vm2474_vm12, 1.0, %v7370_v16 }
 0x4ef   :  { %v2477_v42 = vsel %vm2476_vm13, 1.0, %v7370_v16  ;;  %v2479_v28 = vsel %vm2478_vm14, 1.0, %v7370_v16  ;;  %v2481_v47 = vsel %vm2480_vm11, 1.0, %v7370_v16  ;;  %vm2482_vm0 = vcmp.ge.f32.partialorder %v8054_v10, 1.4 }
 0x4f0   :  { %v8079_v19 = vsel %vm2468_vm9, 1.0, %v7370_v16  ;;  %v2471_v20 = vsel %vm2470_vm10, 1.0, %v7370_v16  ;;  %vm2484_vm1 = vcmp.ge.f32.partialorder %v8054_v10, 1.8  ;;  %vm2486_vm2 = vcmp.ge.f32.partialorder %v8054_v10, 2.2 }
 0x4f1   :  { %v8085_v21 = vmul.f32 1.25, %v8054_v10  ;;  %v2483_v30 = vsel %vm2482_vm0, 1.0, %v7370_v16  ;;  %v2485_v22 = vsel %vm2484_vm1, 1.0, %v7370_v16  ;;  %v2487_v23 = vsel %vm2486_vm2, 1.0, %v7370_v16 }
 0x4f2   :  { %v8091_v24 = vsub.f32 %v8072_v18, %v2477_v42  ;;  %v2494_v25 = vsub.f32 %v2477_v42, %v2479_v28  ;;  %v2495_v26 = vsub.f32 %v2479_v28, %v2481_v47  ;;  %v8094_v31 = vmul.f32 0.8333333, %v8054_v10 }
 0x4f3   :  { %v8097_v62 = vmul.f32 2.5, %v8068_v17  ;;  %v2473_v32 = vsel %vm2472_vm15, 1.0, %v7370_v16  ;;  %v8103_v33 = vsub.f32 %v8079_v19, %v2471_v20  ;;  %v5833_v34 = vadd.f32 0.5, %v8066_v55 }
 0x4f4   :  { %v2527_v35 = vsub.f32 1.5, %v8066_v55  ;;  %v5834_v37 = vadd.f32 -0.5, %v8066_v55  ;;  %v2532_v40 = vsub.f32 2.5, %v8066_v55  ;;  %v2496_v41 = vsub.f32 %v2481_v47, %v2483_v30 }
 0x4f5   :  { %v2497_v43 = vsub.f32 %v2483_v30, %v2485_v22  ;;  %v2498_v44 = vsub.f32 %v2485_v22, %v2487_v23  ;;  %v5835_v45 = vadd.f32 -1.5, %v8066_v55  ;;  %v2526_v46 = vmul.f32 %v5833_v34, %v8091_v24 }
 0x4f6   :  { %v2528_v49 = vmul.f32 %v2527_v35, %v2494_v25  ;;  %v2531_v51 = vmul.f32 %v5834_v37, %v2494_v25  ;;  %v2533_v38 = vmul.f32 %v2532_v40, %v2495_v26  ;;  %v2537_v48 = vsub.f32 3.5, %v8066_v55 }
 0x4f7   :  { %v2536_v52 = vmul.f32 %v5835_v45, %v2495_v26  ;;  %v5836_v29 = vadd.f32 -2.5, %v8066_v55  ;;  %v2542_v53 = vsub.f32 4.5, %v8066_v55  ;;  %v5837_v57 = vadd.f32 -3.5, %v8066_v55 }
 0x4f8   :  { %v8114_v56 = vadd.f32 %v2528_v49, %v2526_v46  ;;  %v8116_v11 = vadd.f32 %v2533_v38, %v2531_v51  ;;  %v2547_v3 = vsub.f32 5.5, %v8066_v55  ;;  %v2538_v63 = vmul.f32 %v2537_v48, %v2496_v41 }
 0x4f9   :  { %v2541_v58 = vmul.f32 %v5836_v29, %v2496_v41  ;;  %v2543_v61 = vmul.f32 %v2542_v53, %v2497_v43  ;;  %v5844_v59 = vadd.f32 -0.25, %v8085_v21  ;;  %v2546_v1 = vmul.f32 %v5837_v57, %v2497_v43 }
 0x4fa   :  { %v2548_v36 = vmul.f32 %v2547_v3, %v2498_v44  ;;  %v2583_v39 = vsub.f32 1.75, %v8085_v21  ;;  %v5845_v14 = vadd.f32 -0.75, %v8085_v21  ;;  %v2539_v60 = vadd.f32 %v2538_v63, %v2536_v52 }
 0x4fb   :  { %v2544_v2 = vadd.f32 %v2543_v61, %v2541_v58  ;;  %v2582_v6 = vmul.f32 %v5844_v59, %v8116_v11  ;;  %v2588_v5 = vsub.f32 2.25, %v8085_v21  ;;  %v8126_v8 = vmul.f32 1.25, %v8068_v17 }
 0x4fc   :  { %v2549_v9 = vadd.f32 %v2548_v36, %v2546_v1  ;;  %v5846_v7 = vadd.f32 -1.25, %v8085_v21  ;;  %v2593_v0 = vsub.f32 2.75, %v8085_v21  ;;  %v8131_v4 = vmul.f32 0.8333333, %v8068_v17 }
 0x4fd   :  { %v2584_v27 = vmul.f32 %v2583_v39, %v2539_v60  ;;  %v2587_v50 = vmul.f32 %v5845_v14, %v2539_v60  ;;  %v2589_v54 = vmul.f32 %v2588_v5, %v2544_v2  ;;  %v8133_v12 = vsub.f32 %v2471_v20, %v2473_v32 }
 0x4fe   :  { %v2592_v13 = vmul.f32 %v5846_v7, %v2544_v2  ;;  %v2594_v15 = vmul.f32 %v2593_v0, %v2549_v9  ;;  %v5853_v42 = vadd.f32 -0.16666667, %v8094_v31  ;;  %v2629_v30 = vsub.f32 1.5, %v8094_v31 }
 0x4ff   :  { %v8136_v28 = vadd.f32 %v2584_v27, %v2582_v6  ;;  %v2590_v47 = vadd.f32 %v2589_v54, %v2587_v50  ;;  %v5854_v22 = vadd.f32 -0.5, %v8094_v31  ;;  %v8141_v23 = vsub.f32 %v2473_v32, %v8072_v18 }
 0x500   :  { %v5832_v25 = vadd.f32 1.5, %v8066_v55  ;;  %v2595_v26 = vadd.f32 %v2594_v15, %v2592_v13  ;;  %v2634_v20 = vsub.f32 1.8333334, %v8094_v31  ;;  %v2522_v34 = vsub.f32 0.5, %v8066_v55 }
 0x501   :  { %v2628_v35 = vmul.f32 %v5853_v42, %v8136_v28  ;;  %v2630_v37 = vmul.f32 %v2629_v30, %v2590_v47  ;;  %v2633_v40 = vmul.f32 %v5854_v22, %v2590_v47  ;;  %vm3482_vm3 = vcmp.ge.f32.partialorder %v8068_v17, -1.4 }
 0x502   :  { %v2635_v41 = vmul.f32 %v2634_v20, %v2595_v26  ;;  %vm3490_vm4 = vcmp.ge.f32.partialorder %v8068_v17, 0.2  ;;  %vm3492_vm5 = vcmp.ge.f32.partialorder %v8068_v17, 0.6  ;;  %vm3484_vm6 = vcmp.ge.f32.partialorder %v8068_v17, -1.0  ;;  %v7055_v26 = vld [vmem:[#allocation6 + $0x80] sm:$0xff]  }
 0x503   :  { %v8150_v18 = vadd.f32 %v2630_v37, %v2628_v35  ;;  %vm3486_vm7 = vcmp.ge.f32.partialorder %v8068_v17, -0.6  ;;  %vm3488_vm9 = vcmp.ge.f32.partialorder %v8068_v17, -0.2  ;;  %vm3494_vm10 = vcmp.ge.f32.partialorder %v8068_v17, 1.0 }
 0x504   :  { %v2636_v32 = vadd.f32 %v2635_v41, %v2633_v40  ;;  %vm3496_vm11 = vcmp.ge.f32.partialorder %v8068_v17, 1.4  ;;  %vm3498_vm12 = vcmp.ge.f32.partialorder %v8068_v17, 1.8  ;;  %v3491_v43 = vsel %vm3490_vm4, 1.0, %v7370_v16  ;;  %v7057_v41 = vld [vmem:[#allocation6 + $0xc8] sm:$0xff]  }
 0x505   :  { %v3493_v44 = vsel %vm3492_vm5, 1.0, %v7370_v16  ;;  %v3495_v45 = vsel %vm3494_vm10, 1.0, %v7370_v16  ;;  %vm3500_vm13 = vcmp.ge.f32.partialorder %v8068_v17, 2.2  ;;  %v8163_v49 = vsel %vm3486_vm7, 1.0, %v7370_v16 }
 0x506   :  { %v2651_v46 = vpack.c.bf16 %v2636_v32, %v2636_v32  ;;  %v3489_v51 = vsel %vm3488_vm9, 1.0, %v7370_v16  ;;  %v3497_v38 = vsel %vm3496_vm11, 1.0, %v7370_v16  ;;  %v2517_v52 = vsub.f32 -0.5, %v8066_v55 }
 0x507   :  { %v8169_v48 = vmul.f32 %v5832_v25, %v8141_v23  ;;  %v8172_v29 = vmul.f32 %v2522_v34, %v8091_v24  ;;  %v3499_v53 = vsel %vm3498_vm12, 1.0, %v7370_v16  ;;  %v8178_v57 = vsel %vm3482_vm3, 1.0, %v7370_v16 }
 0x508   :  { %2652 = vst [vmem:[#allocation2 + $0x20] sm:$0xf] %v2651_v46  ;;  %v3501_v3 = vsel %vm3500_vm13, 1.0, %v7370_v16  ;;  %v8181_v63 = vsub.f32 %v3491_v43, %v3493_v44  ;;  %v3509_v58 = vsub.f32 %v3493_v44, %v3495_v45  ;;  %v8186_v61 = vsel %vm3484_vm6, 1.0, %v7370_v16 }
 0x509   :  { %v8189_v24 = vsub.f32 %v8163_v49, %v3489_v51  ;;  %v8191_v59 = vsub.f32 %v3489_v51, %v3491_v43  ;;  %v3510_v1 = vsub.f32 %v3495_v45, %v3497_v38  ;;  %v3511_v36 = vsub.f32 %v3497_v38, %v3499_v53 }
 0x50a   :  { %v5943_v39 = vadd.f32 -0.5, %v8097_v62  ;;  %v3546_v14 = vsub.f32 2.5, %v8097_v62  ;;  %v5944_v60 = vadd.f32 -1.5, %v8097_v62  ;;  %v3512_v2 = vsub.f32 %v3499_v53, %v3501_v3 }
 0x50b   :  { %v3531_v6 = vsub.f32 -0.5, %v8097_v62  ;;  %v8198_v5 = vadd.f32 1.5, %v8097_v62  ;;  %v3536_v9 = vsub.f32 0.5, %v8097_v62  ;;  %v3551_v50 = vsub.f32 3.5, %v8097_v62 }
 0x50c   :  { %v3545_v7 = vmul.f32 %v5943_v39, %v8181_v63  ;;  %v3547_v0 = vmul.f32 %v3546_v14, %v3509_v58  ;;  %v3550_v27 = vmul.f32 %v5944_v60, %v3509_v58  ;;  %v5942_v54 = vadd.f32 0.5, %v8097_v62  ;;  %v7059_v39 = vld [vmem:[#allocation6 + $0x88] sm:$0xff]  }
 0x50d   :  { %v5945_v13 = vadd.f32 -2.5, %v8097_v62  ;;  %v3556_v15 = vsub.f32 4.5, %v8097_v62  ;;  %v5946_v42 = vadd.f32 -3.5, %v8097_v62  ;;  %v3552_v30 = vmul.f32 %v3551_v50, %v3510_v1 }
 0x50e   :  { %v8207_v47 = vadd.f32 %v3547_v0, %v3545_v7  ;;  %v3561_v22 = vsub.f32 5.5, %v8097_v62  ;;  %v5953_v25 = vadd.f32 -0.25, %v8126_v8  ;;  %v3597_v40 = vsub.f32 1.75, %v8126_v8  ;;  %v7061_v0 = vld [vmem:[#allocation6 + $0xd0] sm:$0xff]  }
 0x50f   :  { %v7054_v20 = vld [vmem:[#allocation2 + $0x20] ss:$0 sps:$4 sm:$0xff]   ;;  %v3555_v34 = vmul.f32 %v5945_v13, %v3510_v1  ;;  %v3557_v35 = vmul.f32 %v3556_v15, %v3511_v36  ;;  %v3560_v37 = vmul.f32 %v5946_v42, %v3511_v36  ;;  %v3553_v32 = vadd.f32 %v3552_v30, %v3550_v27 }
 0x510   :  { %v3562_v43 = vmul.f32 %v3561_v22, %v3512_v2  ;;  %v3596_v44 = vmul.f32 %v5953_v25, %v8207_v47  ;;  %v5954_v45 = vadd.f32 -0.75, %v8126_v8  ;;  %6671 = vmatmul.mubr.bf16.vlgmr.msra.gmra.mrb[4].mxu0 %v7054_v20  ;;  %v3541_v46 = vsub.f32 1.5, %v8097_v62 }
 0x511   :  { %v3558_v51 = vadd.f32 %v3557_v35, %v3555_v34  ;;  %v3602_v38 = vsub.f32 2.25, %v8126_v8  ;;  %v5955_v53 = vadd.f32 -1.25, %v8126_v8  ;;  %v3598_v58 = vmul.f32 %v3597_v40, %v3553_v32  ;;  %6463 = vmatpush3.bf16.msra.mxu0 %v7055_v26  ;;  %v7063_v26 = vld [vmem:[#allocation6 + $0x90] sm:$0xff]  }
 0x512   :  { %v3563_v3 = vadd.f32 %v3562_v43, %v3560_v37  ;;  %v3601_v1 = vmul.f32 %v5954_v45, %v3553_v32  ;;  %v3607_v36 = vsub.f32 2.75, %v8126_v8  ;;  %v3540_v14 = vmul.f32 %v5942_v54, %v8191_v59  ;;  %6464 = vmatprep.subr.bf16.mxu0 %v7057_v41  ;;  %v7065_v32 = vld [vmem:[#allocation6 + $0xd8] sm:$0xff]  }
 0x513   :  { %v3603_v60 = vmul.f32 %v3602_v38, %v3558_v51  ;;  %v3606_v2 = vmul.f32 %v5955_v53, %v3558_v51  ;;  %v5962_v7 = vadd.f32 -0.16666667, %v8131_v4  ;;  %v8220_v27 = vadd.f32 %v3598_v58, %v3596_v44 }
 0x514   :  { %v3608_v50 = vmul.f32 %v3607_v36, %v3563_v3  ;;  %v5963_v13 = vadd.f32 -0.5, %v8131_v4  ;;  %vm2466_vm14 = vcmp.ge.f32.partialorder %v8054_v10, -1.8  ;;  %v5829_v30 = vadd.f32 4.5, %v8066_v55 }
 0x515   :  { %v3604_v15 = vadd.f32 %v3603_v60, %v3601_v1  ;;  %v8225_v42 = vsel %vm2466_vm14, 1.0, %v7370_v16  ;;  %v2507_v54 = vsub.f32 -2.5, %v8066_v55  ;;  %v3648_v25 = vsub.f32 1.8333334, %v8131_v4  ;;  %6465 = vmatpush3.bf16.msra.mxu0 %v7059_v39  ;;  %v7068_v39 = vld [vmem:[#allocation6 + $0x98] sm:$0xff]  }
 0x516   :  { %v3609_v22 = vadd.f32 %v3608_v50, %v3606_v2  ;;  %v8232_v20 = vsub.f32 %v8225_v42, %v8079_v19  ;;  %v5830_v34 = vadd.f32 3.5, %v8066_v55  ;;  %v3643_v35 = vsub.f32 1.5, %v8131_v4  ;;  %6466 = vmatprep.subr.bf16.mxu0 %v7061_v0  ;;  %v7070_v2 = vld [vmem:[#allocation6 + $0xe0] sm:$0xff]  }
 0x517   :  { %v3647_v37 = vmul.f32 %v5963_v13, %v3604_v15  ;;  %v2508_v40 = vmul.f32 %v2507_v54, %v8103_v33  ;;  %v2512_v41 = vsub.f32 -1.5, %v8066_v55  ;;  %v5831_v51 = vadd.f32 2.5, %v8066_v55 }
 0x518   :  { %v3649_v43 = vmul.f32 %v3648_v25, %v3609_v22  ;;  %v2506_v44 = vmul.f32 %v5829_v30, %v8232_v20  ;;  %v2511_v45 = vmul.f32 %v5830_v34, %v8103_v33  ;;  %v3542_v19 = vmul.f32 %v3541_v46, %v8181_v63 }
 0x519   :  { %v3642_v38 = vmul.f32 %v5962_v7, %v8220_v27  ;;  %v3644_v53 = vmul.f32 %v3643_v35, %v3604_v15  ;;  %v2513_v3 = vmul.f32 %v2512_v41, %v8133_v12  ;;  %v2518_v58 = vmul.f32 %v2517_v52, %v8141_v23  ;;  %6467 = vmatpush3.bf16.msra.mxu0 %v7063_v26 }
 0x51a   :  { %v3650_v1 = vadd.f32 %v3649_v43, %v3647_v37  ;;  %v2516_v36 = vmul.f32 %v5831_v51, %v8133_v12  ;;  %v3504_v33 = vsub.f32 %v8178_v57, %v8186_v61  ;;  %v3505_v63 = vsub.f32 %v8186_v61, %v8163_v49  ;;  %6468 = vmatprep.subr.bf16.mxu0 %v7065_v32  ;;  %v7076_v43 = vld [vmem:[#allocation6 + $0xa8] sm:$0xff]  }
 0x51b   :  { %v3532_v46 = vmul.f32 %v3531_v6, %v8189_v24  ;;  %v8255_v60 = vadd.f32 %v2508_v40, %v2506_v44  ;;  %v3535_v23 = vmul.f32 %v8198_v5, %v8189_v24  ;;  %v3537_v12 = vmul.f32 %v3536_v9, %v8191_v59  ;;  %v7072_v9 = vld [vmem:[#allocation6 + $0xa0] sm:$0xff]  }
 0x51c   :  { %v3665_v52 = vpack.c.bf16 %v3650_v1, %v3650_v1  ;;  %v2514_v7 = vadd.f32 %v2513_v3, %v2511_v45  ;;  %v8262_v0 = vadd.f32 %v3542_v19, %v3540_v14  ;;  %v8264_v49 = vadd.f32 %v3644_v53, %v3642_v38  ;;  %v7078_v19 = vld [vmem:[#allocation6 + $0xf0] sm:$0xff]  }
 0x51d   :  { %v8268_v61 = vadd.f32 %v8172_v29, %v8169_v48  ;;  %v5839_v6 = vadd.f32 2.25, %v8085_v21  ;;  %v2519_v50 = vadd.f32 %v2518_v58, %v2516_v36  ;;  %v2558_v24 = vsub.f32 -0.75, %v8085_v21  ;;  %6469 = vmatpush3.bf16.msra.mxu0 %v7068_v39  ;;  %v7074_v29 = vld [vmem:[#allocation6 + $0xe8] sm:$0xff]  }
 0x51e   :  { %3666 = vst [vmem:[#allocation2 + $0x20] sm:$0xf] %v3665_v52  ;;  %v5840_v5 = vadd.f32 1.75, %v8085_v21  ;;  %v2563_v59 = vsub.f32 -0.25, %v8085_v21  ;;  %v5841_v13 = vadd.f32 1.25, %v8085_v21  ;;  %v5938_v48 = vadd.f32 4.5, %v8097_v62  ;;  %6470 = vmatprep.subr.bf16.mxu0 %v7070_v2 }
 0x51f   :  { %v2557_v14 = vmul.f32 %v5839_v6, %v8255_v60  ;;  %vm3480_vm15 = vcmp.ge.f32.partialorder %v8068_v17, -1.8  ;;  %v2559_v15 = vmul.f32 %v2558_v24, %v2514_v7  ;;  %v2568_v30 = vsub.f32 0.25, %v8085_v21 }
 0x520   :  { %v8280_v54 = vsel %vm3480_vm15, 1.0, %v7370_v16  ;;  %v3521_v22 = vsub.f32 -2.5, %v8097_v62  ;;  %v8283_v25 = vmul.f32 %v5840_v5, %v2514_v7  ;;  %v5939_v34 = vadd.f32 3.5, %v8097_v62 }
 0x521   :  { %v8287_v26 = vsub.f32 %v8280_v54, %v8178_v57  ;;  %v3526_v35 = vsub.f32 -1.5, %v8097_v62  ;;  %v2564_v37 = vmul.f32 %v2563_v59, %v2519_v50  ;;  %v8292_v40 = vadd.f32 1.5, %v8094_v31  ;;  %6471 = vmatpush3.bf16.msra.mxu0 %v7072_v9 }
 0x522   :  { %v2604_v41 = vsub.f32 -0.16666667, %v8094_v31  ;;  %v3522_v32 = vmul.f32 %v3521_v22, %v3504_v33  ;;  %v3525_v45 = vmul.f32 %v5939_v34, %v3504_v33  ;;  %v5940_v57 = vadd.f32 2.5, %v8097_v62  ;;  %6472 = vmatprep.subr.bf16.mxu0 %v7074_v29  ;;  %v7084_v34 = vld [vmem:[#allocation6 + $0xb8] sm:$0xff]  }
 0x523   :  { %v3520_v44 = vmul.f32 %v5938_v48, %v8287_v26  ;;  %v3527_v51 = vmul.f32 %v3526_v35, %v3505_v63  ;;  %v2567_v38 = vmul.f32 %v5841_v13, %v2519_v50  ;;  %v2569_v53 = vmul.f32 %v2568_v30, %v8268_v61 }
 0x524   :  { %v8298_v3 = vadd.f32 %v3537_v12, %v3535_v23  ;;  %v5948_v58 = vadd.f32 2.25, %v8126_v8  ;;  %v3530_v39 = vmul.f32 %v5940_v57, %v3505_v63  ;;  %v3572_v2 = vsub.f32 -0.75, %v8126_v8  ;;  %v7080_v23 = vld [vmem:[#allocation6 + $0xb0] sm:$0xff]   ;;  %v7082_v63 = vld [vmem:[#allocation6 + $0xf8] sm:$0xff]  }
 0x525   :  { %v8301_v1 = vadd.f32 %v3522_v32, %v3520_v44  ;;  %v3528_v36 = vadd.f32 %v3527_v51, %v3525_v45  ;;  %v8305_v33 = vadd.f32 1.1666666, %v8094_v31  ;;  %v5949_v52 = vadd.f32 1.75, %v8126_v8  ;;  %6473 = vmatpush3.bf16.msra.mxu0 %v7076_v43 }
 0x526   :  { %v3577_v7 = vsub.f32 -0.25, %v8126_v8  ;;  %v5950_v6 = vadd.f32 1.25, %v8126_v8  ;;  %v3533_v12 = vadd.f32 %v3532_v46, %v3530_v39  ;;  %v3582_v5 = vsub.f32 0.25, %v8126_v8  ;;  %6474 = vmatprep.subr.bf16.mxu0 %v7078_v19  ;;  %v7086_v19 = vld [vmem:[#allocation6 + $0x1c0] sm:$0xff]  }
 0x527   :  { %v3571_v50 = vmul.f32 %v5948_v58, %v8301_v1  ;;  %v3573_v24 = vmul.f32 %v3572_v2, %v3528_v36  ;;  %v3576_v59 = vmul.f32 %v5949_v52, %v3528_v36  ;;  %v5957_v9 = vadd.f32 1.5, %v8131_v4 }
 0x528   :  { %v3618_v13 = vsub.f32 -0.16666667, %v8131_v4  ;;  %v5958_v48 = vadd.f32 1.1666666, %v8131_v4  ;;  %v3578_v30 = vmul.f32 %v3577_v7, %v3533_v12  ;;  %v3581_v22 = vmul.f32 %v5950_v6, %v3533_v12 }
 0x529   :  { %v8315_v29 = vadd.f32 %v3573_v24, %v3571_v50  ;;  %v3583_v46 = vmul.f32 %v3582_v5, %v8298_v3  ;;  %v2560_v35 = vadd.f32 %v2559_v15, %v2557_v14  ;;  %v3623_v32 = vsub.f32 0.16666667, %v8131_v4  ;;  %6475 = vmatpush3.bf16.msra.mxu0 %v7080_v23 }
 0x52a   :  { %v5827_v43 = vmul.f32 -1.442695, %v8054_v10  ;;  %vm2464_vm0 = vcmp.ge.f32.partialorder %v8054_v10, -2.2  ;;  %v3579_v44 = vadd.f32 %v3578_v30, %v3576_v59  ;;  %6476 = vmatprep.subr.bf16.mxu0 %v7082_v63  ;;  %v5828_v14 = vadd.f32 5.5, %v8066_v55 }
 0x52b   :  { %v8321_v45 = vadd.f32 %v3583_v46, %v3581_v22  ;;  %v3617_v51 = vmul.f32 %v5957_v9, %v8315_v29  ;;  %v2465_v57 = vsel %vm2464_vm0, 1.0, %v7370_v16  ;;  %v2502_v15 = vsub.f32 -3.5, %v8066_v55  ;;  %v7088_v22 = vld [vmem:[#allocation6 + $0x180] sm:$0xff]  }
 0x52c   :  { %7272 = vpow2.f32 %v5827_v43  ;;  %v2488_v58 = vsub.f32 %v2465_v57, %v8225_v42  ;;  %v2609_v36 = vsub.f32 0.16666667, %v8094_v31  ;;  %v3619_v39 = vmul.f32 %v3618_v13, %v3579_v44  ;;  %v7090_v43 = vld [vmem:[#allocation6 + $0x1c8] sm:$0xff]  }
 0x52d   :  { %v3622_v2 = vmul.f32 %v5958_v48, %v3579_v44  ;;  %v3624_v52 = vmul.f32 %v3623_v32, %v8321_v45  ;;  %v2565_v7 = vadd.f32 %v2564_v37, %v8283_v25  ;;  %v2503_v23 = vmul.f32 %v2502_v15, %v8232_v20  ;;  %6477 = vmatpush3.bf16.msra.mxu0 %v7084_v34 }
 0x52e   :  { %v2501_v6 = vmul.f32 %v5828_v14, %v2488_v58  ;;  %v2553_v12 = vsub.f32 -1.25, %v8085_v21  ;;  %v8333_v50 = vadd.f32 %v2569_v53, %v2567_v38  ;;  %v3620_v42 = vadd.f32 %v3619_v39, %v3617_v51  ;;  %6506 = vmatprep.subr.bf16.mxu0 %v7086_v19  ;;  %v7092_v39 = vld [vmem:[#allocation6 + $0x188] sm:$0xff]  }
 0x52f   :  { %v3625_v24 = vadd.f32 %v3624_v52, %v3622_v2  ;;  %v5936_v55 = vmul.f32 -1.442695, %v8068_v17  ;;  %v5838_v63 = vadd.f32 2.75, %v8085_v21  ;;  %vm3478_vm1 = vcmp.ge.f32.partialorder %v8068_v17, -2.2 }
 0x530   :  { %v2504_v5 = vadd.f32 %v2503_v23, %v2501_v6  ;;  %v2554_v59 = vmul.f32 %v2553_v12, %v8255_v60  ;;  %v2599_v25 = vsub.f32 -0.5, %v8094_v31  ;;  %v3479_v20 = vsel %vm3478_vm1, 1.0, %v7370_v16 }
 0x531   :  { %7274 = vpow2.f32 %v5936_v55  ;;  %v3502_v38 = vsub.f32 %v3479_v20, %v8280_v54  ;;  %v5937_v53 = vadd.f32 5.5, %v8097_v62  ;;  %v3516_v9 = vsub.f32 -3.5, %v8097_v62  ;;  %v7096_v20 = vld [vmem:[#allocation6 + $0x190] sm:$0xff]  }
 0x532   :  { %v2552_v37 = vmul.f32 %v5838_v63, %v2504_v5  ;;  %v8345_v13 = vmul.f32 %v8292_v40, %v2560_v35  ;;  %v8349_v60 = vmul.f32 %v2604_v41, %v2565_v7  ;;  %v8352_v48 = vmul.f32 %v8305_v33, %v2565_v7 }
 0x533   :  { %v7298_v30 = vpack.c.bf16 %v3625_v24, %v3625_v24  ;;  %v5847_v34 = vadd.f32 1.8333334, %v8094_v31  ;;  %v2600_v54 = vmul.f32 %v2599_v25, %v2560_v35  ;;  %v7299_v32 = vpack.c.bf16 %v3620_v42, %v3620_v42 }
 0x534   :  { %v2555_v46 = vadd.f32 %v2554_v59, %v2552_v37  ;;  %v8356_v62 = vmul.f32 %v2609_v36, %v8333_v50  ;;  %v5947_v40 = vadd.f32 2.75, %v8126_v8  ;;  %v5843_v41 = vadd.f32 0.25, %v8085_v21 }
 0x535   :  { %4352 = vmatprep.mubr.bf16.mxu0 %v7298_v30  ;;  %v2578_v44 = vsub.f32 1.25, %v8085_v21  ;;  %v3515_v57 = vmul.f32 %v5937_v53, %v3502_v38  ;;  %v3517_v19 = vmul.f32 %v3516_v9, %v8287_v26  ;;  %v2624_v35 = vsub.f32 1.1666666, %v8094_v31  ;;  %v7094_v26 = vld [vmem:[#allocation6 + $0x1d0] sm:$0xff]  }
 0x536   :  { %v7273_v33 = vpop.eup %7272  ;;  %v2598_v51 = vmul.f32 %v5847_v34, %v2555_v46  ;;  %4353 = vmatmul.mubr.bf16.vlgmr.msra.gmra.mrb[8].mxu0 %v7299_v32  ;;  %v2577_v14 = vmul.f32 %v5843_v41, %v8114_v56  ;;  %v5952_v36 = vadd.f32 0.25, %v8126_v8  ;;  %v3567_v52 = vsub.f32 -1.25, %v8126_v8 }
 0x537   :  { %v2458_v58 = vadd.f32 1.0, %v7273_v33  ;;  %6507 = vmatpush3.bf16.msra.mxu0 %v7088_v22  ;;  %v2579_v15 = vmul.f32 %v2578_v44, %v8116_v11  ;;  %v5852_v7 = vadd.f32 0.16666667, %v8094_v31  ;;  %v3592_v6 = vsub.f32 1.25, %v8126_v8 }
 0x538   :  { %v2601_v2 = vadd.f32 %v2600_v54, %v2598_v51  ;;  %6508 = vmatprep.subr.bf16.mxu0 %v7090_v43  ;;  %v2625_v12 = vmul.f32 %v2624_v35, %v8136_v28  ;;  %v3591_v42 = vmul.f32 %v5952_v36, %v8262_v0  ;;  %v3518_v11 = vadd.f32 %v3517_v19, %v3515_v57  ;;  %v7100_v43 = vld [vmem:[#allocation6 + $0x198] sm:$0xff]  }
 0x539   :  { %7276 = vrcp.f32 %v2458_v58  ;;  %v2580_v23 = vadd.f32 %v2579_v15, %v2577_v14  ;;  %v3593_v55 = vmul.f32 %v3592_v6, %v8207_v47  ;;  %v3638_v5 = vsub.f32 1.1666666, %v8131_v4  ;;  %v7098_v47 = vld [vmem:[#allocation6 + $0x1d8] sm:$0xff]  }
 0x53a   :  { %v2637_v24 = vpack.c.bf16 %v2601_v2, %v2601_v2  ;;  %v3568_v59 = vmul.f32 %v3567_v52, %v8301_v1  ;;  %v5842_v37 = vadd.f32 0.75, %v8085_v21  ;;  %v2573_v38 = vsub.f32 0.75, %v8085_v21 }
 0x53b   :  { %v7275_v63 = vpop.eup %7274  ;;  %v2623_v25 = vmul.f32 %v5852_v7, %v2580_v23  ;;  %6509 = vmatpush3.bf16.msra.mxu0 %v7092_v39  ;;  %v3594_v53 = vadd.f32 %v3593_v55, %v3591_v42  ;;  %v5961_v9 = vadd.f32 0.16666667, %v8131_v4  ;;  %v3639_v30 = vmul.f32 %v3638_v5, %v8220_v27  ;;  %v7104_v7 = vld [vmem:[#allocation6 + $0x1a0] sm:$0xff]  }
 0x53c   :  { %2638 = vst [vmem:[#allocation2 + $0x4] sm:$0xf] %v2637_v24  ;;  %v3472_v28 = vadd.f32 1.0, %v7275_v63  ;;  %6510 = vmatprep.subr.bf16.mxu0 %v7094_v26  ;;  %v2572_v1 = vmul.f32 %v5842_v37, %v8268_v61  ;;  %v2574_v46 = vmul.f32 %v2573_v38, %v8114_v56  ;;  %v5850_v34 = vadd.f32 0.8333333, %v8094_v31 }
 0x53d   :  { %v8378_v22 = vadd.f32 %v2625_v12, %v2623_v25  ;;  %v3566_v54 = vmul.f32 %v5947_v40, %v3518_v11  ;;  %v3637_v21 = vmul.f32 %v5961_v9, %v3594_v53  ;;  %v2614_v32 = vsub.f32 0.5, %v8094_v31  ;;  %v7102_v40 = vld [vmem:[#allocation6 + $0x1e0] sm:$0xff]  }
 0x53e   :  { %7278 = vrcp.f32 %v3472_v28  ;;  %v2575_v41 = vadd.f32 %v2574_v46, %v2572_v1  ;;  %v2613_v27 = vmul.f32 %v5850_v34, %v8333_v50  ;;  %v5851_v44 = vadd.f32 0.5, %v8094_v31  ;;  %v7112_v28 = vld [vmem:[#allocation6 + $0x1b0] sm:$0xff]  }
 0x53f   :  { %6511 = vmatpush3.bf16.msra.mxu0 %v7096_v20  ;;  %v5956_v33 = vadd.f32 1.8333334, %v8131_v4  ;;  %v8387_v51 = vadd.f32 %v3639_v30, %v3637_v21  ;;  %v2619_v56 = vsub.f32 0.8333333, %v8094_v31  ;;  %v5951_v61 = vadd.f32 0.75, %v8126_v8  ;;  %v7077_v21 = vld [vmem:[%s8950_s8 + $0x90] sm:$0xff]  }
 0x540   :  { %6512 = vmatprep.subr.bf16.mxu0 %v7098_v47  ;;  %v2615_v57 = vmul.f32 %v2614_v32, %v2575_v41  ;;  %v2618_v19 = vmul.f32 %v5851_v44, %v2575_v41  ;;  %v3587_v35 = vsub.f32 0.75, %v8126_v8  ;;  %v5959_v58 = vadd.f32 0.8333333, %v8131_v4  ;;  %v7079_v32 = vld [vmem:[%s8950_s8 + $0xd8] sm:$0xff]   ;;  %v7083_v41 = vld [vmem:[%s8950_s8 + $0xe0] sm:$0xff]   ;;  %v7087_v44 = vld [vmem:[%s8950_s8 + $0xe8] sm:$0xff]  }
 0x541   :  { %v3569_v14 = vadd.f32 %v3568_v59, %v3566_v54  ;;  %v2620_v50 = vmul.f32 %v2619_v56, %v2580_v23  ;;  %v3586_v15 = vmul.f32 %v5951_v61, %v8298_v3  ;;  %v3613_v39 = vsub.f32 -0.5, %v8131_v4  ;;  %v7106_v23 = vld [vmem:[#allocation6 + $0x1e8] sm:$0xff]   ;;  %v7110_v59 = vld [vmem:[#allocation6 + $0x1f0] sm:$0xff]  }
 0x542   :  { %v8395_v2 = vadd.f32 %v2615_v57, %v2613_v27  ;;  %v3588_v31 = vmul.f32 %v3587_v35, %v8262_v0  ;;  %v3627_v52 = vmul.f32 %v5959_v58, %v8321_v45  ;;  %v7300_v8 = vpack.c.bf16 %v8264_v49, %v8264_v49  ;;  %v7108_v49 = vld [vmem:[#allocation6 + $0x1a8] sm:$0xff]   ;;  %v7085_v27 = vld [vmem:[%s8950_s8 + $0xa0] sm:$0xff]   ;;  %v7095_v61 = vld [vmem:[%s8950_s8 + $0xf8] sm:$0xff]  }
 0x543   :  { %v7277_v36 = vpop.eup %7276  ;;  %6513 = vmatpush3.bf16.msra.mxu0 %v7100_v43  ;;  %v8402_v26 = vadd.f32 %v2620_v50, %v2618_v19  ;;  %v3633_v3 = vsub.f32 0.8333333, %v8131_v4  ;;  %v3614_v12 = vmul.f32 %v3613_v39, %v8315_v29  ;;  %v3628_v24 = vsub.f32 0.5, %v8131_v4  ;;  %v7075_v54 = vld [vmem:[%s8950_s8 + $0xd0] sm:$0xff]   ;;  %v7081_v43 = vld [vmem:[%s8950_s8 + $0x98] sm:$0xff]   ;;  %v7099_v57 = vld [vmem:[%s8950_s8 + $0x140] sm:$0xff]  }
 0x544   :  { %v2461_v6 = vmul.f32 %v7277_v36, %v8054_v10  ;;  %6514 = vmatprep.subr.bf16.mxu0 %v7102_v40  ;;  %v3589_v42 = vadd.f32 %v3588_v31, %v3586_v15  ;;  %v5960_v0 = vadd.f32 0.5, %v8131_v4  ;;  %v3612_v11 = vmul.f32 %v5956_v33, %v3569_v14  ;;  %4432 = vmatprep.mubr.bf16.mxu0 %v7300_v8  ;;  %v7089_v33 = vld [vmem:[%s8950_s8 + $0xa8] sm:$0xff]   ;;  %v7093_v56 = vld [vmem:[%s8950_s8 + $0xb0] sm:$0xff]   ;;  %v7097_v40 = vld [vmem:[%s8950_s8 + $0xb8] sm:$0xff]  }
 0x545   :  { %v3634_v10 = vmul.f32 %v3633_v3, %v3594_v53  ;;  %v2606_v4 = vadd.f32 %v8349_v60, %v8345_v13  ;;  %v2611_v37 = vadd.f32 %v8356_v62, %v8352_v48  ;;  %v7114_v53 = vld [vmem:[#allocation6 + $0x1f8] sm:$0xff]   ;;  %v7071_v60 = vld [vmem:[%s8950_s8 + $0xc8] sm:$0xff]   ;;  %v7302_v34 = vpack.c.bf16 %v8387_v51, %v8387_v51  ;;  %v7091_v51 = vld [vmem:[%s8950_s8 + $0xf0] sm:$0xff]  }
 0x546   :  { %v2462_v45 = vpack.c.bf16 %v2461_v6, %v2461_v6  ;;  %v3629_v55 = vmul.f32 %v3628_v24, %v3589_v42  ;;  %v3632_v5 = vmul.f32 %v5960_v0, %v3589_v42  ;;  %v3615_v38 = vadd.f32 %v3614_v12, %v3612_v11  ;;  %v7069_v13 = vld [vmem:[%s8950_s8 + $0x80] sm:$0xff]   ;;  %v7073_v62 = vld [vmem:[%s8950_s8 + $0x88] sm:$0xff]   ;;  %v7107_v15 = vld [vmem:[%s8950_s8 + $0x150] sm:$0xff]  }
 0x547   :  { %6515 = vmatpush3.bf16.msra.mxu0 %v7104_v7  ;;  %v7301_v48 = vpack.c.bf16 %v2611_v37, %v2611_v37  ;;  %v7101_v19 = vld [vmem:[%s8950_s8 + $0x100] sm:$0xff]   ;;  %v7303_v35 = vpack.c.bf16 %v2606_v4, %v2606_v4  ;;  %v7103_v58 = vld [vmem:[%s8950_s8 + $0x148] sm:$0xff]   ;;  %v7304_v14 = vpack.c.bf16 %v8402_v26, %v8402_v26  ;;  %v7109_v36 = vld [vmem:[%s8950_s8 + $0x110] sm:$0xff]   ;;  %v7305_v0 = vpack.c.bf16 %v8395_v2, %v8395_v2 }
 0x548   :  { %v7279_v63 = vpop.eup %7278  ;;  %2463 = vst [vmem:[#allocation2] sm:$0xf] %v2462_v45  ;;  %6516 = vmatprep.subr.bf16.mxu0 %v7106_v23  ;;  %v8409_v29 = vadd.f32 %v3629_v55, %v3627_v52  ;;  %v8411_v20 = vadd.f32 %v3634_v10, %v3632_v5  ;;  %v3651_v30 = vpack.c.bf16 %v3615_v38, %v3615_v38  ;;  %v7105_v50 = vld [vmem:[%s8950_s8 + $0x108] sm:$0xff]   ;;  %v7111_v39 = vld [vmem:[%s8950_s8 + $0x158] sm:$0xff]   ;;  %v7115_v52 = vld [vmem:[%s8950_s8 + $0x160] sm:$0xff]   ;;  %vm3466_vm2 = vcmask 7168  }
 0x549   :  { %v3475_v25 = vmul.f32 %v7279_v63, %v8068_v17  ;;  %v7116_v17 = vld [vmem:[#allocation6 + $0x1b8] sm:$0xff]   ;;  %v7118_v6 = vld [vmem:[%s8950_s8 + $0x168] sm:$0xff]   ;;  %v7120_v26 = vld [vmem:[%s8950_s8 + $0x170] sm:$0xff]   ;;  %v7306_v11 = vpack.c.bf16 %v8150_v18, %v8150_v18 }
 0x54a   :  { %v7113_v31 = vld [vmem:[%s8950_s8 + $0x118] sm:$0xff]   ;;  %v7117_v7 = vld [vmem:[%s8950_s8 + $0x120] sm:$0xff]   ;;  %v7119_v8 = vld [vmem:[%s8950_s8 + $0x128] sm:$0xff]  }
 0x54b   :  { %6517 = vmatpush3.bf16.msra.mxu0 %v7108_v49  ;;  %v3476_v9 = vpack.c.bf16 %v3475_v25, %v3475_v25  ;;  %v7121_v3 = vld [vmem:[%s8950_s8 + $0x130] sm:$0xff]   ;;  %v7122_v23 = vld [vmem:[%s8950_s8 + $0x178] sm:$0xff]   ;;  %v7124_v42 = vld [vmem:[%s8950_s8 + $0x1c0] sm:$0xff]  }
 0x54c   :  { %6518 = vmatprep.subr.bf16.mxu0 %v7110_v59  ;;  %v7123_v12 = vld [vmem:[%s8950_s8 + $0x138] sm:$0xff]   ;;  %v7125_v24 = vld [vmem:[%s8950_s8 + $0x180] sm:$0xff]   ;;  %v7126_v45 = vld [vmem:[%s8950_s8 + $0x1c8] sm:$0xff]  }
 0x54d   :  { %v7127_v10 = vld [vmem:[%s8950_s8 + $0x188] sm:$0xff]   ;;  %v7128_v2 = vld [vmem:[%s8950_s8 + $0x1d0] sm:$0xff]   ;;  %v7130_v18 = vld [vmem:[%s8950_s8 + $0x1d8] sm:$0xff]  }
 0x54e   :  { %v7129_v55 = vld [vmem:[%s8950_s8 + $0x190] sm:$0xff]   ;;  %v7131_v5 = vld [vmem:[%s8950_s8 + $0x198] sm:$0xff]   ;;  %v7132_v49 = vld [vmem:[%s8950_s8 + $0x1e0] sm:$0xff]  }
 0x54f   :  { %v2653_v47 = vld [vmem:[#allocation2] sm:$0xff]  ;;  %6519 = vmatpush3.bf16.msra.mxu0 %v7112_v28  ;;  %v7134_v59 = vld [vmem:[%s8950_s8 + $0x1e8] sm:$0xff]   ;;  %v7136_v4 = vld [vmem:[%s8950_s8 + $0x1f0] sm:$0xff]  }
 0x550   :  { %v5856_v1 = vcombine.high %v2653_v47, %v2653_v47  ;;  %3477 = vst [vmem:[#allocation2] sm:$0xf] %v3476_v9  ;;  %3652 = vst [vmem:[#allocation2 + $0x4] sm:$0xf] %v3651_v30  ;;  %v5855_v46 = vcombine.low %v2653_v47, %v2653_v47  ;;  %6520 = vmatprep.subr.bf16.mxu0 %v7114_v53  ;;  %v7133_v63 = vld [vmem:[%s8950_s8 + $0x1a0] sm:$0xff]   ;;  %v7135_v25 = vld [vmem:[%s8950_s8 + $0x1a8] sm:$0xff]   ;;  %v7307_v47 = vpack.c.bf16 %v8378_v22, %v8378_v22 }
 0x551   :  { %v7137_v37 = vld [vmem:[%s8950_s8 + $0x1b0] sm:$0xff]   ;;  %v7138_v38 = vld [vmem:[%s8950_s8 + $0x1f8] sm:$0xff]   ;;  %v7140_v53 = vld [vmem:[#allocation6 + $0x40] sm:$0xff]  }
 0x552   :  { %3298 = vmatprep.mubr.bf16.mxu1 %v5856_v1  ;;  %v7139_v28 = vld [vmem:[%s8950_s8 + $0x1b8] sm:$0xff]   ;;  %v7141_v30 = vld [vmem:[#allocation6] sm:$0xff]   ;;  %v7151_v22 = vld [vmem:[#allocation6 + $0x68] sm:$0xff]  }
 0x553   :  { %3299 = vmatmul.mubr.bf16.vlgmr.msra.gmra.mrb[20].mxu1 %v5855_v46  ;;  %6521 = vmatpush3.bf16.msra.mxu0 %v7116_v17  ;;  %v7143_v17 = vld [vmem:[#allocation6 + $0x48] sm:$0xff]  }
 0x554   :  { %6366 = vmatpush3.bf16.msra.mxu1 %v7069_v13  ;;  %3338 = vmatprep.mubr.bf16.mxu1 %v7301_v48  ;;  %v7144_v46 = vld [vmem:[#allocation6 + $0x8] sm:$0xff]   ;;  %v7145_v13 = vld [vmem:[#allocation6 + $0x50] sm:$0xff]   ;;  %v7147_v48 = vld [vmem:[#allocation6 + $0x58] sm:$0xff]  }
 0x555   :  { %6367 = vmatprep.subr.bf16.mxu1 %v7071_v60  ;;  %v7146_v60 = vld [vmem:[#allocation6 + $0x10] sm:$0xff]  }
 0x556   :  { %4433 = vmatmul.mubr.bf16.vlgmr.msra.gmra.mrb[12].mxu0 %v7302_v34  ;;  %v7149_v34 = vld [vmem:[#allocation6 + $0x60] sm:$0xff]  }
 0x557   :  { %v3667_v9 = vld [vmem:[#allocation2] sm:$0xff] }
 0x558   :  { %6368 = vmatpush3.bf16.msra.mxu1 %v7073_v62  ;;  %v5965_v1 = vcombine.high %v3667_v9, %v3667_v9  ;;  %v7148_v62 = vld [vmem:[#allocation6 + $0x18] sm:$0xff]  }
 0x559   :  { %6369 = vmatprep.subr.bf16.mxu1 %v7075_v54  ;;  %v7150_v54 = vld [vmem:[#allocation6 + $0x20] sm:$0xff]  }
 0x55c   :  { %6370 = vmatpush3.bf16.msra.mxu1 %v7077_v21  ;;  %v7152_v21 = vld [vmem:[#allocation6 + $0x28] sm:$0xff]  }
 0x55d   :  { %6371 = vmatprep.subr.bf16.mxu1 %v7079_v32  ;;  %v7153_v32 = vld [vmem:[#allocation6 + $0x70] sm:$0xff]  }
 0x560   :  { %6372 = vmatpush3.bf16.msra.mxu1 %v7081_v43  ;;  %v7154_v43 = vld [vmem:[#allocation6 + $0x30] sm:$0xff]  }
 0x561   :  { %6373 = vmatprep.subr.bf16.mxu1 %v7083_v41  ;;  %v7155_v41 = vld [vmem:[#allocation6 + $0x78] sm:$0xff]  }
 0x564   :  { %6374 = vmatpush3.bf16.msra.mxu1 %v7085_v27  ;;  %v7156_v27 = vld [vmem:[#allocation6 + $0x38] sm:$0xff]  }
 0x565   :  { %6375 = vmatprep.subr.bf16.mxu1 %v7087_v44  ;;  %v7158_v44 = vld [vmem:[#allocation6 + $0x140] sm:$0xff]  }
 0x568   :  { %6376 = vmatpush3.bf16.msra.mxu1 %v7089_v33  ;;  %v7159_v33 = vld [vmem:[#allocation6 + $0x100] sm:$0xff]  }
 0x569   :  { %6377 = vmatprep.subr.bf16.mxu1 %v7091_v51  ;;  %v5964_v51 = vcombine.low %v3667_v9, %v3667_v9 }
 0x56c   :  { %6378 = vmatpush3.bf16.msra.mxu1 %v7093_v56  ;;  %v7160_v56 = vld [vmem:[#allocation6 + $0x148] sm:$0xff]  }
 0x56d   :  { %6379 = vmatprep.subr.bf16.mxu1 %v7095_v61  ;;  %v7308_v61 = vpack.c.bf16 %v8411_v20, %v8411_v20  ;;  %v7169_v20 = vld [vmem:[#allocation6 + $0x128] sm:$0xff]  }
 0x570   :  { %6380 = vmatpush3.bf16.msra.mxu1 %v7097_v40  ;;  %v7161_v40 = vld [vmem:[#allocation6 + $0x108] sm:$0xff]  }
 0x571   :  { %6387 = vmatprep.subr.bf16.mxu1 %v7099_v57  ;;  %v7162_v57 = vld [vmem:[#allocation6 + $0x150] sm:$0xff]  }
 0x573   :  { %3339 = vmatmul.mubr.bf16.vlgmr.msra.gmra.mrb[24].mxu1 %v7303_v35  ;;  %v7164_v35 = vld [vmem:[#allocation6 + $0x158] sm:$0xff]  }
 0x574   :  { %6388 = vmatpush3.bf16.msra.mxu1 %v7101_v19  ;;  %3378 = vmatprep.mubr.bf16.mxu1 %v7304_v14  ;;  %v7163_v19 = vld [vmem:[#allocation6 + $0x110] sm:$0xff]   ;;  %v7166_v14 = vld [vmem:[#allocation6 + $0x160] sm:$0xff]  }
 0x575   :  { %6389 = vmatprep.subr.bf16.mxu1 %v7103_v58  ;;  %v7165_v58 = vld [vmem:[#allocation6 + $0x118] sm:$0xff]  }
 0x578   :  { %6390 = vmatpush3.bf16.msra.mxu1 %v7105_v50  ;;  %v7167_v50 = vld [vmem:[#allocation6 + $0x120] sm:$0xff]  }
 0x579   :  { %6391 = vmatprep.subr.bf16.mxu1 %v7107_v15  ;;  %v7168_v15 = vld [vmem:[#allocation6 + $0x168] sm:$0xff]  }
 0x57c   :  { %6392 = vmatpush3.bf16.msra.mxu1 %v7109_v36 }
 0x57d   :  { %6393 = vmatprep.subr.bf16.mxu1 %v7111_v39  ;;  %v7170_v39 = vld [vmem:[#allocation6 + $0x170] sm:$0xff]  }
 0x580   :  { %6394 = vmatpush3.bf16.msra.mxu1 %v7113_v31 }
 0x581   :  { %6395 = vmatprep.subr.bf16.mxu1 %v7115_v52 }
 0x584   :  { %6396 = vmatpush3.bf16.msra.mxu1 %v7117_v7 }
 0x585   :  { %6397 = vmatprep.subr.bf16.mxu1 %v7118_v6  ;;  %v7171_v6 = vld [vmem:[#allocation6 + $0x130] sm:$0xff]  }
 0x588   :  { %6398 = vmatpush3.bf16.msra.mxu1 %v7119_v8  ;;  %v7172_v8 = vld [vmem:[#allocation6 + $0x178] sm:$0xff]  }
 0x589   :  { %6399 = vmatprep.subr.bf16.mxu1 %v7120_v26  ;;  %v7173_v26 = vld [vmem:[#allocation6 + $0x138] sm:$0xff]  }
 0x58c   :  { %6400 = vmatpush3.bf16.msra.mxu1 %v7121_v3  ;;  %v7174_v3 = vld [vmem:[#allocation6 + $0x200] sm:$0xff]  }
 0x58d   :  { %6401 = vmatprep.subr.bf16.mxu1 %v7122_v23  ;;  %v7309_v23 = vpack.c.bf16 %v8409_v29, %v8409_v29  ;;  %v7178_v29 = vld [vmem:[#allocation6 + $0x220] sm:$0xff]  }
 0x590   :  { %6402 = vmatpush3.bf16.msra.mxu1 %v7123_v12  ;;  %v7175_v12 = vld [vmem:[#allocation6 + $0x208] sm:$0xff]  }
 0x591   :  { %6409 = vmatprep.subr.bf16.mxu1 %v7124_v42  ;;  %v7176_v42 = vld [vmem:[#allocation6 + $0x210] sm:$0xff]  }
 0x593   :  { %3379 = vmatmul.mubr.bf16.vlgmr.msra.gmra.mrb[28].mxu1 %v7305_v0  ;;  %v7179_v0 = vld [vmem:[#allocation6 + $0x228] sm:$0xff]  }
 0x594   :  { %6410 = vmatpush3.bf16.msra.mxu1 %v7125_v24  ;;  %3418 = vmatprep.mubr.bf16.mxu1 %v7306_v11  ;;  %v7177_v24 = vld [vmem:[#allocation6 + $0x218] sm:$0xff]  }
 0x595   :  { %6411 = vmatprep.subr.bf16.mxu1 %v7126_v45  ;;  %v7180_v45 = vld [vmem:[#allocation6 + $0x230] sm:$0xff]  }
 0x598   :  { %6412 = vmatpush3.bf16.msra.mxu1 %v7127_v10 }
 0x599   :  { %6413 = vmatprep.subr.bf16.mxu1 %v7128_v2 }
 0x59c   :  { %6414 = vmatpush3.bf16.msra.mxu1 %v7129_v55 }
 0x59d   :  { %6415 = vmatprep.subr.bf16.mxu1 %v7130_v18  ;;  %v7181_v18 = vld [vmem:[#allocation6 + $0x238] sm:$0xff]  }
 0x5a0   :  { %6416 = vmatpush3.bf16.msra.mxu1 %v7131_v5 }
 0x5a1   :  { %6417 = vmatprep.subr.bf16.mxu1 %v7132_v49  ;;  %v7182_v49 = vld [vmem:[#allocation2 + $0x20] ss:$0 sps:$4 sm:$0xff]  }
 0x5a4   :  { %6418 = vmatpush3.bf16.msra.mxu1 %v7133_v63 }
 0x5a5   :  { %6419 = vmatprep.subr.bf16.mxu1 %v7134_v59 }
 0x5a8   :  { %6420 = vmatpush3.bf16.msra.mxu1 %v7135_v25 }
 0x5a9   :  { %6421 = vmatprep.subr.bf16.mxu1 %v7136_v4 }
 0x5ac   :  { %6422 = vmatpush3.bf16.msra.mxu1 %v7137_v37 }
 0x5ad   :  { %6423 = vmatprep.subr.bf16.mxu1 %v7138_v38 }
 0x5b0   :  { %6424 = vmatpush3.bf16.msra.mxu1 %v7139_v28 }
 0x5b1   :  { %6440 = vmatprep.subr.bf16.mxu1 %v7140_v53 }
 0x5b3   :  { %3419 = vmatmul.mubr.bf16.vlgmr.msra.gmra.mrb[32].mxu1 %v7307_v47 }
 0x5b4   :  { %6441 = vmatpush3.bf16.msra.mxu1 %v7141_v30  ;;  %4312 = vmatprep.mubr.bf16.mxu1 %v5965_v1 }
 0x5b5   :  { %6442 = vmatprep.subr.bf16.mxu1 %v7143_v17 }
 0x5b8   :  { %6443 = vmatpush3.bf16.msra.mxu1 %v7144_v46 }
 0x5b9   :  { %6444 = vmatprep.subr.bf16.mxu1 %v7145_v13 }
 0x5bc   :  { %6445 = vmatpush3.bf16.msra.mxu1 %v7146_v60 }
 0x5bd   :  { %6446 = vmatprep.subr.bf16.mxu1 %v7147_v48 }
 0x5c0   :  { %6447 = vmatpush3.bf16.msra.mxu1 %v7148_v62 }
 0x5c1   :  { %6448 = vmatprep.subr.bf16.mxu1 %v7149_v34 }
 0x5c4   :  { %6449 = vmatpush3.bf16.msra.mxu1 %v7150_v54 }
 0x5c5   :  { %6450 = vmatprep.subr.bf16.mxu1 %v7151_v22 }
 0x5c8   :  { %6451 = vmatpush3.bf16.msra.mxu1 %v7152_v21 }
 0x5c9   :  { %6452 = vmatprep.subr.bf16.mxu1 %v7153_v32 }
 0x5cc   :  { %6453 = vmatpush3.bf16.msra.mxu1 %v7154_v43 }
 0x5cd   :  { %6454 = vmatprep.subr.bf16.mxu1 %v7155_v41 }
 0x5d0   :  { %6455 = vmatpush3.bf16.msra.mxu1 %v7156_v27 }
 0x5d1   :  { %6484 = vmatprep.subr.bf16.mxu1 %v7158_v44 }
 0x5d3   :  { %4313 = vmatmul.mubr.bf16.vlgmr.msra.gmra.mrb[36].mxu1 %v5964_v51 }
 0x5d4   :  { %6485 = vmatpush3.bf16.msra.mxu1 %v7159_v33  ;;  %4392 = vmatprep.mubr.bf16.mxu1 %v7308_v61 }
 0x5d5   :  { %6486 = vmatprep.subr.bf16.mxu1 %v7160_v56 }
 0x5d8   :  { %6487 = vmatpush3.bf16.msra.mxu1 %v7161_v40 }
 0x5d9   :  { %6488 = vmatprep.subr.bf16.mxu1 %v7162_v57 }
 0x5dc   :  { %6489 = vmatpush3.bf16.msra.mxu1 %v7163_v19 }
 0x5dd   :  { %6490 = vmatprep.subr.bf16.mxu1 %v7164_v35 }
 0x5e0   :  { %6491 = vmatpush3.bf16.msra.mxu1 %v7165_v58 }
 0x5e1   :  { %6492 = vmatprep.subr.bf16.mxu1 %v7166_v14 }
 0x5e3   :  { %v8570_v36 = vpop.f32.mrb[4].mxu0 }
 0x5e4   :  { %6493 = vmatpush3.bf16.msra.mxu1 %v7167_v50  ;;  %v6672_v31 = vpop.f32.mrb[5].mxu0 }
 0x5e5   :  { %6494 = vmatprep.subr.bf16.mxu1 %v7168_v15  ;;  %v3463_v52 = vpop.f32.mrb[6].mxu0 }
 0x5e6   :  { %v6673_v7 = vpop.f32.mrb[7].mxu0 }
 0x5e8   :  { %6495 = vmatpush3.bf16.msra.mxu1 %v7169_v20 }
 0x5e9   :  { %6496 = vmatprep.subr.bf16.mxu1 %v7170_v39 }
 0x5ec   :  { %6497 = vmatpush3.bf16.msra.mxu1 %v7171_v6 }
 0x5ed   :  { %6498 = vmatprep.subr.bf16.mxu1 %v7172_v8 }
 0x5f0   :  { %6499 = vmatpush3.bf16.msra.mxu1 %v7173_v26 }
 0x5f1   :  { %6674 = vmatprep.subr.bf16.mxu1 %v7370_v16 }
 0x5f3   :  { %4393 = vmatmul.mubr.bf16.vlgmr.msra.gmra.mrb[40].mxu1 %v7309_v23  ;;  %v7184_v23 = vld [vmem:[%s8950_s8 + $0x80] sm:$0xff]  }
 0x5f4   :  { %6675 = vmatpush3.bf16.msra.mxu1 %v7174_v3  ;;  %6690 = vmatprep.mubr.msk.bf16.mxu1 %vm7372_vm8, %v7370_v16  ;;  %v7183_v3 = vld [vmem:[%s8950_s8 + $0xc0] sm:$0xff]  }
 0x5f5   :  { %6676 = vmatprep.subr.bf16.mxu1 %v7370_v16 }
 0x5f8   :  { %6677 = vmatpush3.bf16.msra.mxu1 %v7175_v12  ;;  %v7185_v12 = vld [vmem:[%s8950_s8 + $0xc8] sm:$0xff]  }
 0x5f9   :  { %6678 = vmatprep.subr.bf16.mxu1 %v7370_v16 }
 0x5fc   :  { %6679 = vmatpush3.bf16.msra.mxu1 %v7176_v42  ;;  %v7189_v42 = vld [vmem:[%s8950_s8 + $0x40] sm:$0xff]  }
 0x5fd   :  { %6680 = vmatprep.subr.bf16.mxu1 %v7370_v16  ;;  %6537 = vmatprep.subr.bf16.mxu0 %v7189_v42 }
 0x600   :  { %6681 = vmatpush3.bf16.msra.mxu1 %v7177_v24  ;;  %v7191_v24 = vld [vmem:[%s8950_s8] sm:$0xff]  }
 0x601   :  { %6682 = vmatprep.subr.bf16.mxu1 %v7370_v16  ;;  %6538 = vmatpush3.bf16.msra.mxu0 %v7191_v24 }
 0x604   :  { %6683 = vmatpush3.bf16.msra.mxu1 %v7178_v29  ;;  %v7186_v29 = vld [vmem:[%s8950_s8 + $0x88] sm:$0xff]  }
 0x605   :  { %6684 = vmatprep.subr.bf16.mxu1 %v7370_v16 }
 0x608   :  { %6685 = vmatpush3.bf16.msra.mxu1 %v7179_v0  ;;  %v7193_v0 = vld [vmem:[%s8950_s8 + $0x48] sm:$0xff]  }
 0x609   :  { %6686 = vmatprep.subr.bf16.mxu1 %v7370_v16  ;;  %v6478_v11 = vpop.f32.mrb[8].mxu0  ;;  %6539 = vmatprep.subr.bf16.mxu0 %v7193_v0 }
 0x60a   :  { %v6479_v10 = vpop.f32.mrb[9].mxu0 }
 0x60b   :  { %v6480_v2 = vadd.f32 %v6479_v10, %v6478_v11  ;;  %v6481_v55 = vpop.f32.mrb[10].mxu0  ;;  %v7195_v11 = vld [vmem:[%s8950_s8 + $0x8] sm:$0xff]   ;;  %v7197_v10 = vld [vmem:[%s8950_s8 + $0x50] sm:$0xff]  }
 0x60c   :  { %6687 = vmatpush3.bf16.msra.mxu1 %v7180_v45  ;;  %v6482_v5 = vpop.f32.mrb[11].mxu0  ;;  %v7187_v45 = vld [vmem:[%s8950_s8 + $0xd0] sm:$0xff]   ;;  %v7190_v55 = vld [vmem:[%s8950_s8 + $0xd8] sm:$0xff]   ;;  %6540 = vmatpush3.bf16.msra.mxu0 %v7195_v11 }
 0x60d   :  { %6688 = vmatprep.subr.bf16.mxu1 %v7370_v16  ;;  %6541 = vmatprep.subr.bf16.mxu0 %v7197_v10  ;;  %v7201_v5 = vld [vmem:[%s8950_s8 + $0x58] sm:$0xff]  }
 0x610   :  { %6689 = vmatpush3.bf16.msra.mxu1 %v7181_v18  ;;  %v7199_v18 = vld [vmem:[%s8950_s8 + $0x10] sm:$0xff]  }
 0x611   :  { %6559 = vmatprep.subr.bf16.mxu1 %v7183_v3  ;;  %6542 = vmatpush3.bf16.msra.mxu0 %v7199_v18 }
 0x612   :  { %6543 = vmatprep.subr.bf16.mxu0 %v7201_v5 }
 0x613   :  { %6691 = vmatmul.mubr.bf16.vlgmr.msra.gmra.mrb[44].mxu1 %v7182_v49  ;;  %v7192_v49 = vld [vmem:[%s8950_s8 + $0x98] sm:$0xff]  }
 0x614   :  { %6560 = vmatpush3.bf16.msra.mxu1 %v7184_v23 }
 0x615   :  { %6561 = vmatprep.subr.bf16.mxu1 %v7185_v12 }
 0x618   :  { %6562 = vmatpush3.bf16.msra.mxu1 %v7186_v29 }
 0x619   :  { %6563 = vmatprep.subr.bf16.mxu1 %v7187_v45 }
 0x626   :  { %v6359_v63 = vpop.f32.mrb[20].mxu1 }
 0x627   :  { %v6360_v59 = vpop.f32.mrb[21].mxu1 }
 0x628   :  { %v6361_v25 = vadd.f32 %v6360_v59, %v6359_v63  ;;  %v6362_v4 = vpop.f32.mrb[22].mxu1  ;;  %v7194_v63 = vld [vmem:[%s8950_s8 + $0xe0] sm:$0xff]   ;;  %v7203_v59 = vld [vmem:[%s8950_s8 + $0x18] sm:$0xff]  }
 0x629   :  { %v6363_v37 = vpop.f32.mrb[23].mxu1  ;;  %v6522_v38 = vpop.f32.mrb[12].mxu0  ;;  %v7196_v4 = vld [vmem:[%s8950_s8 + $0xa0] sm:$0xff]   ;;  %6544 = vmatpush3.bf16.msra.mxu0 %v7203_v59 }
 0x62a   :  { %v6523_v28 = vpop.f32.mrb[13].mxu0  ;;  %v7198_v37 = vld [vmem:[%s8950_s8 + $0xe8] sm:$0xff]  }
 0x62b   :  { %v6524_v53 = vadd.f32 %v6523_v28, %v6522_v38  ;;  %v6525_v9 = vpop.f32.mrb[14].mxu0  ;;  %v7207_v38 = vld [vmem:[%s8950_s8 + $0x20] sm:$0xff]   ;;  %v7209_v28 = vld [vmem:[%s8950_s8 + $0x68] sm:$0xff]  }
 0x62c   :  { %v6526_v30 = vpop.f32.mrb[15].mxu0  ;;  %v7202_v9 = vld [vmem:[%s8950_s8 + $0xf0] sm:$0xff]  }
 0x62d   :  { %v7204_v30 = vld [vmem:[%s8950_s8 + $0xb0] sm:$0xff]  }
 0x646   :  { %v6381_v47 = vpop.f32.mrb[24].mxu1 }
 0x647   :  { %v6382_v17 = vpop.f32.mrb[25].mxu1 }
 0x648   :  { %v6383_v1 = vadd.f32 %v6382_v17, %v6381_v47  ;;  %v6384_v46 = vpop.f32.mrb[26].mxu1  ;;  %v7206_v47 = vld [vmem:[%s8950_s8 + $0xf8] sm:$0xff]  }
 0x649   :  { %v6385_v13 = vpop.f32.mrb[27].mxu1  ;;  %v7208_v17 = vld [vmem:[%s8950_s8 + $0xb8] sm:$0xff]   ;;  %v7211_v46 = vld [vmem:[%s8950_s8 + $0x28] sm:$0xff]  }
 0x64a   :  { %v3341_v60 = vadd.f32 %v6383_v1, %v6361_v25  ;;  %v7205_v25 = vld [vmem:[%s8950_s8 + $0x60] sm:$0xff]   ;;  %v7213_v13 = vld [vmem:[%s8950_s8 + $0x70] sm:$0xff]  }
 0x64b   :  { %6545 = vmatprep.subr.bf16.mxu0 %v7205_v25  ;;  %v7210_v1 = vld [vmem:[%s8950_s8 + $0x1c0] sm:$0xff]  }
 0x64c   :  { %6546 = vmatpush3.bf16.msra.mxu0 %v7207_v38 }
 0x64d   :  { %6547 = vmatprep.subr.bf16.mxu0 %v7209_v28 }
 0x650   :  { %6548 = vmatpush3.bf16.msra.mxu0 %v7211_v46 }
 0x651   :  { %6549 = vmatprep.subr.bf16.mxu0 %v7213_v13 }
 0x666   :  { %v6403_v48 = vpop.f32.mrb[28].mxu1 }
 0x667   :  { %v6404_v62 = vpop.f32.mrb[29].mxu1 }
 0x668   :  { %v6405_v34 = vadd.f32 %v6404_v62, %v6403_v48  ;;  %v6406_v54 = vpop.f32.mrb[30].mxu1  ;;  %v7217_v48 = vld [vmem:[%s8950_s8 + $0x78] sm:$0xff]  }
 0x669   :  { %v6407_v22 = vpop.f32.mrb[31].mxu1  ;;  %v7219_v62 = vld [vmem:[%s8950_s8 + $0x38] sm:$0xff]  }
 0x66a   :  { %v3381_v21 = vadd.f32 %v6405_v34, %v3341_v60  ;;  %v7215_v60 = vld [vmem:[%s8950_s8 + $0x30] sm:$0xff]   ;;  %v7223_v34 = vld [vmem:[%s8950_s8 + $0x140] sm:$0xff]  }
 0x66b   :  { %6550 = vmatpush3.bf16.msra.mxu0 %v7215_v60 }
 0x66c   :  { %6551 = vmatprep.subr.bf16.mxu0 %v7217_v48 }
 0x66f   :  { %6552 = vmatpush3.bf16.msra.mxu0 %v7219_v62 }
 0x670   :  { %6581 = vmatprep.subr.bf16.mxu0 %v7223_v34 }
 0x686   :  { %v6425_v32 = vpop.f32.mrb[32].mxu1 }
 0x687   :  { %v6426_v43 = vpop.f32.mrb[33].mxu1 }
 0x688   :  { %v6427_v41 = vadd.f32 %v6426_v43, %v6425_v32  ;;  %v6428_v27 = vpop.f32.mrb[34].mxu1 }
 0x689   :  { %v6429_v44 = vpop.f32.mrb[35].mxu1 }
 0x68a   :  { %v3421_v33 = vadd.f32 %v6427_v41, %v3381_v21 }
 0x68c   :  { %v3461_v51 = vadd.f32 %v8570_v36, %v3421_v33 }
 0x68e   :  { %3467 = vst.msk [vmem:[%s8951_s9] sm:$0xff] %vm3466_vm2, %v3461_v51  ;;  %v6045_v51 = vld [vmem:[%s8948_s6 + $0x1] ss:$0 sm:$0xff] }
 0x6a6   :  { %v6456_v56 = vpop.f32.mrb[36].mxu1 }
 0x6a7   :  { %v6457_v61 = vpop.f32.mrb[37].mxu1 }
 0x6a8   :  { %v6458_v40 = vadd.f32 %v6457_v61, %v6456_v56  ;;  %v6459_v57 = vpop.f32.mrb[38].mxu1  ;;  %v6046_v61 = vld [vmem:[%s8949_s7 + $0x1] ss:$0 sm:$0xff] }
 0x6a9   :  { %v6460_v19 = vpop.f32.mrb[39].mxu1 }
 0x6aa   :  { %v4355_v35 = vadd.f32 %v6480_v2, %v6458_v40  ;;  %v7188_v2 = vld [vmem:[%s8950_s8 + $0x90] sm:$0xff]  }
 0x6ab   :  { %6564 = vmatpush3.bf16.msra.mxu1 %v7188_v2 }
 0x6ac   :  { %6565 = vmatprep.subr.bf16.mxu1 %v7190_v55 }
 0x6af   :  { %6566 = vmatpush3.bf16.msra.mxu1 %v7192_v49 }
 0x6b0   :  { %6567 = vmatprep.subr.bf16.mxu1 %v7194_v63 }
 0x6b3   :  { %6568 = vmatpush3.bf16.msra.mxu1 %v7196_v4 }
 0x6b4   :  { %6569 = vmatprep.subr.bf16.mxu1 %v7198_v37 }
 0x6c6   :  { %v6500_v58 = vpop.f32.mrb[40].mxu1 }
 0x6c7   :  { %v6501_v14 = vpop.f32.mrb[41].mxu1 }
 0x6c8   :  { %v6502_v50 = vadd.f32 %v6501_v14, %v6500_v58  ;;  %v6503_v15 = vpop.f32.mrb[42].mxu1 }
 0x6c9   :  { %v6504_v20 = vpop.f32.mrb[43].mxu1 }
 0x6ca   :  { %v4395_v39 = vadd.f32 %v6502_v50, %v4355_v35 }
 0x6cc   :  { %v4435_v31 = vadd.f32 %v6524_v53, %v4395_v39  ;;  %v7200_v53 = vld [vmem:[%s8950_s8 + $0xa8] sm:$0xff]  }
 0x6cd   :  { %6570 = vmatpush3.bf16.msra.mxu1 %v7200_v53 }
 0x6ce   :  { %6571 = vmatprep.subr.bf16.mxu1 %v7202_v9 }
 0x6d1   :  { %6572 = vmatpush3.bf16.msra.mxu1 %v7204_v30 }
 0x6d2   :  { %6573 = vmatprep.subr.bf16.mxu1 %v7206_v47 }
 0x6d5   :  { %6574 = vmatpush3.bf16.msra.mxu1 %v7208_v17 }
 0x6d6   :  { %6603 = vmatprep.subr.bf16.mxu1 %v7210_v1 }
 0x6e6   :  { %v4474_v52 = vpop.f32.mrb[44].mxu1 }
 0x6e7   :  { %v8589_v36 = vadd.f32 %v4474_v52, %v4435_v31  ;;  %v6692_v7 = vpop.f32.mrb[45].mxu1 }
 0x6e8   :  { %v4477_v6 = vpop.f32.mrb[46].mxu1 }
 0x6e9   :  { %v6693_v8 = vpop.f32.mrb[47].mxu1  ;;  %4482 = vadd.xlane.f32.xlu0 %v8589_v36  ;;  %v4484_v26 = vmul.f32 %v8589_v36, %v8589_v36 }
 0x6eb   :  { %4485 = vadd.xlane.f32.xlu1 %v4484_v26 }
 0x776   :  { %v4483_v54 = vpop.xlane.xlu0 %4482 }
 0x777   :  { %v4487_v22 = vmul.f32 0.03125, %v4483_v54 }
 0x778   :  { %v4486_v21 = vpop.xlane.xlu1 %4485 }
 0x779   :  { %v4489_v32 = vmul.f32 %v4487_v22, %v4487_v22  ;;  %v4488_v43 = vmul.f32 0.03125, %v4486_v21  ;;  %v4491_v44 = vsub.f32 %v8589_v36, %v4487_v22 }
 0x77b   :  { %v4490_v41 = vsub.f32 %v4488_v43, %v4489_v32 }
 0x77d   :  { %v4492_v27 = vadd.f32 1e-05, %v4490_v41 }
 0x77f   :  { %7280 = vrsqrt.f32 %v4492_v27 }
 0x789   :  { %v7281_v33 = vpop.eup %7280 }
 0x78a   :  { %v4494_v56 = vmul.f32 %v7281_v33, %v4491_v44 }
 0x78c   :  { %v4499_v40 = vmul.f32 %v6045_v51, %v4494_v56 }
 0x78e   :  { %v8703_v57 = vadd.f32 %v6046_v61, %v4499_v40 }
 0x790   :  { %v8706_v19 = vmul.f32 2.5, %v8703_v57  ;;  %v8709_v35 = vmul.f32 1.25, %v8703_v57  ;;  %v8712_v58 = vmul.f32 0.8333333, %v8703_v57  ;;  %vm4514_vm3 = vcmp.ge.f32.partialorder %v8703_v57, -2.2 }
 0x791   :  { %v4515_v14 = vsel %vm4514_vm3, 1.0, %v7370_v16  ;;  %vm4516_vm4 = vcmp.ge.f32.partialorder %v8703_v57, -1.8  ;;  %vm4518_vm5 = vcmp.ge.f32.partialorder %v8703_v57, -1.4  ;;  %vm4520_vm6 = vcmp.ge.f32.partialorder %v8703_v57, -1.0 }
 0x792   :  { %v4517_v50 = vsel %vm4516_vm4, 1.0, %v7370_v16  ;;  %v4519_v15 = vsel %vm4518_vm5, 1.0, %v7370_v16  ;;  %v4521_v20 = vsel %vm4520_vm6, 1.0, %v7370_v16  ;;  %vm4522_vm7 = vcmp.ge.f32.partialorder %v8703_v57, -0.6 }
 0x793   :  { %v4523_v39 = vsel %vm4522_vm7, 1.0, %v7370_v16  ;;  %vm4524_vm9 = vcmp.ge.f32.partialorder %v8703_v57, -0.2  ;;  %vm4526_vm10 = vcmp.ge.f32.partialorder %v8703_v57, 0.2  ;;  %v4538_v31 = vsub.f32 %v4515_v14, %v4517_v50 }
 0x794   :  { %v4525_v52 = vsel %vm4524_vm9, 1.0, %v7370_v16  ;;  %v8728_v36 = vsel %vm4526_vm10, 1.0, %v7370_v16  ;;  %v4539_v7 = vsub.f32 %v4517_v50, %v4519_v15  ;;  %v4540_v6 = vsub.f32 %v4519_v15, %v4521_v20 }
 0x795   :  { %v4541_v8 = vsub.f32 %v4521_v20, %v4523_v39  ;;  %v4542_v26 = vsub.f32 %v4523_v39, %v4525_v52  ;;  %v8731_v3 = vsub.f32 %v4525_v52, %v8728_v36  ;;  %v6048_v23 = vadd.f32 5.5, %v8706_v19 }
 0x796   :  { %v4552_v12 = vsub.f32 -3.5, %v8706_v19  ;;  %v6049_v42 = vadd.f32 4.5, %v8706_v19  ;;  %v4557_v24 = vsub.f32 -2.5, %v8706_v19  ;;  %v6050_v29 = vadd.f32 3.5, %v8706_v19 }
 0x797   :  { %v4551_v0 = vmul.f32 %v6048_v23, %v4538_v31  ;;  %v4562_v45 = vsub.f32 -1.5, %v8706_v19  ;;  %v6051_v11 = vadd.f32 2.5, %v8706_v19  ;;  %v4567_v10 = vsub.f32 -0.5, %v8706_v19 }
 0x798   :  { %v4553_v2 = vmul.f32 %v4552_v12, %v4539_v7  ;;  %v4556_v55 = vmul.f32 %v6049_v42, %v4539_v7  ;;  %v4558_v18 = vmul.f32 %v4557_v24, %v4540_v6  ;;  %v4561_v5 = vmul.f32 %v6050_v29, %v4540_v6 }
 0x799   :  { %v4563_v49 = vmul.f32 %v4562_v45, %v4541_v8  ;;  %v4566_v63 = vmul.f32 %v6051_v11, %v4541_v8  ;;  %v4568_v59 = vmul.f32 %v4567_v10, %v4542_v26  ;;  %v6052_v25 = vadd.f32 1.5, %v8706_v19 }
 0x79a   :  { %v4554_v4 = vadd.f32 %v4553_v2, %v4551_v0  ;;  %v4559_v37 = vadd.f32 %v4558_v18, %v4556_v55  ;;  %v4572_v38 = vsub.f32 0.5, %v8706_v19  ;;  %v6058_v28 = vadd.f32 2.75, %v8709_v35 }
 0x79b   :  { %v4564_v53 = vadd.f32 %v4563_v49, %v4561_v5  ;;  %v4569_v9 = vadd.f32 %v4568_v59, %v4566_v63  ;;  %v4571_v30 = vmul.f32 %v6052_v25, %v4542_v26  ;;  %v4603_v47 = vsub.f32 -1.25, %v8709_v35 }
 0x79c   :  { %v4573_v17 = vmul.f32 %v4572_v38, %v8731_v3  ;;  %v4602_v1 = vmul.f32 %v6058_v28, %v4554_v4  ;;  %v6059_v46 = vadd.f32 2.25, %v8709_v35  ;;  %v4608_v13 = vsub.f32 -0.75, %v8709_v35 }
 0x79d   :  { %v4604_v60 = vmul.f32 %v4603_v47, %v4559_v37  ;;  %v6060_v48 = vadd.f32 1.75, %v8709_v35  ;;  %v4613_v62 = vsub.f32 -0.25, %v8709_v35  ;;  %v6061_v34 = vadd.f32 1.25, %v8709_v35 }
 0x79e   :  { %v8751_v54 = vadd.f32 %v4573_v17, %v4571_v30  ;;  %v4607_v22 = vmul.f32 %v6059_v46, %v4559_v37  ;;  %v4609_v21 = vmul.f32 %v4608_v13, %v4564_v53  ;;  %v4618_v32 = vsub.f32 0.25, %v8709_v35 }
 0x79f   :  { %v4605_v43 = vadd.f32 %v4604_v60, %v4602_v1  ;;  %v4612_v41 = vmul.f32 %v6060_v48, %v4564_v53  ;;  %v4614_v27 = vmul.f32 %v4613_v62, %v4569_v9  ;;  %v4617_v44 = vmul.f32 %v6061_v34, %v4569_v9  ;;  %v7214_v1 = vld [vmem:[%s8950_s8 + $0x1c8] sm:$0xff]  }
 0x7a0   :  { %v4610_v33 = vadd.f32 %v4609_v21, %v4607_v22  ;;  %v4619_v51 = vmul.f32 %v4618_v32, %v8751_v54  ;;  %v6067_v56 = vadd.f32 1.8333334, %v8712_v58  ;;  %v4649_v61 = vsub.f32 -0.5, %v8712_v58 }
 0x7a1   :  { %v4615_v40 = vadd.f32 %v4614_v27, %v4612_v41  ;;  %v6068_v14 = vadd.f32 1.5, %v8712_v58  ;;  %v4654_v50 = vsub.f32 -0.16666667, %v8712_v58  ;;  %v6069_v15 = vadd.f32 1.1666666, %v8712_v58  ;;  %v7216_v27 = vld [vmem:[%s8950_s8 + $0x188] sm:$0xff]  }
 0x7a2   :  { %v8760_v20 = vadd.f32 %v4619_v51, %v4617_v44  ;;  %v4648_v39 = vmul.f32 %v6067_v56, %v4605_v43  ;;  %v4650_v31 = vmul.f32 %v4649_v61, %v4610_v33  ;;  %v4659_v52 = vsub.f32 0.16666667, %v8712_v58 }
 0x7a3   :  { %v4653_v7 = vmul.f32 %v6068_v14, %v4610_v33  ;;  %v4655_v6 = vmul.f32 %v4654_v50, %v4615_v40  ;;  %v4658_v8 = vmul.f32 %v6069_v15, %v4615_v40  ;;  %vm4528_vm11 = vcmp.ge.f32.partialorder %v8703_v57, 0.6 }
 0x7a4   :  { %v4651_v26 = vadd.f32 %v4650_v31, %v4648_v39  ;;  %v4660_v23 = vmul.f32 %v4659_v52, %v8760_v20  ;;  %v4529_v12 = vsel %vm4528_vm11, 1.0, %v7370_v16  ;;  %vm4530_vm12 = vcmp.ge.f32.partialorder %v8703_v57, 1.0 }
 0x7a5   :  { %v4656_v42 = vadd.f32 %v4655_v6, %v4653_v7  ;;  %v4531_v24 = vsel %vm4530_vm12, 1.0, %v7370_v16  ;;  %vm4532_vm13 = vcmp.ge.f32.partialorder %v8703_v57, 1.4  ;;  %vm4534_vm14 = vcmp.ge.f32.partialorder %v8703_v57, 1.8 }
 0x7a6   :  { %v4661_v29 = vadd.f32 %v4660_v23, %v4658_v8  ;;  %v4687_v0 = vpack.c.bf16 %v4651_v26, %v4651_v26  ;;  %v4533_v45 = vsel %vm4532_vm13, 1.0, %v7370_v16  ;;  %v4535_v11 = vsel %vm4534_vm14, 1.0, %v7370_v16  ;;  %v7220_v23 = vld [vmem:[%s8950_s8 + $0x190] sm:$0xff]  }
 0x7a7   :  { %vm4536_vm15 = vcmp.ge.f32.partialorder %v8703_v57, 2.2  ;;  %v4544_v10 = vsub.f32 %v8728_v36, %v4529_v12  ;;  %v4545_v2 = vsub.f32 %v4529_v12, %v4531_v24  ;;  %v4546_v55 = vsub.f32 %v4531_v24, %v4533_v45  ;;  %v7212_v36 = vld [vmem:[%s8950_s8 + $0x180] sm:$0xff]  }
 0x7a8   :  { %4688 = vst [vmem:[#allocation2 + $0x4] sm:$0xf] %v4687_v0  ;;  %v4537_v18 = vsel %vm4536_vm15, 1.0, %v7370_v16  ;;  %v4547_v5 = vsub.f32 %v4533_v45, %v4535_v11  ;;  %v6053_v49 = vadd.f32 0.5, %v8706_v19  ;;  %v4577_v59 = vsub.f32 1.5, %v8706_v19  ;;  %v7224_v0 = vld [vmem:[%s8950_s8 + $0x1d8] sm:$0xff]  }
 0x7a9   :  { %v4548_v63 = vsub.f32 %v4535_v11, %v4537_v18  ;;  %v6054_v25 = vadd.f32 -0.5, %v8706_v19  ;;  %v4582_v4 = vsub.f32 2.5, %v8706_v19  ;;  %v7310_v37 = vpack.c.bf16 %v4656_v42, %v4656_v42 }
 0x7aa   :  { %v7311_v38 = vpack.c.bf16 %v4661_v29, %v4661_v29  ;;  %v4576_v28 = vmul.f32 %v6053_v49, %v8731_v3  ;;  %v6055_v53 = vadd.f32 -1.5, %v8706_v19  ;;  %v4578_v9 = vmul.f32 %v4577_v59, %v4544_v10 }
 0x7ab   :  { %v4581_v30 = vmul.f32 %v6054_v25, %v4544_v10  ;;  %v4583_v47 = vmul.f32 %v4582_v4, %v4545_v2  ;;  %v4587_v17 = vsub.f32 3.5, %v8706_v19  ;;  %v6056_v13 = vadd.f32 -2.5, %v8706_v19 }
 0x7ac   :  { %5388 = vmatprep.mubr.bf16.mxu1 %v7311_v38  ;;  %v4586_v46 = vmul.f32 %v6055_v53, %v4545_v2  ;;  %v4592_v60 = vsub.f32 4.5, %v8706_v19  ;;  %v6057_v48 = vadd.f32 -3.5, %v8706_v19  ;;  %v8791_v3 = vadd.f32 %v4578_v9, %v4576_v28  ;;  %v7228_v9 = vld [vmem:[%s8950_s8 + $0x1e0] sm:$0xff]  }
 0x7ad   :  { %5389 = vmatmul.mubr.bf16.vlgmr.msra.gmra.mrb[48].mxu1 %v7310_v37  ;;  %v4584_v62 = vadd.f32 %v4583_v47, %v4581_v30  ;;  %v4588_v34 = vmul.f32 %v4587_v17, %v4546_v55  ;;  %v4597_v22 = vsub.f32 5.5, %v8706_v19  ;;  %v4591_v21 = vmul.f32 %v6056_v13, %v4546_v55  ;;  %v7218_v19 = vld [vmem:[%s8950_s8 + $0x1d0] sm:$0xff]   ;;  %v7226_v37 = vld [vmem:[%s8950_s8 + $0x198] sm:$0xff]  }
 0x7ae   :  { %6604 = vmatpush3.bf16.msra.mxu1 %v7212_v36  ;;  %v4593_v32 = vmul.f32 %v4592_v60, %v4547_v5  ;;  %v4596_v43 = vmul.f32 %v6057_v48, %v4547_v5  ;;  %v6063_v41 = vadd.f32 0.25, %v8709_v35  ;;  %v4628_v51 = vsub.f32 1.25, %v8709_v35 }
 0x7af   :  { %v4589_v44 = vadd.f32 %v4588_v34, %v4586_v46  ;;  %v4598_v33 = vmul.f32 %v4597_v22, %v4548_v63  ;;  %v6064_v56 = vadd.f32 -0.25, %v8709_v35  ;;  %6605 = vmatprep.subr.bf16.mxu1 %v7214_v1  ;;  %v4633_v14 = vsub.f32 1.75, %v8709_v35 }
 0x7b0   :  { %v4594_v61 = vadd.f32 %v4593_v32, %v4591_v21  ;;  %v4627_v40 = vmul.f32 %v6063_v41, %v8791_v3  ;;  %v6065_v50 = vadd.f32 -0.75, %v8709_v35  ;;  %v4629_v39 = vmul.f32 %v4628_v51, %v4584_v62  ;;  %v7236_v51 = vld [vmem:[%s8950_s8 + $0x1f0] sm:$0xff]  }
 0x7b1   :  { %v4599_v15 = vadd.f32 %v4598_v33, %v4596_v43  ;;  %v4632_v31 = vmul.f32 %v6064_v56, %v4584_v62  ;;  %v4638_v52 = vsub.f32 2.25, %v8709_v35  ;;  %v4634_v7 = vmul.f32 %v4633_v14, %v4589_v44  ;;  %v7230_v62 = vld [vmem:[%s8950_s8 + $0x1a0] sm:$0xff]   ;;  %v7234_v33 = vld [vmem:[%s8950_s8 + $0x1a8] sm:$0xff]   ;;  %v7242_v14 = vld [vmem:[%s8950_s8 + $0x1b8] sm:$0xff]  }
 0x7b2   :  { %v4637_v6 = vmul.f32 %v6065_v50, %v4589_v44  ;;  %v6066_v8 = vadd.f32 -1.25, %v8709_v35  ;;  %v4643_v26 = vsub.f32 2.75, %v8709_v35  ;;  %6606 = vmatpush3.bf16.msra.mxu1 %v7216_v27  ;;  %v4630_v12 = vadd.f32 %v4629_v39, %v4627_v40 }
 0x7b3   :  { %v4639_v42 = vmul.f32 %v4638_v52, %v4594_v61  ;;  %v6072_v24 = vadd.f32 0.16666667, %v8712_v58  ;;  %v4674_v29 = vsub.f32 1.1666666, %v8712_v58  ;;  %6607 = vmatprep.subr.bf16.mxu1 %v7218_v19  ;;  %v4635_v45 = vadd.f32 %v4634_v7, %v4632_v31 }
 0x7b4   :  { %v4642_v11 = vmul.f32 %v6066_v8, %v4594_v61  ;;  %v4644_v10 = vmul.f32 %v4643_v26, %v4599_v15  ;;  %v6073_v2 = vadd.f32 -0.16666667, %v8712_v58  ;;  %v4679_v5 = vsub.f32 1.5, %v8712_v58  ;;  %v7240_v61 = vld [vmem:[%s8950_s8 + $0x1f8] sm:$0xff]   ;;  %v7225_v8 = vld [vmem:[%s8950_s8 + $0x100] sm:$0xff]   ;;  %v7227_v26 = vld [vmem:[%s8950_s8 + $0x148] sm:$0xff]  }
 0x7b5   :  { %v4640_v55 = vadd.f32 %v4639_v42, %v4637_v6  ;;  %v4673_v18 = vmul.f32 %v6072_v24, %v4630_v12  ;;  %v6074_v49 = vadd.f32 -0.5, %v8712_v58  ;;  %v4675_v59 = vmul.f32 %v4674_v29, %v4635_v45  ;;  %v7233_v42 = vld [vmem:[%s8950_s8 + $0x110] sm:$0xff]   ;;  %v7235_v24 = vld [vmem:[%s8950_s8 + $0x158] sm:$0xff]  }
 0x7b6   :  { %v4645_v63 = vadd.f32 %v4644_v10, %v4642_v11  ;;  %v4678_v25 = vmul.f32 %v6073_v2, %v4635_v45  ;;  %v4684_v4 = vsub.f32 1.8333334, %v8712_v58  ;;  %6608 = vmatpush3.bf16.msra.mxu1 %v7220_v23  ;;  %v6047_v28 = vmul.f32 -1.442695, %v8703_v57  ;;  %v7237_v29 = vld [vmem:[%s8950_s8 + $0x118] sm:$0xff]   ;;  %v7241_v45 = vld [vmem:[%s8950_s8 + $0x120] sm:$0xff]  }
 0x7b7   :  { %v4680_v38 = vmul.f32 %v4679_v5, %v4640_v55  ;;  %v4683_v36 = vmul.f32 %v6074_v49, %v4640_v55  ;;  %6609 = vmatprep.subr.bf16.mxu1 %v7224_v0  ;;  %v6062_v53 = vadd.f32 0.75, %v8709_v35  ;;  %v4676_v30 = vadd.f32 %v4675_v59, %v4673_v18  ;;  %v7239_v0 = vld [vmem:[%s8950_s8 + $0x160] sm:$0xff]   ;;  %v7243_v11 = vld [vmem:[%s8950_s8 + $0x168] sm:$0xff]   ;;  %v7245_v2 = vld [vmem:[%s8950_s8 + $0x170] sm:$0xff]  }
 0x7b8   :  { %v4685_v47 = vmul.f32 %v4684_v4, %v4645_v63  ;;  %v4623_v17 = vsub.f32 0.75, %v8709_v35  ;;  %7282 = vpow2.f32 %v6047_v28  ;;  %v6070_v48 = vadd.f32 0.8333333, %v8712_v58  ;;  %v7232_v35 = vld [vmem:[%s8950_s8 + $0x1e8] sm:$0xff]   ;;  %v7246_v55 = vld [vmem:[%s8950_s8 + $0x130] sm:$0xff]   ;;  %v7247_v18 = vld [vmem:[%s8950_s8 + $0x178] sm:$0xff]  }
 0x7b9   :  { %v4681_v1 = vadd.f32 %v4680_v38, %v4678_v25  ;;  %v4622_v46 = vmul.f32 %v6062_v53, %v8751_v54  ;;  %v4664_v34 = vsub.f32 0.5, %v8712_v58  ;;  %v4669_v22 = vsub.f32 0.8333333, %v8712_v58  ;;  %v7244_v10 = vld [vmem:[%s8950_s8 + $0x128] sm:$0xff]   ;;  %v7248_v5 = vld [vmem:[%s8950_s8 + $0x138] sm:$0xff]   ;;  %v7249_v49 = vld [vmem:[%s8950_s8 + $0x200] sm:$0xff]  }
 0x7ba   :  { %v4686_v13 = vadd.f32 %v4685_v47, %v4683_v36  ;;  %6610 = vmatpush3.bf16.msra.mxu1 %v7226_v37  ;;  %v4624_v60 = vmul.f32 %v4623_v17, %v8791_v3  ;;  %v4663_v32 = vmul.f32 %v6070_v48, %v8760_v20  ;;  %v6071_v3 = vadd.f32 0.5, %v8712_v58  ;;  %v7238_v58 = vld [vmem:[%s8950_s8 + $0x1b0] sm:$0xff]   ;;  %v7250_v59 = vld [vmem:[%s8950_s8 + $0x208] sm:$0xff]   ;;  %v7252_v4 = vld [vmem:[%s8950_s8 + $0x218] sm:$0xff]  }
 0x7bb   :  { %6611 = vmatprep.subr.bf16.mxu1 %v7228_v9  ;;  %v7312_v43 = vpack.c.bf16 %v4681_v1, %v4681_v1  ;;  %v4670_v41 = vmul.f32 %v4669_v22, %v4630_v12  ;;  %v7313_v50 = vpack.c.bf16 %v4676_v30, %v4676_v30  ;;  %v7231_v12 = vld [vmem:[%s8950_s8 + $0x150] sm:$0xff]   ;;  %v7253_v37 = vld [vmem:[%s8950_s8 + $0x220] sm:$0xff]   ;;  %v7254_v38 = vld [vmem:[%s8950_s8 + $0x228] sm:$0xff]  }
 0x7bc   :  { %v4701_v54 = vpack.c.bf16 %v4686_v13, %v4686_v13  ;;  %v4625_v21 = vadd.f32 %v4624_v60, %v4622_v46  ;;  %v7251_v25 = vld [vmem:[%s8950_s8 + $0x210] sm:$0xff]   ;;  %v7256_v28 = vld [vmem:[%s8950_s8 + $0x238] sm:$0xff]  }
 0x7bd   :  { %5468 = vmatprep.mubr.bf16.mxu1 %v7312_v43  ;;  %v7255_v36 = vld [vmem:[%s8950_s8 + $0x230] sm:$0xff]  }
 0x7be   :  { %4702 = vst [vmem:[#allocation2 + $0x20] sm:$0xf] %v4701_v54  ;;  %v4665_v27 = vmul.f32 %v4664_v34, %v4625_v21  ;;  %v4668_v44 = vmul.f32 %v6071_v3, %v4625_v21  ;;  %6612 = vmatpush3.bf16.msra.mxu1 %v7230_v62 }
 0x7bf   :  { %6613 = vmatprep.subr.bf16.mxu1 %v7232_v35 }
 0x7c0   :  { %v4666_v56 = vadd.f32 %v4665_v27, %v4663_v32  ;;  %v4671_v20 = vadd.f32 %v4670_v41, %v4668_v44 }
 0x7c2   :  { %6614 = vmatpush3.bf16.msra.mxu1 %v7234_v33  ;;  %v7283_v19 = vpop.eup %7282  ;;  %v7314_v23 = vpack.c.bf16 %v4671_v20, %v4671_v20  ;;  %v7315_v63 = vpack.c.bf16 %v4666_v56, %v4666_v56 }
 0x7c3   :  { %6615 = vmatprep.subr.bf16.mxu1 %v7236_v51  ;;  %v4508_v40 = vadd.f32 1.0, %v7283_v19 }
 0x7c5   :  { %7284 = vrcp.f32 %v4508_v40  ;;  %v7257_v53 = vld [vmem:[#allocation2 + $0x20] ss:$0 sps:$4 sm:$0xff]  }
 0x7c6   :  { %6616 = vmatpush3.bf16.msra.mxu1 %v7238_v58 }
 0x7c7   :  { %6617 = vmatprep.subr.bf16.mxu1 %v7240_v61 }
 0x7ca   :  { %6618 = vmatpush3.bf16.msra.mxu1 %v7242_v14 }
 0x7cd   :  { %5469 = vmatmul.mubr.bf16.vlgmr.msra.gmra.mrb[52].mxu1 %v7313_v50 }
 0x7cf   :  { %v7285_v15 = vpop.eup %7284 }
 0x7d0   :  { %v4511_v39 = vmul.f32 %v7285_v15, %v8703_v57  ;;  %v7229_v57 = vld [vmem:[%s8950_s8 + $0x108] sm:$0xff]   ;;  %s7373_s8 = smov 127  }
 0x7d2   :  { %v4512_v31 = vpack.c.bf16 %v4511_v39, %v4511_v39 }
 0x7d4   :  { %4513 = vst [vmem:[#allocation2] sm:$0xf] %v4512_v31 }
 0x7db   :  { %v4703_v52 = vld [vmem:[#allocation2] sm:$0xff] }
 0x7dc   :  { %v6075_v7 = vcombine.low %v4703_v52, %v4703_v52  ;;  %v6076_v6 = vcombine.high %v4703_v52, %v4703_v52 }
 0x7de   :  { %5348 = vmatprep.mubr.bf16.mxu0 %v6076_v6 }
 0x7df   :  { %5349 = vmatmul.mubr.bf16.vlgmr.msra.gmra.mrb[16].mxu0 %v6075_v7 }
 0x7e0   :  { %6582 = vmatpush3.bf16.msra.mxu0 %v7225_v8  ;;  %5428 = vmatprep.mubr.bf16.mxu0 %v7314_v23 }
 0x7e1   :  { %6583 = vmatprep.subr.bf16.mxu0 %v7227_v26 }
 0x7e4   :  { %6584 = vmatpush3.bf16.msra.mxu0 %v7229_v57 }
 0x7e5   :  { %6585 = vmatprep.subr.bf16.mxu0 %v7231_v12 }
 0x7e8   :  { %6586 = vmatpush3.bf16.msra.mxu0 %v7233_v42 }
 0x7e9   :  { %6587 = vmatprep.subr.bf16.mxu0 %v7235_v24 }
 0x7ec   :  { %6588 = vmatpush3.bf16.msra.mxu0 %v7237_v29 }
 0x7ed   :  { %6589 = vmatprep.subr.bf16.mxu0 %v7239_v0 }
 0x7f0   :  { %6590 = vmatpush3.bf16.msra.mxu0 %v7241_v45 }
 0x7f1   :  { %6591 = vmatprep.subr.bf16.mxu0 %v7243_v11 }
 0x7f4   :  { %6592 = vmatpush3.bf16.msra.mxu0 %v7244_v10 }
 0x7f5   :  { %6593 = vmatprep.subr.bf16.mxu0 %v7245_v2 }
 0x7f8   :  { %6594 = vmatpush3.bf16.msra.mxu0 %v7246_v55 }
 0x7f9   :  { %6595 = vmatprep.subr.bf16.mxu0 %v7247_v18 }
 0x7fc   :  { %6596 = vmatpush3.bf16.msra.mxu0 %v7248_v5 }
 0x7fd   :  { %6694 = vmatprep.subr.bf16.mxu0 %v7370_v16 }
 0x7ff   :  { %5429 = vmatmul.mubr.bf16.vlgmr.msra.gmra.mrb[20].mxu0 %v7315_v63 }
 0x800   :  { %6695 = vmatpush3.bf16.msra.mxu0 %v7249_v49  ;;  %6710 = vmatprep.mubr.msk.bf16.mxu0 %vm7372_vm8, %v7370_v16 }
 0x801   :  { %6696 = vmatprep.subr.bf16.mxu0 %v7370_v16 }
 0x804   :  { %6697 = vmatpush3.bf16.msra.mxu0 %v7250_v59 }
 0x805   :  { %6698 = vmatprep.subr.bf16.mxu0 %v7370_v16 }
 0x808   :  { %6699 = vmatpush3.bf16.msra.mxu0 %v7251_v25 }
 0x809   :  { %6700 = vmatprep.subr.bf16.mxu0 %v7370_v16 }
 0x80c   :  { %6701 = vmatpush3.bf16.msra.mxu0 %v7252_v4 }
 0x80d   :  { %6702 = vmatprep.subr.bf16.mxu0 %v7370_v16 }
 0x810   :  { %6703 = vmatpush3.bf16.msra.mxu0 %v7253_v37 }
 0x811   :  { %6704 = vmatprep.subr.bf16.mxu0 %v7370_v16 }
 0x814   :  { %6705 = vmatpush3.bf16.msra.mxu0 %v7254_v38 }
 0x815   :  { %6706 = vmatprep.subr.bf16.mxu0 %v7370_v16 }
 0x818   :  { %6707 = vmatpush3.bf16.msra.mxu0 %v7255_v36 }
 0x819   :  { %6708 = vmatprep.subr.bf16.mxu0 %v7370_v16 }
 0x81c   :  { %6709 = vmatpush3.bf16.msra.mxu0 %v7256_v28 }
 0x81f   :  { %6711 = vmatmul.mubr.bf16.vlgmr.msra.gmra.mrb[24].mxu0 %v7257_v53 }
 0x880   :  { %v6575_v9 = vpop.f32.mrb[48].mxu1 }
 0x881   :  { %v6576_v30 = vpop.f32.mrb[49].mxu1 }
 0x882   :  { %v6577_v47 = vadd.f32 %v6576_v30, %v6575_v9  ;;  %v6578_v17 = vpop.f32.mrb[50].mxu1 }
 0x883   :  { %v6579_v1 = vpop.f32.mrb[51].mxu1 }
 0x8a0   :  { %v6619_v46 = vpop.f32.mrb[52].mxu1 }
 0x8a1   :  { %v6620_v13 = vpop.f32.mrb[53].mxu1 }
 0x8a2   :  { %v6621_v60 = vadd.f32 %v6620_v13, %v6619_v46  ;;  %v6622_v48 = vpop.f32.mrb[54].mxu1 }
 0x8a3   :  { %v6623_v62 = vpop.f32.mrb[55].mxu1 }
 0x8b2   :  { %v6553_v34 = vpop.f32.mrb[16].mxu0 }
 0x8b3   :  { %v6554_v22 = vpop.f32.mrb[17].mxu0 }
 0x8b4   :  { %v6555_v35 = vadd.f32 %v6554_v22, %v6553_v34  ;;  %v6556_v54 = vpop.f32.mrb[18].mxu0 }
 0x8b5   :  { %v6557_v21 = vpop.f32.mrb[19].mxu0 }
 0x8b6   :  { %v5391_v32 = vadd.f32 %v6577_v47, %v6555_v35 }
 0x8d2   :  { %v6597_v16 = vpop.f32.mrb[20].mxu0 }
 0x8d3   :  { %v6598_v3 = vpop.f32.mrb[21].mxu0 }
 0x8d4   :  { %v6599_v43 = vadd.f32 %v6598_v3, %v6597_v16  ;;  %v6600_v41 = vpop.f32.mrb[22].mxu0 }
 0x8d5   :  { %v6601_v27 = vpop.f32.mrb[23].mxu0 }
 0x8d6   :  { %v5431_v44 = vadd.f32 %v6599_v43, %v5391_v32 }
 0x8d8   :  { %v5471_v33 = vadd.f32 %v6621_v60, %v5431_v44 }
 0x8f2   :  { %v5510_v51 = vpop.f32.mrb[24].mxu0 }
 0x8f3   :  { %v5511_v56 = vadd.f32 %v5510_v51, %v5471_v33  ;;  %v6712_v20 = vpop.f32.mrb[25].mxu0 }
 0x8f4   :  { %v5513_v58 = vpop.f32.mrb[26].mxu0 }
 0x8f5   :  { %v6713_v19 = vpop.f32.mrb[27].mxu0  ;;  %5517 = vrot.lane.b32.xlu0 %v5511_v56, %s7373_s8 }
 0x967   :  { %v5518_v61 = vpop.permute.xlu0 %5517 }
 0x968   :  { %5520 = vst.msk [vmem:[%s8952_s10] sm:$0xff] %vm3466_vm2, %v5518_v61 }
 0x969   :  { %5529 = vsyncpa [#allocation5], 1 }
 0x96a   :  { %5530 = vsyncpa [#allocation7], 1 }

</bundles_post_ra>
